<compile_context>
chip_gen: v7x
topology: tpu7x:2x2x1
jax: 0.10.0
libtpu: 0.0.40
codegen_flags: <defaults>
</compile_context>

<pallas_src>
import functools

import jax
import jax.numpy as jnp
from jax.experimental import pallas as pl
from jax.experimental.pallas import tpu as pltpu

BN_EPS = 1e-5


def _pointgencon_kernel(x_ref,
                        w1_ref, b1_ref, g1_ref, be1_ref,
                        w2_ref, b2_ref, g2_ref, be2_ref,
                        w3_ref, b3_ref, g3_ref, be3_ref,
                        w4_ref, b4_ref,
                        o_ref,
                        acc1, acc2, acc3,
                        *, total_rows):
    phase = pl.program_id(0)
    b = pl.program_id(1)
    t = pl.program_id(2)
    is_first = jnp.logical_and(b == 0, t == 0)
    is_last = jnp.logical_and(b == pl.num_programs(1) - 1,
                              t == pl.num_programs(2) - 1)
    inv_n = 1.0 / float(total_rows)

    xb = x_ref[...].astype(jnp.bfloat16)                     # (C, tile_n), channels-first

    def mm(w_ref, h_bf16, bias_ref):
        # Channels-first layer: (Cout, Cin) @ (Cin, tile_n) on the MXU, f32 accumulation.
        return jnp.dot(w_ref[...], h_bf16,
                       preferred_element_type=jnp.float32) + bias_ref[...]

    def bn_relu(z, acc_ref):
        # acc_ref holds the finalized per-channel (scale, shift) from an earlier phase.
        return jnp.maximum(z * acc_ref[0] + acc_ref[1], 0.0)

    def update_stats(z, acc_ref, g_ref, be_ref):
        # Accumulate per-channel sum / sum-of-squares of the pre-activation over all
        # (batch, tile) steps of this phase; fold into (scale, shift) at the last step.
        @pl.when(is_first)
        def _():
            acc_ref[...] = jnp.zeros_like(acc_ref)

        acc_ref[0] = acc_ref[0] + jnp.sum(z, axis=1, keepdims=True)
        acc_ref[1] = acc_ref[1] + jnp.sum(z * z, axis=1, keepdims=True)

        @pl.when(is_last)
        def _():
            mu = acc_ref[0] * inv_n
            var = jnp.maximum(acc_ref[1] * inv_n - mu * mu, 0.0)   # clamp single-pass var
            scale = g_ref[...] * jax.lax.rsqrt(var + BN_EPS)
            acc_ref[0] = scale
            acc_ref[1] = be_ref[...] - mu * scale

    def z1():
        return mm(w1_ref, xb, b1_ref)

    def z2():
        h1 = bn_relu(z1(), acc1).astype(jnp.bfloat16)
        return mm(w2_ref, h1, b2_ref)

    def z3():
        h2 = bn_relu(z2(), acc2).astype(jnp.bfloat16)
        return mm(w3_ref, h2, b3_ref)

    @pl.when(phase == 0)          # global stats of conv1 pre-activation
    def _():
        update_stats(z1(), acc1, g1_ref, be1_ref)

    @pl.when(phase == 1)          # global stats of conv2 pre-activation
    def _():
        update_stats(z2(), acc2, g2_ref, be2_ref)

    @pl.when(phase == 2)          # global stats of conv3 pre-activation
    def _():
        update_stats(z3(), acc3, g3_ref, be3_ref)

    @pl.when(phase == 3)          # full stack + tanh(conv4) -> (3, tile_n) output tile
    def _():
        h3 = bn_relu(z3(), acc3).astype(jnp.bfloat16)
        y = jnp.tanh(mm(w4_ref, h3, b4_ref))
        o_ref[...] = y.astype(o_ref.dtype)


@jax.jit
def pointgencon_forward(x, params):
    """x: (B, C, N) float32 (PyTorch Conv1d layout). Returns (B, 3, N) float32."""
    B, C, N = x.shape
    assert C % 8 == 0 and (C // 4) % 8 == 0, C
    assert N % 128 == 0, "N must be a multiple of 128 (pad points upstream)"
    tile_n = next(tn for tn in (512, 256, 128) if N % tn == 0)
    n_tiles = N // tile_n
    R = B * N

    bf16, f32 = jnp.bfloat16, jnp.float32
    col = lambda v: jnp.reshape(v, (-1, 1)).astype(f32)      # per-channel column vector

    operands = (
        x,
        params["w1"].astype(bf16), col(params["b1"]), col(params["g1"]), col(params["be1"]),
        params["w2"].astype(bf16), col(params["b2"]), col(params["g2"]), col(params["be2"]),
        params["w3"].astype(bf16), col(params["b3"]), col(params["g3"]), col(params["be3"]),
        params["w4"].astype(bf16), col(params["b4"]),
    )

    # Weights / biases / BN params: full-array blocks, constant index -> DMA'd once.
    def const_spec(shape):
        zeros = (0,) * len(shape)
        return pl.BlockSpec(shape, lambda p, b, t: zeros)

    x_spec = pl.BlockSpec((None, C, tile_n), lambda p, b, t: (b, 0, t))
    in_specs = [x_spec] + [const_spec(op.shape) for op in operands[1:]]

    # Output tiles are only produced in the final phase; keep the block index constant
    # in earlier phases so no stale/garbage blocks are ever flushed to HBM.
    def out_index_map(p, b, t):
        sel = (p == 3).astype(jnp.int32)
        return (b * sel, 0, t * sel)

    out_spec = pl.BlockSpec((None, 3, tile_n), out_index_map)

    weight_bytes = 2 * (C * C + (C // 2) * C + (C // 4) * (C // 2) + 3 * (C // 4))
    param_bytes = 4 * (3 * C + 3 * (C // 2) + 3 * (C // 4) + 3)
    mm_flops_per_point = 2 * (4 * C * C + 3 * C * (C // 2)
                              + 2 * (C // 2) * (C // 4) + 3 * (C // 4))
    cost = pl.CostEstimate(
        flops=int(mm_flops_per_point) * R,
        transcendentals=3 * R,
        bytes_accessed=4 * (4 * C * R) + 4 * 3 * R + weight_bytes + param_bytes,
    )

    # VMEM: double-buffered x/out blocks + resident weights + activation temporaries.
    tile_bytes = 4 * C * tile_n
    vmem_estimate = (2 * tile_bytes + 2 * 4 * 3 * tile_n
                     + 2 * (weight_bytes + param_bytes) + 10 * tile_bytes)
    vmem_limit = int(min(max(4 * vmem_estimate, 16 * 2**20), 32 * 2**20))

    return pl.pallas_call(
        functools.partial(_pointgencon_kernel, total_rows=R),
        out_shape=jax.ShapeDtypeStruct((B, 3, N), jnp.float32),
        grid=(4, B, n_tiles),                     # (phase, batch, N-tile)
        in_specs=in_specs,
        out_specs=out_spec,
        scratch_shapes=[
            pltpu.VMEM((2, C, 1), f32),           # bn1: sum/sumsq -> scale/shift
            pltpu.VMEM((2, C // 2, 1), f32),      # bn2
            pltpu.VMEM((2, C // 4, 1), f32),      # bn3
        ],
        compiler_params=pltpu.CompilerParams(
            # All axes sequential: global BatchNorm stats couple every (batch, tile)
            # step, and phases must run in order.
            dimension_semantics=("arbitrary", "arbitrary", "arbitrary"),
            vmem_limit_bytes=vmem_limit),
        cost_estimate=cost,
    )(*operands)


def init_params(key, bottleneck=128):
    """Synthetic parameters matching PointGenCon.__init__ shapes.

    Conv weights stored in PyTorch layout (Cout, Cin) (kernel_size=1 squeezed);
    biases / BN affine params stored as (Cout,).
    """
    c = bottleneck
    dims = [(c, c), (c // 2, c), (c // 4, c // 2), (3, c // 4)]   # (Cout, Cin)
    params = {}
    keys = jax.random.split(key, 14)
    ki = 0
    for i, (cout, cin) in enumerate(dims, start=1):
        bound = 1.0 / (cin ** 0.5)
        params[f"w{i}"] = jax.random.uniform(
            keys[ki], (cout, cin), jnp.float32, -bound, bound); ki += 1
        params[f"b{i}"] = jax.random.uniform(
            keys[ki], (cout,), jnp.float32, -bound, bound); ki += 1
    for i, (cout, _) in enumerate(dims[:3], start=1):
        params[f"g{i}"] = 1.0 + 0.1 * jax.random.normal(keys[ki], (cout,), jnp.float32); ki += 1
        params[f"be{i}"] = 0.1 * jax.random.normal(keys[ki], (cout,), jnp.float32); ki += 1
    return params


def reference_forward(x, params, matmul_dtype=jnp.float32):
    """Pure-JAX reference, faithful to the PyTorch module (training-mode BN).
    matmul_dtype=bf16 mirrors the kernel's MXU-operand precision."""
    B, C, N = x.shape
    h = jnp.transpose(x, (0, 2, 1)).reshape(B * N, C)

    def mm(a, w, b):
        return jnp.dot(a.astype(matmul_dtype), w.T.astype(matmul_dtype),
                       preferred_element_type=jnp.float32) + b[None, :]

    def bn_relu(z, g, be):
        mu = jnp.mean(z, axis=0, keepdims=True)
        var = jnp.mean((z - mu) ** 2, axis=0, keepdims=True)
        return jnp.maximum((z - mu) * jax.lax.rsqrt(var + BN_EPS) * g[None, :] + be[None, :], 0.0)

    h = bn_relu(mm(h, params["w1"], params["b1"]), params["g1"], params["be1"])
    h = bn_relu(mm(h, params["w2"], params["b2"]), params["g2"], params["be2"])
    h = bn_relu(mm(h, params["w3"], params["b3"]), params["g3"], params["be3"])
    h = jnp.tanh(mm(h, params["w4"], params["b4"]))
    return jnp.transpose(h.reshape(B, N, 3), (0, 2, 1))


if __name__ == "__main__":
    key = jax.random.PRNGKey(0)
    k_x, k_p = jax.random.split(key)

    B, C, N = 2, 128, 1024            # bottleneck_size=128 is the module default
    x = jax.random.normal(k_x, (B, C, N), jnp.float32)
    params = init_params(k_p, bottleneck=C)

    out = jax.block_until_ready(pointgencon_forward(x, params))
    assert out.shape == (B, 3, N), out.shape
    assert bool(jnp.all(jnp.isfinite(out)))

    # Check against a pure-JAX reference using the same bf16 MXU-operand precision.
    ref = reference_forward(x, params, matmul_dtype=jnp.bfloat16)
    err = float(jnp.max(jnp.abs(out - ref)))
    assert err < 5e-2, f"max abs err vs bf16 reference: {err}"

    print("KERNEL_OK")
</pallas_src>

<mosaic_0001>
module attributes {stable_mosaic.version = 11 : i64} {
  func.func @_pointgencon_kernel(%arg0: i32, %arg1: i32, %arg2: i32, %arg3: memref<1x128x512xf32, #tpu.memory_space<vmem>>, %arg4: memref<128x128xbf16, #tpu.memory_space<vmem>>, %arg5: memref<128x1xf32, #tpu.memory_space<vmem>>, %arg6: memref<128x1xf32, #tpu.memory_space<vmem>>, %arg7: memref<128x1xf32, #tpu.memory_space<vmem>>, %arg8: memref<64x128xbf16, #tpu.memory_space<vmem>>, %arg9: memref<64x1xf32, #tpu.memory_space<vmem>>, %arg10: memref<64x1xf32, #tpu.memory_space<vmem>>, %arg11: memref<64x1xf32, #tpu.memory_space<vmem>>, %arg12: memref<32x64xbf16, #tpu.memory_space<vmem>>, %arg13: memref<32x1xf32, #tpu.memory_space<vmem>>, %arg14: memref<32x1xf32, #tpu.memory_space<vmem>>, %arg15: memref<32x1xf32, #tpu.memory_space<vmem>>, %arg16: memref<3x32xbf16, #tpu.memory_space<vmem>>, %arg17: memref<3x1xf32, #tpu.memory_space<vmem>>, %arg18: memref<1x3x512xf32, #tpu.memory_space<vmem>>, %arg19: memref<2x128x1xf32, #tpu.memory_space<vmem>>, %arg20: memref<2x64x1xf32, #tpu.memory_space<vmem>>, %arg21: memref<2x32x1xf32, #tpu.memory_space<vmem>>) attributes {dimension_semantics = [#tpu.dimension_semantics<arbitrary>, #tpu.dimension_semantics<arbitrary>, #tpu.dimension_semantics<arbitrary>], iteration_bounds = array<i64: 4, 2, 2>, scalar_prefetch = 0 : i64, scratch_operands = 3 : i64, tpu.core_type = #tpu.core_type<tc>, window_params = [{transform_indices = @transform_0, window_bounds = array<i64: 1, 128, 512>}, {pipeline_mode = #tpu.pipeline_mode<synchronous>, transform_indices = @transform_1, window_bounds = array<i64: 128, 128>}, {pipeline_mode = #tpu.pipeline_mode<synchronous>, transform_indices = @transform_2, window_bounds = array<i64: 128, 1>}, {pipeline_mode = #tpu.pipeline_mode<synchronous>, transform_indices = @transform_3, window_bounds = array<i64: 128, 1>}, {pipeline_mode = #tpu.pipeline_mode<synchronous>, transform_indices = @transform_4, window_bounds = array<i64: 128, 1>}, {pipeline_mode = #tpu.pipeline_mode<synchronous>, transform_indices = @transform_5, window_bounds = array<i64: 64, 128>}, {pipeline_mode = #tpu.pipeline_mode<synchronous>, transform_indices = @transform_6, window_bounds = array<i64: 64, 1>}, {pipeline_mode = #tpu.pipeline_mode<synchronous>, transform_indices = @transform_7, window_bounds = array<i64: 64, 1>}, {pipeline_mode = #tpu.pipeline_mode<synchronous>, transform_indices = @transform_8, window_bounds = array<i64: 64, 1>}, {pipeline_mode = #tpu.pipeline_mode<synchronous>, transform_indices = @transform_9, window_bounds = array<i64: 32, 64>}, {pipeline_mode = #tpu.pipeline_mode<synchronous>, transform_indices = @transform_10, window_bounds = array<i64: 32, 1>}, {pipeline_mode = #tpu.pipeline_mode<synchronous>, transform_indices = @transform_11, window_bounds = array<i64: 32, 1>}, {pipeline_mode = #tpu.pipeline_mode<synchronous>, transform_indices = @transform_12, window_bounds = array<i64: 32, 1>}, {pipeline_mode = #tpu.pipeline_mode<synchronous>, transform_indices = @transform_13, window_bounds = array<i64: 3, 32>}, {pipeline_mode = #tpu.pipeline_mode<synchronous>, transform_indices = @transform_14, window_bounds = array<i64: 3, 1>}, {transform_indices = @transform_15, window_bounds = array<i64: 1, 3, 512>}]} {
    %c0_i32 = arith.constant 0 : i32
    %0 = arith.cmpi eq, %arg1, %c0_i32 : i32
    %c0_i32_0 = arith.constant 0 : i32
    %1 = arith.cmpi eq, %arg2, %c0_i32_0 : i32
    %2 = arith.andi %0, %1 : i1
    %c1_i32 = arith.constant 1 : i32
    %3 = arith.cmpi eq, %arg1, %c1_i32 : i32
    %c1_i32_1 = arith.constant 1 : i32
    %4 = arith.cmpi eq, %arg2, %c1_i32_1 : i32
    %5 = arith.andi %3, %4 : i1
    %c0 = arith.constant 0 : index
    %c0_2 = arith.constant 0 : index
    %c0_3 = arith.constant 0 : index
    %6 = vector.load %arg3[%c0, %c0_2, %c0_3] : memref<1x128x512xf32, #tpu.memory_space<vmem>>, vector<1x128x512xf32>
    %7 = vector.shape_cast %6 : vector<1x128x512xf32> to vector<128x512xf32>
    %8 = arith.truncf %7 : vector<128x512xf32> to vector<128x512xbf16>
    %c0_i32_4 = arith.constant 0 : i32
    %9 = arith.cmpi eq, %arg0, %c0_i32_4 : i32
    %10 = arith.extui %9 : i1 to i32
    %c0_i32_5 = arith.constant 0 : i32
    %11 = arith.cmpi ne, %10, %c0_i32_5 : i32
    scf.if %11 {
      %c0_10 = arith.constant 0 : index
      %c0_11 = arith.constant 0 : index
      %21 = vector.load %arg4[%c0_10, %c0_11] : memref<128x128xbf16, #tpu.memory_space<vmem>>, vector<128x128xbf16>
      %cst = arith.constant dense<0.000000e+00> : vector<128x512xf32>
      %22 = tpu.matmul %21, %8, %cst {dimension_numbers = #tpu.dot_dimension_numbers<[1], [0], [0], [1], [0, 0, 1, 1], [], []>} : vector<128x128xbf16>, vector<128x512xbf16>, vector<128x512xf32> -> vector<128x512xf32>
      %c0_12 = arith.constant 0 : index
      %c0_13 = arith.constant 0 : index
      %23 = vector.load %arg5[%c0_12, %c0_13] : memref<128x1xf32, #tpu.memory_space<vmem>>, vector<128x1xf32>
      %24 = vector.broadcast %23 : vector<128x1xf32> to vector<128x512xf32>
      %25 = arith.addf %22, %24 : vector<128x512xf32>
      %26 = arith.extui %2 : i1 to i32
      %c0_i32_14 = arith.constant 0 : i32
      %27 = arith.cmpi ne, %26, %c0_i32_14 : i32
      scf.if %27 {
        %cst_29 = arith.constant 0.000000e+00 : f32
        %47 = vector.broadcast %cst_29 : f32 to vector<2x128x1xf32>
        %c0_30 = arith.constant 0 : index
        %c0_31 = arith.constant 0 : index
        %c0_32 = arith.constant 0 : index
        %48 = vector.load %arg19[%c0_30, %c0_31, %c0_32] : memref<2x128x1xf32, #tpu.memory_space<vmem>>, vector<2x128x1xf32>
        tpu.vector_store %arg19[%c0_30, %c0_31, %c0_32], %47 {strides = array<i32>} : memref<2x128x1xf32, #tpu.memory_space<vmem>>, vector<2x128x1xf32>,
      } else {
      }
      %c0_15 = arith.constant 0 : index
      %c0_16 = arith.constant 0 : index
      %c0_17 = arith.constant 0 : index
      %28 = vector.load %arg19[%c0_15, %c0_16, %c0_17] : memref<2x128x1xf32, #tpu.memory_space<vmem>>, vector<1x128x1xf32>
      %29 = vector.shape_cast %28 : vector<1x128x1xf32> to vector<128x1xf32>
      %cst_18 = arith.constant dense<0.000000e+00> : vector<128xf32>
      %30 = vector.multi_reduction <add>, %25, %cst_18 [1] : vector<128x512xf32> to vector<128xf32>
      %31 = vector.shape_cast %30 : vector<128xf32> to vector<128x1xf32>
      %32 = arith.addf %29, %31 : vector<128x1xf32>
      %c0_19 = arith.constant 0 : index
      %c0_20 = arith.constant 0 : index
      %c0_21 = arith.constant 0 : index
      %33 = vector.load %arg19[%c0_19, %c0_20, %c0_21] : memref<2x128x1xf32, #tpu.memory_space<vmem>>, vector<1x128x1xf32>
      %34 = vector.shape_cast %33 : vector<1x128x1xf32> to vector<128x1xf32>
      %35 = vector.shape_cast %32 : vector<128x1xf32> to vector<1x128x1xf32>
      tpu.vector_store %arg19[%c0_19, %c0_20, %c0_21], %35 {strides = array<i32>} : memref<2x128x1xf32, #tpu.memory_space<vmem>>, vector<1x128x1xf32>,
      %c1 = arith.constant 1 : index
      %c0_22 = arith.constant 0 : index
      %c0_23 = arith.constant 0 : index
      %36 = vector.load %arg19[%c1, %c0_22, %c0_23] : memref<2x128x1xf32, #tpu.memory_space<vmem>>, vector<1x128x1xf32>
      %37 = vector.shape_cast %36 : vector<1x128x1xf32> to vector<128x1xf32>
      %38 = arith.mulf %25, %25 : vector<128x512xf32>
      %cst_24 = arith.constant dense<0.000000e+00> : vector<128xf32>
      %39 = vector.multi_reduction <add>, %38, %cst_24 [1] : vector<128x512xf32> to vector<128xf32>
      %40 = vector.shape_cast %39 : vector<128xf32> to vector<128x1xf32>
      %41 = arith.addf %37, %40 : vector<128x1xf32>
      %c1_25 = arith.constant 1 : index
      %c0_26 = arith.constant 0 : index
      %c0_27 = arith.constant 0 : index
      %42 = vector.load %arg19[%c1_25, %c0_26, %c0_27] : memref<2x128x1xf32, #tpu.memory_space<vmem>>, vector<1x128x1xf32>
      %43 = vector.shape_cast %42 : vector<1x128x1xf32> to vector<128x1xf32>
      %44 = vector.shape_cast %41 : vector<128x1xf32> to vector<1x128x1xf32>
      tpu.vector_store %arg19[%c1_25, %c0_26, %c0_27], %44 {strides = array<i32>} : memref<2x128x1xf32, #tpu.memory_space<vmem>>, vector<1x128x1xf32>,
      %45 = arith.extui %5 : i1 to i32
      %c0_i32_28 = arith.constant 0 : i32
      %46 = arith.cmpi ne, %45, %c0_i32_28 : i32
      scf.if %46 {
        %c0_29 = arith.constant 0 : index
        %c0_30 = arith.constant 0 : index
        %c0_31 = arith.constant 0 : index
        %47 = vector.load %arg19[%c0_29, %c0_30, %c0_31] : memref<2x128x1xf32, #tpu.memory_space<vmem>>, vector<1x128x1xf32>
        %48 = vector.shape_cast %47 : vector<1x128x1xf32> to vector<128x1xf32>
        %cst_32 = arith.constant 4.8828125E-4 : f32
        %49 = vector.broadcast %cst_32 : f32 to vector<128x1xf32>
        %50 = arith.mulf %48, %49 : vector<128x1xf32>
        %c1_33 = arith.constant 1 : index
        %c0_34 = arith.constant 0 : index
        %c0_35 = arith.constant 0 : index
        %51 = vector.load %arg19[%c1_33, %c0_34, %c0_35] : memref<2x128x1xf32, #tpu.memory_space<vmem>>, vector<1x128x1xf32>
        %52 = vector.shape_cast %51 : vector<1x128x1xf32> to vector<128x1xf32>
        %cst_36 = arith.constant 4.8828125E-4 : f32
        %53 = vector.broadcast %cst_36 : f32 to vector<128x1xf32>
        %54 = arith.mulf %52, %53 : vector<128x1xf32>
        %55 = arith.mulf %50, %50 : vector<128x1xf32>
        %56 = arith.subf %54, %55 : vector<128x1xf32>
        %cst_37 = arith.constant 0.000000e+00 : f32
        %57 = vector.broadcast %cst_37 : f32 to vector<128x1xf32>
        %58 = arith.maximumf %56, %57 : vector<128x1xf32>
        %c0_38 = arith.constant 0 : index
        %c0_39 = arith.constant 0 : index
        %59 = vector.load %arg6[%c0_38, %c0_39] : memref<128x1xf32, #tpu.memory_space<vmem>>, vector<128x1xf32>
        %cst_40 = arith.constant 9.99999974E-6 : f32
        %60 = vector.broadcast %cst_40 : f32 to vector<128x1xf32>
        %61 = arith.addf %58, %60 : vector<128x1xf32>
        %62 = math.rsqrt %61 : vector<128x1xf32>
        %63 = arith.mulf %59, %62 : vector<128x1xf32>
        %c0_41 = arith.constant 0 : index
        %c0_42 = arith.constant 0 : index
        %c0_43 = arith.constant 0 : index
        %64 = vector.load %arg19[%c0_41, %c0_42, %c0_43] : memref<2x128x1xf32, #tpu.memory_space<vmem>>, vector<1x128x1xf32>
        %65 = vector.shape_cast %64 : vector<1x128x1xf32> to vector<128x1xf32>
        %66 = vector.shape_cast %63 : vector<128x1xf32> to vector<1x128x1xf32>
        tpu.vector_store %arg19[%c0_41, %c0_42, %c0_43], %66 {strides = array<i32>} : memref<2x128x1xf32, #tpu.memory_space<vmem>>, vector<1x128x1xf32>,
        %c0_44 = arith.constant 0 : index
        %c0_45 = arith.constant 0 : index
        %67 = vector.load %arg7[%c0_44, %c0_45] : memref<128x1xf32, #tpu.memory_space<vmem>>, vector<128x1xf32>
        %68 = arith.mulf %50, %63 : vector<128x1xf32>
        %69 = arith.subf %67, %68 : vector<128x1xf32>
        %c1_46 = arith.constant 1 : index
        %c0_47 = arith.constant 0 : index
        %c0_48 = arith.constant 0 : index
        %70 = vector.load %arg19[%c1_46, %c0_47, %c0_48] : memref<2x128x1xf32, #tpu.memory_space<vmem>>, vector<1x128x1xf32>
        %71 = vector.shape_cast %70 : vector<1x128x1xf32> to vector<128x1xf32>
        %72 = vector.shape_cast %69 : vector<128x1xf32> to vector<1x128x1xf32>
        tpu.vector_store %arg19[%c1_46, %c0_47, %c0_48], %72 {strides = array<i32>} : memref<2x128x1xf32, #tpu.memory_space<vmem>>, vector<1x128x1xf32>,
      } else {
      }
    } else {
    }
    %c1_i32_6 = arith.constant 1 : i32
    %12 = arith.cmpi eq, %arg0, %c1_i32_6 : i32
    %13 = arith.extui %12 : i1 to i32
    %c0_i32_7 = arith.constant 0 : i32
    %14 = arith.cmpi ne, %13, %c0_i32_7 : i32
    scf.if %14 {
      %c0_10 = arith.constant 0 : index
      %c0_11 = arith.constant 0 : index
      %21 = vector.load %arg4[%c0_10, %c0_11] : memref<128x128xbf16, #tpu.memory_space<vmem>>, vector<128x128xbf16>
      %cst = arith.constant dense<0.000000e+00> : vector<128x512xf32>
      %22 = tpu.matmul %21, %8, %cst {dimension_numbers = #tpu.dot_dimension_numbers<[1], [0], [0], [1], [0, 0, 1, 1], [], []>} : vector<128x128xbf16>, vector<128x512xbf16>, vector<128x512xf32> -> vector<128x512xf32>
      %c0_12 = arith.constant 0 : index
      %c0_13 = arith.constant 0 : index
      %23 = vector.load %arg5[%c0_12, %c0_13] : memref<128x1xf32, #tpu.memory_space<vmem>>, vector<128x1xf32>
      %24 = vector.broadcast %23 : vector<128x1xf32> to vector<128x512xf32>
      %25 = arith.addf %22, %24 : vector<128x512xf32>
      %c0_14 = arith.constant 0 : index
      %c0_15 = arith.constant 0 : index
      %c0_16 = arith.constant 0 : index
      %26 = vector.load %arg19[%c0_14, %c0_15, %c0_16] : memref<2x128x1xf32, #tpu.memory_space<vmem>>, vector<1x128x1xf32>
      %27 = vector.shape_cast %26 : vector<1x128x1xf32> to vector<128x1xf32>
      %28 = vector.broadcast %27 : vector<128x1xf32> to vector<128x512xf32>
      %29 = arith.mulf %25, %28 : vector<128x512xf32>
      %c1 = arith.constant 1 : index
      %c0_17 = arith.constant 0 : index
      %c0_18 = arith.constant 0 : index
      %30 = vector.load %arg19[%c1, %c0_17, %c0_18] : memref<2x128x1xf32, #tpu.memory_space<vmem>>, vector<1x128x1xf32>
      %31 = vector.shape_cast %30 : vector<1x128x1xf32> to vector<128x1xf32>
      %32 = vector.broadcast %31 : vector<128x1xf32> to vector<128x512xf32>
      %33 = arith.addf %29, %32 : vector<128x512xf32>
      %cst_19 = arith.constant 0.000000e+00 : f32
      %34 = vector.broadcast %cst_19 : f32 to vector<128x512xf32>
      %35 = arith.maximumf %33, %34 : vector<128x512xf32>
      %36 = arith.truncf %35 : vector<128x512xf32> to vector<128x512xbf16>
      %c0_20 = arith.constant 0 : index
      %c0_21 = arith.constant 0 : index
      %37 = vector.load %arg8[%c0_20, %c0_21] : memref<64x128xbf16, #tpu.memory_space<vmem>>, vector<64x128xbf16>
      %cst_22 = arith.constant dense<0.000000e+00> : vector<64x512xf32>
      %38 = tpu.matmul %37, %36, %cst_22 {dimension_numbers = #tpu.dot_dimension_numbers<[1], [0], [0], [1], [0, 0, 1, 1], [], []>} : vector<64x128xbf16>, vector<128x512xbf16>, vector<64x512xf32> -> vector<64x512xf32>
      %c0_23 = arith.constant 0 : index
      %c0_24 = arith.constant 0 : index
      %39 = vector.load %arg9[%c0_23, %c0_24] : memref<64x1xf32, #tpu.memory_space<vmem>>, vector<64x1xf32>
      %40 = vector.broadcast %39 : vector<64x1xf32> to vector<64x512xf32>
      %41 = arith.addf %38, %40 : vector<64x512xf32>
      %42 = arith.extui %2 : i1 to i32
      %c0_i32_25 = arith.constant 0 : i32
      %43 = arith.cmpi ne, %42, %c0_i32_25 : i32
      scf.if %43 {
        %cst_41 = arith.constant 0.000000e+00 : f32
        %63 = vector.broadcast %cst_41 : f32 to vector<2x64x1xf32>
        %c0_42 = arith.constant 0 : index
        %c0_43 = arith.constant 0 : index
        %c0_44 = arith.constant 0 : index
        %64 = vector.load %arg20[%c0_42, %c0_43, %c0_44] : memref<2x64x1xf32, #tpu.memory_space<vmem>>, vector<2x64x1xf32>
        tpu.vector_store %arg20[%c0_42, %c0_43, %c0_44], %63 {strides = array<i32>} : memref<2x64x1xf32, #tpu.memory_space<vmem>>, vector<2x64x1xf32>,
      } else {
      }
      %c0_26 = arith.constant 0 : index
      %c0_27 = arith.constant 0 : index
      %c0_28 = arith.constant 0 : index
      %44 = vector.load %arg20[%c0_26, %c0_27, %c0_28] : memref<2x64x1xf32, #tpu.memory_space<vmem>>, vector<1x64x1xf32>
      %45 = vector.shape_cast %44 : vector<1x64x1xf32> to vector<64x1xf32>
      %cst_29 = arith.constant dense<0.000000e+00> : vector<64xf32>
      %46 = vector.multi_reduction <add>, %41, %cst_29 [1] : vector<64x512xf32> to vector<64xf32>
      %47 = vector.shape_cast %46 : vector<64xf32> to vector<64x1xf32>
      %48 = arith.addf %45, %47 : vector<64x1xf32>
      %c0_30 = arith.constant 0 : index
      %c0_31 = arith.constant 0 : index
      %c0_32 = arith.constant 0 : index
      %49 = vector.load %arg20[%c0_30, %c0_31, %c0_32] : memref<2x64x1xf32, #tpu.memory_space<vmem>>, vector<1x64x1xf32>
      %50 = vector.shape_cast %49 : vector<1x64x1xf32> to vector<64x1xf32>
      %51 = vector.shape_cast %48 : vector<64x1xf32> to vector<1x64x1xf32>
      tpu.vector_store %arg20[%c0_30, %c0_31, %c0_32], %51 {strides = array<i32>} : memref<2x64x1xf32, #tpu.memory_space<vmem>>, vector<1x64x1xf32>,
      %c1_33 = arith.constant 1 : index
      %c0_34 = arith.constant 0 : index
      %c0_35 = arith.constant 0 : index
      %52 = vector.load %arg20[%c1_33, %c0_34, %c0_35] : memref<2x64x1xf32, #tpu.memory_space<vmem>>, vector<1x64x1xf32>
      %53 = vector.shape_cast %52 : vector<1x64x1xf32> to vector<64x1xf32>
      %54 = arith.mulf %41, %41 : vector<64x512xf32>
      %cst_36 = arith.constant dense<0.000000e+00> : vector<64xf32>
      %55 = vector.multi_reduction <add>, %54, %cst_36 [1] : vector<64x512xf32> to vector<64xf32>
      %56 = vector.shape_cast %55 : vector<64xf32> to vector<64x1xf32>
      %57 = arith.addf %53, %56 : vector<64x1xf32>
      %c1_37 = arith.constant 1 : index
      %c0_38 = arith.constant 0 : index
      %c0_39 = arith.constant 0 : index
      %58 = vector.load %arg20[%c1_37, %c0_38, %c0_39] : memref<2x64x1xf32, #tpu.memory_space<vmem>>, vector<1x64x1xf32>
      %59 = vector.shape_cast %58 : vector<1x64x1xf32> to vector<64x1xf32>
      %60 = vector.shape_cast %57 : vector<64x1xf32> to vector<1x64x1xf32>
      tpu.vector_store %arg20[%c1_37, %c0_38, %c0_39], %60 {strides = array<i32>} : memref<2x64x1xf32, #tpu.memory_space<vmem>>, vector<1x64x1xf32>,
      %61 = arith.extui %5 : i1 to i32
      %c0_i32_40 = arith.constant 0 : i32
      %62 = arith.cmpi ne, %61, %c0_i32_40 : i32
      scf.if %62 {
        %c0_41 = arith.constant 0 : index
        %c0_42 = arith.constant 0 : index
        %c0_43 = arith.constant 0 : index
        %63 = vector.load %arg20[%c0_41, %c0_42, %c0_43] : memref<2x64x1xf32, #tpu.memory_space<vmem>>, vector<1x64x1xf32>
        %64 = vector.shape_cast %63 : vector<1x64x1xf32> to vector<64x1xf32>
        %cst_44 = arith.constant 4.8828125E-4 : f32
        %65 = vector.broadcast %cst_44 : f32 to vector<64x1xf32>
        %66 = arith.mulf %64, %65 : vector<64x1xf32>
        %c1_45 = arith.constant 1 : index
        %c0_46 = arith.constant 0 : index
        %c0_47 = arith.constant 0 : index
        %67 = vector.load %arg20[%c1_45, %c0_46, %c0_47] : memref<2x64x1xf32, #tpu.memory_space<vmem>>, vector<1x64x1xf32>
        %68 = vector.shape_cast %67 : vector<1x64x1xf32> to vector<64x1xf32>
        %cst_48 = arith.constant 4.8828125E-4 : f32
        %69 = vector.broadcast %cst_48 : f32 to vector<64x1xf32>
        %70 = arith.mulf %68, %69 : vector<64x1xf32>
        %71 = arith.mulf %66, %66 : vector<64x1xf32>
        %72 = arith.subf %70, %71 : vector<64x1xf32>
        %cst_49 = arith.constant 0.000000e+00 : f32
        %73 = vector.broadcast %cst_49 : f32 to vector<64x1xf32>
        %74 = arith.maximumf %72, %73 : vector<64x1xf32>
        %c0_50 = arith.constant 0 : index
        %c0_51 = arith.constant 0 : index
        %75 = vector.load %arg10[%c0_50, %c0_51] : memref<64x1xf32, #tpu.memory_space<vmem>>, vector<64x1xf32>
        %cst_52 = arith.constant 9.99999974E-6 : f32
        %76 = vector.broadcast %cst_52 : f32 to vector<64x1xf32>
        %77 = arith.addf %74, %76 : vector<64x1xf32>
        %78 = math.rsqrt %77 : vector<64x1xf32>
        %79 = arith.mulf %75, %78 : vector<64x1xf32>
        %c0_53 = arith.constant 0 : index
        %c0_54 = arith.constant 0 : index
        %c0_55 = arith.constant 0 : index
        %80 = vector.load %arg20[%c0_53, %c0_54, %c0_55] : memref<2x64x1xf32, #tpu.memory_space<vmem>>, vector<1x64x1xf32>
        %81 = vector.shape_cast %80 : vector<1x64x1xf32> to vector<64x1xf32>
        %82 = vector.shape_cast %79 : vector<64x1xf32> to vector<1x64x1xf32>
        tpu.vector_store %arg20[%c0_53, %c0_54, %c0_55], %82 {strides = array<i32>} : memref<2x64x1xf32, #tpu.memory_space<vmem>>, vector<1x64x1xf32>,
        %c0_56 = arith.constant 0 : index
        %c0_57 = arith.constant 0 : index
        %83 = vector.load %arg11[%c0_56, %c0_57] : memref<64x1xf32, #tpu.memory_space<vmem>>, vector<64x1xf32>
        %84 = arith.mulf %66, %79 : vector<64x1xf32>
        %85 = arith.subf %83, %84 : vector<64x1xf32>
        %c1_58 = arith.constant 1 : index
        %c0_59 = arith.constant 0 : index
        %c0_60 = arith.constant 0 : index
        %86 = vector.load %arg20[%c1_58, %c0_59, %c0_60] : memref<2x64x1xf32, #tpu.memory_space<vmem>>, vector<1x64x1xf32>
        %87 = vector.shape_cast %86 : vector<1x64x1xf32> to vector<64x1xf32>
        %88 = vector.shape_cast %85 : vector<64x1xf32> to vector<1x64x1xf32>
        tpu.vector_store %arg20[%c1_58, %c0_59, %c0_60], %88 {strides = array<i32>} : memref<2x64x1xf32, #tpu.memory_space<vmem>>, vector<1x64x1xf32>,
      } else {
      }
    } else {
    }
    %c2_i32 = arith.constant 2 : i32
    %15 = arith.cmpi eq, %arg0, %c2_i32 : i32
    %16 = arith.extui %15 : i1 to i32
    %c0_i32_8 = arith.constant 0 : i32
    %17 = arith.cmpi ne, %16, %c0_i32_8 : i32
    scf.if %17 {
      %c0_10 = arith.constant 0 : index
      %c0_11 = arith.constant 0 : index
      %21 = vector.load %arg4[%c0_10, %c0_11] : memref<128x128xbf16, #tpu.memory_space<vmem>>, vector<128x128xbf16>
      %cst = arith.constant dense<0.000000e+00> : vector<128x512xf32>
      %22 = tpu.matmul %21, %8, %cst {dimension_numbers = #tpu.dot_dimension_numbers<[1], [0], [0], [1], [0, 0, 1, 1], [], []>} : vector<128x128xbf16>, vector<128x512xbf16>, vector<128x512xf32> -> vector<128x512xf32>
      %c0_12 = arith.constant 0 : index
      %c0_13 = arith.constant 0 : index
      %23 = vector.load %arg5[%c0_12, %c0_13] : memref<128x1xf32, #tpu.memory_space<vmem>>, vector<128x1xf32>
      %24 = vector.broadcast %23 : vector<128x1xf32> to vector<128x512xf32>
      %25 = arith.addf %22, %24 : vector<128x512xf32>
      %c0_14 = arith.constant 0 : index
      %c0_15 = arith.constant 0 : index
      %c0_16 = arith.constant 0 : index
      %26 = vector.load %arg19[%c0_14, %c0_15, %c0_16] : memref<2x128x1xf32, #tpu.memory_space<vmem>>, vector<1x128x1xf32>
      %27 = vector.shape_cast %26 : vector<1x128x1xf32> to vector<128x1xf32>
      %28 = vector.broadcast %27 : vector<128x1xf32> to vector<128x512xf32>
      %29 = arith.mulf %25, %28 : vector<128x512xf32>
      %c1 = arith.constant 1 : index
      %c0_17 = arith.constant 0 : index
      %c0_18 = arith.constant 0 : index
      %30 = vector.load %arg19[%c1, %c0_17, %c0_18] : memref<2x128x1xf32, #tpu.memory_space<vmem>>, vector<1x128x1xf32>
      %31 = vector.shape_cast %30 : vector<1x128x1xf32> to vector<128x1xf32>
      %32 = vector.broadcast %31 : vector<128x1xf32> to vector<128x512xf32>
      %33 = arith.addf %29, %32 : vector<128x512xf32>
      %cst_19 = arith.constant 0.000000e+00 : f32
      %34 = vector.broadcast %cst_19 : f32 to vector<128x512xf32>
      %35 = arith.maximumf %33, %34 : vector<128x512xf32>
      %36 = arith.truncf %35 : vector<128x512xf32> to vector<128x512xbf16>
      %c0_20 = arith.constant 0 : index
      %c0_21 = arith.constant 0 : index
      %37 = vector.load %arg8[%c0_20, %c0_21] : memref<64x128xbf16, #tpu.memory_space<vmem>>, vector<64x128xbf16>
      %cst_22 = arith.constant dense<0.000000e+00> : vector<64x512xf32>
      %38 = tpu.matmul %37, %36, %cst_22 {dimension_numbers = #tpu.dot_dimension_numbers<[1], [0], [0], [1], [0, 0, 1, 1], [], []>} : vector<64x128xbf16>, vector<128x512xbf16>, vector<64x512xf32> -> vector<64x512xf32>
      %c0_23 = arith.constant 0 : index
      %c0_24 = arith.constant 0 : index
      %39 = vector.load %arg9[%c0_23, %c0_24] : memref<64x1xf32, #tpu.memory_space<vmem>>, vector<64x1xf32>
      %40 = vector.broadcast %39 : vector<64x1xf32> to vector<64x512xf32>
      %41 = arith.addf %38, %40 : vector<64x512xf32>
      %c0_25 = arith.constant 0 : index
      %c0_26 = arith.constant 0 : index
      %c0_27 = arith.constant 0 : index
      %42 = vector.load %arg20[%c0_25, %c0_26, %c0_27] : memref<2x64x1xf32, #tpu.memory_space<vmem>>, vector<1x64x1xf32>
      %43 = vector.shape_cast %42 : vector<1x64x1xf32> to vector<64x1xf32>
      %44 = vector.broadcast %43 : vector<64x1xf32> to vector<64x512xf32>
      %45 = arith.mulf %41, %44 : vector<64x512xf32>
      %c1_28 = arith.constant 1 : index
      %c0_29 = arith.constant 0 : index
      %c0_30 = arith.constant 0 : index
      %46 = vector.load %arg20[%c1_28, %c0_29, %c0_30] : memref<2x64x1xf32, #tpu.memory_space<vmem>>, vector<1x64x1xf32>
      %47 = vector.shape_cast %46 : vector<1x64x1xf32> to vector<64x1xf32>
      %48 = vector.broadcast %47 : vector<64x1xf32> to vector<64x512xf32>
      %49 = arith.addf %45, %48 : vector<64x512xf32>
      %cst_31 = arith.constant 0.000000e+00 : f32
      %50 = vector.broadcast %cst_31 : f32 to vector<64x512xf32>
      %51 = arith.maximumf %49, %50 : vector<64x512xf32>
      %52 = arith.truncf %51 : vector<64x512xf32> to vector<64x512xbf16>
      %c0_32 = arith.constant 0 : index
      %c0_33 = arith.constant 0 : index
      %53 = vector.load %arg12[%c0_32, %c0_33] : memref<32x64xbf16, #tpu.memory_space<vmem>>, vector<32x64xbf16>
      %cst_34 = arith.constant dense<0.000000e+00> : vector<32x512xf32>
      %54 = tpu.matmul %53, %52, %cst_34 {dimension_numbers = #tpu.dot_dimension_numbers<[1], [0], [0], [1], [0, 0, 1, 1], [], []>} : vector<32x64xbf16>, vector<64x512xbf16>, vector<32x512xf32> -> vector<32x512xf32>
      %c0_35 = arith.constant 0 : index
      %c0_36 = arith.constant 0 : index
      %55 = vector.load %arg13[%c0_35, %c0_36] : memref<32x1xf32, #tpu.memory_space<vmem>>, vector<32x1xf32>
      %56 = vector.broadcast %55 : vector<32x1xf32> to vector<32x512xf32>
      %57 = arith.addf %54, %56 : vector<32x512xf32>
      %58 = arith.extui %2 : i1 to i32
      %c0_i32_37 = arith.constant 0 : i32
      %59 = arith.cmpi ne, %58, %c0_i32_37 : i32
      scf.if %59 {
        %cst_53 = arith.constant 0.000000e+00 : f32
        %79 = vector.broadcast %cst_53 : f32 to vector<2x32x1xf32>
        %c0_54 = arith.constant 0 : index
        %c0_55 = arith.constant 0 : index
        %c0_56 = arith.constant 0 : index
        %80 = vector.load %arg21[%c0_54, %c0_55, %c0_56] : memref<2x32x1xf32, #tpu.memory_space<vmem>>, vector<2x32x1xf32>
        tpu.vector_store %arg21[%c0_54, %c0_55, %c0_56], %79 {strides = array<i32>} : memref<2x32x1xf32, #tpu.memory_space<vmem>>, vector<2x32x1xf32>,
      } else {
      }
      %c0_38 = arith.constant 0 : index
      %c0_39 = arith.constant 0 : index
      %c0_40 = arith.constant 0 : index
      %60 = vector.load %arg21[%c0_38, %c0_39, %c0_40] : memref<2x32x1xf32, #tpu.memory_space<vmem>>, vector<1x32x1xf32>
      %61 = vector.shape_cast %60 : vector<1x32x1xf32> to vector<32x1xf32>
      %cst_41 = arith.constant dense<0.000000e+00> : vector<32xf32>
      %62 = vector.multi_reduction <add>, %57, %cst_41 [1] : vector<32x512xf32> to vector<32xf32>
      %63 = vector.shape_cast %62 : vector<32xf32> to vector<32x1xf32>
      %64 = arith.addf %61, %63 : vector<32x1xf32>
      %c0_42 = arith.constant 0 : index
      %c0_43 = arith.constant 0 : index
      %c0_44 = arith.constant 0 : index
      %65 = vector.load %arg21[%c0_42, %c0_43, %c0_44] : memref<2x32x1xf32, #tpu.memory_space<vmem>>, vector<1x32x1xf32>
      %66 = vector.shape_cast %65 : vector<1x32x1xf32> to vector<32x1xf32>
      %67 = vector.shape_cast %64 : vector<32x1xf32> to vector<1x32x1xf32>
      tpu.vector_store %arg21[%c0_42, %c0_43, %c0_44], %67 {strides = array<i32>} : memref<2x32x1xf32, #tpu.memory_space<vmem>>, vector<1x32x1xf32>,
      %c1_45 = arith.constant 1 : index
      %c0_46 = arith.constant 0 : index
      %c0_47 = arith.constant 0 : index
      %68 = vector.load %arg21[%c1_45, %c0_46, %c0_47] : memref<2x32x1xf32, #tpu.memory_space<vmem>>, vector<1x32x1xf32>
      %69 = vector.shape_cast %68 : vector<1x32x1xf32> to vector<32x1xf32>
      %70 = arith.mulf %57, %57 : vector<32x512xf32>
      %cst_48 = arith.constant dense<0.000000e+00> : vector<32xf32>
      %71 = vector.multi_reduction <add>, %70, %cst_48 [1] : vector<32x512xf32> to vector<32xf32>
      %72 = vector.shape_cast %71 : vector<32xf32> to vector<32x1xf32>
      %73 = arith.addf %69, %72 : vector<32x1xf32>
      %c1_49 = arith.constant 1 : index
      %c0_50 = arith.constant 0 : index
      %c0_51 = arith.constant 0 : index
      %74 = vector.load %arg21[%c1_49, %c0_50, %c0_51] : memref<2x32x1xf32, #tpu.memory_space<vmem>>, vector<1x32x1xf32>
      %75 = vector.shape_cast %74 : vector<1x32x1xf32> to vector<32x1xf32>
      %76 = vector.shape_cast %73 : vector<32x1xf32> to vector<1x32x1xf32>
      tpu.vector_store %arg21[%c1_49, %c0_50, %c0_51], %76 {strides = array<i32>} : memref<2x32x1xf32, #tpu.memory_space<vmem>>, vector<1x32x1xf32>,
      %77 = arith.extui %5 : i1 to i32
      %c0_i32_52 = arith.constant 0 : i32
      %78 = arith.cmpi ne, %77, %c0_i32_52 : i32
      scf.if %78 {
        %c0_53 = arith.constant 0 : index
        %c0_54 = arith.constant 0 : index
        %c0_55 = arith.constant 0 : index
        %79 = vector.load %arg21[%c0_53, %c0_54, %c0_55] : memref<2x32x1xf32, #tpu.memory_space<vmem>>, vector<1x32x1xf32>
        %80 = vector.shape_cast %79 : vector<1x32x1xf32> to vector<32x1xf32>
        %cst_56 = arith.constant 4.8828125E-4 : f32
        %81 = vector.broadcast %cst_56 : f32 to vector<32x1xf32>
        %82 = arith.mulf %80, %81 : vector<32x1xf32>
        %c1_57 = arith.constant 1 : index
        %c0_58 = arith.constant 0 : index
        %c0_59 = arith.constant 0 : index
        %83 = vector.load %arg21[%c1_57, %c0_58, %c0_59] : memref<2x32x1xf32, #tpu.memory_space<vmem>>, vector<1x32x1xf32>
        %84 = vector.shape_cast %83 : vector<1x32x1xf32> to vector<32x1xf32>
        %cst_60 = arith.constant 4.8828125E-4 : f32
        %85 = vector.broadcast %cst_60 : f32 to vector<32x1xf32>
        %86 = arith.mulf %84, %85 : vector<32x1xf32>
        %87 = arith.mulf %82, %82 : vector<32x1xf32>
        %88 = arith.subf %86, %87 : vector<32x1xf32>
        %cst_61 = arith.constant 0.000000e+00 : f32
        %89 = vector.broadcast %cst_61 : f32 to vector<32x1xf32>
        %90 = arith.maximumf %88, %89 : vector<32x1xf32>
        %c0_62 = arith.constant 0 : index
        %c0_63 = arith.constant 0 : index
        %91 = vector.load %arg14[%c0_62, %c0_63] : memref<32x1xf32, #tpu.memory_space<vmem>>, vector<32x1xf32>
        %cst_64 = arith.constant 9.99999974E-6 : f32
        %92 = vector.broadcast %cst_64 : f32 to vector<32x1xf32>
        %93 = arith.addf %90, %92 : vector<32x1xf32>
        %94 = math.rsqrt %93 : vector<32x1xf32>
        %95 = arith.mulf %91, %94 : vector<32x1xf32>
        %c0_65 = arith.constant 0 : index
        %c0_66 = arith.constant 0 : index
        %c0_67 = arith.constant 0 : index
        %96 = vector.load %arg21[%c0_65, %c0_66, %c0_67] : memref<2x32x1xf32, #tpu.memory_space<vmem>>, vector<1x32x1xf32>
        %97 = vector.shape_cast %96 : vector<1x32x1xf32> to vector<32x1xf32>
        %98 = vector.shape_cast %95 : vector<32x1xf32> to vector<1x32x1xf32>
        tpu.vector_store %arg21[%c0_65, %c0_66, %c0_67], %98 {strides = array<i32>} : memref<2x32x1xf32, #tpu.memory_space<vmem>>, vector<1x32x1xf32>,
        %c0_68 = arith.constant 0 : index
        %c0_69 = arith.constant 0 : index
        %99 = vector.load %arg15[%c0_68, %c0_69] : memref<32x1xf32, #tpu.memory_space<vmem>>, vector<32x1xf32>
        %100 = arith.mulf %82, %95 : vector<32x1xf32>
        %101 = arith.subf %99, %100 : vector<32x1xf32>
        %c1_70 = arith.constant 1 : index
        %c0_71 = arith.constant 0 : index
        %c0_72 = arith.constant 0 : index
        %102 = vector.load %arg21[%c1_70, %c0_71, %c0_72] : memref<2x32x1xf32, #tpu.memory_space<vmem>>, vector<1x32x1xf32>
        %103 = vector.shape_cast %102 : vector<1x32x1xf32> to vector<32x1xf32>
        %104 = vector.shape_cast %101 : vector<32x1xf32> to vector<1x32x1xf32>
        tpu.vector_store %arg21[%c1_70, %c0_71, %c0_72], %104 {strides = array<i32>} : memref<2x32x1xf32, #tpu.memory_space<vmem>>, vector<1x32x1xf32>,
      } else {
      }
    } else {
    }
    %c3_i32 = arith.constant 3 : i32
    %18 = arith.cmpi eq, %arg0, %c3_i32 : i32
    %19 = arith.extui %18 : i1 to i32
    %c0_i32_9 = arith.constant 0 : i32
    %20 = arith.cmpi ne, %19, %c0_i32_9 : i32
    scf.if %20 {
      %c0_10 = arith.constant 0 : index
      %c0_11 = arith.constant 0 : index
      %21 = vector.load %arg4[%c0_10, %c0_11] : memref<128x128xbf16, #tpu.memory_space<vmem>>, vector<128x128xbf16>
      %cst = arith.constant dense<0.000000e+00> : vector<128x512xf32>
      %22 = tpu.matmul %21, %8, %cst {dimension_numbers = #tpu.dot_dimension_numbers<[1], [0], [0], [1], [0, 0, 1, 1], [], []>} : vector<128x128xbf16>, vector<128x512xbf16>, vector<128x512xf32> -> vector<128x512xf32>
      %c0_12 = arith.constant 0 : index
      %c0_13 = arith.constant 0 : index
      %23 = vector.load %arg5[%c0_12, %c0_13] : memref<128x1xf32, #tpu.memory_space<vmem>>, vector<128x1xf32>
      %24 = vector.broadcast %23 : vector<128x1xf32> to vector<128x512xf32>
      %25 = arith.addf %22, %24 : vector<128x512xf32>
      %c0_14 = arith.constant 0 : index
      %c0_15 = arith.constant 0 : index
      %c0_16 = arith.constant 0 : index
      %26 = vector.load %arg19[%c0_14, %c0_15, %c0_16] : memref<2x128x1xf32, #tpu.memory_space<vmem>>, vector<1x128x1xf32>
      %27 = vector.shape_cast %26 : vector<1x128x1xf32> to vector<128x1xf32>
      %28 = vector.broadcast %27 : vector<128x1xf32> to vector<128x512xf32>
      %29 = arith.mulf %25, %28 : vector<128x512xf32>
      %c1 = arith.constant 1 : index
      %c0_17 = arith.constant 0 : index
      %c0_18 = arith.constant 0 : index
      %30 = vector.load %arg19[%c1, %c0_17, %c0_18] : memref<2x128x1xf32, #tpu.memory_space<vmem>>, vector<1x128x1xf32>
      %31 = vector.shape_cast %30 : vector<1x128x1xf32> to vector<128x1xf32>
      %32 = vector.broadcast %31 : vector<128x1xf32> to vector<128x512xf32>
      %33 = arith.addf %29, %32 : vector<128x512xf32>
      %cst_19 = arith.constant 0.000000e+00 : f32
      %34 = vector.broadcast %cst_19 : f32 to vector<128x512xf32>
      %35 = arith.maximumf %33, %34 : vector<128x512xf32>
      %36 = arith.truncf %35 : vector<128x512xf32> to vector<128x512xbf16>
      %c0_20 = arith.constant 0 : index
      %c0_21 = arith.constant 0 : index
      %37 = vector.load %arg8[%c0_20, %c0_21] : memref<64x128xbf16, #tpu.memory_space<vmem>>, vector<64x128xbf16>
      %cst_22 = arith.constant dense<0.000000e+00> : vector<64x512xf32>
      %38 = tpu.matmul %37, %36, %cst_22 {dimension_numbers = #tpu.dot_dimension_numbers<[1], [0], [0], [1], [0, 0, 1, 1], [], []>} : vector<64x128xbf16>, vector<128x512xbf16>, vector<64x512xf32> -> vector<64x512xf32>
      %c0_23 = arith.constant 0 : index
      %c0_24 = arith.constant 0 : index
      %39 = vector.load %arg9[%c0_23, %c0_24] : memref<64x1xf32, #tpu.memory_space<vmem>>, vector<64x1xf32>
      %40 = vector.broadcast %39 : vector<64x1xf32> to vector<64x512xf32>
      %41 = arith.addf %38, %40 : vector<64x512xf32>
      %c0_25 = arith.constant 0 : index
      %c0_26 = arith.constant 0 : index
      %c0_27 = arith.constant 0 : index
      %42 = vector.load %arg20[%c0_25, %c0_26, %c0_27] : memref<2x64x1xf32, #tpu.memory_space<vmem>>, vector<1x64x1xf32>
      %43 = vector.shape_cast %42 : vector<1x64x1xf32> to vector<64x1xf32>
      %44 = vector.broadcast %43 : vector<64x1xf32> to vector<64x512xf32>
      %45 = arith.mulf %41, %44 : vector<64x512xf32>
      %c1_28 = arith.constant 1 : index
      %c0_29 = arith.constant 0 : index
      %c0_30 = arith.constant 0 : index
      %46 = vector.load %arg20[%c1_28, %c0_29, %c0_30] : memref<2x64x1xf32, #tpu.memory_space<vmem>>, vector<1x64x1xf32>
      %47 = vector.shape_cast %46 : vector<1x64x1xf32> to vector<64x1xf32>
      %48 = vector.broadcast %47 : vector<64x1xf32> to vector<64x512xf32>
      %49 = arith.addf %45, %48 : vector<64x512xf32>
      %cst_31 = arith.constant 0.000000e+00 : f32
      %50 = vector.broadcast %cst_31 : f32 to vector<64x512xf32>
      %51 = arith.maximumf %49, %50 : vector<64x512xf32>
      %52 = arith.truncf %51 : vector<64x512xf32> to vector<64x512xbf16>
      %c0_32 = arith.constant 0 : index
      %c0_33 = arith.constant 0 : index
      %53 = vector.load %arg12[%c0_32, %c0_33] : memref<32x64xbf16, #tpu.memory_space<vmem>>, vector<32x64xbf16>
      %cst_34 = arith.constant dense<0.000000e+00> : vector<32x512xf32>
      %54 = tpu.matmul %53, %52, %cst_34 {dimension_numbers = #tpu.dot_dimension_numbers<[1], [0], [0], [1], [0, 0, 1, 1], [], []>} : vector<32x64xbf16>, vector<64x512xbf16>, vector<32x512xf32> -> vector<32x512xf32>
      %c0_35 = arith.constant 0 : index
      %c0_36 = arith.constant 0 : index
      %55 = vector.load %arg13[%c0_35, %c0_36] : memref<32x1xf32, #tpu.memory_space<vmem>>, vector<32x1xf32>
      %56 = vector.broadcast %55 : vector<32x1xf32> to vector<32x512xf32>
      %57 = arith.addf %54, %56 : vector<32x512xf32>
      %c0_37 = arith.constant 0 : index
      %c0_38 = arith.constant 0 : index
      %c0_39 = arith.constant 0 : index
      %58 = vector.load %arg21[%c0_37, %c0_38, %c0_39] : memref<2x32x1xf32, #tpu.memory_space<vmem>>, vector<1x32x1xf32>
      %59 = vector.shape_cast %58 : vector<1x32x1xf32> to vector<32x1xf32>
      %60 = vector.broadcast %59 : vector<32x1xf32> to vector<32x512xf32>
      %61 = arith.mulf %57, %60 : vector<32x512xf32>
      %c1_40 = arith.constant 1 : index
      %c0_41 = arith.constant 0 : index
      %c0_42 = arith.constant 0 : index
      %62 = vector.load %arg21[%c1_40, %c0_41, %c0_42] : memref<2x32x1xf32, #tpu.memory_space<vmem>>, vector<1x32x1xf32>
      %63 = vector.shape_cast %62 : vector<1x32x1xf32> to vector<32x1xf32>
      %64 = vector.broadcast %63 : vector<32x1xf32> to vector<32x512xf32>
      %65 = arith.addf %61, %64 : vector<32x512xf32>
      %cst_43 = arith.constant 0.000000e+00 : f32
      %66 = vector.broadcast %cst_43 : f32 to vector<32x512xf32>
      %67 = arith.maximumf %65, %66 : vector<32x512xf32>
      %68 = arith.truncf %67 : vector<32x512xf32> to vector<32x512xbf16>
      %c0_44 = arith.constant 0 : index
      %c0_45 = arith.constant 0 : index
      %69 = vector.load %arg16[%c0_44, %c0_45] : memref<3x32xbf16, #tpu.memory_space<vmem>>, vector<3x32xbf16>
      %cst_46 = arith.constant dense<0.000000e+00> : vector<3x512xf32>
      %70 = tpu.matmul %69, %68, %cst_46 {dimension_numbers = #tpu.dot_dimension_numbers<[1], [0], [0], [1], [0, 0, 1, 1], [], []>} : vector<3x32xbf16>, vector<32x512xbf16>, vector<3x512xf32> -> vector<3x512xf32>
      %c0_47 = arith.constant 0 : index
      %c0_48 = arith.constant 0 : index
      %71 = vector.load %arg17[%c0_47, %c0_48] : memref<3x1xf32, #tpu.memory_space<vmem>>, vector<3x1xf32>
      %72 = vector.broadcast %71 : vector<3x1xf32> to vector<3x512xf32>
      %73 = arith.addf %70, %72 : vector<3x512xf32>
      %74 = math.tanh %73 : vector<3x512xf32>
      %c0_49 = arith.constant 0 : index
      %c0_50 = arith.constant 0 : index
      %c0_51 = arith.constant 0 : index
      %75 = vector.load %arg18[%c0_49, %c0_50, %c0_51] : memref<1x3x512xf32, #tpu.memory_space<vmem>>, vector<1x3x512xf32>
      %76 = vector.shape_cast %75 : vector<1x3x512xf32> to vector<3x512xf32>
      %77 = vector.shape_cast %74 : vector<3x512xf32> to vector<1x3x512xf32>
      tpu.vector_store %arg18[%c0_49, %c0_50, %c0_51], %77 {strides = array<i32>} : memref<1x3x512xf32, #tpu.memory_space<vmem>>, vector<1x3x512xf32>,
    } else {
    }
    return
  }
  func.func @transform_0(%arg0: i32, %arg1: i32, %arg2: i32) -> (i32, i32, i32) {
    %c0_i32 = arith.constant 0 : i32
    %c0_i32_0 = arith.constant 0 : i32
    return %arg1, %c0_i32, %arg2 : i32, i32, i32
  }
  func.func @transform_1(%arg0: i32, %arg1: i32, %arg2: i32) -> (i32, i32) {
    %c0_i32 = arith.constant 0 : i32
    %c0_i32_0 = arith.constant 0 : i32
    %c0_i32_1 = arith.constant 0 : i32
    return %c0_i32, %c0_i32_0 : i32, i32
  }
  func.func @transform_2(%arg0: i32, %arg1: i32, %arg2: i32) -> (i32, i32) {
    %c0_i32 = arith.constant 0 : i32
    %c0_i32_0 = arith.constant 0 : i32
    %c0_i32_1 = arith.constant 0 : i32
    return %c0_i32, %c0_i32_0 : i32, i32
  }
  func.func @transform_3(%arg0: i32, %arg1: i32, %arg2: i32) -> (i32, i32) {
    %c0_i32 = arith.constant 0 : i32
    %c0_i32_0 = arith.constant 0 : i32
    %c0_i32_1 = arith.constant 0 : i32
    return %c0_i32, %c0_i32_0 : i32, i32
  }
  func.func @transform_4(%arg0: i32, %arg1: i32, %arg2: i32) -> (i32, i32) {
    %c0_i32 = arith.constant 0 : i32
    %c0_i32_0 = arith.constant 0 : i32
    %c0_i32_1 = arith.constant 0 : i32
    return %c0_i32, %c0_i32_0 : i32, i32
  }
  func.func @transform_5(%arg0: i32, %arg1: i32, %arg2: i32) -> (i32, i32) {
    %c0_i32 = arith.constant 0 : i32
    %c0_i32_0 = arith.constant 0 : i32
    %c0_i32_1 = arith.constant 0 : i32
    return %c0_i32, %c0_i32_0 : i32, i32
  }
  func.func @transform_6(%arg0: i32, %arg1: i32, %arg2: i32) -> (i32, i32) {
    %c0_i32 = arith.constant 0 : i32
    %c0_i32_0 = arith.constant 0 : i32
    %c0_i32_1 = arith.constant 0 : i32
    return %c0_i32, %c0_i32_0 : i32, i32
  }
  func.func @transform_7(%arg0: i32, %arg1: i32, %arg2: i32) -> (i32, i32) {
    %c0_i32 = arith.constant 0 : i32
    %c0_i32_0 = arith.constant 0 : i32
    %c0_i32_1 = arith.constant 0 : i32
    return %c0_i32, %c0_i32_0 : i32, i32
  }
  func.func @transform_8(%arg0: i32, %arg1: i32, %arg2: i32) -> (i32, i32) {
    %c0_i32 = arith.constant 0 : i32
    %c0_i32_0 = arith.constant 0 : i32
    %c0_i32_1 = arith.constant 0 : i32
    return %c0_i32, %c0_i32_0 : i32, i32
  }
  func.func @transform_9(%arg0: i32, %arg1: i32, %arg2: i32) -> (i32, i32) {
    %c0_i32 = arith.constant 0 : i32
    %c0_i32_0 = arith.constant 0 : i32
    %c0_i32_1 = arith.constant 0 : i32
    return %c0_i32, %c0_i32_0 : i32, i32
  }
  func.func @transform_10(%arg0: i32, %arg1: i32, %arg2: i32) -> (i32, i32) {
    %c0_i32 = arith.constant 0 : i32
    %c0_i32_0 = arith.constant 0 : i32
    %c0_i32_1 = arith.constant 0 : i32
    return %c0_i32, %c0_i32_0 : i32, i32
  }
  func.func @transform_11(%arg0: i32, %arg1: i32, %arg2: i32) -> (i32, i32) {
    %c0_i32 = arith.constant 0 : i32
    %c0_i32_0 = arith.constant 0 : i32
    %c0_i32_1 = arith.constant 0 : i32
    return %c0_i32, %c0_i32_0 : i32, i32
  }
  func.func @transform_12(%arg0: i32, %arg1: i32, %arg2: i32) -> (i32, i32) {
    %c0_i32 = arith.constant 0 : i32
    %c0_i32_0 = arith.constant 0 : i32
    %c0_i32_1 = arith.constant 0 : i32
    return %c0_i32, %c0_i32_0 : i32, i32
  }
  func.func @transform_13(%arg0: i32, %arg1: i32, %arg2: i32) -> (i32, i32) {
    %c0_i32 = arith.constant 0 : i32
    %c0_i32_0 = arith.constant 0 : i32
    %c0_i32_1 = arith.constant 0 : i32
    return %c0_i32, %c0_i32_0 : i32, i32
  }
  func.func @transform_14(%arg0: i32, %arg1: i32, %arg2: i32) -> (i32, i32) {
    %c0_i32 = arith.constant 0 : i32
    %c0_i32_0 = arith.constant 0 : i32
    %c0_i32_1 = arith.constant 0 : i32
    return %c0_i32, %c0_i32_0 : i32, i32
  }
  func.func @transform_15(%arg0: i32, %arg1: i32, %arg2: i32) -> (i32, i32, i32) {
    %c3_i32 = arith.constant 3 : i32
    %0 = arith.cmpi eq, %arg0, %c3_i32 : i32
    %1 = arith.extui %0 : i1 to i32
    %2 = arith.muli %arg1, %1 : i32
    %3 = arith.muli %arg2, %1 : i32
    %c0_i32 = arith.constant 0 : i32
    %c0_i32_0 = arith.constant 0 : i32
    return %2, %c0_i32, %3 : i32, i32, i32
  }
}

</mosaic_0001>

<bundles_post_ra>
// kernel: pointgencon_forward.1
= control target key start
LH: loop header
LB: loop body
LE: loop exit
PB: predicated region body
PF: predicated region fallthrough
CT: control target
= control target key end

     0   :  { %s9623_s0 = inlined_call_operand.hbm [shape: f32[2,128,1024], index: 0, kind: input, shape index: {}]   ;;  %s9624_s1 = inlined_call_operand.vmem [shape: bf16[128,128], index: 1, kind: input, shape index: {}]   ;;  %s9625_s2 = inlined_call_operand.vmem [shape: f32[128,1], index: 2, kind: input, shape index: {}]   ;;  %s9626_s3 = inlined_call_operand.vmem [shape: f32[128,1], index: 3, kind: input, shape index: {}]   ;;  %s9627_s4 = inlined_call_operand.vmem [shape: f32[128,1], index: 4, kind: input, shape index: {}]   ;;  %s9628_s5 = inlined_call_operand.vmem [shape: bf16[64,128], index: 5, kind: input, shape index: {}]   ;;  %s9629_s6 = inlined_call_operand.vmem [shape: f32[64,1], index: 6, kind: input, shape index: {}]   ;;  %s9630_s7 = inlined_call_operand.vmem [shape: f32[64,1], index: 7, kind: input, shape index: {}]   ;;  %s9631_s8 = inlined_call_operand.vmem [shape: f32[64,1], index: 8, kind: input, shape index: {}]   ;;  %s9632_s9 = inlined_call_operand.vmem [shape: bf16[32,64], index: 9, kind: input, shape index: {}]   ;;  %s9633_s10 = inlined_call_operand.vmem [shape: f32[32,1], index: 10, kind: input, shape index: {}]   ;;  %s9634_s11 = inlined_call_operand.vmem [shape: f32[32,1], index: 11, kind: input, shape index: {}]   ;;  %s9635_s12 = inlined_call_operand.vmem [shape: f32[32,1], index: 12, kind: input, shape index: {}]   ;;  %s9636_s13 = inlined_call_operand.vmem [shape: bf16[3,32], index: 13, kind: input, shape index: {}]   ;;  %s9637_s14 = inlined_call_operand.vmem [shape: f32[3,1], index: 14, kind: input, shape index: {}]   ;;  %s9638_s15 = inlined_call_operand.vmem [shape: f32[2,3,1024], index: 15, kind: output, shape index: {}]  }
   0x1   :  { %9707 = sst [smem:[#allocation65_spill]] %s9628_s5 }
   0x2   :  { %9708 = sst [smem:[#allocation66_spill]] %s9630_s7 }
   0x3   :  { %9709 = sst [smem:[#allocation67_spill]] %s9631_s8 }
   0x4   :  { %9710 = sst [smem:[#allocation68_spill]] %s9632_s9 }
   0x5   :  { %9711 = sst [smem:[#allocation69_spill]] %s9633_s10 }
   0x6   :  { %9712 = sst [smem:[#allocation70_spill]] %s9634_s11 }
   0x7   :  { %9713 = sst [smem:[#allocation71_spill]] %s9635_s12 }
   0x8   :  { %9714 = sst [smem:[#allocation72_spill]] %s9636_s13 }
   0x9   :  { %9715 = sst [smem:[#allocation73_spill]] %s9637_s14 }
   0xa   :  { %20 = vsyncpa [#allocation6], 0 }
   0xb   :  { %22 = vsyncpa [#allocation6 + $0x1], 0  ;;  %s6796_s18 = smov 0   ;;  %s6798_s19 = smov 0  }
   0xc   :  { %s6800_s20 = smov 0   ;;  %s6802_s21 = smov 0  }
   0xd   :  { %s6804_s22 = smov 0   ;;  %s6806_s23 = smov 0  }
   0xe   :  { %s6808_s24 = smov 0   ;;  %s6810_s25 = smov 0  }
   0xf   :  { %s6812_s26 = smov 0   ;;  %s6814_s27 = smov 0  }
  0x10 LB: > { %9716 = sst [smem:[#allocation8_spill]] %s6699_s26  ;;  %s6297_s28 = sadd.s32 4294967295, %s6703_s27   ;;  %s6703_s27 = sphi %s6814_s27, %s28_s27   ;;  %s6699_s26 = sphi %s6812_s26, %s9924_s26   ;;  %s6695_s25 = sphi %s6810_s25, %s9923_s25   ;;  %s6691_s24 = sphi %s6808_s24, %s9922_s24   ;;  %s6687_s23 = sphi %s6806_s23, %s9914_s23   ;;  %s6683_s22 = sphi %s6804_s22, %s9921_s22   ;;  %s6679_s21 = sphi %s6802_s21, %s9920_s21   ;;  %s6675_s20 = sphi %s6800_s20, %s9919_s20   ;;  %s6671_s19 = sphi %s6798_s19, %s9918_s19   ;;  %s6667_s18 = sphi %s6796_s18, %s9917_s18  }
  0x11   : > { %s40_s29 = sadd.s32 1, %s6691_s24  ;;  %s43_s30 = sadd.s32 1, %s6695_s25 }
  0x12   : > { %p41_p0 = scmp.ge.s32.totalorder %s40_s29, 2  ;;  %s47_s16 = sadd.s32 1, %s6699_s26 }
  0x13   : > { %s56_s17 = sadd.s32 1, %s6675_s20  ;;  %p63_p1 = scmp.ne.s32.totalorder %s6675_s20, %s6671_s19 }
  0x14   : > { %s9926_s29 = smov (%p41_p0, %s40_s29), 0  ;;  %s9928_s30 = smov (!%p41_p0, %s43_s30), %s6695_s25 }
  0x15   : > { %9717 = sst [smem:[#allocation9_spill]] %s9926_s29  ;;  %s52_s13 = ssub.s32 %s6691_s24, %s9926_s29 }
  0x16   : > { %p45_p2 = scmp.ge.s32.totalorder %s9928_s30, 2  ;;  %p64_p3 = scmp.eq.s32.totalorder %s6703_s27, 0 }
  0x17   : > { %p69_p4 = scmp.ne.s32.totalorder %s6671_s19, %s6667_s18  ;;  %p70_p5 = scmp.eq.s32.totalorder %s6297_s28, 0 }
  0x18   : > { %s9930_s30 = smov (%p45_p2, %s9928_s30), 0  ;;  %s9932_s16 = smov (!%p45_p2, %s47_s16), %s6699_s26 }
  0x19   : > { %9718 = sst [smem:[#allocation10_spill]] %s9930_s30  ;;  %s51_s14 = ssub.s32 %s6695_s25, %s9930_s30 }
  0x1a   : > { %p6866_p6 = por %p64_p3, %p63_p1  ;;  %p49_p7 = scmp.ge.s32.totalorder %s9932_s16, 4 }
  0x1b   : > { %s53_s29 = sor.u32 %s52_s13, %s51_s14  ;;  %p6870_p9 = por %p70_p5, %p69_p4 }
  0x1c   : > { %p54_p8 = scmp.eq.s32.totalorder %s53_s29, 0  ;;  %s9934_s16 = smov (%p49_p7, %s9932_s16), 0 }
  0x1d   : > { %p6380_p10 = scmp.lt.s32.totalorder %s6703_s27, 16  ;;  %s465_s28 = sand.u32 1, %s6675_s20  }
  0x1e   : > { %s6877_s18 = scalar_select %p54_p8, %s6675_s20, %s56_s17  }
  0x1f   : > { %s6302_s26 = sshll.u32 %s6691_s24, 2  ;;  %s6301_s30 = sshll.u32 %s465_s28, 9 }
  0x20   : > { %s6303_s9 = sshll.u32 %s6695_s25, 7  ;;  %s469_s8 = scalar_lea.vmem [#allocation5], %s6301_s30 }
  0x21   : > { %s475_s10 = sadd.s32 %s6303_s9, %s6302_s26  ;;  %s478_s7 = sshll.u32 %s469_s8, 4  ;;  %s6883_s7 = int_to_ptr.vmem [resolvable:$true] %s478_s7 }
  0x22   : > { %s6304_s5 = sshll.u32 %s475_s10, 7  ;;  %p6892_p11 = pnand %p6380_p10, %p6866_p6 }
  0x23   : > { %s6888_s29 = scalar_lea.hbm %s9623_s0, %s6304_s5  ;;  %s6896_s8 = scalar_lea.sflag [#allocation6], %s465_s28 }
  0x24   : > { %s6591_s9 = scalar_lea.hbm %s6888_s29, 8192  ;;  %p6593_p13 = pneg %p6892_p11 }
  0x25   : > { %p6592_p12 = scmp.ne.s32.totalorder %s6888_s29, %s6591_s9  ;;  %s6596_s12 = scalar_lea.hbm %s9623_s0, 32768 }
  0x26   : > { %p6597_p2 = scmp.lt.u32.totalorder %s6888_s29, %s9623_s0  ;;  %p6598_p3 = scmp.lt.u32.totalorder %s6596_s12, %s6591_s9 }
  0x27   : > { %p6594_p0 = pnand %p6593_p13, %p6592_p12  ;;  %p6600_p5 = scmp.lt.u32.totalorder %s6591_s9, %s6888_s29 }
  0x28   : > { %p6599_p4 = por %p6598_p3, %p6597_p2 }
  0x29   : > { %p6595_p1 = pneg %p6594_p0 }
  0x2a   : > { %p6601_p6 = por %p6600_p5, %p6599_p4 }
  0x2c   : > { %p6602_p7 = pnand %p6601_p6, %p6595_p1 }
  0x2e   : > { %6605 = shalt.err (!%p6602_p7)
}
  0x2f   : > { %s6606_s28 = scalar_lea.vmem %s6883_s7, 8192  ;;  %s6705_s13 = smov [#allocation5]  }
  0x30   : > { %p6607_p8 = scmp.ne.s32.totalorder %s6883_s7, %s6606_s28  ;;  %s6611_s14 = sshll.u32 %s6705_s13, 4  ;;  %s6612_s14 = int_to_ptr.vmem [resolvable:$false] %s6611_s14 }
  0x31   : > { %s6613_s5 = scalar_lea.vmem %s6612_s14, 16384  ;;  %p6614_p0 = scmp.lt.s32.totalorder %s6883_s7, %s6612_s14 }
  0x32   : > { %p6609_p10 = pnand %p6607_p8, %p6593_p13  ;;  %p6615_p2 = scmp.lt.s32.totalorder %s6613_s5, %s6606_s28 }
  0x34   : > { %p6610_p12 = pneg %p6609_p10  ;;  %p6616_p3 = por %p6615_p2, %p6614_p0 }
  0x36   : > { %p6617_p4 = pnand %p6616_p3, %p6610_p12 }
  0x38   : > { %6620 = shalt.err (!%p6617_p4)
}
  0x39   : > { %s6706_s9 = smov 1024   ;;  %s6707_s10 = smov 512  }
  0x3a   : > { %s6708_s12 = smov 32   ;;  %p6305_p13 = scmp.ge.s32.totalorder %s6703_s27, 1 }
  0x3b   : > { %6379 = dma.hbm_to_vmem [thread:$0]  (!%p6892_p11), %s6888_s29, 8192, %s6883_s7, %s6896_s8, %s6706_s9, %s6707_s10, %s6708_s12  }
  0x3c   : > { %p486_p1 = scmp.lt.s32.totalorder %s6703_s27, 17 }
  0x3e   : > { %p487_p5 = pnand %p6305_p13, %p486_p1 }
  0x40   : > { %490 = sbr.rel (%p487_p5) target bundleno = 3505 (0xdb1), region = 80 }
  0x47   : > { %s492_s26 = sand.u32 1, %s6671_s19  }
  0x48   : > { %s6306_s30 = sshll.u32 %s492_s26, 9  ;;  %s493_s28 = scalar_lea.sflag [#allocation6], %s492_s26 }
  0x49   : > { %s6927_s13 = scalar_lea.vmem [#allocation5], %s6306_s30 }
  0x4a   : > { %6662 = dma.done.wait (%p6870_p9), %s493_s28, 8192  }
  0x4b   : > { %6664 = vsyncadd (%p6870_p9), %s493_s28, 4294959104  ;;  %p552_p11 = scmp.eq.s32.totalorder %s6687_s23, 3  ;;  %p571_p6 = scmp.eq.s32.totalorder %s6683_s22, 0  ;;  %v579_v0 = vld [vmem:[%s6927_s13] sm:$0xff]  ;;  %v580_v1 = vld [vmem:[%s6927_s13 + $0x8] sm:$0xff] }
  0x4c   : > { %p572_p7 = scmp.eq.s32.totalorder %s6679_s21, 0  ;;  %p575_p8 = scmp.eq.s32.totalorder %s6683_s22, 1  ;;  %v581_v2 = vld [vmem:[%s6927_s13 + $0x10] sm:$0xff]  ;;  %v582_v3 = vld [vmem:[%s6927_s13 + $0x18] sm:$0xff]  ;;  %v583_v4 = vld [vmem:[%s6927_s13 + $0x20] sm:$0xff] }
  0x4d   : > { %s553_s7 = scalar_select %p552_p11, 1, 0  ;;  %v584_v5 = vld [vmem:[%s6927_s13 + $0x28] sm:$0xff]  ;;  %v585_v6 = vld [vmem:[%s6927_s13 + $0x30] sm:$0xff]  ;;  %v586_v7 = vld [vmem:[%s6927_s13 + $0x38] sm:$0xff]  ;;  %v6957_v9 = vpack.c.bf16 %v583_v4, %v579_v0 }
  0x4e   : > { %p6937_p9 = pnand %p572_p7, %p571_p6  ;;  %p576_p10 = scmp.eq.s32.totalorder %s6679_s21, 1  ;;  %v587_v8 = vld [vmem:[%s6927_s13 + $0x40] sm:$0xff]  ;;  %v6959_v10 = vpack.c.bf16 %v584_v5, %v580_v1  ;;  %v588_v11 = vld [vmem:[%s6927_s13 + $0x48] sm:$0xff]  ;;  %v589_v12 = vld [vmem:[%s6927_s13 + $0x50] sm:$0xff]  ;;  %v6964_v14 = vpack.c.bf16 %v585_v6, %v581_v2  ;;  %v6966_v15 = vpack.c.bf16 %v586_v7, %v582_v3 }
  0x4f   : > { %s554_s29 = smul.u32 %s6683_s22, %s553_s7  ;;  %9724 = vst [vmem:[#allocation11_spill] sm:$0xff] %v6957_v9  ;;  %v590_v13 = vld [vmem:[%s6927_s13 + $0x58] sm:$0xff]  ;;  %v591_v16 = vld [vmem:[%s6927_s13 + $0x60] sm:$0xff]  ;;  %v592_v17 = vld [vmem:[%s6927_s13 + $0x68] sm:$0xff]  ;;  %p6310_p3 = scmp.ne.s32.totalorder %s6687_s23, 0 }
  0x50   : > { %s555_s17 = smul.u32 %s6679_s21, %s553_s7  ;;  %p6944_p12 = pnand %p576_p10, %p575_p8  ;;  %9725 = vst [vmem:[#allocation12_spill] sm:$0xff] %v6959_v10  ;;  %9726 = vst [vmem:[#allocation13_spill] sm:$0xff] %v6964_v14  ;;  %v593_v18 = vld [vmem:[%s6927_s13 + $0x70] sm:$0xff]  ;;  %v594_v19 = vld [vmem:[%s6927_s13 + $0x78] sm:$0xff]  ;;  %v6974_v22 = vpack.c.bf16 %v591_v16, %v587_v8  ;;  %v6976_v23 = vpack.c.bf16 %v592_v17, %v588_v11 }
  0x51   : > { %p557_p0 = scmp.lt.s32.totalorder %s554_s29, 1  ;;  %9727 = vst [vmem:[#allocation14_spill] sm:$0xff] %v6966_v15  ;;  %v595_v20 = vld [vmem:[%s6927_s13 + $0x80] sm:$0xff]  ;;  %v596_v21 = vld [vmem:[%s6927_s13 + $0x88] sm:$0xff]  ;;  %v6978_v24 = vpack.c.bf16 %v593_v18, %v589_v12  ;;  %v597_v25 = vld [vmem:[%s6927_s13 + $0x90] sm:$0xff]  ;;  %v6983_v28 = vpack.c.bf16 %v594_v19, %v590_v13 }
  0x52   : > { %s6307_s14 = sshll.u32 %s555_s17, 2  ;;  %9728 = vst [vmem:[#allocation15_spill] sm:$0xff] %v6974_v22  ;;  %9729 = vst [vmem:[#allocation16_spill] sm:$0xff] %v6976_v23  ;;  %v598_v26 = vld [vmem:[%s6927_s13 + $0x98] sm:$0xff]  ;;  %v599_v27 = vld [vmem:[%s6927_s13 + $0xa0] sm:$0xff] }
  0x53   : > { %s9936_s29 = smov (!%p557_p0, %s554_s29), 1  ;;  %p559_p2 = scmp.lt.s32.totalorder %s6307_s14, 7  ;;  %9730 = vst [vmem:[#allocation17_spill] sm:$0xff] %v6978_v24  ;;  %9731 = vst [vmem:[#allocation18_spill] sm:$0xff] %v6983_v28  ;;  %v600_v29 = vld [vmem:[%s6927_s13 + $0xa8] sm:$0xff]  ;;  %v601_v30 = vld [vmem:[%s6927_s13 + $0xb0] sm:$0xff]  ;;  %v6988_v32 = vpack.c.bf16 %v599_v27, %v595_v20 }
  0x54   : > { %s6308_s21 = sshll.u32 %s9936_s29, 3  ;;  %v602_v31 = vld [vmem:[%s6927_s13 + $0xb8] sm:$0xff]  ;;  %v603_v33 = vld [vmem:[%s6927_s13 + $0xc0] sm:$0xff]  ;;  %v604_v34 = vld [vmem:[%s6927_s13 + $0xc8] sm:$0xff]  ;;  %v6998_v36 = vpack.c.bf16 %v600_v29, %v596_v21  ;;  %v7000_v37 = vpack.c.bf16 %v601_v30, %v597_v25 }
  0x55   : > { %s9938_s14 = smov (!%p559_p2, %s6307_s14), 7  ;;  %9732 = vst [vmem:[#allocation19_spill] sm:$0xff] %v6988_v32  ;;  %v605_v35 = vld [vmem:[%s6927_s13 + $0xd0] sm:$0xff]  ;;  %v7002_v38 = vpack.c.bf16 %v602_v31, %v598_v26  ;;  %v606_v39 = vld [vmem:[%s6927_s13 + $0xd8] sm:$0xff]  ;;  %v607_v40 = vld [vmem:[%s6927_s13 + $0xe0] sm:$0xff] }
  0x56   : > { %s562_s22 = sadd.s32 %s6308_s21, %s9938_s14  ;;  %9733 = vst [vmem:[#allocation20_spill] sm:$0xff] %v6998_v36  ;;  %9734 = vst [vmem:[#allocation21_spill] sm:$0xff] %v7000_v37  ;;  %v608_v41 = vld [vmem:[%s6927_s13 + $0xe8] sm:$0xff]  ;;  %v609_v42 = vld [vmem:[%s6927_s13 + $0xf0] sm:$0xff]  ;;  %v7010_v45 = vpack.c.bf16 %v607_v40, %v603_v33 }
  0x57   : > { %s6309_s5 = sshll.u32 %s562_s22, 2  ;;  %9735 = vst [vmem:[#allocation22_spill] sm:$0xff] %v7002_v38  ;;  %v610_v43 = vld [vmem:[%s6927_s13 + $0xf8] sm:$0xff]  ;;  %v611_v44 = vld [vmem:[%s6927_s13 + $0x100] sm:$0xff]  ;;  %v7012_v46 = vpack.c.bf16 %v608_v41, %v604_v34  ;;  %v612_v47 = vld [vmem:[%s6927_s13 + $0x108] sm:$0xff]  ;;  %v7017_v50 = vpack.c.bf16 %v609_v42, %v605_v35 }
  0x58   : > { %s6993_s12 = scalar_lea.vmem %s9638_s15, %s6309_s5  ;;  %9736 = vst [vmem:[#allocation23_spill] sm:$0xff] %v7010_v45  ;;  %v613_v48 = vld [vmem:[%s6927_s13 + $0x110] sm:$0xff]  ;;  %v614_v49 = vld [vmem:[%s6927_s13 + $0x118] sm:$0xff]  ;;  %v7019_v51 = vpack.c.bf16 %v610_v43, %v606_v39  ;;  %v615_v52 = vld [vmem:[%s6927_s13 + $0x120] sm:$0xff] }
  0x59   : > { %9737 = vst [vmem:[#allocation24_spill] sm:$0xff] %v7012_v46  ;;  %9738 = vst [vmem:[#allocation25_spill] sm:$0xff] %v7017_v50  ;;  %v616_v53 = vld [vmem:[%s6927_s13 + $0x128] sm:$0xff]  ;;  %v617_v54 = vld [vmem:[%s6927_s13 + $0x130] sm:$0xff]  ;;  %v7027_v58 = vpack.c.bf16 %v615_v52, %v611_v44 }
  0x5a   : > { %9739 = vst [vmem:[#allocation26_spill] sm:$0xff] %v7019_v51  ;;  %v618_v55 = vld [vmem:[%s6927_s13 + $0x138] sm:$0xff]  ;;  %v619_v56 = vld [vmem:[%s6927_s13 + $0x140] sm:$0xff]  ;;  %v620_v57 = vld [vmem:[%s6927_s13 + $0x148] sm:$0xff]  ;;  %v7029_v59 = vpack.c.bf16 %v616_v53, %v612_v47  ;;  %v7031_v60 = vpack.c.bf16 %v617_v54, %v613_v48 }
  0x5b   : > { %9740 = vst [vmem:[#allocation27_spill] sm:$0xff] %v7027_v58  ;;  %v621_v61 = vld [vmem:[%s6927_s13 + $0x150] sm:$0xff]  ;;  %v622_v62 = vld [vmem:[%s6927_s13 + $0x158] sm:$0xff]  ;;  %v623_v63 = vld [vmem:[%s6927_s13 + $0x160] sm:$0xff]  ;;  %v7036_v0 = vpack.c.bf16 %v618_v55, %v614_v49 }
  0x5c   : > { %9741 = vst [vmem:[#allocation28_spill] sm:$0xff] %v7029_v59  ;;  %9742 = vst [vmem:[#allocation29_spill] sm:$0xff] %v7031_v60  ;;  %v624_v1 = vld [vmem:[%s6927_s13 + $0x168] sm:$0xff]  ;;  %v625_v2 = vld [vmem:[%s6927_s13 + $0x170] sm:$0xff]  ;;  %v7041_v4 = vpack.c.bf16 %v623_v63, %v619_v56 }
  0x5d   : > { %9743 = vst [vmem:[#allocation30_spill] sm:$0xff] %v7036_v0  ;;  %v626_v3 = vld [vmem:[%s6927_s13 + $0x178] sm:$0xff]  ;;  %v627_v5 = vld [vmem:[%s6927_s13 + $0x180] sm:$0xff]  ;;  %v628_v6 = vld [vmem:[%s6927_s13 + $0x188] sm:$0xff]  ;;  %v7046_v8 = vpack.c.bf16 %v624_v1, %v620_v57  ;;  %v7048_v11 = vpack.c.bf16 %v625_v2, %v621_v61 }
  0x5e   : > { %9744 = vst [vmem:[#allocation31_spill] sm:$0xff] %v7041_v4  ;;  %v629_v7 = vld [vmem:[%s6927_s13 + $0x190] sm:$0xff]  ;;  %v7050_v12 = vpack.c.bf16 %v626_v3, %v622_v62  ;;  %v630_v13 = vld [vmem:[%s6927_s13 + $0x198] sm:$0xff]  ;;  %v631_v16 = vld [vmem:[%s6927_s13 + $0x1a0] sm:$0xff] }
  0x5f   : > { %9745 = vst [vmem:[#allocation32_spill] sm:$0xff] %v7046_v8  ;;  %9746 = vst [vmem:[#allocation33_spill] sm:$0xff] %v7048_v11  ;;  %v632_v17 = vld [vmem:[%s6927_s13 + $0x1a8] sm:$0xff]  ;;  %v633_v18 = vld [vmem:[%s6927_s13 + $0x1b0] sm:$0xff]  ;;  %v7058_v21 = vpack.c.bf16 %v631_v16, %v627_v5 }
  0x60   : > { %9747 = vst [vmem:[#allocation34_spill] sm:$0xff] %v7050_v12  ;;  %v634_v19 = vld [vmem:[%s6927_s13 + $0x1b8] sm:$0xff]  ;;  %v635_v20 = vld [vmem:[%s6927_s13 + $0x1c0] sm:$0xff]  ;;  %v7060_v25 = vpack.c.bf16 %v632_v17, %v628_v6  ;;  %v636_v26 = vld [vmem:[%s6927_s13 + $0x1c8] sm:$0xff]  ;;  %v7065_v30 = vpack.c.bf16 %v633_v18, %v629_v7  ;;  %678 = sbr.rel (%p6310_p3) target bundleno = 672 (0x2a0), region = 88 }
  0x61   : > { %9748 = vst [vmem:[#allocation35_spill] sm:$0xff] %v7058_v21  ;;  %v637_v27 = vld [vmem:[%s6927_s13 + $0x1d0] sm:$0xff]  ;;  %v638_v29 = vld [vmem:[%s6927_s13 + $0x1d8] sm:$0xff]  ;;  %v7067_v31 = vpack.c.bf16 %v634_v19, %v630_v13  ;;  %v639_v33 = vld [vmem:[%s6927_s13 + $0x1e0] sm:$0xff] }
  0x62   : > { %9749 = vst [vmem:[#allocation36_spill] sm:$0xff] %v7060_v25  ;;  %9750 = vst [vmem:[#allocation37_spill] sm:$0xff] %v7065_v30  ;;  %v640_v34 = vld [vmem:[%s6927_s13 + $0x1e8] sm:$0xff]  ;;  %v641_v35 = vld [vmem:[%s6927_s13 + $0x1f0] sm:$0xff]  ;;  %v7073_v40 = vpack.c.bf16 %v639_v33, %v635_v20 }
  0x63   : > { %9751 = vst [vmem:[#allocation38_spill] sm:$0xff] %v7067_v31  ;;  %v642_v39 = vld [vmem:[%s6927_s13 + $0x1f8] sm:$0xff]  ;;  %v7075_v41 = vpack.c.bf16 %v640_v34, %v636_v26  ;;  %v7077_v42 = vpack.c.bf16 %v641_v35, %v637_v27 }
  0x64   : > { %9752 = vst [vmem:[#allocation39_spill] sm:$0xff] %v7073_v40  ;;  %v7079_v43 = vpack.c.bf16 %v642_v39, %v638_v29 }
  0x65   : > { %9753 = vst [vmem:[#allocation40_spill] sm:$0xff] %v7075_v41  ;;  %9754 = vst [vmem:[#allocation41_spill] sm:$0xff] %v7077_v42 }
  0x66   : > { %9755 = vst [vmem:[#allocation42_spill] sm:$0xff] %v7079_v43 }
  0x67   : > { %839 = vmatprep.subr.bf16.mxu0 %v6959_v10  ;;  %952 = vmatprep.subr.bf16.mxu1 %v6966_v15  ;;  %v6709_v44 = vmov 0   ;;  %v695_v47 = vld [vmem:[%s9625_s2] sm:$0xff]  ;;  %v697_v48 = vld [vmem:[%s9625_s2 + $0x10] sm:$0xff]  ;;  %v696_v49 = vld [vmem:[%s9625_s2 + $0x8] sm:$0xff]  ;;  %vm1067_vm0 = vcmask (!%p6937_p9), 7168  }
  0x68   : > { %840 = vmatpush1.bf16.msra.mxu0 %v6957_v9  ;;  %953 = vmatpush1.bf16.msra.mxu1 %v6964_v14  ;;  %v698_v52 = vld [vmem:[%s9625_s2 + $0x18] sm:$0xff]  ;;  %v700_v53 = vld [vmem:[%s9625_s2 + $0x28] sm:$0xff]  ;;  %v699_v54 = vld [vmem:[%s9625_s2 + $0x20] sm:$0xff] }
  0x69   : > { %841 = vmatprep.subr.bf16.mxu0 %v6976_v23  ;;  %954 = vmatprep.subr.bf16.mxu1 %v6983_v28  ;;  %v702_v55 = vld [vmem:[%s9625_s2 + $0x38] sm:$0xff]  ;;  %v701_v56 = vld [vmem:[%s9625_s2 + $0x30] sm:$0xff]  ;;  %v704_v57 = vld [vmem:[%s9625_s2 + $0x48] sm:$0xff] }
  0x6a   : > { %871 = vmatprep.mubr.bf16.mxu0 %v6709_v44  ;;  %984 = vmatprep.mubr.bf16.mxu1 %v6709_v44  ;;  %v703_v61 = vld [vmem:[%s9625_s2 + $0x40] sm:$0xff]  ;;  %v706_v63 = vld [vmem:[%s9625_s2 + $0x58] sm:$0xff]  ;;  %v705_v1 = vld [vmem:[%s9625_s2 + $0x50] sm:$0xff] }
  0x6b   : > { %6471 = vset.pattern.permute.xlu0 %v6709_v44  ;;  %6472 = vset.pattern.permute.xlu1 %v6709_v44  ;;  %v6473_v62 = vld [vmem:[%s9624_s1] sm:$0xff]   ;;  %v708_v2 = vld [vmem:[%s9625_s2 + $0x68] sm:$0xff]  ;;  %v710_v6 = vld [vmem:[%s9625_s2 + $0x78] sm:$0xff] }
  0x6c   : > { %842 = vmatpush1.bf16.msra.mxu0 %v6974_v22  ;;  %955 = vmatpush1.bf16.msra.mxu1 %v6978_v24  ;;  %v707_v3 = vld [vmem:[%s9625_s2 + $0x60] sm:$0xff]  ;;  %v6474_v5 = vld [vmem:[%s9624_s1 + $0x8] sm:$0xff]   ;;  %v709_v7 = vld [vmem:[%s9625_s2 + $0x70] sm:$0xff] }
  0x6d   : > { %843 = vmatprep.subr.bf16.mxu0 %v6998_v36  ;;  %956 = vmatprep.subr.bf16.mxu1 %v7002_v38  ;;  %v6475_v13 = vld [vmem:[%s9624_s1 + $0x10] sm:$0xff]   ;;  %v6476_v16 = vld [vmem:[%s9624_s1 + $0x18] sm:$0xff]   ;;  %v6477_v17 = vld [vmem:[%s9624_s1 + $0x20] sm:$0xff]  }
  0x6e   : > { %713 = vperm.xlu0 %6471, %v695_v47   ;;  %723 = vperm.xlu1 %6472, %v697_v48   ;;  %v6478_v18 = vld [vmem:[%s9624_s1 + $0x28] sm:$0xff]   ;;  %v6479_v19 = vld [vmem:[%s9624_s1 + $0x30] sm:$0xff]   ;;  %v6480_v20 = vld [vmem:[%s9624_s1 + $0x38] sm:$0xff]  }
  0x70   : > { %844 = vmatpush1.bf16.msra.mxu0 %v6988_v32  ;;  %957 = vmatpush1.bf16.msra.mxu1 %v7000_v37 }
  0x71   : > { %845 = vmatprep.subr.bf16.mxu0 %v7012_v46  ;;  %958 = vmatprep.subr.bf16.mxu1 %v7019_v51 }
  0x72   : > { %718 = vperm.xlu0 %6471, %v696_v49   ;;  %728 = vperm.xlu1 %6472, %v698_v52  }
  0x74   : > { %846 = vmatpush1.bf16.msra.mxu0 %v7010_v45  ;;  %959 = vmatpush1.bf16.msra.mxu1 %v7017_v50 }
  0x75   : > { %847 = vmatprep.subr.bf16.mxu0 %v7029_v59  ;;  %960 = vmatprep.subr.bf16.mxu1 %v7036_v0 }
  0x76   : > { %738 = vperm.xlu1 %6472, %v700_v53   ;;  %733 = vperm.xlu0 %6471, %v699_v54  }
  0x78   : > { %848 = vmatpush1.bf16.msra.mxu0 %v7027_v58  ;;  %961 = vmatpush1.bf16.msra.mxu1 %v7031_v60 }
  0x79   : > { %849 = vmatprep.subr.bf16.mxu0 %v7046_v8  ;;  %962 = vmatprep.subr.bf16.mxu1 %v7050_v12 }
  0x7a   : > { %748 = vperm.xlu1 %6472, %v702_v55   ;;  %743 = vperm.xlu0 %6471, %v701_v56  }
  0x7c   : > { %850 = vmatpush1.bf16.msra.mxu0 %v7041_v4  ;;  %963 = vmatpush1.bf16.msra.mxu1 %v7048_v11 }
  0x7d   : > { %851 = vmatprep.subr.bf16.mxu0 %v7060_v25  ;;  %964 = vmatprep.subr.bf16.mxu1 %v7067_v31 }
  0x7e   : > { %758 = vperm.xlu1 %6472, %v704_v57   ;;  %753 = vperm.xlu0 %6471, %v703_v61  }
  0x80   : > { %852 = vmatpush1.bf16.msra.mxu0 %v7058_v21  ;;  %965 = vmatpush1.bf16.msra.mxu1 %v7065_v30 }
  0x81   : > { %853 = vmatprep.subr.bf16.mxu0 %v7075_v41  ;;  %966 = vmatprep.subr.bf16.mxu1 %v7079_v43 }
  0x82   : > { %768 = vperm.xlu1 %6472, %v706_v63   ;;  %763 = vperm.xlu0 %6471, %v705_v1  }
  0x84   : > { %854 = vmatpush1.bf16.msra.mxu0 %v7073_v40  ;;  %967 = vmatpush1.bf16.msra.mxu1 %v7077_v42 }
  0x86   : > { %778 = vperm.xlu1 %6472, %v708_v2   ;;  %773 = vperm.xlu0 %6471, %v707_v3  }
  0x87   : > { %872 = vmatmul.mubr.bf16.vlgmr.msra.gmra.mrb[0].mxu0 %v6473_v62  ;;  %985 = vmatmul.mubr.bf16.vlgmr.msra.gmra.mrb[0].mxu1 %v6473_v62 }
  0x88   : > { %881 = vmatprep.mubr.bf16.mxu0 %v6709_v44  ;;  %994 = vmatprep.mubr.bf16.mxu1 %v6709_v44 }
  0x8a   : > { %788 = vperm.xlu1 %6472, %v710_v6   ;;  %783 = vperm.xlu0 %6471, %v709_v7  }
  0x8f   : > { %882 = vmatmul.mubr.bf16.gmra.mrb[4].mxu0 %v6474_v5  ;;  %995 = vmatmul.mubr.bf16.gmra.mrb[4].mxu1 %v6474_v5 }
  0x90   : > { %891 = vmatprep.mubr.bf16.mxu0 %v6709_v44  ;;  %1004 = vmatprep.mubr.bf16.mxu1 %v6709_v44 }
  0x97   : > { %892 = vmatmul.mubr.bf16.gmra.mrb[8].mxu0 %v6475_v13  ;;  %1005 = vmatmul.mubr.bf16.gmra.mrb[8].mxu1 %v6475_v13 }
  0x98   : > { %901 = vmatprep.mubr.bf16.mxu0 %v6709_v44  ;;  %1014 = vmatprep.mubr.bf16.mxu1 %v6709_v44 }
  0x9f   : > { %902 = vmatmul.mubr.bf16.gmra.mrb[12].mxu0 %v6476_v16  ;;  %1015 = vmatmul.mubr.bf16.gmra.mrb[12].mxu1 %v6476_v16 }
  0xa0   : > { %911 = vmatprep.mubr.bf16.mxu0 %v6709_v44  ;;  %1024 = vmatprep.mubr.bf16.mxu1 %v6709_v44 }
  0xa7   : > { %912 = vmatmul.mubr.bf16.gmra.mrb[16].mxu0 %v6477_v17  ;;  %1025 = vmatmul.mubr.bf16.gmra.mrb[16].mxu1 %v6477_v17 }
  0xa8   : > { %921 = vmatprep.mubr.bf16.mxu0 %v6709_v44  ;;  %1034 = vmatprep.mubr.bf16.mxu1 %v6709_v44 }
  0xaf   : > { %922 = vmatmul.mubr.bf16.gmra.mrb[20].mxu0 %v6478_v18  ;;  %1035 = vmatmul.mubr.bf16.gmra.mrb[20].mxu1 %v6478_v18 }
  0xb0   : > { %931 = vmatprep.mubr.bf16.mxu0 %v6709_v44  ;;  %1044 = vmatprep.mubr.bf16.mxu1 %v6709_v44 }
  0xb7   : > { %932 = vmatmul.mubr.bf16.gmra.mrb[24].mxu0 %v6479_v19  ;;  %1045 = vmatmul.mubr.bf16.gmra.mrb[24].mxu1 %v6479_v19 }
  0xb8   : > { %941 = vmatprep.mubr.bf16.mxu0 %v6709_v44  ;;  %1054 = vmatprep.mubr.bf16.mxu1 %v6709_v44 }
  0xbf   : > { %942 = vmatmul.mubr.bf16.gmra.mrb[28].mxu0 %v6480_v20  ;;  %1055 = vmatmul.mubr.bf16.gmra.mrb[28].mxu1 %v6480_v20 }
  0xed   : > { %v714_v26 = vpop.permute.xlu0 %713  ;;  %v724_v29 = vpop.permute.xlu1 %723 }
  0xf1   : > { %v719_v27 = vpop.permute.xlu0 %718  ;;  %v729_v63 = vpop.permute.xlu1 %728 }
 0x15a   : > { %v873_v33 = vpop.f32.mrb[0].mxu0  ;;  %v986_v34 = vpop.f32.mrb[0].mxu1 }
 0x15b   : > { %v7204_v35 = vadd.f32 %v873_v33, %v714_v26  ;;  %v7206_v39 = vadd.f32 %v986_v34, %v714_v26  ;;  %v875_v47 = vpop.f32.mrb[1].mxu0  ;;  %v988_v48 = vpop.f32.mrb[1].mxu1 }
 0x15c   : > { %v7208_v49 = vadd.f32 %v875_v47, %v714_v26  ;;  %v7210_v44 = vadd.f32 %v988_v48, %v714_v26  ;;  %v877_v52 = vpop.f32.mrb[2].mxu0  ;;  %v990_v53 = vpop.f32.mrb[2].mxu1 }
 0x15d   : > { %v7212_v54 = vadd.f32 %v877_v52, %v719_v27  ;;  %v7214_v55 = vadd.f32 %v990_v53, %v719_v27  ;;  %v879_v56 = vpop.f32.mrb[3].mxu0  ;;  %v992_v57 = vpop.f32.mrb[3].mxu1 }
 0x15e   : > { %v7216_v61 = vadd.f32 %v879_v56, %v719_v27  ;;  %v7218_v62 = vadd.f32 %v992_v57, %v719_v27  ;;  %v739_v47 = vpop.permute.xlu1 %738  ;;  %v734_v48 = vpop.permute.xlu0 %733 }
 0x162   : > { %v883_v1 = vpop.f32.mrb[4].mxu0  ;;  %v996_v2 = vpop.f32.mrb[4].mxu1 }
 0x163   : > { %v7220_v3 = vadd.f32 %v883_v1, %v724_v29  ;;  %v7222_v5 = vadd.f32 %v996_v2, %v724_v29  ;;  %v885_v6 = vpop.f32.mrb[5].mxu0  ;;  %v998_v7 = vpop.f32.mrb[5].mxu1 }
 0x164   : > { %v7224_v13 = vadd.f32 %v885_v6, %v724_v29  ;;  %v7226_v16 = vadd.f32 %v998_v7, %v724_v29  ;;  %v887_v17 = vpop.f32.mrb[6].mxu0  ;;  %v1000_v18 = vpop.f32.mrb[6].mxu1 }
 0x165   : > { %v7228_v19 = vadd.f32 %v887_v17, %v729_v63  ;;  %v7230_v20 = vadd.f32 %v1000_v18, %v729_v63  ;;  %v889_v26 = vpop.f32.mrb[7].mxu0  ;;  %v1002_v27 = vpop.f32.mrb[7].mxu1 }
 0x166   : > { %v7232_v33 = vadd.f32 %v889_v26, %v729_v63  ;;  %v7234_v34 = vadd.f32 %v1002_v27, %v729_v63  ;;  %v744_v40 = vpop.permute.xlu0 %743 }
 0x16a   : > { %v893_v52 = vpop.f32.mrb[8].mxu0  ;;  %v1006_v53 = vpop.f32.mrb[8].mxu1 }
 0x16b   : > { %v7236_v56 = vadd.f32 %v893_v52, %v734_v48  ;;  %v7238_v29 = vadd.f32 %v1006_v53, %v734_v48  ;;  %v895_v57 = vpop.f32.mrb[9].mxu0  ;;  %v1008_v1 = vpop.f32.mrb[9].mxu1 }
 0x16c   : > { %v7240_v2 = vadd.f32 %v895_v57, %v734_v48  ;;  %v7242_v6 = vadd.f32 %v1008_v1, %v734_v48  ;;  %v897_v7 = vpop.f32.mrb[10].mxu0  ;;  %v1010_v17 = vpop.f32.mrb[10].mxu1 }
 0x16d   : > { %v7244_v18 = vadd.f32 %v897_v7, %v739_v47  ;;  %v7246_v63 = vadd.f32 %v1010_v17, %v739_v47  ;;  %v899_v26 = vpop.f32.mrb[11].mxu0  ;;  %v1012_v27 = vpop.f32.mrb[11].mxu1 }
 0x16e   : > { %9756 = vst [vmem:[#allocation43_spill] sm:$0xff] %v7240_v2  ;;  %v7248_v42 = vadd.f32 %v899_v26, %v739_v47  ;;  %v7250_v52 = vadd.f32 %v1012_v27, %v739_v47  ;;  %v749_v53 = vpop.permute.xlu1 %748  ;;  %v754_v4 = vpop.permute.xlu0 %753 }
 0x170   : > { %9757 = vst [vmem:[#allocation44_spill] sm:$0xff] %v7248_v42 }
 0x172   : > { %v903_v43 = vpop.f32.mrb[12].mxu0  ;;  %v1016_v41 = vpop.f32.mrb[12].mxu1 }
 0x173   : > { %v7252_v57 = vadd.f32 %v903_v43, %v744_v40  ;;  %v7254_v48 = vadd.f32 %v1016_v41, %v744_v40  ;;  %v905_v1 = vpop.f32.mrb[13].mxu0  ;;  %v1018_v30 = vpop.f32.mrb[13].mxu1 }
 0x174   : > { %v7256_v7 = vadd.f32 %v905_v1, %v744_v40  ;;  %v7258_v17 = vadd.f32 %v1018_v30, %v744_v40  ;;  %v907_v21 = vpop.f32.mrb[14].mxu0  ;;  %v1020_v31 = vpop.f32.mrb[14].mxu1 }
 0x175   : > { %v7260_v26 = vadd.f32 %v907_v21, %v749_v53  ;;  %v7262_v47 = vadd.f32 %v1020_v31, %v749_v53  ;;  %v909_v27 = vpop.f32.mrb[15].mxu0  ;;  %v1022_v25 = vpop.f32.mrb[15].mxu1 }
 0x176   : > { %9758 = vst [vmem:[#allocation45_spill] sm:$0xff] %v7258_v17  ;;  %v7264_v11 = vadd.f32 %v909_v27, %v749_v53  ;;  %v7266_v43 = vadd.f32 %v1022_v25, %v749_v53  ;;  %v759_v41 = vpop.permute.xlu1 %758  ;;  %v764_v45 = vpop.permute.xlu0 %763 }
 0x17a   : > { %v913_v12 = vpop.f32.mrb[16].mxu0  ;;  %v1026_v8 = vpop.f32.mrb[16].mxu1 }
 0x17b   : > { %v7268_v1 = vadd.f32 %v913_v12, %v754_v4  ;;  %v7270_v30 = vadd.f32 %v1026_v8, %v754_v4  ;;  %v915_v40 = vpop.f32.mrb[17].mxu0  ;;  %v1028_v60 = vpop.f32.mrb[17].mxu1 }
 0x17c   : > { %v7272_v21 = vadd.f32 %v915_v40, %v754_v4  ;;  %v7274_v31 = vadd.f32 %v1028_v60, %v754_v4  ;;  %v917_v58 = vpop.f32.mrb[18].mxu0  ;;  %v1030_v0 = vpop.f32.mrb[18].mxu1 }
 0x17d   : > { %v7276_v27 = vadd.f32 %v917_v58, %v759_v41  ;;  %v7278_v25 = vadd.f32 %v1030_v0, %v759_v41  ;;  %v919_v53 = vpop.f32.mrb[19].mxu0  ;;  %v1032_v59 = vpop.f32.mrb[19].mxu1 }
 0x17e   : > { %9759 = vst [vmem:[#allocation46_spill] sm:$0xff] %v7274_v31  ;;  %v7280_v50 = vadd.f32 %v919_v53, %v759_v41  ;;  %v7282_v12 = vadd.f32 %v1032_v59, %v759_v41  ;;  %v769_v8 = vpop.permute.xlu1 %768  ;;  %v774_v22 = vpop.permute.xlu0 %773 }
 0x180   : > { %9760 = vst [vmem:[#allocation47_spill] sm:$0xff] %v7282_v12 }
 0x182   : > { %v923_v51 = vpop.f32.mrb[20].mxu0  ;;  %v1036_v46 = vpop.f32.mrb[20].mxu1 }
 0x183   : > { %v7284_v40 = vadd.f32 %v923_v51, %v764_v45  ;;  %v7286_v60 = vadd.f32 %v1036_v46, %v764_v45  ;;  %v925_v4 = vpop.f32.mrb[21].mxu0  ;;  %v1038_v37 = vpop.f32.mrb[21].mxu1 }
 0x184   : > { %v7288_v58 = vadd.f32 %v925_v4, %v764_v45  ;;  %v7290_v0 = vadd.f32 %v1038_v37, %v764_v45  ;;  %v927_v32 = vpop.f32.mrb[22].mxu0  ;;  %v1040_v38 = vpop.f32.mrb[22].mxu1 }
 0x185   : > { %9761 = vst [vmem:[#allocation48_spill] sm:$0xff] %v7286_v60  ;;  %v7292_v53 = vadd.f32 %v927_v32, %v769_v8  ;;  %v7294_v59 = vadd.f32 %v1040_v38, %v769_v8  ;;  %v929_v41 = vpop.f32.mrb[23].mxu0  ;;  %v1042_v36 = vpop.f32.mrb[23].mxu1 }
 0x186   : > { %9762 = vst [vmem:[#allocation49_spill] sm:$0xff] %v7290_v0  ;;  %v7296_v24 = vadd.f32 %v929_v41, %v769_v8  ;;  %v7298_v51 = vadd.f32 %v1042_v36, %v769_v8  ;;  %v779_v46 = vpop.permute.xlu1 %778 }
 0x188   : > { %9763 = vst [vmem:[#allocation50_spill] sm:$0xff] %v7298_v51 }
 0x18a   : > { %v933_v28 = vpop.f32.mrb[24].mxu0  ;;  %v1046_v23 = vpop.f32.mrb[24].mxu1 }
 0x18b   : > { %v7300_v4 = vadd.f32 %v933_v28, %v774_v22  ;;  %v7302_v37 = vadd.f32 %v1046_v23, %v774_v22  ;;  %v935_v45 = vpop.f32.mrb[25].mxu0  ;;  %v1048_v14 = vpop.f32.mrb[25].mxu1 }
 0x18c   : > { %v7304_v32 = vadd.f32 %v935_v45, %v774_v22  ;;  %v7306_v38 = vadd.f32 %v1048_v14, %v774_v22  ;;  %v937_v9 = vpop.f32.mrb[26].mxu0  ;;  %v1050_v15 = vpop.f32.mrb[26].mxu1 }
 0x18d   : > { %9764 = vst [vmem:[#allocation51_spill] sm:$0xff] %v7300_v4  ;;  %9765 = vst [vmem:[#allocation52_spill] sm:$0xff] %v7302_v37  ;;  %v7308_v41 = vadd.f32 %v937_v9, %v779_v46  ;;  %v7310_v36 = vadd.f32 %v1050_v15, %v779_v46  ;;  %v939_v8 = vpop.f32.mrb[27].mxu0  ;;  %v1052_v10 = vpop.f32.mrb[27].mxu1 }
 0x18e   : > { %9766 = vst [vmem:[#allocation53_spill] sm:$0xff] %v7304_v32  ;;  %9767 = vst [vmem:[#allocation54_spill] sm:$0xff] %v7306_v38  ;;  %v7312_v0 = vadd.f32 %v939_v8, %v779_v46  ;;  %v7314_v28 = vadd.f32 %v1052_v10, %v779_v46  ;;  %v789_v23 = vpop.permute.xlu1 %788  ;;  %v784_v37 = vpop.permute.xlu0 %783 }
 0x18f   : > { %9768 = vst [vmem:[#allocation55_spill] sm:$0xff] %v7308_v41  ;;  %9769 = vst [vmem:[#allocation56_spill] sm:$0xff] %v7310_v36 }
 0x190   : > { %9770 = vst [vmem:[#allocation57_spill] sm:$0xff] %v7312_v0  ;;  %9771 = vst [vmem:[#allocation58_spill] sm:$0xff] %v7314_v28 }
 0x192   : > { %v943_v51 = vpop.f32.mrb[28].mxu0  ;;  %v1056_v60 = vpop.f32.mrb[28].mxu1  ;;  %1066 = sbr.rel (%p6937_p9) target bundleno = 423 (0x1a7), region = 92 }
 0x193   : > { %v7316_v45 = vadd.f32 %v943_v51, %v784_v37  ;;  %v7318_v14 = vadd.f32 %v1056_v60, %v784_v37  ;;  %v945_v22 = vpop.f32.mrb[29].mxu0  ;;  %v1058_v38 = vpop.f32.mrb[29].mxu1  ;;  %v6710_v60 = vmov (!%p6937_p9), 0.0  }
 0x194   : > { %v7320_v9 = vadd.f32 %v945_v22, %v784_v37  ;;  %v7322_v15 = vadd.f32 %v1058_v38, %v784_v37  ;;  %v947_v36 = vpop.f32.mrb[30].mxu0  ;;  %v1060_v31 = vpop.f32.mrb[30].mxu1  ;;  %1068 = vst.msk [vmem:[#allocation2] sm:$0xff] (!%p6937_p9), %vm1067_vm0, %v6710_v60  ;;  %1069 = vst.msk [vmem:[#allocation2 + $0x8] sm:$0xff] (!%p6937_p9), %vm1067_vm0, %v6710_v60 }
 0x195   : > { %9772 = vst [vmem:[#allocation59_spill] sm:$0xff] %v7318_v14  ;;  %v7324_v8 = vadd.f32 %v947_v36, %v789_v23  ;;  %v7326_v10 = vadd.f32 %v1060_v31, %v789_v23  ;;  %v949_v46 = vpop.f32.mrb[31].mxu0  ;;  %v1062_v28 = vpop.f32.mrb[31].mxu1  ;;  %1070 = vst.msk [vmem:[#allocation2 + $0x10] sm:$0xff] (!%p6937_p9), %vm1067_vm0, %v6710_v60 }
 0x196   : > { %9773 = vst [vmem:[#allocation60_spill] sm:$0xff] %v7320_v9  ;;  %9774 = vst [vmem:[#allocation61_spill] sm:$0xff] %v7322_v15  ;;  %v7328_v12 = vadd.f32 %v949_v46, %v789_v23  ;;  %v7330_v51 = vadd.f32 %v1062_v28, %v789_v23 }
 0x197   : > { %9775 = vst [vmem:[#allocation62_spill] sm:$0xff] %v7326_v10  ;;  %1071 = vst.msk [vmem:[#allocation2 + $0x18] sm:$0xff] (!%p6937_p9), %vm1067_vm0, %v6710_v60 }
 0x198   : > { %9776 = vst [vmem:[#allocation63_spill] sm:$0xff] %v7328_v12  ;;  %9777 = vst [vmem:[#allocation64_spill] sm:$0xff] %v7330_v51 }
 0x199   : > { %1072 = vst.msk [vmem:[#allocation2 + $0x20] sm:$0xff] %vm1067_vm0, %v6710_v60  ;;  %1073 = vst.msk [vmem:[#allocation2 + $0x28] sm:$0xff] %vm1067_vm0, %v6710_v60 }
 0x19a   : > { %1074 = vst.msk [vmem:[#allocation2 + $0x30] sm:$0xff] %vm1067_vm0, %v6710_v60  ;;  %1075 = vst.msk [vmem:[#allocation2 + $0x38] sm:$0xff] %vm1067_vm0, %v6710_v60 }
 0x19b   : > { %1076 = vst.msk [vmem:[#allocation2 + $0x40] sm:$0xff] %vm1067_vm0, %v6710_v60  ;;  %1077 = vst.msk [vmem:[#allocation2 + $0x48] sm:$0xff] %vm1067_vm0, %v6710_v60 }
 0x19c   : > { %1078 = vst.msk [vmem:[#allocation2 + $0x50] sm:$0xff] %vm1067_vm0, %v6710_v60  ;;  %1079 = vst.msk [vmem:[#allocation2 + $0x58] sm:$0xff] %vm1067_vm0, %v6710_v60 }
 0x19d   : > { %1080 = vst.msk [vmem:[#allocation2 + $0x60] sm:$0xff] %vm1067_vm0, %v6710_v60  ;;  %1081 = vst.msk [vmem:[#allocation2 + $0x68] sm:$0xff] %vm1067_vm0, %v6710_v60 }
 0x19e   : > { %1082 = vst.msk [vmem:[#allocation2 + $0x70] sm:$0xff] %vm1067_vm0, %v6710_v60  ;;  %1083 = vst.msk [vmem:[#allocation2 + $0x78] sm:$0xff] %vm1067_vm0, %v6710_v60 }
 0x19f   : > { %1084 = vst.msk [vmem:[#allocation2 + $0x80] sm:$0xff] %vm1067_vm0, %v6710_v60  ;;  %1085 = vst.msk [vmem:[#allocation2 + $0x88] sm:$0xff] %vm1067_vm0, %v6710_v60 }
 0x1a0   : > { %1086 = vst.msk [vmem:[#allocation2 + $0x90] sm:$0xff] %vm1067_vm0, %v6710_v60  ;;  %1087 = vst.msk [vmem:[#allocation2 + $0x98] sm:$0xff] %vm1067_vm0, %v6710_v60 }
 0x1a1   : > { %1088 = vst.msk [vmem:[#allocation2 + $0xa0] sm:$0xff] %vm1067_vm0, %v6710_v60  ;;  %1089 = vst.msk [vmem:[#allocation2 + $0xa8] sm:$0xff] %vm1067_vm0, %v6710_v60 }
 0x1a2   : > { %1090 = vst.msk [vmem:[#allocation2 + $0xb0] sm:$0xff] %vm1067_vm0, %v6710_v60  ;;  %1091 = vst.msk [vmem:[#allocation2 + $0xb8] sm:$0xff] %vm1067_vm0, %v6710_v60 }
 0x1a3   : > { %1092 = vst.msk [vmem:[#allocation2 + $0xc0] sm:$0xff] %vm1067_vm0, %v6710_v60  ;;  %1093 = vst.msk [vmem:[#allocation2 + $0xc8] sm:$0xff] %vm1067_vm0, %v6710_v60 }
 0x1a4   : > { %1094 = vst.msk [vmem:[#allocation2 + $0xd0] sm:$0xff] %vm1067_vm0, %v6710_v60  ;;  %1095 = vst.msk [vmem:[#allocation2 + $0xd8] sm:$0xff] %vm1067_vm0, %v6710_v60 }
 0x1a5   : > { %1096 = vst.msk [vmem:[#allocation2 + $0xe0] sm:$0xff] %vm1067_vm0, %v6710_v60  ;;  %1097 = vst.msk [vmem:[#allocation2 + $0xe8] sm:$0xff] %vm1067_vm0, %v6710_v60 }
 0x1a6   : > { %1098 = vst.msk [vmem:[#allocation2 + $0xf0] sm:$0xff] %vm1067_vm0, %v6710_v60  ;;  %1099 = vst.msk [vmem:[#allocation2 + $0xf8] sm:$0xff] %vm1067_vm0, %v6710_v60 }
 0x1a7 PF: > { %v1126_v31 = vadd.f32 %v7224_v13, %v7220_v3  ;;  %v1116_v37 = vadd.f32 %v7208_v49, %v7204_v35  ;;  %v1131_v38 = vadd.f32 %v7232_v33, %v7228_v19  ;;  %v1121_v36 = vadd.f32 %v7216_v61, %v7212_v54 }
 0x1a8   : > { %v1141_v28 = vadd.f32 %v7248_v42, %v7244_v18  ;;  %v1136_v23 = vadd.f32 %v7240_v2, %v7236_v56  ;;  %v1151_v42 = vadd.f32 %v7264_v11, %v7260_v26  ;;  %v1146_v2 = vadd.f32 %v7256_v7, %v7252_v57 }
 0x1a9   : > { %v1127_v22 = vadd.f32 %v1126_v31, %v7222_v5  ;;  %v1117_v46 = vadd.f32 %v1116_v37, %v7206_v39  ;;  %v1132_v60 = vadd.f32 %v1131_v38, %v7230_v20  ;;  %v1122_v15 = vadd.f32 %v1121_v36, %v7214_v55 }
 0x1aa   : > { %v1142_v10 = vadd.f32 %v1141_v28, %v7246_v63  ;;  %v1137_v38 = vadd.f32 %v1136_v23, %v7238_v29  ;;  %v1147_v28 = vadd.f32 %v1146_v2, %v7254_v48  ;;  %vm1212_vm1 = vcmask 7168  }
 0x1ab   : > { %v1128_v51 = vadd.f32 %v1127_v22, %v7226_v16  ;;  %v1118_v14 = vadd.f32 %v1117_v46, %v7210_v44  ;;  %v1133_v31 = vadd.f32 %v1132_v60, %v7234_v34  ;;  %v1123_v37 = vadd.f32 %v1122_v15, %v7218_v62 }
 0x1ac   : > { %v1143_v36 = vadd.f32 %v1142_v10, %v7250_v52  ;;  %v1152_v22 = vadd.f32 %v1151_v42, %v7262_v47  ;;  %v1138_v46 = vadd.f32 %v1137_v38, %v7242_v6  ;;  %v1148_v23 = vadd.f32 %v1147_v28, %v7258_v17  ;;  %v9779_v28 = vld [vmem:[#allocation46_spill] sm:$0xff] }
 0x1ad   : > { %1129 = vadd.xlane.f32.xlu1 %v1128_v51  ;;  %1119 = vadd.xlane.f32.xlu0 %v1118_v14  ;;  %v1161_v51 = vadd.f32 %v7280_v50, %v7276_v27  ;;  %v1156_v14 = vadd.f32 %v7272_v21, %v7268_v1  ;;  %v1171_v10 = vadd.f32 %v7296_v24, %v7292_v53 }
 0x1ae   : > { %v1153_v15 = vadd.f32 %v1152_v22, %v7266_v43  ;;  %v1166_v60 = vadd.f32 %v7288_v58, %v7284_v40  ;;  %v1176_v38 = vadd.f32 %v7304_v32, %v7300_v4  ;;  %v9778_v22 = vld [vmem:[#allocation47_spill] sm:$0xff]  ;;  %v1247_v32 = vmul.f32 %v7208_v49, %v7208_v49  ;;  %v9783_v4 = vld [vmem:[#allocation49_spill] sm:$0xff] }
 0x1af   : > { %v1162_v42 = vadd.f32 %v1161_v51, %v7278_v25  ;;  %v1157_v2 = vadd.f32 %v1156_v14, %v7270_v30  ;;  %v9780_v51 = vld [vmem:[#allocation48_spill] sm:$0xff]  ;;  %v1250_v14 = vmul.f32 %v7212_v54, %v7212_v54  ;;  %v9782_v54 = vld [vmem:[#allocation50_spill] sm:$0xff] }
 0x1b0   : > { %v1167_v17 = vadd.f32 %v1166_v60, %v9780_v51  ;;  %v9784_v51 = vld [vmem:[#allocation52_spill] sm:$0xff] }
 0x1b1   : > { %1134 = vadd.xlane.f32.xlu1 %v1133_v31  ;;  %1124 = vadd.xlane.f32.xlu0 %v1123_v37  ;;  %v1172_v31 = vadd.f32 %v1171_v10, %v7294_v59  ;;  %v1181_v37 = vadd.f32 %v7312_v0, %v7308_v41  ;;  %v1251_v10 = vmul.f32 %v7216_v61, %v7216_v61 }
 0x1b2   : > { %v1246_v0 = vmul.f32 %v7204_v35, %v7204_v35  ;;  %v1168_v61 = vadd.f32 %v1167_v17, %v9783_v4  ;;  %v1177_v41 = vadd.f32 %v1176_v38, %v9784_v51  ;;  %v1252_v35 = vmul.f32 %v7214_v55, %v7214_v55  ;;  %v9785_v38 = vld [vmem:[#allocation62_spill] sm:$0xff] }
 0x1b3   : > { %v1173_v60 = vadd.f32 %v1172_v31, %v9782_v54  ;;  %v1315_v49 = vadd.f32 %v1251_v10, %v1250_v14  ;;  %v1254_v31 = vmul.f32 %v7220_v3, %v7220_v3  ;;  %v1255_v17 = vmul.f32 %v7224_v13, %v7224_v13  ;;  %v9786_v55 = vld [vmem:[#allocation58_spill] sm:$0xff] }
 0x1b4   : > { %v1249_v3 = vmul.f32 %v7210_v44, %v7210_v44  ;;  %v1260_v13 = vmul.f32 %v7230_v20, %v7230_v20  ;;  %v9791_v44 = vld [vmem:[#allocation61_spill] sm:$0xff]  ;;  %v1262_v20 = vmul.f32 %v7236_v56, %v7236_v56  ;;  %v1264_v56 = vmul.f32 %v7238_v29, %v7238_v29 }
 0x1b5   : > { %1144 = vadd.xlane.f32.xlu1 %v1143_v36  ;;  %1139 = vadd.xlane.f32.xlu0 %v1138_v46  ;;  %v1163_v36 = vadd.f32 %v1162_v42, %v9778_v22  ;;  %v1158_v46 = vadd.f32 %v1157_v2, %v9779_v28  ;;  %v1191_v42 = vadd.f32 %v7328_v12, %v7324_v8 }
 0x1b6   : > { %v1186_v2 = vadd.f32 %v7320_v9, %v7316_v45  ;;  %v1258_v12 = vmul.f32 %v7228_v19, %v7228_v19  ;;  %v1253_v19 = vmul.f32 %v7218_v62, %v7218_v62  ;;  %v1282_v29 = vmul.f32 %v7276_v27, %v7276_v27 }
 0x1b9   : > { %1154 = vadd.xlane.f32.xlu1 %v1153_v15  ;;  %1149 = vadd.xlane.f32.xlu0 %v1148_v23  ;;  %v9781_v15 = vld [vmem:[#allocation56_spill] sm:$0xff] }
 0x1ba   : > { %v1182_v23 = vadd.f32 %v1181_v37, %v9781_v15  ;;  %v1248_v37 = vmul.f32 %v7206_v39, %v7206_v39  ;;  %v1310_v15 = vadd.f32 %v1247_v32, %v1246_v0  ;;  %v9787_v39 = vld [vmem:[#allocation54_spill] sm:$0xff]  ;;  %v9788_v32 = vld [vmem:[#allocation59_spill] sm:$0xff] }
 0x1bb   : > { %v1178_v0 = vadd.f32 %v1177_v41, %v9787_v39  ;;  %v1187_v10 = vadd.f32 %v1186_v2, %v9788_v32  ;;  %v1266_v2 = vmul.f32 %v7244_v18, %v7244_v18  ;;  %v9790_v32 = vld [vmem:[#allocation44_spill] sm:$0xff]  ;;  %v1257_v18 = vmul.f32 %v7226_v16, %v7226_v16 }
 0x1bc   : > { %v1183_v14 = vadd.f32 %v1182_v23, %v9786_v55  ;;  %v1311_v9 = vadd.f32 %v1310_v15, %v1248_v37  ;;  %v1320_v23 = vadd.f32 %v1255_v17, %v1254_v31  ;;  %v1267_v62 = vmul.f32 %v9790_v32, %v9790_v32 }
 0x1bd   : > { %1164 = vadd.xlane.f32.xlu1 %v1163_v36  ;;  %1159 = vadd.xlane.f32.xlu0 %v1158_v46  ;;  %v1259_v36 = vmul.f32 %v7232_v33, %v7232_v33  ;;  %v1192_v46 = vadd.f32 %v1191_v42, %v9785_v38  ;;  %v1316_v33 = vadd.f32 %v1315_v49, %v1252_v35 }
 0x1be   : > { %v1188_v35 = vadd.f32 %v1187_v10, %v9791_v44  ;;  %v1261_v49 = vmul.f32 %v7234_v34, %v7234_v34  ;;  %v1312_v37 = vadd.f32 %v1311_v9, %v1249_v3  ;;  %v1268_v17 = vmul.f32 %v7246_v63, %v7246_v63 }
 0x1bf   : > { %v1325_v42 = vadd.f32 %v1259_v36, %v1258_v12  ;;  %v9792_v12 = vld [vmem:[#allocation43_spill] sm:$0xff]  ;;  %v1270_v16 = vmul.f32 %v7252_v57, %v7252_v57  ;;  %v1271_v9 = vmul.f32 %v7256_v7, %v7256_v7  ;;  %v1269_v63 = vmul.f32 %v7250_v52, %v7250_v52 }
 0x1c0   : > { %v1263_v15 = vmul.f32 %v9792_v12, %v9792_v12  ;;  %v1278_v10 = vmul.f32 %v7268_v1, %v7268_v1  ;;  %v1279_v57 = vmul.f32 %v7272_v21, %v7272_v21  ;;  %v1276_v52 = vmul.f32 %v7262_v47, %v7262_v47 }
 0x1c1   : > { %1174 = vadd.xlane.f32.xlu1 %v1173_v60  ;;  %1169 = vadd.xlane.f32.xlu0 %v1168_v61  ;;  %v1256_v60 = vmul.f32 %v7222_v5, %v7222_v5  ;;  %v9789_v61 = vld [vmem:[#allocation64_spill] sm:$0xff]  ;;  %v1317_v5 = vadd.f32 %v1316_v33, %v1253_v19  ;;  %v1326_v36 = vadd.f32 %v1325_v42, %v1260_v13 }
 0x1c2   : > { %v1193_v41 = vadd.f32 %v1192_v46, %v9789_v61  ;;  %v1335_v46 = vadd.f32 %v1267_v62, %v1266_v2  ;;  %v1330_v34 = vadd.f32 %v1263_v15, %v1262_v20  ;;  %v1340_v3 = vadd.f32 %v1271_v9, %v1270_v16  ;;  %v9793_v2 = vld [vmem:[#allocation45_spill] sm:$0xff]  ;;  %v9799_v9 = vld [vmem:[#allocation56_spill] sm:$0xff] }
 0x1c3   : > { %v1321_v31 = vadd.f32 %v1320_v23, %v1256_v60  ;;  %v1327_v32 = vadd.f32 %v1326_v36, %v1261_v49  ;;  %v1290_v21 = vmul.f32 %v7292_v53, %v7292_v53  ;;  %v1291_v13 = vmul.f32 %v7296_v24, %v7296_v24 }
 0x1c4   : > { %v1336_v19 = vadd.f32 %v1335_v46, %v1268_v17  ;;  %v1331_v27 = vadd.f32 %v1330_v34, %v1264_v56  ;;  %v1277_v47 = vmul.f32 %v7266_v43, %v7266_v43  ;;  %v1280_v42 = vmul.f32 %v7270_v30, %v7270_v30  ;;  %v9798_v46 = vld [vmem:[#allocation53_spill] sm:$0xff] }
 0x1c5   : > { %1184 = vadd.xlane.f32.xlu1 %v1183_v14  ;;  %1179 = vadd.xlane.f32.xlu0 %v1178_v0  ;;  %v1274_v14 = vmul.f32 %v7260_v26, %v7260_v26  ;;  %v1275_v0 = vmul.f32 %v7264_v11, %v7264_v11  ;;  %v1283_v26 = vmul.f32 %v7280_v50, %v7280_v50 }
 0x1c6   : > { %v1265_v11 = vmul.f32 %v7242_v6, %v7242_v6  ;;  %v1322_v7 = vadd.f32 %v1321_v31, %v1257_v18  ;;  %v1272_v50 = vmul.f32 %v7254_v48, %v7254_v48  ;;  %v1284_v6 = vmul.f32 %v7278_v25, %v7278_v25 }
 0x1c7   : > { %v1345_v33 = vadd.f32 %v1275_v0, %v1274_v14  ;;  %v1355_v1 = vadd.f32 %v1283_v26, %v1282_v29  ;;  %v1350_v60 = vadd.f32 %v1279_v57, %v1278_v10  ;;  %v1337_v23 = vadd.f32 %v1336_v19, %v1269_v63  ;;  %v9800_v10 = vld [vmem:[#allocation63_spill] sm:$0xff] }
 0x1c8   : > { %v1287_v25 = vmul.f32 %v7288_v58, %v7288_v58  ;;  %v1332_v53 = vadd.f32 %v1331_v27, %v1265_v11  ;;  %v1273_v24 = vmul.f32 %v9793_v2, %v9793_v2  ;;  %v1341_v62 = vadd.f32 %v1340_v3, %v1272_v50  ;;  %v9794_v58 = vld [vmem:[#allocation55_spill] sm:$0xff] }
 0x1c9   : > { %1194 = vadd.xlane.f32.xlu1 %v1193_v41  ;;  %1189 = vadd.xlane.f32.xlu0 %v1188_v35  ;;  %v1346_v48 = vadd.f32 %v1345_v33, %v1276_v52  ;;  %v1286_v41 = vmul.f32 %v7284_v40, %v7284_v40  ;;  %v1285_v43 = vmul.f32 %v9778_v22, %v9778_v22 }
 0x1ca   : > { %v1356_v30 = vadd.f32 %v1355_v1, %v1284_v6  ;;  %v1292_v35 = vmul.f32 %v7294_v59, %v7294_v59  ;;  %v1365_v20 = vadd.f32 %v1291_v13, %v1290_v21  ;;  %v1281_v40 = vmul.f32 %v9779_v28, %v9779_v28  ;;  %v9797_v59 = vld [vmem:[#allocation51_spill] sm:$0xff] }
 0x1cb   : > { %v1351_v12 = vadd.f32 %v1350_v60, %v1280_v42  ;;  %v1298_v15 = vmul.f32 %v9794_v58, %v9794_v58  ;;  %v1347_v18 = vadd.f32 %v1346_v48, %v1277_v47  ;;  %v1360_v22 = vadd.f32 %v1287_v25, %v1286_v41  ;;  %v1102_v48 = vld [vmem:[#allocation2 + $0x10] sm:$0xff]  ;;  %v1100_v41 = vld [vmem:[#allocation2] sm:$0xff] }
 0x1cc   : > { %v1342_v31 = vadd.f32 %v1341_v62, %v1273_v24  ;;  %v1294_v17 = vmul.f32 %v9797_v59, %v9797_v59  ;;  %v1295_v28 = vmul.f32 %v9798_v46, %v9798_v46  ;;  %v1357_v56 = vadd.f32 %v1356_v30, %v1285_v43  ;;  %v1103_v24 = vld [vmem:[#allocation2 + $0x18] sm:$0xff]  ;;  %v1109_v59 = vld [vmem:[#allocation2 + $0x48] sm:$0xff] }
 0x1cd   : > { %1318 = vadd.xlane.f32.xlu1 %v1317_v5  ;;  %1313 = vadd.xlane.f32.xlu0 %v1312_v37  ;;  %v9795_v5 = vld [vmem:[#allocation57_spill] sm:$0xff]  ;;  %v9796_v37 = vld [vmem:[#allocation48_spill] sm:$0xff]  ;;  %v1293_v14 = vmul.f32 %v9782_v54, %v9782_v54  ;;  %v1366_v0 = vadd.f32 %v1365_v20, %v1292_v35  ;;  %v1352_v34 = vadd.f32 %v1351_v12, %v1281_v40  ;;  %v1104_v40 = vld [vmem:[#allocation2 + $0x20] sm:$0xff] }
 0x1ce   : > { %v1299_v49 = vmul.f32 %v9795_v5, %v9795_v5  ;;  %v1288_v36 = vmul.f32 %v9796_v37, %v9796_v37  ;;  %v1289_v16 = vmul.f32 %v9783_v4, %v9783_v4  ;;  %v1300_v63 = vmul.f32 %v9799_v9, %v9799_v9  ;;  %v1105_v20 = vld [vmem:[#allocation2 + $0x28] sm:$0xff] }
 0x1cf   : > { %v1306_v11 = vmul.f32 %v7324_v8, %v7324_v8  ;;  %v1307_v57 = vmul.f32 %v9800_v10, %v9800_v10  ;;  %v1370_v54 = vadd.f32 %v1295_v28, %v1294_v17  ;;  %v1302_v4 = vmul.f32 %v7316_v45, %v7316_v45  ;;  %v9802_v45 = vld [vmem:[#allocation59_spill] sm:$0xff] }
 0x1d0   : > { %v1375_v29 = vadd.f32 %v1299_v49, %v1298_v15  ;;  %v1361_v26 = vadd.f32 %v1360_v22, %v1288_v36  ;;  %v1367_v52 = vadd.f32 %v1366_v0, %v1293_v14  ;;  %v1301_v33 = vmul.f32 %v9786_v55, %v9786_v55  ;;  %v1107_v49 = vld [vmem:[#allocation2 + $0x38] sm:$0xff]  ;;  %v1108_v17 = vld [vmem:[#allocation2 + $0x40] sm:$0xff] }
 0x1d1   : > { %1328 = vadd.xlane.f32.xlu1 %v1327_v32  ;;  %1323 = vadd.xlane.f32.xlu0 %v1322_v7  ;;  %v1296_v32 = vmul.f32 %v9784_v51, %v9784_v51  ;;  %v9801_v7 = vld [vmem:[#allocation60_spill] sm:$0xff]  ;;  %v1297_v51 = vmul.f32 %v9787_v39, %v9787_v39  ;;  %v1308_v50 = vmul.f32 %v9785_v38, %v9785_v38  ;;  %v1111_v0 = vld [vmem:[#allocation2 + $0x58] sm:$0xff] }
 0x1d2   : > { %v1303_v19 = vmul.f32 %v9801_v7, %v9801_v7  ;;  %v1362_v8 = vadd.f32 %v1361_v26, %v1289_v16  ;;  %v1376_v27 = vadd.f32 %v1375_v29, %v1300_v63  ;;  %v1385_v3 = vadd.f32 %v1307_v57, %v1306_v11  ;;  %v1113_v26 = vld [vmem:[#allocation2 + $0x68] sm:$0xff]  ;;  %v1114_v7 = vld [vmem:[#allocation2 + $0x70] sm:$0xff] }
 0x1d3   : > { %v1371_v6 = vadd.f32 %v1370_v54, %v1296_v32  ;;  %v1304_v1 = vmul.f32 %v9802_v45, %v9802_v45  ;;  %v1309_v55 = vmul.f32 %v9789_v61, %v9789_v61  ;;  %v1305_v39 = vmul.f32 %v9791_v44, %v9791_v44  ;;  %v1101_v44 = vld [vmem:[#allocation2 + $0x8] sm:$0xff]  ;;  %v1112_v32 = vld [vmem:[#allocation2 + $0x60] sm:$0xff] }
 0x1d4   : > { %v1380_v21 = vadd.f32 %v1303_v19, %v1302_v4  ;;  %v1377_v13 = vadd.f32 %v1376_v27, %v1301_v33  ;;  %v1386_v42 = vadd.f32 %v1385_v3, %v1308_v50  ;;  %v1115_v4 = vld [vmem:[#allocation2 + $0x78] sm:$0xff]  ;;  %v1230_v27 = vld [vmem:[#allocation2 + $0x80] sm:$0xff] }
 0x1d5   : > { %1338 = vadd.xlane.f32.xlu1 %v1337_v23  ;;  %1333 = vadd.xlane.f32.xlu0 %v1332_v53  ;;  %v1372_v47 = vadd.f32 %v1371_v6, %v1297_v51 }
 0x1d6   : > { %v1381_v38 = vadd.f32 %v1380_v21, %v1304_v1  ;;  %v1387_v60 = vadd.f32 %v1386_v42, %v1309_v55  ;;  %v1233_v1 = vld [vmem:[#allocation2 + $0x98] sm:$0xff]  ;;  %v1232_v21 = vld [vmem:[#allocation2 + $0x90] sm:$0xff]  ;;  %v1235_v42 = vld [vmem:[#allocation2 + $0xa8] sm:$0xff] }
 0x1d8   : > { %v1382_v23 = vadd.f32 %v1381_v38, %v1305_v39  ;;  %v1234_v38 = vld [vmem:[#allocation2 + $0xa0] sm:$0xff] }
 0x1d9   : > { %1348 = vadd.xlane.f32.xlu1 %v1347_v18  ;;  %1343 = vadd.xlane.f32.xlu0 %v1342_v31  ;;  %v1106_v18 = vld [vmem:[#allocation2 + $0x30] sm:$0xff] }
 0x1dd   : > { %1358 = vadd.xlane.f32.xlu1 %v1357_v56  ;;  %1353 = vadd.xlane.f32.xlu0 %v1352_v34  ;;  %v1110_v34 = vld [vmem:[#allocation2 + $0x50] sm:$0xff] }
 0x1e1   : > { %1368 = vadd.xlane.f32.xlu1 %v1367_v52  ;;  %1363 = vadd.xlane.f32.xlu0 %v1362_v8  ;;  %v1231_v8 = vld [vmem:[#allocation2 + $0x88] sm:$0xff] }
 0x1e5   : > { %1378 = vadd.xlane.f32.xlu1 %v1377_v13  ;;  %1373 = vadd.xlane.f32.xlu0 %v1372_v47 }
 0x1e9   : > { %1388 = vadd.xlane.f32.xlu1 %v1387_v60  ;;  %1383 = vadd.xlane.f32.xlu0 %v1382_v23 }
 0x23a   : > { %v1130_v25 = vpop.xlane.xlu1 %1129  ;;  %v1120_v53 = vpop.xlane.xlu0 %1119 }
 0x23b   : > { %v1198_v61 = vadd.f32 %v1130_v25, %v1102_v48  ;;  %v1196_v2 = vadd.f32 %v1120_v53, %v1100_v41  ;;  %v1237_v25 = vld [vmem:[#allocation2 + $0xb8] sm:$0xff]  ;;  %v1236_v53 = vld [vmem:[#allocation2 + $0xb0] sm:$0xff] }
 0x23d   : > { %1215 = vst.msk [vmem:[#allocation2 + $0x10] sm:$0xff] %vm1212_vm1, %v1198_v61  ;;  %1213 = vst.msk [vmem:[#allocation2] sm:$0xff] %vm1212_vm1, %v1196_v2 }
 0x23e   : > { %v1135_v62 = vpop.xlane.xlu1 %1134  ;;  %v1125_v43 = vpop.xlane.xlu0 %1124 }
 0x23f   : > { %v1199_v30 = vadd.f32 %v1135_v62, %v1103_v24  ;;  %v1197_v35 = vadd.f32 %v1125_v43, %v1101_v44  ;;  %v1239_v62 = vld [vmem:[#allocation2 + $0xc8] sm:$0xff]  ;;  %v1238_v43 = vld [vmem:[#allocation2 + $0xc0] sm:$0xff] }
 0x241   : > { %1216 = vst.msk [vmem:[#allocation2 + $0x18] sm:$0xff] %vm1212_vm1, %v1199_v30  ;;  %1214 = vst.msk [vmem:[#allocation2 + $0x8] sm:$0xff] %vm1212_vm1, %v1197_v35 }
 0x242   : > { %v1145_v12 = vpop.xlane.xlu1 %1144  ;;  %v1140_v58 = vpop.xlane.xlu0 %1139 }
 0x243   : > { %v1201_v15 = vadd.f32 %v1145_v12, %v1105_v20  ;;  %v1200_v5 = vadd.f32 %v1140_v58, %v1104_v40  ;;  %v1241_v12 = vld [vmem:[#allocation2 + $0xd8] sm:$0xff]  ;;  %v1240_v58 = vld [vmem:[#allocation2 + $0xd0] sm:$0xff] }
 0x245   : > { %1218 = vst.msk [vmem:[#allocation2 + $0x28] sm:$0xff] %vm1212_vm1, %v1201_v15  ;;  %1217 = vst.msk [vmem:[#allocation2 + $0x20] sm:$0xff] %vm1212_vm1, %v1200_v5 }
 0x246   : > { %v1155_v37 = vpop.xlane.xlu1 %1154  ;;  %v1150_v36 = vpop.xlane.xlu0 %1149 }
 0x247   : > { %v1203_v22 = vadd.f32 %v1155_v37, %v1107_v49  ;;  %v1202_v31 = vadd.f32 %v1150_v36, %v1106_v18  ;;  %v1243_v37 = vld [vmem:[#allocation2 + $0xe8] sm:$0xff]  ;;  %v1242_v36 = vld [vmem:[#allocation2 + $0xe0] sm:$0xff] }
 0x249   : > { %1220 = vst.msk [vmem:[#allocation2 + $0x38] sm:$0xff] %vm1212_vm1, %v1203_v22  ;;  %1219 = vst.msk [vmem:[#allocation2 + $0x30] sm:$0xff] %vm1212_vm1, %v1202_v31 }
 0x24a   : > { %v1165_v46 = vpop.xlane.xlu1 %1164  ;;  %v1160_v28 = vpop.xlane.xlu0 %1159 }
 0x24b   : > { %v1205_v56 = vadd.f32 %v1165_v46, %v1109_v59  ;;  %v1204_v14 = vadd.f32 %v1160_v28, %v1108_v17  ;;  %v1245_v46 = vld [vmem:[#allocation2 + $0xf8] sm:$0xff]  ;;  %v1244_v28 = vld [vmem:[#allocation2 + $0xf0] sm:$0xff] }
 0x24d   : > { %1222 = vst.msk [vmem:[#allocation2 + $0x48] sm:$0xff] %vm1212_vm1, %v1205_v56  ;;  %1221 = vst.msk [vmem:[#allocation2 + $0x40] sm:$0xff] %vm1212_vm1, %v1204_v14 }
 0x24e   : > { %v1175_v16 = vpop.xlane.xlu1 %1174  ;;  %v1170_v9 = vpop.xlane.xlu0 %1169 }
 0x24f   : > { %v1207_v63 = vadd.f32 %v1175_v16, %v1111_v0  ;;  %v1206_v29 = vadd.f32 %v1170_v9, %v1110_v34  ;;  %v1424_v16 = vld [vmem:[#allocation2] sm:$0xff] (!%p6944_p12) }
 0x251   : > { %1224 = vst.msk [vmem:[#allocation2 + $0x58] sm:$0xff] %vm1212_vm1, %v1207_v63  ;;  %1223 = vst.msk [vmem:[#allocation2 + $0x50] sm:$0xff] %vm1212_vm1, %v1206_v29  ;;  %v7592_v63 = vmul.f32 (!%p6944_p12), 0.00048828125, %v1424_v16 }
 0x252   : > { %v1185_v11 = vpop.xlane.xlu1 %1184  ;;  %v1180_v10 = vpop.xlane.xlu0 %1179 }
 0x253   : > { %v1209_v57 = vadd.f32 %v1185_v11, %v1113_v26  ;;  %v1208_v54 = vadd.f32 %v1180_v10, %v1112_v32  ;;  %v1425_v26 = vld [vmem:[#allocation2 + $0x8] sm:$0xff] (!%p6944_p12) }
 0x254   : > { %v7594_v11 = vmul.f32 (!%p6944_p12), 0.00048828125, %v1425_v26 }
 0x255   : > { %1226 = vst.msk [vmem:[#allocation2 + $0x68] sm:$0xff] %vm1212_vm1, %v1209_v57  ;;  %1225 = vst.msk [vmem:[#allocation2 + $0x60] sm:$0xff] %vm1212_vm1, %v1208_v54  ;;  %v1426_v57 = vld [vmem:[#allocation2 + $0x10] sm:$0xff] (!%p6944_p12) }
 0x256   : > { %v1195_v19 = vpop.xlane.xlu1 %1194  ;;  %v1190_v52 = vpop.xlane.xlu0 %1189 }
 0x257   : > { %v1211_v33 = vadd.f32 %v1195_v19, %v1115_v4  ;;  %v1210_v51 = vadd.f32 %v1190_v52, %v1114_v7  ;;  %v1488_v4 = vmul.f32 (!%p6944_p12), %v7592_v63, %v7592_v63  ;;  %v7598_v7 = vmul.f32 (!%p6944_p12), 0.00048828125, %v1426_v57  ;;  %v1427_v52 = vld [vmem:[#allocation2 + $0x18] sm:$0xff] (!%p6944_p12) }
 0x259   : > { %1228 = vst.msk [vmem:[#allocation2 + $0x78] sm:$0xff] %vm1212_vm1, %v1211_v33  ;;  %1227 = vst.msk [vmem:[#allocation2 + $0x70] sm:$0xff] %vm1212_vm1, %v1210_v51  ;;  %v1489_v51 = vmul.f32 (!%p6944_p12), %v7594_v11, %v7594_v11 }
 0x25a   : > { %v1319_v50 = vpop.xlane.xlu1 %1318  ;;  %v1314_v3 = vpop.xlane.xlu0 %1313 }
 0x25b   : > { %v1391_v6 = vadd.f32 %v1319_v50, %v1231_v8  ;;  %v1390_v45 = vadd.f32 %v1314_v3, %v1230_v27  ;;  %v7602_v8 = vmul.f32 (!%p6944_p12), 0.00048828125, %v1427_v52  ;;  %v1428_v50 = vld [vmem:[#allocation2 + $0x20] sm:$0xff] (!%p6944_p12) }
 0x25d   : > { %1407 = vst.msk [vmem:[#allocation2 + $0x88] sm:$0xff] %vm1212_vm1, %v1391_v6  ;;  %1406 = vst.msk [vmem:[#allocation2 + $0x80] sm:$0xff] %vm1212_vm1, %v1390_v45  ;;  %v1490_v45 = vmul.f32 (!%p6944_p12), %v7598_v7, %v7598_v7 }
 0x25e   : > { %v1329_v13 = vpop.xlane.xlu1 %1328  ;;  %v1324_v55 = vpop.xlane.xlu0 %1323 }
 0x25f   : > { %v1393_v39 = vadd.f32 %v1329_v13, %v1233_v1  ;;  %v1392_v47 = vadd.f32 %v1324_v55, %v1232_v21  ;;  %v7606_v1 = vmul.f32 (!%p6944_p12), 0.00048828125, %v1428_v50  ;;  %v1429_v13 = vld [vmem:[#allocation2 + $0x28] sm:$0xff] (!%p6944_p12) }
 0x261   : > { %1409 = vst.msk [vmem:[#allocation2 + $0x98] sm:$0xff] %vm1212_vm1, %v1393_v39  ;;  %1408 = vst.msk [vmem:[#allocation2 + $0x90] sm:$0xff] %vm1212_vm1, %v1392_v47  ;;  %v1491_v47 = vmul.f32 (!%p6944_p12), %v7602_v8, %v7602_v8 }
 0x262   : > { %v1339_v60 = vpop.xlane.xlu1 %1338  ;;  %v1334_v23 = vpop.xlane.xlu0 %1333 }
 0x263   : > { %v1395_v48 = vadd.f32 %v1339_v60, %v1235_v42  ;;  %v1394_v41 = vadd.f32 %v1334_v23, %v1234_v38  ;;  %v7610_v42 = vmul.f32 (!%p6944_p12), 0.00048828125, %v1429_v13  ;;  %v1430_v60 = vld [vmem:[#allocation2 + $0x30] sm:$0xff] (!%p6944_p12) }
 0x264   : > { %v1456_v9 = vld [vmem:[#allocation2 + $0x80] sm:$0xff] (!%p6944_p12)  ;;  %v1457_v32 = vld [vmem:[#allocation2 + $0x88] sm:$0xff] (!%p6944_p12) }
 0x265   : > { %1411 = vst.msk [vmem:[#allocation2 + $0xa8] sm:$0xff] %vm1212_vm1, %v1395_v48  ;;  %1410 = vst.msk [vmem:[#allocation2 + $0xa0] sm:$0xff] %vm1212_vm1, %v1394_v41  ;;  %v1472_v29 = vmul.f32 (!%p6944_p12), 0.00048828125, %v1456_v9  ;;  %v1473_v10 = vmul.f32 (!%p6944_p12), 0.00048828125, %v1457_v32 }
 0x266   : > { %v1349_v61 = vpop.xlane.xlu1 %1348  ;;  %v1344_v2 = vpop.xlane.xlu0 %1343 }
 0x267   : > { %v1397_v24 = vadd.f32 %v1349_v61, %v1237_v25  ;;  %v1396_v44 = vadd.f32 %v1344_v2, %v1236_v53  ;;  %v1504_v6 = vsub.f32 (!%p6944_p12), %v1472_v29, %v1488_v4  ;;  %v1505_v39 = vsub.f32 (!%p6944_p12), %v1473_v10, %v1489_v51  ;;  %v1431_v61 = vld [vmem:[#allocation2 + $0x38] sm:$0xff] (!%p6944_p12)  ;;  %v1436_v51 = vld [vmem:[#allocation2 + $0x60] sm:$0xff] (!%p6944_p12) }
 0x268   : > { %v1458_v54 = vld [vmem:[#allocation2 + $0x90] sm:$0xff] (!%p6944_p12)  ;;  %v1459_v33 = vld [vmem:[#allocation2 + $0x98] sm:$0xff] (!%p6944_p12)  ;;  %v1492_v25 = vmul.f32 (!%p6944_p12), %v7606_v1, %v7606_v1  ;;  %v7614_v53 = vmul.f32 (!%p6944_p12), 0.00048828125, %v1430_v60 }
 0x269   : > { %1413 = vst.msk [vmem:[#allocation2 + $0xb8] sm:$0xff] %vm1212_vm1, %v1397_v24  ;;  %1412 = vst.msk [vmem:[#allocation2 + $0xb0] sm:$0xff] %vm1212_vm1, %v1396_v44  ;;  %v1474_v19 = vmul.f32 (!%p6944_p12), 0.00048828125, %v1458_v54  ;;  %v1475_v27 = vmul.f32 (!%p6944_p12), 0.00048828125, %v1459_v33  ;;  %v1520_v48 = vmax.f32 (!%p6944_p12), %v1504_v6, 0.0  ;;  %v1521_v2 = vmax.f32 (!%p6944_p12), %v1505_v39, 0.0 }
 0x26a   : > { %v1359_v30 = vpop.xlane.xlu1 %1358  ;;  %v1354_v35 = vpop.xlane.xlu0 %1353  ;;  %v1493_v44 = vmul.f32 (!%p6944_p12), %v7610_v42, %v7610_v42  ;;  %v1435_v54 = vld [vmem:[#allocation2 + $0x58] sm:$0xff] (!%p6944_p12) }
 0x26b   : > { %v1399_v20 = vadd.f32 %v1359_v30, %v1239_v62  ;;  %v1398_v40 = vadd.f32 %v1354_v35, %v1238_v43  ;;  %v1506_v41 = vsub.f32 (!%p6944_p12), %v1474_v19, %v1490_v45  ;;  %v1507_v24 = vsub.f32 (!%p6944_p12), %v1475_v27, %v1491_v47  ;;  %v1437_v45 = vld [vmem:[#allocation2 + $0x68] sm:$0xff] (!%p6944_p12) }
 0x26c   : > { %v1460_v3 = vld [vmem:[#allocation2 + $0xa0] sm:$0xff] (!%p6944_p12)  ;;  %v1461_v55 = vld [vmem:[#allocation2 + $0xa8] sm:$0xff] (!%p6944_p12)  ;;  %v1552_v43 = vadd.f32 (!%p6944_p12), 1e-05, %v1520_v48  ;;  %v7641_v48 = vmul.f32 (!%p6944_p12), 0.00048828125, %v1436_v51 }
 0x26d   : > { %1415 = vst.msk [vmem:[#allocation2 + $0xc8] sm:$0xff] %vm1212_vm1, %v1399_v20  ;;  %1414 = vst.msk [vmem:[#allocation2 + $0xc0] sm:$0xff] %vm1212_vm1, %v1398_v40  ;;  %v1476_v21 = vmul.f32 (!%p6944_p12), 0.00048828125, %v1460_v3  ;;  %v1477_v38 = vmul.f32 (!%p6944_p12), 0.00048828125, %v1461_v55  ;;  %v1522_v30 = vmax.f32 (!%p6944_p12), %v1506_v41, 0.0  ;;  %v1494_v20 = vmul.f32 (!%p6944_p12), %v7614_v53, %v7614_v53 }
 0x26e   : > { %v1369_v15 = vpop.xlane.xlu1 %1368  ;;  %v1364_v5 = vpop.xlane.xlu0 %1363  ;;  %6481 = vrsqrt.f32 (!%p6944_p12), %v1552_v43  ;;  %v7636_v55 = vmul.f32 (!%p6944_p12), 0.00048828125, %v1435_v54  ;;  %v1538_v43 = vld [vmem:[%s9626_s3 + $0x10] sm:$0xff] (!%p6944_p12) }
 0x26f   : > { %v1401_v49 = vadd.f32 %v1369_v15, %v1241_v12  ;;  %v1400_v18 = vadd.f32 %v1364_v5, %v1240_v58  ;;  %v1508_v35 = vsub.f32 (!%p6944_p12), %v1476_v21, %v1492_v25  ;;  %v1553_v12 = vadd.f32 (!%p6944_p12), 1e-05, %v1521_v2  ;;  %v1537_v25 = vld [vmem:[%s9626_s3 + $0x8] sm:$0xff] (!%p6944_p12) }
 0x270   : > { %v1462_v23 = vld [vmem:[#allocation2 + $0xb0] sm:$0xff] (!%p6944_p12)  ;;  %v1463_v40 = vld [vmem:[#allocation2 + $0xb8] sm:$0xff] (!%p6944_p12)  ;;  %v1523_v58 = vmax.f32 (!%p6944_p12), %v1507_v24, 0.0  ;;  %v1509_v15 = vsub.f32 (!%p6944_p12), %v1477_v38, %v1493_v44  ;;  %v7620_v5 = vmul.f32 (!%p6944_p12), 0.00048828125, %v1431_v61  ;;  %v1536_v38 = vld [vmem:[%s9626_s3] sm:$0xff] (!%p6944_p12)  ;;  %v1499_v24 = vmul.f32 (!%p6944_p12), %v7636_v55, %v7636_v55 }
 0x271   : > { %1417 = vst.msk [vmem:[#allocation2 + $0xd8] sm:$0xff] %vm1212_vm1, %v1401_v49  ;;  %1416 = vst.msk [vmem:[#allocation2 + $0xd0] sm:$0xff] %vm1212_vm1, %v1400_v18  ;;  %v1478_v62 = vmul.f32 (!%p6944_p12), 0.00048828125, %v1462_v23  ;;  %v1554_v49 = vadd.f32 (!%p6944_p12), 1e-05, %v1522_v30  ;;  %v1524_v18 = vmax.f32 (!%p6944_p12), %v1508_v35, 0.0  ;;  %6483 = vrsqrt.f32 (!%p6944_p12), %v1553_v12 }
 0x272   : > { %v1379_v22 = vpop.xlane.xlu1 %1378  ;;  %v1374_v31 = vpop.xlane.xlu0 %1373  ;;  %v7648_v44 = vmul.f32 (!%p6944_p12), 0.00048828125, %v1437_v45  ;;  %v1500_v35 = vmul.f32 (!%p6944_p12), %v7641_v48, %v7641_v48 }
 0x273   : > { %v1403_v59 = vadd.f32 %v1379_v22, %v1243_v37  ;;  %v1402_v17 = vadd.f32 %v1374_v31, %v1242_v36  ;;  %1423 = sbr.rel (%p6944_p12) target bundleno = 672 (0x2a0), region = 96  ;;  %v1510_v37 = vsub.f32 (!%p6944_p12), %v1478_v62, %v1494_v20  ;;  %v1432_v36 = vld [vmem:[#allocation2 + $0x40] sm:$0xff] (!%p6944_p12)  ;;  %v1555_v31 = vadd.f32 (!%p6944_p12), 1e-05, %v1523_v58  ;;  %v1539_v58 = vld [vmem:[%s9626_s3 + $0x18] sm:$0xff] (!%p6944_p12) }
 0x274   : > { %v1464_v22 = vld [vmem:[#allocation2 + $0xc0] sm:$0xff] (!%p6944_p12)  ;;  %6485 = vrsqrt.f32 (!%p6944_p12), %v1554_v49  ;;  %v7624_v9 = vmul.f32 (!%p6944_p12), 0.00048828125, %v1432_v36 }
 0x275   : > { %1419 = vst.msk [vmem:[#allocation2 + $0xe8] sm:$0xff] %vm1212_vm1, %v1403_v59  ;;  %1418 = vst.msk [vmem:[#allocation2 + $0xe0] sm:$0xff] %vm1212_vm1, %v1402_v17  ;;  %v1525_v59 = vmax.f32 (!%p6944_p12), %v1509_v15, 0.0  ;;  %v1479_v17 = vmul.f32 (!%p6944_p12), 0.00048828125, %v1463_v40  ;;  %6487 = vrsqrt.f32 (!%p6944_p12), %v1555_v31  ;;  %v1480_v29 = vmul.f32 (!%p6944_p12), 0.00048828125, %v1464_v22  ;;  %v1540_v22 = vld [vmem:[%s9626_s3 + $0x20] sm:$0xff] (!%p6944_p12) }
 0x276   : > { %v1389_v56 = vpop.xlane.xlu1 %1388  ;;  %v1384_v14 = vpop.xlane.xlu0 %1383  ;;  %v1496_v19 = vmul.f32 (!%p6944_p12), %v7624_v9, %v7624_v9 }
 0x277   : > { %v1405_v0 = vadd.f32 %v1389_v56, %v1245_v46  ;;  %v1404_v34 = vadd.f32 %v1384_v14, %v1244_v28  ;;  %v1433_v46 = vld [vmem:[#allocation2 + $0x48] sm:$0xff] (!%p6944_p12)  ;;  %v1556_v28 = vadd.f32 (!%p6944_p12), 1e-05, %v1524_v18  ;;  %v1526_v56 = vmax.f32 (!%p6944_p12), %v1510_v37, 0.0 }
 0x278   : > { %v1495_v14 = vmul.f32 (!%p6944_p12), %v7620_v5, %v7620_v5  ;;  %v1557_v16 = vadd.f32 (!%p6944_p12), 1e-05, %v1525_v59  ;;  %v1466_v26 = vld [vmem:[#allocation2 + $0xd0] sm:$0xff] (!%p6944_p12)  ;;  %v7626_v57 = vmul.f32 (!%p6944_p12), 0.00048828125, %v1433_v46  ;;  %v1467_v4 = vld [vmem:[#allocation2 + $0xd8] sm:$0xff] (!%p6944_p12)  ;;  %v1512_v21 = vsub.f32 (!%p6944_p12), %v1480_v29, %v1496_v19  ;;  %v6482_v62 = vpop.eup (!%p6944_p12), %6481 }
 0x279   : > { %1421 = vst.msk [vmem:[#allocation2 + $0xf8] sm:$0xff] %vm1212_vm1, %v1405_v0  ;;  %1420 = vst.msk [vmem:[#allocation2 + $0xf0] sm:$0xff] %vm1212_vm1, %v1404_v34  ;;  %v1465_v0 = vld [vmem:[#allocation2 + $0xc8] sm:$0xff] (!%p6944_p12)  ;;  %v1434_v34 = vld [vmem:[#allocation2 + $0x50] sm:$0xff] (!%p6944_p12)  ;;  %6489 = vrsqrt.f32 (!%p6944_p12), %v1556_v28  ;;  %v1558_v32 = vadd.f32 (!%p6944_p12), 1e-05, %v1526_v56  ;;  %v1584_v12 = vmul.f32 (!%p6944_p12), %v6482_v62, %v1536_v38 }
 0x27a   : > { %v1511_v10 = vsub.f32 %v1479_v17, %v1495_v14  ;;  %6491 = vrsqrt.f32 %v1557_v16  ;;  %v1481_v52 = vmul.f32 0.00048828125, %v1465_v0  ;;  %v7630_v33 = vmul.f32 0.00048828125, %v1434_v34  ;;  %v1438_v46 = vld [vmem:[#allocation2 + $0x70] sm:$0xff]  ;;  %v1541_v14 = vld [vmem:[%s9626_s3 + $0x28] sm:$0xff] }
 0x27b   : > { %6493 = vrsqrt.f32 %v1558_v32  ;;  %v1497_v3 = vmul.f32 %v7626_v57, %v7626_v57  ;;  %v1482_v6 = vmul.f32 0.00048828125, %v1466_v26  ;;  %v1483_v39 = vmul.f32 0.00048828125, %v1467_v4  ;;  %v6484_v40 = vpop.eup %6483  ;;  %1600 = vst.msk [vmem:[#allocation2] sm:$0xff] %vm1212_vm1, %v1584_v12  ;;  %v1542_v32 = vld [vmem:[%s9626_s3 + $0x30] sm:$0xff]  ;;  %v1439_v4 = vld [vmem:[#allocation2 + $0x78] sm:$0xff] }
 0x27c   : > { %v1468_v27 = vld [vmem:[#allocation2 + $0xe0] sm:$0xff]  ;;  %v1527_v50 = vmax.f32 %v1511_v10, 0.0  ;;  %v1498_v13 = vmul.f32 %v7630_v33, %v7630_v33  ;;  %v1469_v47 = vld [vmem:[#allocation2 + $0xe8] sm:$0xff]  ;;  %v1528_v61 = vmax.f32 %v1512_v21, 0.0  ;;  %v1585_v36 = vmul.f32 %v6484_v40, %v1537_v25 }
 0x27d   : > { %v1513_v23 = vsub.f32 %v1481_v52, %v1497_v3  ;;  %v1484_v41 = vmul.f32 0.00048828125, %v1468_v27  ;;  %v1485_v20 = vmul.f32 0.00048828125, %v1469_v47  ;;  %v1515_v18 = vsub.f32 %v1483_v39, %v1499_v24 }
 0x27e   : > { %v1559_v60 = vadd.f32 1e-05, %v1527_v50  ;;  %v1514_v2 = vsub.f32 %v1482_v6, %v1498_v13  ;;  %v1560_v15 = vadd.f32 1e-05, %v1528_v61  ;;  %v6486_v37 = vpop.eup %6485  ;;  %v1501_v17 = vmul.f32 %v7648_v44, %v7648_v44  ;;  %1601 = vst.msk [vmem:[#allocation2 + $0x8] sm:$0xff] %vm1212_vm1, %v1585_v36 }
 0x27f   : > { %v1529_v30 = vmax.f32 %v1513_v23, 0.0  ;;  %v1516_v59 = vsub.f32 %v1484_v41, %v1500_v35  ;;  %v6488_v28 = vpop.eup %6487  ;;  %v1586_v56 = vmul.f32 %v6486_v37, %v1538_v43  ;;  %v1531_v34 = vmax.f32 %v1515_v18, 0.0  ;;  %v1543_v23 = vld [vmem:[%s9626_s3 + $0x38] sm:$0xff] }
 0x280   : > { %6495 = vrsqrt.f32 %v1559_v60  ;;  %v1530_v49 = vmax.f32 %v1514_v2, 0.0  ;;  %v1470_v16 = vld [vmem:[#allocation2 + $0xf0] sm:$0xff]  ;;  %v1587_v26 = vmul.f32 %v6488_v28, %v1539_v58  ;;  %v1517_v54 = vsub.f32 %v1485_v20, %v1501_v17  ;;  %v1471_v50 = vld [vmem:[#allocation2 + $0xf8] sm:$0xff]  ;;  %v1616_v60 = vld [vmem:[%s9627_s4] sm:$0xff] }
 0x281   : > { %v1561_v31 = vadd.f32 1e-05, %v1529_v30  ;;  %6497 = vrsqrt.f32 %v1560_v15  ;;  %v1532_v10 = vmax.f32 %v1516_v59, 0.0  ;;  %1602 = vst.msk [vmem:[#allocation2 + $0x10] sm:$0xff] %vm1212_vm1, %v1586_v56  ;;  %v1563_v51 = vadd.f32 1e-05, %v1531_v34 }
 0x282   : > { %v1562_v0 = vadd.f32 1e-05, %v1530_v49  ;;  %v7672_v27 = vmul.f32 0.00048828125, %v1438_v46  ;;  %1603 = vst.msk [vmem:[#allocation2 + $0x18] sm:$0xff] %vm1212_vm1, %v1587_v26  ;;  %v1533_v21 = vmax.f32 %v1517_v54, 0.0  ;;  %v1486_v13 = vmul.f32 0.00048828125, %v1470_v16 }
 0x283   : > { %v6490_v29 = vpop.eup %6489  ;;  %6499 = vrsqrt.f32 %v1561_v31  ;;  %v1564_v45 = vadd.f32 1e-05, %v1532_v10  ;;  %v7678_v38 = vmul.f32 0.00048828125, %v1439_v4  ;;  %v1487_v25 = vmul.f32 0.00048828125, %v1471_v50  ;;  %v1617_v2 = vld [vmem:[%s9627_s4 + $0x8] sm:$0xff]  ;;  %v1618_v30 = vld [vmem:[%s9627_s4 + $0x10] sm:$0xff] }
 0x284   : > { %v6492_v19 = vpop.eup %6491  ;;  %v1588_v52 = vmul.f32 %v6490_v29, %v1540_v22  ;;  %6501 = vrsqrt.f32 %v1562_v0  ;;  %v1502_v47 = vmul.f32 %v7672_v27, %v7672_v27  ;;  %v1565_v41 = vadd.f32 1e-05, %v1533_v21  ;;  %v1620_v20 = vld [vmem:[%s9627_s4 + $0x20] sm:$0xff]  ;;  %v1545_v22 = vld [vmem:[%s9626_s3 + $0x48] sm:$0xff]  ;;  %v1622_v17 = vld [vmem:[%s9627_s4 + $0x30] sm:$0xff] }
 0x285   : > { %v6494_v3 = vpop.eup %6493  ;;  %v1589_v6 = vmul.f32 %v6492_v19, %v1541_v14  ;;  %6503 = vrsqrt.f32 %v1563_v51  ;;  %v1632_v61 = vmul.f32 %v1584_v12, %v7592_v63  ;;  %v1503_v62 = vmul.f32 %v7678_v38, %v7678_v38  ;;  %v1619_v63 = vld [vmem:[%s9627_s4 + $0x18] sm:$0xff]  ;;  %v1546_v28 = vld [vmem:[%s9626_s3 + $0x50] sm:$0xff] }
 0x286   : > { %1604 = vst.msk [vmem:[#allocation2 + $0x20] sm:$0xff] %vm1212_vm1, %v1588_v52  ;;  %v1590_v39 = vmul.f32 %v6494_v3, %v1542_v32  ;;  %6505 = vrsqrt.f32 %v1564_v45  ;;  %v1518_v24 = vsub.f32 %v1486_v13, %v1502_v47  ;;  %v1633_v43 = vmul.f32 %v1585_v36, %v7594_v11  ;;  %v1621_v36 = vld [vmem:[%s9627_s4 + $0x28] sm:$0xff]  ;;  %v1626_v21 = vld [vmem:[%s9627_s4 + $0x50] sm:$0xff] }
 0x287   : > { %1605 = vst.msk [vmem:[#allocation2 + $0x28] sm:$0xff] %vm1212_vm1, %v1589_v6  ;;  %v1634_v35 = vmul.f32 %v1586_v56, %v7598_v7  ;;  %6507 = vrsqrt.f32 %v1565_v41  ;;  %v1648_v12 = vsub.f32 %v1616_v60, %v1632_v61  ;;  %v1635_v58 = vmul.f32 %v1587_v26, %v7602_v8  ;;  %v1544_v7 = vld [vmem:[%s9626_s3 + $0x40] sm:$0xff]  ;;  %v1625_v3 = vld [vmem:[%s9627_s4 + $0x48] sm:$0xff] }
 0x288   : > { %1606 = vst.msk [vmem:[#allocation2 + $0x30] sm:$0xff] %vm1212_vm1, %v1590_v39  ;;  %v1636_v11 = vmul.f32 %v1588_v52, %v7606_v1  ;;  %v1534_v49 = vmax.f32 %v1518_v24, 0.0  ;;  %v1519_v18 = vsub.f32 %v1487_v25, %v1503_v62  ;;  %v1649_v37 = vsub.f32 %v1617_v2, %v1633_v43  ;;  %v1548_v52 = vld [vmem:[%s9626_s3 + $0x60] sm:$0xff] }
 0x289   : > { %1664 = vst.msk [vmem:[#allocation2 + $0x80] sm:$0xff] %vm1212_vm1, %v1648_v12  ;;  %v1650_v8 = vsub.f32 %v1618_v30, %v1634_v35  ;;  %v1651_v1 = vsub.f32 %v1619_v63, %v1635_v58  ;;  %v1637_v59 = vmul.f32 %v1589_v6, %v7610_v42  ;;  %v1638_v0 = vmul.f32 %v1590_v39, %v7614_v53  ;;  %v1623_v42 = vld [vmem:[%s9627_s4 + $0x38] sm:$0xff]  ;;  %v1549_v39 = vld [vmem:[%s9626_s3 + $0x68] sm:$0xff]  ;;  %v1628_v24 = vld [vmem:[%s9627_s4 + $0x60] sm:$0xff] }
 0x28a   : > { %v6496_v40 = vpop.eup %6495  ;;  %v1652_v31 = vsub.f32 %v1620_v20, %v1636_v11  ;;  %v1566_v56 = vadd.f32 1e-05, %v1534_v49  ;;  %v1535_v14 = vmax.f32 %v1519_v18, 0.0  ;;  %1665 = vst.msk [vmem:[#allocation2 + $0x88] sm:$0xff] %vm1212_vm1, %v1649_v37  ;;  %v1547_v53 = vld [vmem:[%s9626_s3 + $0x58] sm:$0xff]  ;;  %v1629_v30 = vld [vmem:[%s9627_s4 + $0x68] sm:$0xff] }
 0x28b   : > { %v1591_v15 = vmul.f32 %v6496_v40, %v1543_v23  ;;  %v6498_v46 = vpop.eup %6497  ;;  %1666 = vst.msk [vmem:[#allocation2 + $0x90] sm:$0xff] %vm1212_vm1, %v1650_v8  ;;  %1667 = vst.msk [vmem:[#allocation2 + $0x98] sm:$0xff] %vm1212_vm1, %v1651_v1  ;;  %v1653_v26 = vsub.f32 %v1621_v36, %v1637_v59  ;;  %v1654_v4 = vsub.f32 %v1622_v17, %v1638_v0  ;;  %v1630_v11 = vld [vmem:[%s9627_s4 + $0x70] sm:$0xff] }
 0x28c   : > { %v1592_v29 = vmul.f32 %v6498_v46, %v1544_v7  ;;  %1668 = vst.msk [vmem:[#allocation2 + $0xa0] sm:$0xff] %vm1212_vm1, %v1652_v31  ;;  %6509 = vrsqrt.f32 %v1566_v56  ;;  %v1567_v54 = vadd.f32 1e-05, %v1535_v14  ;;  %v1631_v7 = vld [vmem:[%s9627_s4 + $0x78] sm:$0xff] }
 0x28d   : > { %1607 = vst.msk [vmem:[#allocation2 + $0x38] sm:$0xff] %vm1212_vm1, %v1591_v15  ;;  %v1639_v34 = vmul.f32 %v1591_v15, %v7620_v5  ;;  %v6500_v16 = vpop.eup %6499  ;;  %v1624_v5 = vld [vmem:[%s9627_s4 + $0x40] sm:$0xff]  ;;  %1669 = vst.msk [vmem:[#allocation2 + $0xa8] sm:$0xff] %vm1212_vm1, %v1653_v26 }
 0x28e   : > { %v6502_v32 = vpop.eup %6501  ;;  %v1593_v10 = vmul.f32 %v6500_v16, %v1545_v22  ;;  %1608 = vst.msk [vmem:[#allocation2 + $0x40] sm:$0xff] %vm1212_vm1, %v1592_v29  ;;  %v1640_v50 = vmul.f32 %v1592_v29, %v7624_v9  ;;  %6511 = vrsqrt.f32 %v1567_v54  ;;  %1670 = vst.msk [vmem:[#allocation2 + $0xb0] sm:$0xff] %vm1212_vm1, %v1654_v4 }
 0x28f   : > { %v1594_v19 = vmul.f32 %v6502_v32, %v1546_v28  ;;  %v1655_v51 = vsub.f32 %v1623_v42, %v1639_v34  ;;  %v6504_v6 = vpop.eup %6503 }
 0x290   : > { %1609 = vst.msk [vmem:[#allocation2 + $0x48] sm:$0xff] %vm1212_vm1, %v1593_v10  ;;  %v1641_v45 = vmul.f32 %v1593_v10, %v7626_v57  ;;  %v6506_v13 = vpop.eup %6505  ;;  %v1595_v9 = vmul.f32 %v6504_v6, %v1547_v53  ;;  %v1656_v47 = vsub.f32 %v1624_v5, %v1640_v50  ;;  %v1627_v57 = vld [vmem:[%s9627_s4 + $0x58] sm:$0xff] }
 0x291   : > { %1610 = vst.msk [vmem:[#allocation2 + $0x50] sm:$0xff] %vm1212_vm1, %v1594_v19  ;;  %1671 = vst.msk [vmem:[#allocation2 + $0xb8] sm:$0xff] %vm1212_vm1, %v1655_v51  ;;  %v1642_v60 = vmul.f32 %v1594_v19, %v7630_v33  ;;  %v1596_v23 = vmul.f32 %v6506_v13, %v1548_v52  ;;  %v6508_v25 = vpop.eup %6507 }
 0x292   : > { %v1657_v41 = vsub.f32 %v1625_v3, %v1641_v45  ;;  %1611 = vst.msk [vmem:[#allocation2 + $0x58] sm:$0xff] %vm1212_vm1, %v1595_v9  ;;  %1672 = vst.msk [vmem:[#allocation2 + $0xc0] sm:$0xff] %vm1212_vm1, %v1656_v47  ;;  %v1643_v2 = vmul.f32 %v1595_v9, %v7636_v55  ;;  %v1597_v33 = vmul.f32 %v6508_v25, %v1549_v39  ;;  %v1550_v55 = vld [vmem:[%s9626_s3 + $0x70] sm:$0xff] }
 0x293   : > { %v1658_v61 = vsub.f32 %v1626_v21, %v1642_v60  ;;  %1612 = vst.msk [vmem:[#allocation2 + $0x60] sm:$0xff] %vm1212_vm1, %v1596_v23  ;;  %v1644_v62 = vmul.f32 %v1596_v23, %v7641_v48  ;;  %v1551_v48 = vld [vmem:[%s9626_s3 + $0x78] sm:$0xff] }
 0x294   : > { %1673 = vst.msk [vmem:[#allocation2 + $0xc8] sm:$0xff] %vm1212_vm1, %v1657_v41  ;;  %v1659_v43 = vsub.f32 %v1627_v57, %v1643_v2  ;;  %1613 = vst.msk [vmem:[#allocation2 + $0x68] sm:$0xff] %vm1212_vm1, %v1597_v33  ;;  %v1645_v63 = vmul.f32 %v1597_v33, %v7648_v44 }
 0x295   : > { %1674 = vst.msk [vmem:[#allocation2 + $0xd0] sm:$0xff] %vm1212_vm1, %v1658_v61  ;;  %v1660_v35 = vsub.f32 %v1628_v24, %v1644_v62 }
 0x296   : > { %1675 = vst.msk [vmem:[#allocation2 + $0xd8] sm:$0xff] %vm1212_vm1, %v1659_v43  ;;  %v6510_v20 = vpop.eup %6509  ;;  %v1661_v40 = vsub.f32 %v1629_v30, %v1645_v63 }
 0x297   : > { %1676 = vst.msk [vmem:[#allocation2 + $0xe0] sm:$0xff] %vm1212_vm1, %v1660_v35  ;;  %v1598_v12 = vmul.f32 %v6510_v20, %v1550_v55 }
 0x298   : > { %v6512_v58 = vpop.eup %6511  ;;  %1677 = vst.msk [vmem:[#allocation2 + $0xe8] sm:$0xff] %vm1212_vm1, %v1661_v40 }
 0x299   : > { %1614 = vst.msk [vmem:[#allocation2 + $0x70] sm:$0xff] %vm1212_vm1, %v1598_v12  ;;  %v1599_v44 = vmul.f32 %v6512_v58, %v1551_v48  ;;  %v1646_v15 = vmul.f32 %v1598_v12, %v7672_v27 }
 0x29b   : > { %1615 = vst.msk [vmem:[#allocation2 + $0x78] sm:$0xff] %vm1212_vm1, %v1599_v44  ;;  %v1662_v49 = vsub.f32 %v1630_v11, %v1646_v15  ;;  %v1647_v18 = vmul.f32 %v1599_v44, %v7678_v38 }
 0x29d   : > { %1678 = vst.msk [vmem:[#allocation2 + $0xf0] sm:$0xff] %vm1212_vm1, %v1662_v49  ;;  %v1663_v37 = vsub.f32 %v1631_v7, %v1647_v18 }
 0x29f   : > { %1679 = vst.msk [vmem:[#allocation2 + $0xf8] sm:$0xff] %vm1212_vm1, %v1663_v37 }
 0x2a0 PF: > { %p6319_p4 = scmp.ne.s32.totalorder %s6687_s23, 1 }
 0x2a1   : > { %v9803_v27 = vld [vmem:[#allocation12_spill] sm:$0xff] (!%p6319_p4)  ;;  %v9804_v36 = vld [vmem:[#allocation14_spill] sm:$0xff] (!%p6319_p4)  ;;  %v2070_v22 = vld [vmem:[#allocation2] sm:$0xff] (!%p6319_p4)  ;;  %v6711_v31 = vmov (!%p6319_p4), 0   ;;  %s9835_s22 = sld [smem:[#allocation65_spill]] (!%p6319_p4) }
 0x2a2   : > { %1683 = sbr.rel (%p6319_p4) target bundleno = 1452 (0x5ac), region = 100  ;;  %1844 = vmatprep.subr.bf16.mxu0 (!%p6319_p4), %v9803_v27  ;;  %1957 = vmatprep.subr.bf16.mxu1 (!%p6319_p4), %v9804_v36  ;;  %v1700_v8 = vld [vmem:[%s9625_s2] sm:$0xff] (!%p6319_p4)  ;;  %v9806_v1 = vld [vmem:[#allocation13_spill] sm:$0xff] (!%p6319_p4)  ;;  %v9807_v59 = vld [vmem:[#allocation16_spill] sm:$0xff] (!%p6319_p4) }
 0x2a3   : > { %v9805_v38 = vld [vmem:[#allocation11_spill] sm:$0xff] (!%p6319_p4)  ;;  %1958 = vmatpush1.bf16.msra.mxu1 (!%p6319_p4), %v9806_v1  ;;  %6514 = vset.pattern.permute.xlu1 (!%p6319_p4), %v6711_v31  ;;  %v9808_v17 = vld [vmem:[#allocation18_spill] sm:$0xff] (!%p6319_p4)  ;;  %v2071_v46 = vld [vmem:[#allocation2 + $0x8] sm:$0xff] (!%p6319_p4) }
 0x2a4   : > { %1845 = vmatpush1.bf16.msra.mxu0 (!%p6319_p4), %v9805_v38  ;;  %6513 = vset.pattern.permute.xlu0 (!%p6319_p4), %v6711_v31  ;;  %v1701_v28 = vld [vmem:[%s9625_s2 + $0x8] sm:$0xff] (!%p6319_p4)  ;;  %v9809_v56 = vld [vmem:[#allocation15_spill] sm:$0xff] (!%p6319_p4)  ;;  %v9810_v14 = vld [vmem:[#allocation17_spill] sm:$0xff] (!%p6319_p4) }
 0x2a5   : > { %2088 = vperm.xlu1 (!%p6319_p4), %6514, %v2070_v22   ;;  %1718 = vperm.xlu0 (!%p6319_p4), %6513, %v1700_v8   ;;  %v9811_v0 = vld [vmem:[#allocation20_spill] sm:$0xff] (!%p6319_p4)  ;;  %v9812_v42 = vld [vmem:[#allocation22_spill] sm:$0xff] (!%p6319_p4)  ;;  %v1702_v16 = vld [vmem:[%s9625_s2 + $0x10] sm:$0xff] (!%p6319_p4) }
 0x2a6   : > { %1846 = vmatprep.subr.bf16.mxu0 (!%p6319_p4), %v9807_v59  ;;  %1959 = vmatprep.subr.bf16.mxu1 (!%p6319_p4), %v9808_v17  ;;  %v1703_v34 = vld [vmem:[%s9625_s2 + $0x18] sm:$0xff] (!%p6319_p4)  ;;  %v9813_v29 = vld [vmem:[#allocation19_spill] sm:$0xff] (!%p6319_p4)  ;;  %v9814_v26 = vld [vmem:[#allocation21_spill] sm:$0xff] (!%p6319_p4) }
 0x2a7   : > { %1960 = vmatpush1.bf16.msra.mxu1 (!%p6319_p4), %v9810_v14  ;;  %1876 = vmatprep.mubr.bf16.mxu0 (!%p6319_p4), %v6711_v31  ;;  %v9815_v32 = vld [vmem:[#allocation24_spill] sm:$0xff] (!%p6319_p4)  ;;  %v9816_v10 = vld [vmem:[#allocation26_spill] sm:$0xff] (!%p6319_p4)  ;;  %v2231_v54 = vld [vmem:[#allocation2 + $0x80] sm:$0xff] (!%p6319_p4) }
 0x2a8   : > { %1847 = vmatpush1.bf16.msra.mxu0 (!%p6319_p4), %v9809_v56  ;;  %1961 = vmatprep.subr.bf16.mxu1 (!%p6319_p4), %v9812_v42  ;;  %v2232_v53 = vld [vmem:[#allocation2 + $0x88] sm:$0xff] (!%p6319_p4)  ;;  %v9817_v4 = vld [vmem:[#allocation23_spill] sm:$0xff] (!%p6319_p4)  ;;  %v9818_v5 = vld [vmem:[#allocation25_spill] sm:$0xff] (!%p6319_p4) }
 0x2a9   : > { %1848 = vmatprep.subr.bf16.mxu0 %v9811_v0  ;;  %2093 = vperm.xlu1 %6514, %v2071_v46   ;;  %v9819_v19 = vld [vmem:[#allocation28_spill] sm:$0xff]  ;;  %v9820_v52 = vld [vmem:[#allocation30_spill] sm:$0xff]  ;;  %v2072_v50 = vld [vmem:[#allocation2 + $0x10] sm:$0xff]  ;;  %vm2715_vm2 = vcmask (!%p6937_p9), 7168  }
 0x2aa   : > { %1723 = vperm.xlu0 %6513, %v1701_v28   ;;  %1989 = vmatprep.mubr.bf16.mxu1 %v6711_v31  ;;  %v2073_v51 = vld [vmem:[#allocation2 + $0x18] sm:$0xff]  ;;  %v9821_v3 = vld [vmem:[#allocation27_spill] sm:$0xff]  ;;  %v9822_v6 = vld [vmem:[#allocation29_spill] sm:$0xff] }
 0x2ab   : > { %1962 = vmatpush1.bf16.msra.mxu1 %v9814_v26  ;;  %v9823_v45 = vld [vmem:[#allocation32_spill] sm:$0xff]  ;;  %v9824_v21 = vld [vmem:[#allocation34_spill] sm:$0xff]  ;;  %v1704_v9 = vld [vmem:[%s9625_s2 + $0x20] sm:$0xff] }
 0x2ac   : > { %1849 = vmatpush1.bf16.msra.mxu0 %v9813_v29  ;;  %1963 = vmatprep.subr.bf16.mxu1 %v9816_v10  ;;  %v1705_v13 = vld [vmem:[%s9625_s2 + $0x28] sm:$0xff]  ;;  %v9825_v39 = vld [vmem:[#allocation31_spill] sm:$0xff]  ;;  %v9826_v47 = vld [vmem:[#allocation33_spill] sm:$0xff] }
 0x2ad   : > { %1850 = vmatprep.subr.bf16.mxu0 %v9815_v32  ;;  %1733 = vperm.xlu1 %6514, %v1703_v34   ;;  %v9827_v60 = vld [vmem:[#allocation36_spill] sm:$0xff]  ;;  %v9828_v23 = vld [vmem:[#allocation38_spill] sm:$0xff]  ;;  %v2233_v57 = vld [vmem:[#allocation2 + $0x90] sm:$0xff] }
 0x2ae   : > { %1728 = vperm.xlu0 %6513, %v1702_v16   ;;  %v2234_v41 = vld [vmem:[#allocation2 + $0x98] sm:$0xff]  ;;  %v9829_v25 = vld [vmem:[#allocation35_spill] sm:$0xff]  ;;  %v9830_v61 = vld [vmem:[#allocation37_spill] sm:$0xff] }
 0x2af   : > { %1964 = vmatpush1.bf16.msra.mxu1 %v9818_v5  ;;  %v9831_v2 = vld [vmem:[#allocation40_spill] sm:$0xff]  ;;  %v9832_v24 = vld [vmem:[#allocation42_spill] sm:$0xff]  ;;  %v2074_v62 = vld [vmem:[#allocation2 + $0x20] sm:$0xff] }
 0x2b0   : > { %1851 = vmatpush1.bf16.msra.mxu0 %v9817_v4  ;;  %1965 = vmatprep.subr.bf16.mxu1 %v9820_v52  ;;  %v2075_v33 = vld [vmem:[#allocation2 + $0x28] sm:$0xff]  ;;  %v6515_v43 = vld [vmem:[%s9624_s1] sm:$0xff]   ;;  %v9834_v55 = vld [vmem:[#allocation41_spill] sm:$0xff] }
 0x2b1   : > { %1852 = vmatprep.subr.bf16.mxu0 %v9819_v19  ;;  %2254 = vperm.xlu1 %6514, %v2232_v53   ;;  %v9833_v30 = vld [vmem:[#allocation39_spill] sm:$0xff]  ;;  %v1707_v35 = vld [vmem:[%s9625_s2 + $0x38] sm:$0xff]  ;;  %v1706_v63 = vld [vmem:[%s9625_s2 + $0x30] sm:$0xff] }
 0x2b2   : > { %2249 = vperm.xlu0 %6513, %v2231_v54   ;;  %v2236_v20 = vld [vmem:[#allocation2 + $0xa8] sm:$0xff]  ;;  %v2235_v48 = vld [vmem:[#allocation2 + $0xa0] sm:$0xff]  ;;  %v2077_v12 = vld [vmem:[#allocation2 + $0x38] sm:$0xff] }
 0x2b3   : > { %1966 = vmatpush1.bf16.msra.mxu1 %v9822_v6  ;;  %v6516_v40 = vld [vmem:[%s9624_s1 + $0x8] sm:$0xff]   ;;  %v2076_v58 = vld [vmem:[#allocation2 + $0x30] sm:$0xff]  ;;  %v1708_v44 = vld [vmem:[%s9625_s2 + $0x40] sm:$0xff] }
 0x2b4   : > { %1853 = vmatpush1.bf16.msra.mxu0 %v9821_v3  ;;  %1967 = vmatprep.subr.bf16.mxu1 %v9824_v21  ;;  %v1709_v11 = vld [vmem:[%s9625_s2 + $0x48] sm:$0xff]  ;;  %v6517_v15 = vld [vmem:[%s9624_s1 + $0x10] sm:$0xff]   ;;  %v2238_v7 = vld [vmem:[#allocation2 + $0xb8] sm:$0xff] }
 0x2b5   : > { %1854 = vmatprep.subr.bf16.mxu0 %v9823_v45  ;;  %2103 = vperm.xlu1 %6514, %v2073_v51   ;;  %v2237_v49 = vld [vmem:[#allocation2 + $0xb0] sm:$0xff]  ;;  %v2079_v18 = vld [vmem:[#allocation2 + $0x48] sm:$0xff]  ;;  %v2078_v37 = vld [vmem:[#allocation2 + $0x40] sm:$0xff] }
 0x2b6   : > { %2098 = vperm.xlu0 %6513, %v2072_v50   ;;  %v6518_v27 = vld [vmem:[%s9624_s1 + $0x18] sm:$0xff]   ;;  %v1710_v22 = vld [vmem:[%s9625_s2 + $0x50] sm:$0xff]  ;;  %v2240_v8 = vld [vmem:[#allocation2 + $0xc8] sm:$0xff] }
 0x2b7   : > { %1968 = vmatpush1.bf16.msra.mxu1 %v9826_v47  ;;  %v1711_v36 = vld [vmem:[%s9625_s2 + $0x58] sm:$0xff]  ;;  %v2239_v38 = vld [vmem:[#allocation2 + $0xc0] sm:$0xff]  ;;  %v2080_v17 = vld [vmem:[#allocation2 + $0x50] sm:$0xff] }
 0x2b8   : > { %1855 = vmatpush1.bf16.msra.mxu0 %v9825_v39  ;;  %1969 = vmatprep.subr.bf16.mxu1 %v9828_v23  ;;  %v6519_v1 = vld [vmem:[%s9624_s1 + $0x20] sm:$0xff]   ;;  %v2081_v59 = vld [vmem:[#allocation2 + $0x58] sm:$0xff]  ;;  %v1713_v46 = vld [vmem:[%s9625_s2 + $0x68] sm:$0xff] }
 0x2b9   : > { %1856 = vmatprep.subr.bf16.mxu0 %v9827_v60  ;;  %1743 = vperm.xlu1 %6514, %v1705_v13   ;;  %v1712_v28 = vld [vmem:[%s9625_s2 + $0x60] sm:$0xff]  ;;  %v6520_v56 = vld [vmem:[%s9624_s1 + $0x28] sm:$0xff]   ;;  %v2242_v14 = vld [vmem:[#allocation2 + $0xd8] sm:$0xff] }
 0x2ba   : > { %1738 = vperm.xlu0 %6513, %v1704_v9   ;;  %v2241_v0 = vld [vmem:[#allocation2 + $0xd0] sm:$0xff]  ;;  %v2083_v42 = vld [vmem:[#allocation2 + $0x68] sm:$0xff]  ;;  %v2082_v34 = vld [vmem:[#allocation2 + $0x60] sm:$0xff] }
 0x2bb   : > { %1970 = vmatpush1.bf16.msra.mxu1 %v9830_v61  ;;  %v6521_v16 = vld [vmem:[%s9624_s1 + $0x30] sm:$0xff]   ;;  %v1715_v29 = vld [vmem:[%s9625_s2 + $0x78] sm:$0xff]  ;;  %v2244_v32 = vld [vmem:[#allocation2 + $0xe8] sm:$0xff] }
 0x2bc   : > { %1857 = vmatpush1.bf16.msra.mxu0 %v9829_v25  ;;  %1971 = vmatprep.subr.bf16.mxu1 %v9832_v24  ;;  %v1714_v26 = vld [vmem:[%s9625_s2 + $0x70] sm:$0xff]  ;;  %v2243_v10 = vld [vmem:[#allocation2 + $0xe0] sm:$0xff]  ;;  %v6522_v53 = vld [vmem:[%s9624_s1 + $0x38] sm:$0xff]  }
 0x2bd   : > { %1858 = vmatprep.subr.bf16.mxu0 %v9831_v2  ;;  %2264 = vperm.xlu1 %6514, %v2234_v41   ;;  %v2085_v54 = vld [vmem:[#allocation2 + $0x78] sm:$0xff]  ;;  %v2084_v4 = vld [vmem:[#allocation2 + $0x70] sm:$0xff]  ;;  %v2496_v52 = vld [vmem:[%s9629_s6 + $0x8] sm:$0xff] }
 0x2be   : > { %2259 = vperm.xlu0 %6513, %v2233_v57   ;;  %v2246_v5 = vld [vmem:[#allocation2 + $0xf8] sm:$0xff]  ;;  %v2245_v19 = vld [vmem:[#allocation2 + $0xf0] sm:$0xff]  ;;  %v2495_v51 = vld [vmem:[%s9629_s6] sm:$0xff] }
 0x2bf   : > { %1972 = vmatpush1.bf16.msra.mxu1 %v9834_v55  ;;  %v2498_v50 = vld [vmem:[%s9629_s6 + $0x18] sm:$0xff]  ;;  %v2497_v3 = vld [vmem:[%s9629_s6 + $0x10] sm:$0xff]  ;;  %v2500_v6 = vld [vmem:[%s9629_s6 + $0x28] sm:$0xff] }
 0x2c0   : > { %1859 = vmatpush1.bf16.msra.mxu0 %v9833_v30  ;;  %v2499_v45 = vld [vmem:[%s9629_s6 + $0x20] sm:$0xff]  ;;  %v2502_v21 = vld [vmem:[%s9629_s6 + $0x38] sm:$0xff]  ;;  %v2501_v13 = vld [vmem:[%s9629_s6 + $0x30] sm:$0xff] }
 0x2c1   : > { %2113 = vperm.xlu1 %6514, %v2075_v33  }
 0x2c2   : > { %2108 = vperm.xlu0 %6513, %v2074_v62   ;;  %1990 = vmatmul.mubr.bf16.vlgmr.msra.gmra.mrb[0].mxu1 %v6515_v43 }
 0x2c3   : > { %1877 = vmatmul.mubr.bf16.vlgmr.msra.gmra.mrb[0].mxu0 %v6515_v43  ;;  %1999 = vmatprep.mubr.bf16.mxu1 %v6711_v31 }
 0x2c4   : > { %1886 = vmatprep.mubr.bf16.mxu0 %v6711_v31 }
 0x2c5   : > { %1753 = vperm.xlu1 %6514, %v1707_v35  }
 0x2c6   : > { %1748 = vperm.xlu0 %6513, %v1706_v63  }
 0x2c9   : > { %2274 = vperm.xlu1 %6514, %v2236_v20  }
 0x2ca   : > { %2269 = vperm.xlu0 %6513, %v2235_v48   ;;  %2000 = vmatmul.mubr.bf16.gmra.mrb[4].mxu1 %v6516_v40 }
 0x2cb   : > { %1887 = vmatmul.mubr.bf16.gmra.mrb[4].mxu0 %v6516_v40  ;;  %2009 = vmatprep.mubr.bf16.mxu1 %v6711_v31 }
 0x2cc   : > { %1896 = vmatprep.mubr.bf16.mxu0 %v6711_v31 }
 0x2cd   : > { %2123 = vperm.xlu1 %6514, %v2077_v12  }
 0x2ce   : > { %2118 = vperm.xlu0 %6513, %v2076_v58  }
 0x2d1   : > { %1763 = vperm.xlu1 %6514, %v1709_v11  }
 0x2d2   : > { %1758 = vperm.xlu0 %6513, %v1708_v44   ;;  %2010 = vmatmul.mubr.bf16.gmra.mrb[8].mxu1 %v6517_v15 }
 0x2d3   : > { %1897 = vmatmul.mubr.bf16.gmra.mrb[8].mxu0 %v6517_v15  ;;  %2019 = vmatprep.mubr.bf16.mxu1 %v6711_v31 }
 0x2d4   : > { %1906 = vmatprep.mubr.bf16.mxu0 %v6711_v31 }
 0x2d5   : > { %2284 = vperm.xlu1 %6514, %v2238_v7  }
 0x2d6   : > { %2279 = vperm.xlu0 %6513, %v2237_v49  }
 0x2d9   : > { %2133 = vperm.xlu1 %6514, %v2079_v18  }
 0x2da   : > { %2128 = vperm.xlu0 %6513, %v2078_v37   ;;  %2020 = vmatmul.mubr.bf16.gmra.mrb[12].mxu1 %v6518_v27 }
 0x2db   : > { %1907 = vmatmul.mubr.bf16.gmra.mrb[12].mxu0 %v6518_v27  ;;  %2029 = vmatprep.mubr.bf16.mxu1 %v6711_v31 }
 0x2dc   : > { %1916 = vmatprep.mubr.bf16.mxu0 %v6711_v31 }
 0x2dd   : > { %1773 = vperm.xlu1 %6514, %v1711_v36  }
 0x2de   : > { %1768 = vperm.xlu0 %6513, %v1710_v22  }
 0x2e1   : > { %2294 = vperm.xlu1 %6514, %v2240_v8  }
 0x2e2   : > { %2289 = vperm.xlu0 %6513, %v2239_v38   ;;  %2030 = vmatmul.mubr.bf16.gmra.mrb[16].mxu1 %v6519_v1 }
 0x2e3   : > { %1917 = vmatmul.mubr.bf16.gmra.mrb[16].mxu0 %v6519_v1  ;;  %2039 = vmatprep.mubr.bf16.mxu1 %v6711_v31 }
 0x2e4   : > { %1926 = vmatprep.mubr.bf16.mxu0 %v6711_v31 }
 0x2e5   : > { %2143 = vperm.xlu1 %6514, %v2081_v59  }
 0x2e6   : > { %2138 = vperm.xlu0 %6513, %v2080_v17  }
 0x2e9   : > { %1783 = vperm.xlu1 %6514, %v1713_v46  }
 0x2ea   : > { %1778 = vperm.xlu0 %6513, %v1712_v28   ;;  %2040 = vmatmul.mubr.bf16.gmra.mrb[20].mxu1 %v6520_v56 }
 0x2eb   : > { %1927 = vmatmul.mubr.bf16.gmra.mrb[20].mxu0 %v6520_v56  ;;  %2049 = vmatprep.mubr.bf16.mxu1 %v6711_v31 }
 0x2ec   : > { %1936 = vmatprep.mubr.bf16.mxu0 %v6711_v31 }
 0x2ed   : > { %2304 = vperm.xlu1 %6514, %v2242_v14  }
 0x2ee   : > { %2299 = vperm.xlu0 %6513, %v2241_v0  }
 0x2f1   : > { %2153 = vperm.xlu1 %6514, %v2083_v42  }
 0x2f2   : > { %2148 = vperm.xlu0 %6513, %v2082_v34   ;;  %2050 = vmatmul.mubr.bf16.gmra.mrb[24].mxu1 %v6521_v16 }
 0x2f3   : > { %1937 = vmatmul.mubr.bf16.gmra.mrb[24].mxu0 %v6521_v16  ;;  %2059 = vmatprep.mubr.bf16.mxu1 %v6711_v31 }
 0x2f4   : > { %1946 = vmatprep.mubr.bf16.mxu0 %v6711_v31 }
 0x2f5   : > { %1793 = vperm.xlu1 %6514, %v1715_v29  }
 0x2f6   : > { %1788 = vperm.xlu0 %6513, %v1714_v26  }
 0x2f9   : > { %2314 = vperm.xlu1 %6514, %v2244_v32  }
 0x2fa   : > { %2309 = vperm.xlu0 %6513, %v2243_v10   ;;  %2060 = vmatmul.mubr.bf16.gmra.mrb[28].mxu1 %v6522_v53 }
 0x2fb   : > { %1947 = vmatmul.mubr.bf16.gmra.mrb[28].mxu0 %v6522_v53  ;;  %2672 = vmatprep.mubr.bf16.mxu1 %v6711_v31 }
 0x2fc   : > { %2599 = vmatprep.mubr.bf16.mxu0 %v6711_v31 }
 0x2fd   : > { %2163 = vperm.xlu1 %6514, %v2085_v54  }
 0x2fe   : > { %2158 = vperm.xlu0 %6513, %v2084_v4  }
 0x301   : > { %2324 = vperm.xlu1 %6514, %v2246_v5  }
 0x302   : > { %2319 = vperm.xlu0 %6513, %v2245_v19  }
 0x305   : > { %2510 = vperm.xlu1 %6514, %v2496_v52  }
 0x306   : > { %2505 = vperm.xlu0 %6513, %v2495_v51  }
 0x309   : > { %2520 = vperm.xlu1 %6514, %v2498_v50  }
 0x30a   : > { %2515 = vperm.xlu0 %6513, %v2497_v3  }
 0x30d   : > { %2530 = vperm.xlu1 %6514, %v2500_v6  }
 0x30e   : > { %2525 = vperm.xlu0 %6513, %v2499_v45  }
 0x311   : > { %2540 = vperm.xlu1 %6514, %v2502_v21  }
 0x312   : > { %2535 = vperm.xlu0 %6513, %v2501_v13  }
 0x324   : > { %v2089_v9 = vpop.permute.xlu1 %2088  ;;  %v1719_v39 = vpop.permute.xlu0 %1718 }
 0x328   : > { %v2094_v47 = vpop.permute.xlu1 %2093 }
 0x329   : > { %v1724_v60 = vpop.permute.xlu0 %1723 }
 0x32c   : > { %v7949_v23 = vpop.permute.xlu1 %1733 }
 0x32d   : > { %v7951_v41 = vpop.permute.xlu0 %1728 }
 0x330   : > { %v2255_v57 = vpop.permute.xlu1 %2254 }
 0x331   : > { %v2250_v25 = vpop.permute.xlu0 %2249 }
 0x334   : > { %v7953_v61 = vpop.permute.xlu1 %2103 }
 0x335   : > { %v7955_v2 = vpop.permute.xlu0 %2098 }
 0x338   : > { %v7957_v24 = vpop.permute.xlu1 %1743 }
 0x339   : > { %v7959_v33 = vpop.permute.xlu0 %1738 }
 0x33c   : > { %v7961_v62 = vpop.permute.xlu1 %2264 }
 0x33d   : > { %v7963_v43 = vpop.permute.xlu0 %2259 }
 0x340   : > { %v7965_v30 = vpop.permute.xlu1 %2113 }
 0x341   : > { %v7967_v55 = vpop.permute.xlu0 %2108 }
 0x344   : > { %v7969_v35 = vpop.permute.xlu1 %1753 }
 0x345   : > { %v7971_v63 = vpop.permute.xlu0 %1748 }
 0x348   : > { %v7973_v20 = vpop.permute.xlu1 %2274 }
 0x349   : > { %v7975_v48 = vpop.permute.xlu0 %2269 }
 0x34c   : > { %v7977_v40 = vpop.permute.xlu1 %2123 }
 0x34d   : > { %v7979_v12 = vpop.permute.xlu0 %2118 }
 0x350   : > { %v7981_v58 = vpop.permute.xlu1 %1763 }
 0x351   : > { %v7983_v11 = vpop.permute.xlu0 %1758 }
 0x354   : > { %v7985_v44 = vpop.permute.xlu1 %2284 }
 0x355   : > { %v7987_v15 = vpop.permute.xlu0 %2279 }
 0x358   : > { %v7989_v7 = vpop.permute.xlu1 %2133 }
 0x359   : > { %v7991_v49 = vpop.permute.xlu0 %2128 }
 0x35c   : > { %v7993_v18 = vpop.permute.xlu1 %1773 }
 0x35d   : > { %v7995_v37 = vpop.permute.xlu0 %1768 }
 0x360   : > { %v7997_v51 = vpop.permute.xlu1 %2294 }
 0x361   : > { %v7999_v50 = vpop.permute.xlu0 %2289 }
 0x395   : > { %v1991_v36 = vpop.f32.mrb[0].mxu1 }
 0x396   : > { %v1878_v27 = vpop.f32.mrb[0].mxu0  ;;  %v1992_v8 = vadd.f32 %v1991_v36, %v1719_v39  ;;  %v1993_v1 = vpop.f32.mrb[1].mxu1 }
 0x397   : > { %v1879_v22 = vadd.f32 %v1878_v27, %v1719_v39  ;;  %v1880_v38 = vpop.f32.mrb[1].mxu0  ;;  %v1994_v17 = vadd.f32 %v1993_v1, %v1719_v39  ;;  %v1995_v28 = vpop.f32.mrb[2].mxu1 }
 0x398   : > { %v1881_v59 = vadd.f32 %v1880_v38, %v1719_v39  ;;  %v1882_v46 = vpop.f32.mrb[2].mxu0  ;;  %v2168_v14 = vmul.f32 %v2089_v9, %v1992_v8  ;;  %v1996_v42 = vadd.f32 %v1995_v28, %v1724_v60  ;;  %v1997_v16 = vpop.f32.mrb[3].mxu1 }
 0x399   : > { %v2166_v56 = vmul.f32 %v2089_v9, %v1879_v22  ;;  %v1883_v0 = vadd.f32 %v1882_v46, %v1724_v60  ;;  %v1884_v34 = vpop.f32.mrb[3].mxu0  ;;  %v2169_v26 = vmul.f32 %v2089_v9, %v1994_v17  ;;  %v1998_v10 = vadd.f32 %v1997_v16, %v1724_v60 }
 0x39a   : > { %v2167_v29 = vmul.f32 %v2089_v9, %v1881_v59  ;;  %v1885_v32 = vadd.f32 %v1884_v34, %v1724_v60  ;;  %v2329_v54 = vadd.f32 %v2250_v25, %v2168_v14  ;;  %v2172_v5 = vmul.f32 %v2094_v47, %v1996_v42 }
 0x39b   : > { %v2327_v53 = vadd.f32 %v2250_v25, %v2166_v56  ;;  %v2170_v4 = vmul.f32 %v2094_v47, %v1883_v0  ;;  %v2173_v52 = vmul.f32 %v2094_v47, %v1998_v10  ;;  %v2330_v6 = vadd.f32 %v2250_v25, %v2169_v26 }
 0x39c   : > { %v2171_v19 = vmul.f32 %v2094_v47, %v1885_v32  ;;  %v2328_v3 = vadd.f32 %v2250_v25, %v2167_v29  ;;  %v2333_v21 = vadd.f32 %v2255_v57, %v2172_v5  ;;  %v2393_v39 = vmax.f32 %v2329_v54, 0.0 }
 0x39d   : > { %v2331_v45 = vadd.f32 %v2255_v57, %v2170_v4  ;;  %v2391_v13 = vmax.f32 %v2327_v53, 0.0  ;;  %v2334_v9 = vadd.f32 %v2255_v57, %v2173_v52  ;;  %v2001_v60 = vpop.f32.mrb[4].mxu1 }
 0x39e   : > { %v2332_v27 = vadd.f32 %v2255_v57, %v2171_v19  ;;  %v1888_v36 = vpop.f32.mrb[4].mxu0  ;;  %v2397_v8 = vmax.f32 %v2333_v21, 0.0  ;;  %v2002_v47 = vadd.f32 %v2001_v60, %v7951_v41  ;;  %v2003_v59 = vpop.f32.mrb[5].mxu1  ;;  %v2392_v19 = vmax.f32 %v2328_v3, 0.0 }
 0x39f   : > { %v2395_v22 = vmax.f32 %v2331_v45, 0.0  ;;  %v1889_v38 = vadd.f32 %v1888_v36, %v7951_v41  ;;  %v1890_v1 = vpop.f32.mrb[5].mxu0  ;;  %v2398_v46 = vmax.f32 %v2334_v9, 0.0  ;;  %v2004_v28 = vadd.f32 %v2003_v59, %v7951_v41  ;;  %v2005_v14 = vpop.f32.mrb[6].mxu1 }
 0x3a0   : > { %v2396_v17 = vmax.f32 %v2332_v27, 0.0  ;;  %v1891_v25 = vadd.f32 %v1890_v1, %v7951_v41  ;;  %v1892_v56 = vpop.f32.mrb[6].mxu0  ;;  %v2457_v57 = vpack.c.bf16 %v2397_v8, %v2393_v39  ;;  %v2176_v34 = vmul.f32 %v7955_v2, %v2002_v47  ;;  %v2007_v29 = vpop.f32.mrb[7].mxu1 }
 0x3a1   : > { %v2455_v0 = vpack.c.bf16 %v2395_v22, %v2391_v13  ;;  %v2174_v42 = vmul.f32 %v7955_v2, %v1889_v38  ;;  %v1894_v16 = vpop.f32.mrb[7].mxu0  ;;  %v2177_v32 = vmul.f32 %v7955_v2, %v2004_v28  ;;  %v1893_v10 = vadd.f32 %v1892_v56, %v7949_v23  ;;  %v8017_v21 = vpop.permute.xlu1 %2143 }
 0x3a2   : > { %v2175_v26 = vmul.f32 %v7955_v2, %v1891_v25  ;;  %v2006_v53 = vadd.f32 %v2005_v14, %v7949_v23  ;;  %v2337_v54 = vadd.f32 %v7963_v43, %v2176_v34  ;;  %v1895_v4 = vadd.f32 %v1894_v16, %v7949_v23  ;;  %v8019_v2 = vpop.permute.xlu0 %2138 }
 0x3a3   : > { %v2335_v41 = vadd.f32 %v7963_v43, %v2174_v42  ;;  %v2008_v5 = vadd.f32 %v2007_v29, %v7949_v23  ;;  %v2178_v52 = vmul.f32 %v7953_v61, %v1893_v10  ;;  %v2394_v13 = vmax.f32 %v2330_v6, 0.0 }
 0x3a4   : > { %v2180_v45 = vmul.f32 %v7953_v61, %v2006_v53  ;;  %v8022_v39 = vadd.f32 %v7963_v43, %v2175_v26  ;;  %v2179_v27 = vmul.f32 %v7953_v61, %v1895_v4  ;;  %v8027_v23 = vadd.f32 %v7963_v43, %v2177_v32 }
 0x3a5   : > { %v2181_v9 = vmul.f32 %v7953_v61, %v2008_v5  ;;  %v2399_v36 = vmax.f32 %v2335_v41, 0.0  ;;  %v2339_v3 = vadd.f32 %v7961_v62, %v2178_v52  ;;  %v2011_v8 = vpop.f32.mrb[8].mxu1  ;;  %v2401_v38 = vmax.f32 %v2337_v54, 0.0  ;;  %v8045_v52 = vpop.permute.xlu1 %1783 }
 0x3a6   : > { %v2341_v60 = vadd.f32 %v7961_v62, %v2180_v45  ;;  %v1898_v22 = vpop.f32.mrb[8].mxu0  ;;  %v2340_v6 = vadd.f32 %v7961_v62, %v2179_v27  ;;  %v2456_v47 = vpack.c.bf16 %v2396_v17, %v2392_v19  ;;  %v2458_v1 = vpack.c.bf16 %v2398_v46, %v2394_v13  ;;  %v2013_v25 = vpop.f32.mrb[9].mxu1 }
 0x3a7   : > { %v1900_v59 = vpop.f32.mrb[9].mxu0  ;;  %v2403_v28 = vmax.f32 %v2339_v3, 0.0  ;;  %v1899_v61 = vadd.f32 %v1898_v22, %v7959_v33  ;;  %v2012_v43 = vadd.f32 %v2011_v8, %v7959_v33  ;;  %v2015_v42 = vpop.f32.mrb[10].mxu1  ;;  %v2342_v34 = vadd.f32 %v7961_v62, %v2181_v9 }
 0x3a8   : > { %v2405_v56 = vmax.f32 %v2341_v60, 0.0  ;;  %v1902_v14 = vpop.f32.mrb[10].mxu0  ;;  %2567 = vmatprep.subr.bf16.mxu0 %v2456_v47  ;;  %2640 = vmatprep.subr.bf16.mxu1 %v2458_v1  ;;  %v1901_v16 = vadd.f32 %v1900_v59, %v7959_v33  ;;  %v2014_v29 = vadd.f32 %v2013_v25, %v7959_v33  ;;  %v2017_v46 = vpop.f32.mrb[11].mxu1  ;;  %v2404_v53 = vmax.f32 %v2340_v6, 0.0 }
 0x3a9   : > { %v1904_v17 = vpop.f32.mrb[11].mxu0  ;;  %v2459_v26 = vpack.c.bf16 %v2403_v28, %v2399_v36  ;;  %2568 = vmatpush1.bf16.msra.mxu0 %v2455_v0  ;;  %2641 = vmatpush1.bf16.msra.mxu1 %v2457_v57  ;;  %v2182_v10 = vmul.f32 %v7967_v55, %v1899_v61  ;;  %v2184_v41 = vmul.f32 %v7967_v55, %v2012_v43  ;;  %v8047_v0 = vpop.permute.xlu0 %1778  ;;  %v2400_v57 = vmax.f32 %v8022_v39, 0.0 }
 0x3aa   : > { %v2461_v32 = vpack.c.bf16 %v2405_v56, %v2401_v38  ;;  %v2183_v54 = vmul.f32 %v7967_v55, %v1901_v16  ;;  %v1903_v62 = vadd.f32 %v1902_v14, %v7957_v24  ;;  %v2016_v5 = vadd.f32 %v2015_v42, %v7957_v24 }
 0x3ab   : > { %v2343_v4 = vadd.f32 %v7975_v48, %v2182_v10  ;;  %v1905_v33 = vadd.f32 %v1904_v17, %v7957_v24  ;;  %v2018_v19 = vadd.f32 %v2017_v46, %v7957_v24  ;;  %v2406_v45 = vmax.f32 %v2342_v34, 0.0 }
 0x3ac   : > { %v2185_v13 = vmul.f32 %v7967_v55, %v2014_v29  ;;  %v2186_v27 = vmul.f32 %v7965_v30, %v1903_v62  ;;  %v2345_v9 = vadd.f32 %v7975_v48, %v2184_v41  ;;  %v2188_v36 = vmul.f32 %v7965_v30, %v2016_v5  ;;  %v8071_v5 = vpop.permute.xlu1 %2304 }
 0x3ad   : > { %v2187_v3 = vmul.f32 %v7965_v30, %v1905_v33  ;;  %v2189_v60 = vmul.f32 %v7965_v30, %v2018_v19  ;;  %v2021_v22 = vpop.f32.mrb[12].mxu1  ;;  %v2402_v8 = vmax.f32 %v8027_v23, 0.0  ;;  %v2407_v38 = vmax.f32 %v2343_v4, 0.0  ;;  %v8073_v33 = vpop.permute.xlu0 %2299 }
 0x3ae   : > { %v1908_v24 = vpop.f32.mrb[12].mxu0  ;;  %v2344_v39 = vadd.f32 %v7975_v48, %v2183_v54  ;;  %v2347_v6 = vadd.f32 %v7973_v20, %v2186_v27  ;;  %v2023_v47 = vpop.f32.mrb[13].mxu1  ;;  %v2349_v1 = vadd.f32 %v7973_v20, %v2188_v36  ;;  %v2460_v28 = vpack.c.bf16 %v2404_v53, %v2400_v57 }
 0x3af   : > { %v1910_v55 = vpop.f32.mrb[13].mxu0  ;;  %v2348_v59 = vadd.f32 %v7973_v20, %v2187_v3  ;;  %v2350_v25 = vadd.f32 %v7973_v20, %v2189_v60  ;;  %v2025_v30 = vpop.f32.mrb[14].mxu1  ;;  %v2462_v43 = vpack.c.bf16 %v2406_v45, %v2402_v8  ;;  %v1909_v23 = vadd.f32 %v1908_v24, %v7971_v63 }
 0x3b0   : > { %v1912_v56 = vpop.f32.mrb[14].mxu0  ;;  %v2411_v61 = vmax.f32 %v2347_v6, 0.0  ;;  %v2022_v14 = vadd.f32 %v2021_v22, %v7971_v63  ;;  %v2027_v34 = vpop.f32.mrb[15].mxu1  ;;  %v2409_v16 = vmax.f32 %v2345_v9, 0.0  ;;  %v2346_v29 = vadd.f32 %v7975_v48, %v2185_v13  ;;  %2569 = vmatprep.subr.bf16.mxu0 %v2460_v28 }
 0x3b1   : > { %v1914_v42 = vpop.f32.mrb[15].mxu0  ;;  %v2413_v17 = vmax.f32 %v2349_v1, 0.0  ;;  %v1911_v46 = vadd.f32 %v1910_v55, %v7971_v63  ;;  %v2412_v20 = vmax.f32 %v2348_v59, 0.0  ;;  %2642 = vmatprep.subr.bf16.mxu1 %v2462_v43  ;;  %2570 = vmatpush1.bf16.msra.mxu0 %v2459_v26  ;;  %v2190_v53 = vmul.f32 %v7979_v12, %v1909_v23 }
 0x3b2   : > { %v2463_v10 = vpack.c.bf16 %v2411_v61, %v2407_v38  ;;  %v2192_v41 = vmul.f32 %v7979_v12, %v2022_v14  ;;  %2643 = vmatpush1.bf16.msra.mxu1 %v2461_v32  ;;  %v2024_v4 = vadd.f32 %v2023_v47, %v7971_v63  ;;  %v1913_v48 = vadd.f32 %v1912_v56, %v7969_v35 }
 0x3b3   : > { %v2465_v54 = vpack.c.bf16 %v2413_v17, %v2409_v16  ;;  %v2191_v62 = vmul.f32 %v7979_v12, %v1911_v46  ;;  %v2414_v19 = vmax.f32 %v2350_v25, 0.0  ;;  %v2351_v57 = vadd.f32 %v7987_v15, %v2190_v53  ;;  %v8098_v53 = vpop.permute.xlu0 %2148 }
 0x3b4   : > { %v2026_v26 = vadd.f32 %v2025_v30, %v7969_v35  ;;  %v1915_v45 = vadd.f32 %v1914_v42, %v7969_v35  ;;  %v2353_v13 = vadd.f32 %v7987_v15, %v2192_v41  ;;  %v2193_v32 = vmul.f32 %v7979_v12, %v2024_v4 }
 0x3b5   : > { %v2194_v27 = vmul.f32 %v7977_v40, %v1913_v48  ;;  %v2028_v63 = vadd.f32 %v2027_v34, %v7969_v35  ;;  %v2031_v36 = vpop.f32.mrb[16].mxu1  ;;  %v2408_v3 = vmax.f32 %v2344_v39, 0.0  ;;  %v2410_v60 = vmax.f32 %v2346_v29, 0.0 }
 0x3b6   : > { %v1918_v9 = vpop.f32.mrb[16].mxu0  ;;  %v2196_v24 = vmul.f32 %v7977_v40, %v2026_v26  ;;  %v2195_v22 = vmul.f32 %v7977_v40, %v1915_v45  ;;  %v2033_v38 = vpop.f32.mrb[17].mxu1  ;;  %v2415_v6 = vmax.f32 %v2351_v57, 0.0  ;;  %v2352_v55 = vadd.f32 %v7987_v15, %v2191_v62 }
 0x3b7   : > { %v1920_v8 = vpop.f32.mrb[17].mxu0  ;;  %v2355_v47 = vadd.f32 %v7985_v44, %v2194_v27  ;;  %v2197_v12 = vmul.f32 %v7977_v40, %v2028_v63  ;;  %v2035_v59 = vpop.f32.mrb[18].mxu1  ;;  %v2464_v25 = vpack.c.bf16 %v2412_v20, %v2408_v3  ;;  %v2466_v28 = vpack.c.bf16 %v2414_v19, %v2410_v60 }
 0x3b8   : > { %v1922_v1 = vpop.f32.mrb[18].mxu0  ;;  %v2357_v35 = vadd.f32 %v7985_v44, %v2196_v24  ;;  %v2356_v39 = vadd.f32 %v7985_v44, %v2195_v22  ;;  %v2037_v30 = vpop.f32.mrb[19].mxu1  ;;  %v2417_v61 = vmax.f32 %v2353_v13, 0.0  ;;  %v2354_v43 = vadd.f32 %v7987_v15, %v2193_v32 }
 0x3b9   : > { %v1924_v56 = vpop.f32.mrb[19].mxu0  ;;  %v2419_v23 = vmax.f32 %v2355_v47, 0.0  ;;  %v1919_v14 = vadd.f32 %v1918_v9, %v7983_v11  ;;  %v2358_v34 = vadd.f32 %v7985_v44, %v2197_v12  ;;  %2571 = vmatprep.subr.bf16.mxu0 %v2464_v25  ;;  %2644 = vmatprep.subr.bf16.mxu1 %v2466_v28  ;;  %v2032_v40 = vadd.f32 %v2031_v36, %v7983_v11  ;;  %v8096_v20 = vpop.permute.xlu1 %2153 }
 0x3ba   : > { %v2421_v42 = vmax.f32 %v2357_v35, 0.0  ;;  %v1921_v16 = vadd.f32 %v1920_v8, %v7983_v11  ;;  %v2420_v17 = vmax.f32 %v2356_v39, 0.0  ;;  %2572 = vmatpush1.bf16.msra.mxu0 %v2463_v10  ;;  %2645 = vmatpush1.bf16.msra.mxu1 %v2465_v54  ;;  %v2034_v15 = vadd.f32 %v2033_v38, %v7983_v11 }
 0x3bb   : > { %v2467_v29 = vpack.c.bf16 %v2419_v23, %v2415_v6  ;;  %v2198_v46 = vmul.f32 %v7991_v49, %v1919_v14  ;;  %v2200_v44 = vmul.f32 %v7991_v49, %v2032_v40  ;;  %v1923_v4 = vadd.f32 %v1922_v1, %v7981_v58 }
 0x3bc   : > { %v2469_v41 = vpack.c.bf16 %v2421_v42, %v2417_v61  ;;  %v2199_v62 = vmul.f32 %v7991_v49, %v1921_v16  ;;  %v2201_v10 = vmul.f32 %v7991_v49, %v2034_v15  ;;  %v2036_v54 = vadd.f32 %v2035_v59, %v7981_v58 }
 0x3bd   : > { %v2359_v48 = vadd.f32 %v7999_v50, %v2198_v46  ;;  %v1925_v19 = vadd.f32 %v1924_v56, %v7981_v58  ;;  %v2041_v57 = vpop.f32.mrb[20].mxu1  ;;  %v2422_v26 = vmax.f32 %v2358_v34, 0.0  ;;  %v2361_v45 = vadd.f32 %v7999_v50, %v2200_v44 }
 0x3be   : > { %v1928_v11 = vpop.f32.mrb[20].mxu0  ;;  %v2202_v13 = vmul.f32 %v7989_v7, %v1923_v4  ;;  %v2038_v32 = vadd.f32 %v2037_v30, %v7981_v58  ;;  %v2043_v63 = vpop.f32.mrb[21].mxu1  ;;  %v2416_v9 = vmax.f32 %v2352_v55, 0.0  ;;  %v2418_v36 = vmax.f32 %v2354_v43, 0.0 }
 0x3bf   : > { %v1930_v27 = vpop.f32.mrb[21].mxu0  ;;  %v2204_v3 = vmul.f32 %v7989_v7, %v2036_v54  ;;  %v2203_v49 = vmul.f32 %v7989_v7, %v1925_v19  ;;  %v2045_v24 = vpop.f32.mrb[22].mxu1  ;;  %v2423_v22 = vmax.f32 %v2359_v48, 0.0  ;;  %v2360_v8 = vadd.f32 %v7999_v50, %v2199_v62 }
 0x3c0   : > { %v1932_v60 = vpop.f32.mrb[22].mxu0  ;;  %v2363_v38 = vadd.f32 %v7997_v51, %v2202_v13  ;;  %v2205_v6 = vmul.f32 %v7989_v7, %v2038_v32  ;;  %v2047_v12 = vpop.f32.mrb[23].mxu1  ;;  %v2362_v58 = vadd.f32 %v7999_v50, %v2201_v10  ;;  %v2468_v59 = vpack.c.bf16 %v2420_v17, %v2416_v9 }
 0x3c1   : > { %v1934_v47 = vpop.f32.mrb[23].mxu0  ;;  %v2365_v55 = vadd.f32 %v7997_v51, %v2204_v3  ;;  %v2364_v1 = vadd.f32 %v7997_v51, %v2203_v49  ;;  %v2425_v35 = vmax.f32 %v2361_v45, 0.0  ;;  %v2470_v25 = vpack.c.bf16 %v2422_v26, %v2418_v36  ;;  %v8122_v43 = vpop.permute.xlu1 %1793 }
 0x3c2   : > { %v2427_v39 = vmax.f32 %v2363_v38, 0.0  ;;  %v1929_v28 = vadd.f32 %v1928_v11, %v7995_v37  ;;  %v2366_v30 = vadd.f32 %v7997_v51, %v2205_v6  ;;  %2573 = vmatprep.subr.bf16.mxu0 %v2468_v59  ;;  %v2042_v7 = vadd.f32 %v2041_v57, %v7995_v37  ;;  %v8124_v50 = vpop.permute.xlu0 %1788 }
 0x3c3   : > { %v2429_v56 = vmax.f32 %v2365_v55, 0.0  ;;  %v1931_v61 = vadd.f32 %v1930_v27, %v7995_v37  ;;  %v2428_v14 = vmax.f32 %v2364_v1, 0.0  ;;  %2646 = vmatprep.subr.bf16.mxu1 %v2470_v25  ;;  %2574 = vmatpush1.bf16.msra.mxu0 %v2467_v29  ;;  %v2044_v34 = vadd.f32 %v2043_v63, %v7995_v37 }
 0x3c4   : > { %v2471_v23 = vpack.c.bf16 %v2427_v39, %v2423_v22  ;;  %v2206_v42 = vmul.f32 %v8019_v2, %v1929_v28  ;;  %2647 = vmatpush1.bf16.msra.mxu1 %v2469_v41  ;;  %v2208_v51 = vmul.f32 %v8019_v2, %v2042_v7  ;;  %v1933_v17 = vadd.f32 %v1932_v60, %v7993_v18 }
 0x3c5   : > { %v2473_v40 = vpack.c.bf16 %v2429_v56, %v2425_v35  ;;  %v2207_v16 = vmul.f32 %v8019_v2, %v1931_v61  ;;  %v2051_v15 = vpop.f32.mrb[24].mxu1  ;;  %v2209_v62 = vmul.f32 %v8019_v2, %v2044_v34  ;;  %v2046_v29 = vadd.f32 %v2045_v24, %v7993_v18 }
 0x3c6   : > { %v1938_v46 = vpop.f32.mrb[24].mxu0  ;;  %v2367_v44 = vadd.f32 %v8073_v33, %v2206_v42  ;;  %v1935_v4 = vadd.f32 %v1934_v47, %v7993_v18  ;;  %v2053_v37 = vpop.f32.mrb[25].mxu1  ;;  %v2430_v10 = vmax.f32 %v2366_v30, 0.0  ;;  %v2369_v41 = vadd.f32 %v8073_v33, %v2208_v51 }
 0x3c7   : > { %v1940_v48 = vpop.f32.mrb[25].mxu0  ;;  %v2210_v54 = vmul.f32 %v8017_v21, %v1933_v17  ;;  %v2048_v19 = vadd.f32 %v2047_v12, %v7993_v18  ;;  %v2055_v57 = vpop.f32.mrb[26].mxu1  ;;  %v2424_v26 = vmax.f32 %v2360_v8, 0.0  ;;  %v2426_v45 = vmax.f32 %v2362_v58, 0.0 }
 0x3c8   : > { %v1942_v11 = vpop.f32.mrb[26].mxu0  ;;  %v2212_v13 = vmul.f32 %v8017_v21, %v2046_v29  ;;  %v2211_v2 = vmul.f32 %v8017_v21, %v1935_v4  ;;  %v2057_v27 = vpop.f32.mrb[27].mxu1  ;;  %v2431_v63 = vmax.f32 %v2367_v44, 0.0  ;;  %v2368_v9 = vadd.f32 %v8073_v33, %v2207_v16 }
 0x3c9   : > { %v1944_v32 = vpop.f32.mrb[27].mxu0  ;;  %v2371_v36 = vadd.f32 %v8071_v5, %v2210_v54  ;;  %v2213_v3 = vmul.f32 %v8017_v21, %v2048_v19  ;;  %v2370_v49 = vadd.f32 %v8073_v33, %v2209_v62  ;;  %v2472_v24 = vpack.c.bf16 %v2428_v14, %v2424_v26  ;;  %v2315_v47 = vpop.permute.xlu1 %2314 }
 0x3ca   : > { %v2373_v18 = vadd.f32 %v8071_v5, %v2212_v13  ;;  %v2372_v60 = vadd.f32 %v8071_v5, %v2211_v2  ;;  %v2433_v22 = vmax.f32 %v2369_v41, 0.0  ;;  %v2474_v38 = vpack.c.bf16 %v2430_v10, %v2426_v45  ;;  %v2310_v12 = vpop.permute.xlu0 %2309 }
 0x3cb   : > { %v2435_v8 = vmax.f32 %v2371_v36, 0.0  ;;  %v1939_v6 = vadd.f32 %v1938_v46, %v8047_v0  ;;  %v2374_v55 = vadd.f32 %v8071_v5, %v2213_v3  ;;  %2575 = vmatprep.subr.bf16.mxu0 %v2472_v24  ;;  %v2052_v21 = vadd.f32 %v2051_v15, %v8047_v0 }
 0x3cc   : > { %v2437_v58 = vmax.f32 %v2373_v18, 0.0  ;;  %v1941_v33 = vadd.f32 %v1940_v48, %v8047_v0  ;;  %v2436_v59 = vmax.f32 %v2372_v60, 0.0  ;;  %2648 = vmatprep.subr.bf16.mxu1 %v2474_v38  ;;  %2576 = vmatpush1.bf16.msra.mxu0 %v2471_v23  ;;  %v2054_v39 = vadd.f32 %v2053_v37, %v8047_v0 }
 0x3cd   : > { %v2475_v1 = vpack.c.bf16 %v2435_v8, %v2431_v63  ;;  %v2214_v35 = vmul.f32 %v8098_v53, %v1939_v6  ;;  %v2061_v28 = vpop.f32.mrb[28].mxu1  ;;  %2649 = vmatpush1.bf16.msra.mxu1 %v2473_v40  ;;  %v2216_v30 = vmul.f32 %v8098_v53, %v2052_v21  ;;  %v1943_v7 = vadd.f32 %v1942_v11, %v8045_v52  ;;  %v2164_v13 = vpop.permute.xlu1 %2163 }
 0x3ce   : > { %v1948_v25 = vpop.f32.mrb[28].mxu0  ;;  %v2477_v56 = vpack.c.bf16 %v2437_v58, %v2433_v22  ;;  %v2215_v5 = vmul.f32 %v8098_v53, %v1941_v33  ;;  %v2063_v14 = vpop.f32.mrb[29].mxu1  ;;  %v2217_v34 = vmul.f32 %v8098_v53, %v2054_v39  ;;  %v2056_v23 = vadd.f32 %v2055_v57, %v8045_v52 }
 0x3cf   : > { %v1950_v61 = vpop.f32.mrb[29].mxu0  ;;  %v2375_v42 = vadd.f32 %v2310_v12, %v2214_v35  ;;  %v1945_v51 = vadd.f32 %v1944_v32, %v8045_v52  ;;  %v2065_v16 = vpop.f32.mrb[30].mxu1  ;;  %v2438_v17 = vmax.f32 %v2374_v55, 0.0  ;;  %v2377_v46 = vadd.f32 %v2310_v12, %v2216_v30 }
 0x3d0   : > { %v1952_v0 = vpop.f32.mrb[30].mxu0  ;;  %v2218_v40 = vmul.f32 %v8096_v20, %v1943_v7  ;;  %v2058_v15 = vadd.f32 %v2057_v27, %v8045_v52  ;;  %v2067_v62 = vpop.f32.mrb[31].mxu1  ;;  %v2432_v29 = vmax.f32 %v2368_v9, 0.0  ;;  %v2434_v4 = vmax.f32 %v2370_v49, 0.0 }
 0x3d1   : > { %v1954_v44 = vpop.f32.mrb[31].mxu0  ;;  %v2220_v48 = vmul.f32 %v8096_v20, %v2056_v23  ;;  %v2219_v53 = vmul.f32 %v8096_v20, %v1945_v51  ;;  %v2159_v37 = vpop.permute.xlu0 %2158  ;;  %v2439_v10 = vmax.f32 %v2375_v42, 0.0  ;;  %v2376_v41 = vadd.f32 %v2310_v12, %v2215_v5 }
 0x3d2   : > { %v2379_v54 = vadd.f32 %v2315_v47, %v2218_v40  ;;  %v2221_v19 = vmul.f32 %v8096_v20, %v2058_v15  ;;  %v2441_v11 = vmax.f32 %v2377_v46, 0.0  ;;  %v2378_v57 = vadd.f32 %v2310_v12, %v2217_v34  ;;  %v2325_v35 = vpop.permute.xlu1 %2324 }
 0x3d3   : > { %v2381_v26 = vadd.f32 %v2315_v47, %v2220_v48  ;;  %v2476_v45 = vpack.c.bf16 %v2436_v59, %v2432_v29  ;;  %v2380_v2 = vadd.f32 %v2315_v47, %v2219_v53  ;;  %v2478_v32 = vpack.c.bf16 %v2438_v17, %v2434_v4  ;;  %v6523_v48 = vld [vmem:[%s9835_s22] sm:$0xff]   ;;  %v6524_v53 = vld [vmem:[%s9835_s22 + $0x8] sm:$0xff]  }
 0x3d4   : > { %v2443_v52 = vmax.f32 %v2379_v54, 0.0  ;;  %v1949_v27 = vadd.f32 %v1948_v25, %v8124_v50  ;;  %v2382_v9 = vadd.f32 %v2315_v47, %v2221_v19  ;;  %v2062_v36 = vadd.f32 %v2061_v28, %v8124_v50 }
 0x3d5   : > { %v2445_v63 = vmax.f32 %v2381_v26, 0.0  ;;  %2577 = vmatprep.subr.bf16.mxu0 %v2476_v45  ;;  %v1951_v3 = vadd.f32 %v1950_v61, %v8124_v50  ;;  %v2440_v49 = vmax.f32 %v2376_v41, 0.0  ;;  %2650 = vmatprep.subr.bf16.mxu1 %v2478_v32  ;;  %v2064_v60 = vadd.f32 %v2063_v14, %v8124_v50  ;;  %v2320_v6 = vpop.permute.xlu0 %2319 }
 0x3d6   : > { %v2479_v18 = vpack.c.bf16 %v2443_v52, %v2439_v10  ;;  %2578 = vmatpush1.bf16.msra.mxu0 %v2475_v1  ;;  %v2222_v20 = vmul.f32 %v2159_v37, %v1949_v27  ;;  %2651 = vmatpush1.bf16.msra.mxu1 %v2477_v56  ;;  %v2224_v22 = vmul.f32 %v2159_v37, %v2062_v36  ;;  %v2444_v47 = vmax.f32 %v2380_v2, 0.0  ;;  %v6526_v10 = vld [vmem:[%s9835_s22 + $0x18] sm:$0xff]   ;;  %v2511_v41 = vpop.permute.xlu1 %2510 }
 0x3d7   : > { %v2481_v24 = vpack.c.bf16 %v2445_v63, %v2441_v11  ;;  %v2223_v8 = vmul.f32 %v2159_v37, %v1951_v3  ;;  %v1953_v38 = vadd.f32 %v1952_v0, %v8122_v43  ;;  %v2225_v12 = vmul.f32 %v2159_v37, %v2064_v60  ;;  %v6525_v37 = vld [vmem:[%s9835_s22 + $0x10] sm:$0xff]  }
 0x3d8   : > { %v2066_v58 = vadd.f32 %v2065_v16, %v8122_v43  ;;  %v1955_v55 = vadd.f32 %v1954_v44, %v8122_v43  ;;  %v2446_v21 = vmax.f32 %v2382_v9, 0.0  ;;  %v2383_v33 = vadd.f32 %v2320_v6, %v2222_v20 }
 0x3d9   : > { %v2226_v59 = vmul.f32 %v2164_v13, %v1953_v38  ;;  %v2068_v1 = vadd.f32 %v2067_v62, %v8122_v43  ;;  %v2385_v50 = vadd.f32 %v2320_v6, %v2224_v22  ;;  %v2384_v39 = vadd.f32 %v2320_v6, %v2223_v8  ;;  %v2506_v54 = vpop.permute.xlu0 %2505 }
 0x3da   : > { %v2228_v25 = vmul.f32 %v2164_v13, %v2066_v58  ;;  %v2227_v28 = vmul.f32 %v2164_v13, %v1955_v55  ;;  %v2442_v56 = vmax.f32 %v2378_v57, 0.0  ;;  %v2386_v30 = vadd.f32 %v2320_v6, %v2225_v12 }
 0x3db   : > { %v2387_v5 = vadd.f32 %v2325_v35, %v2226_v59  ;;  %v2229_v7 = vmul.f32 %v2164_v13, %v2068_v1  ;;  %v2480_v42 = vpack.c.bf16 %v2444_v47, %v2440_v49  ;;  %v2447_v34 = vmax.f32 %v2383_v33, 0.0 }
 0x3dc   : > { %v2389_v61 = vadd.f32 %v2325_v35, %v2228_v25  ;;  %v2388_v14 = vadd.f32 %v2325_v35, %v2227_v28  ;;  %v2482_v0 = vpack.c.bf16 %v2446_v21, %v2442_v56  ;;  %v2449_v16 = vmax.f32 %v2385_v50, 0.0 }
 0x3dd   : > { %v2451_v23 = vmax.f32 %v2387_v5, 0.0  ;;  %v2390_v51 = vadd.f32 %v2325_v35, %v2229_v7  ;;  %v2448_v17 = vmax.f32 %v2384_v39, 0.0  ;;  %2579 = vmatprep.subr.bf16.mxu0 %v2480_v42  ;;  %v2450_v40 = vmax.f32 %v2386_v30, 0.0  ;;  %v2516_v20 = vpop.permute.xlu0 %2515 }
 0x3de   : > { %v2453_v46 = vmax.f32 %v2389_v61, 0.0  ;;  %v2452_v43 = vmax.f32 %v2388_v14, 0.0  ;;  %2652 = vmatprep.subr.bf16.mxu1 %v2482_v0  ;;  %2580 = vmatpush1.bf16.msra.mxu0 %v2479_v18  ;;  %v2521_v18 = vpop.permute.xlu1 %2520 }
 0x3df   : > { %v2483_v15 = vpack.c.bf16 %v2451_v23, %v2447_v34  ;;  %v2454_v44 = vmax.f32 %v2390_v51, 0.0  ;;  %2653 = vmatpush1.bf16.msra.mxu1 %v2481_v24 }
 0x3e0   : > { %v2485_v62 = vpack.c.bf16 %v2453_v46, %v2449_v16  ;;  %v2484_v29 = vpack.c.bf16 %v2452_v43, %v2448_v17 }
 0x3e1   : > { %v2486_v4 = vpack.c.bf16 %v2454_v44, %v2450_v40  ;;  %v2526_v25 = vpop.permute.xlu0 %2525 }
 0x3e2   : > { %2581 = vmatprep.subr.bf16.mxu0 %v2484_v29  ;;  %v2531_v39 = vpop.permute.xlu1 %2530 }
 0x3e3   : > { %2654 = vmatprep.subr.bf16.mxu1 %v2486_v4  ;;  %2582 = vmatpush1.bf16.msra.mxu0 %v2483_v15 }
 0x3e4   : > { %2655 = vmatpush1.bf16.msra.mxu1 %v2485_v62 }
 0x3e5   : > { %v2536_v15 = vpop.permute.xlu0 %2535 }
 0x3e6   : > { %2600 = vmatmul.mubr.bf16.vlgmr.msra.gmra.mrb[32].mxu0 %v6523_v48  ;;  %v2541_v40 = vpop.permute.xlu1 %2540 }
 0x3e7   : > { %2673 = vmatmul.mubr.bf16.vlgmr.msra.gmra.mrb[32].mxu1 %v6523_v48  ;;  %2609 = vmatprep.mubr.bf16.mxu0 %v6711_v31 }
 0x3e8   : > { %2682 = vmatprep.mubr.bf16.mxu1 %v6711_v31 }
 0x3ee   : > { %2610 = vmatmul.mubr.bf16.gmra.mrb[36].mxu0 %v6524_v53 }
 0x3ef   : > { %2683 = vmatmul.mubr.bf16.gmra.mrb[36].mxu1 %v6524_v53  ;;  %2619 = vmatprep.mubr.bf16.mxu0 %v6711_v31 }
 0x3f0   : > { %2692 = vmatprep.mubr.bf16.mxu1 %v6711_v31 }
 0x3f6   : > { %2620 = vmatmul.mubr.bf16.gmra.mrb[40].mxu0 %v6525_v37 }
 0x3f7   : > { %2693 = vmatmul.mubr.bf16.gmra.mrb[40].mxu1 %v6525_v37  ;;  %2629 = vmatprep.mubr.bf16.mxu0 %v6711_v31 }
 0x3f8   : > { %2702 = vmatprep.mubr.bf16.mxu1 %v6711_v31 }
 0x3fe   : > { %2630 = vmatmul.mubr.bf16.gmra.mrb[44].mxu0 %v6526_v10 }
 0x3ff   : > { %2703 = vmatmul.mubr.bf16.gmra.mrb[44].mxu1 %v6526_v10 }
 0x4b9   : > { %v2601_v19 = vpop.f32.mrb[32].mxu0 }
 0x4ba   : > { %v8189_v11 = vadd.f32 %v2601_v19, %v2506_v54  ;;  %v2674_v57 = vpop.f32.mrb[32].mxu1  ;;  %v2603_v26 = vpop.f32.mrb[33].mxu0 }
 0x4bb   : > { %v8191_v45 = vadd.f32 %v2674_v57, %v2506_v54  ;;  %v8193_v13 = vadd.f32 %v2603_v26, %v2506_v54  ;;  %v2676_v52 = vpop.f32.mrb[33].mxu1  ;;  %v2605_v2 = vpop.f32.mrb[34].mxu0 }
 0x4bc   : > { %v8195_v31 = vadd.f32 %v2676_v52, %v2506_v54  ;;  %v8197_v32 = vadd.f32 %v2605_v2, %v2511_v41  ;;  %v2678_v27 = vpop.f32.mrb[34].mxu1  ;;  %v2607_v63 = vpop.f32.mrb[35].mxu0 }
 0x4bd   : > { %v8199_v9 = vadd.f32 %v2678_v27, %v2511_v41  ;;  %v8201_v36 = vadd.f32 %v2607_v63, %v2511_v41  ;;  %v2680_v3 = vpop.f32.mrb[35].mxu1  ;;  %v6712_v63 = vmov (!%p6937_p9), 0.0  }
 0x4be   : > { %v8203_v49 = vadd.f32 %v2680_v3, %v2511_v41  ;;  %2716 = vst.msk [vmem:[#allocation3] sm:$0xff] (!%p6937_p9), %vm2715_vm2, %v6712_v63  ;;  %2717 = vst.msk [vmem:[#allocation3 + $0x8] sm:$0xff] (!%p6937_p9), %vm2715_vm2, %v6712_v63 }
 0x4bf   : > { %2718 = vst.msk [vmem:[#allocation3 + $0x10] sm:$0xff] (!%p6937_p9), %vm2715_vm2, %v6712_v63  ;;  %2719 = vst.msk [vmem:[#allocation3 + $0x18] sm:$0xff] (!%p6937_p9), %vm2715_vm2, %v6712_v63 }
 0x4c0   : > { %2720 = vst.msk [vmem:[#allocation3 + $0x20] sm:$0xff] (!%p6937_p9), %vm2715_vm2, %v6712_v63  ;;  %2721 = vst.msk [vmem:[#allocation3 + $0x28] sm:$0xff] (!%p6937_p9), %vm2715_vm2, %v6712_v63 }
 0x4c1   : > { %v2611_v60 = vpop.f32.mrb[36].mxu0  ;;  %2722 = vst.msk [vmem:[#allocation3 + $0x30] sm:$0xff] (!%p6937_p9), %vm2715_vm2, %v6712_v63  ;;  %2723 = vst.msk [vmem:[#allocation3 + $0x38] sm:$0xff] (!%p6937_p9), %vm2715_vm2, %v6712_v63 }
 0x4c2   : > { %v8205_v24 = vadd.f32 %v2611_v60, %v2516_v20  ;;  %v2684_v22 = vpop.f32.mrb[36].mxu1  ;;  %v2613_v8 = vpop.f32.mrb[37].mxu0  ;;  %2724 = vst.msk [vmem:[#allocation3 + $0x40] sm:$0xff] (!%p6937_p9), %vm2715_vm2, %v6712_v63  ;;  %2725 = vst.msk [vmem:[#allocation3 + $0x48] sm:$0xff] (!%p6937_p9), %vm2715_vm2, %v6712_v63 }
 0x4c3   : > { %v8207_v38 = vadd.f32 %v2684_v22, %v2516_v20  ;;  %v8209_v6 = vadd.f32 %v2613_v8, %v2516_v20  ;;  %v2686_v47 = vpop.f32.mrb[37].mxu1  ;;  %v2615_v12 = vpop.f32.mrb[38].mxu0  ;;  %2726 = vst.msk [vmem:[#allocation3 + $0x50] sm:$0xff] (!%p6937_p9), %vm2715_vm2, %v6712_v63  ;;  %2727 = vst.msk [vmem:[#allocation3 + $0x58] sm:$0xff] (!%p6937_p9), %vm2715_vm2, %v6712_v63 }
 0x4c4   : > { %v8211_v58 = vadd.f32 %v2686_v47, %v2516_v20  ;;  %v8213_v55 = vadd.f32 %v2615_v12, %v2521_v18  ;;  %v2688_v21 = vpop.f32.mrb[38].mxu1  ;;  %v2617_v33 = vpop.f32.mrb[39].mxu0  ;;  %2728 = vst.msk [vmem:[#allocation3 + $0x60] sm:$0xff] (!%p6937_p9), %vm2715_vm2, %v6712_v63  ;;  %2729 = vst.msk [vmem:[#allocation3 + $0x68] sm:$0xff] (!%p6937_p9), %vm2715_vm2, %v6712_v63 }
 0x4c5   : > { %v8215_v59 = vadd.f32 %v2688_v21, %v2521_v18  ;;  %v8217_v1 = vadd.f32 %v2617_v33, %v2521_v18  ;;  %v2690_v35 = vpop.f32.mrb[39].mxu1  ;;  %2730 = vst.msk [vmem:[#allocation3 + $0x70] sm:$0xff] (!%p6937_p9), %vm2715_vm2, %v6712_v63  ;;  %2731 = vst.msk [vmem:[#allocation3 + $0x78] sm:$0xff] (!%p6937_p9), %vm2715_vm2, %v6712_v63 }
 0x4c6   : > { %v8219_v50 = vadd.f32 %v2690_v35, %v2521_v18 }
 0x4c9   : > { %v2621_v28 = vpop.f32.mrb[40].mxu0 }
 0x4ca   : > { %v8221_v56 = vadd.f32 %v2621_v28, %v2526_v25  ;;  %v2694_v30 = vpop.f32.mrb[40].mxu1  ;;  %v2623_v5 = vpop.f32.mrb[41].mxu0 }
 0x4cb   : > { %v8223_v7 = vadd.f32 %v2694_v30, %v2526_v25  ;;  %v8225_v61 = vadd.f32 %v2623_v5, %v2526_v25  ;;  %v2696_v14 = vpop.f32.mrb[41].mxu1  ;;  %v2625_v42 = vpop.f32.mrb[42].mxu0 }
 0x4cc   : > { %v8227_v34 = vadd.f32 %v2696_v14, %v2526_v25  ;;  %v8229_v23 = vadd.f32 %v2625_v42, %v2531_v39  ;;  %v2698_v51 = vpop.f32.mrb[42].mxu1  ;;  %v2627_v0 = vpop.f32.mrb[43].mxu0 }
 0x4cd   : > { %v8231_v16 = vadd.f32 %v2698_v51, %v2531_v39  ;;  %v8233_v17 = vadd.f32 %v2627_v0, %v2531_v39  ;;  %v2700_v46 = vpop.f32.mrb[43].mxu1 }
 0x4ce   : > { %v8235_v43 = vadd.f32 %v2700_v46, %v2531_v39 }
 0x4d0   : > { %2714 = sbr.rel (%p6937_p9) target bundleno = 1239 (0x4d7), region = 104 }
 0x4d1   : > { %v2631_v44 = vpop.f32.mrb[44].mxu0 }
 0x4d2   : > { %v8237_v62 = vadd.f32 %v2631_v44, %v2536_v15  ;;  %v2704_v29 = vpop.f32.mrb[44].mxu1  ;;  %v2633_v4 = vpop.f32.mrb[45].mxu0 }
 0x4d3   : > { %v8239_v48 = vadd.f32 %v2704_v29, %v2536_v15  ;;  %v8241_v53 = vadd.f32 %v2633_v4, %v2536_v15  ;;  %v2706_v37 = vpop.f32.mrb[45].mxu1  ;;  %v2635_v10 = vpop.f32.mrb[46].mxu0 }
 0x4d4   : > { %v8243_v41 = vadd.f32 %v2706_v37, %v2536_v15  ;;  %v8245_v54 = vadd.f32 %v2635_v10, %v2541_v40  ;;  %v2708_v19 = vpop.f32.mrb[46].mxu1  ;;  %v2637_v57 = vpop.f32.mrb[47].mxu0 }
 0x4d5   : > { %v8247_v26 = vadd.f32 %v2708_v19, %v2541_v40  ;;  %v8249_v52 = vadd.f32 %v2637_v57, %v2541_v40  ;;  %v2710_v2 = vpop.f32.mrb[47].mxu1 }
 0x4d6   : > { %v8251_v27 = vadd.f32 %v2710_v2, %v2541_v40 }
 0x4d7 PF: > { %v2750_v3 = vadd.f32 %v8209_v6, %v8205_v24  ;;  %v2740_v18 = vadd.f32 %v8193_v13, %v8189_v11  ;;  %v2755_v20 = vadd.f32 %v8217_v1, %v8213_v55  ;;  %v2745_v60 = vadd.f32 %v8201_v36, %v8197_v32  ;;  %s9836_s29 = sld [smem:[#allocation66_spill]] (!%p6944_p12)  ;;  %s9837_s13 = sld [smem:[#allocation67_spill]] (!%p6944_p12) }
 0x4d8   : > { %v2765_v22 = vadd.f32 %v8233_v17, %v8229_v23  ;;  %v2760_v8 = vadd.f32 %v8225_v61, %v8221_v56  ;;  %v2775_v25 = vadd.f32 %v8249_v52, %v8245_v54  ;;  %v2770_v14 = vadd.f32 %v8241_v53, %v8237_v62 }
 0x4d9   : > { %v2751_v47 = vadd.f32 %v2750_v3, %v8207_v38  ;;  %v2741_v12 = vadd.f32 %v2740_v18, %v8191_v45  ;;  %v2756_v21 = vadd.f32 %v2755_v20, %v8215_v59  ;;  %v2746_v33 = vadd.f32 %v2745_v60, %v8199_v9 }
 0x4da   : > { %v2766_v30 = vadd.f32 %v2765_v22, %v8231_v16  ;;  %v2761_v5 = vadd.f32 %v2760_v8, %v8223_v7  ;;  %v2810_v51 = vmul.f32 %v8197_v32, %v8197_v32  ;;  %v2811_v0 = vmul.f32 %v8201_v36, %v8201_v36 }
 0x4db   : > { %v2752_v35 = vadd.f32 %v2751_v47, %v8211_v58  ;;  %v2742_v39 = vadd.f32 %v2741_v12, %v8195_v31  ;;  %v2757_v28 = vadd.f32 %v2756_v21, %v8219_v50  ;;  %v2747_v42 = vadd.f32 %v2746_v33, %v8203_v49 }
 0x4dc   : > { %v2812_v46 = vmul.f32 %v8199_v9, %v8199_v9  ;;  %v2806_v40 = vmul.f32 %v8189_v11, %v8189_v11  ;;  %v2807_v15 = vmul.f32 %v8193_v13, %v8193_v13  ;;  %v2843_v44 = vadd.f32 %v2811_v0, %v2810_v51  ;;  %v2732_v0 = vld [vmem:[#allocation3] sm:$0xff] }
 0x4dd   : > { %2753 = vadd.xlane.f32.xlu1 %v2752_v35  ;;  %2743 = vadd.xlane.f32.xlu0 %v2742_v39  ;;  %v2808_v29 = vmul.f32 %v8191_v45, %v8191_v45  ;;  %v2818_v4 = vmul.f32 %v8213_v55, %v8213_v55  ;;  %v2819_v32 = vmul.f32 %v8217_v1, %v8217_v1  ;;  %vm2788_vm3 = vcmask 7168  }
 0x4de   : > { %v2776_v36 = vadd.f32 %v2775_v25, %v8247_v26  ;;  %v2771_v9 = vadd.f32 %v2770_v14, %v8239_v48  ;;  %v2838_v37 = vadd.f32 %v2807_v15, %v2806_v40  ;;  %v2814_v11 = vmul.f32 %v8205_v24, %v8205_v24 }
 0x4df   : > { %v2767_v13 = vadd.f32 %v2766_v30, %v8235_v43  ;;  %v2762_v45 = vadd.f32 %v2761_v5, %v8227_v34  ;;  %v2815_v55 = vmul.f32 %v8209_v6, %v8209_v6  ;;  %v2813_v1 = vmul.f32 %v8203_v49, %v8203_v49 }
 0x4e0   : > { %v2844_v10 = vadd.f32 %v2843_v44, %v2812_v46  ;;  %v2809_v19 = vmul.f32 %v8195_v31, %v8195_v31  ;;  %v2820_v57 = vmul.f32 %v8215_v59, %v8215_v59  ;;  %v2839_v24 = vadd.f32 %v2838_v37, %v2808_v29  ;;  %v2735_v44 = vld [vmem:[#allocation3 + $0x18] sm:$0xff]  ;;  %v2736_v37 = vld [vmem:[#allocation3 + $0x20] sm:$0xff] }
 0x4e1   : > { %2758 = vadd.xlane.f32.xlu1 %v2757_v28  ;;  %2748 = vadd.xlane.f32.xlu0 %v2747_v42  ;;  %v2853_v2 = vadd.f32 %v2819_v32, %v2818_v4  ;;  %v2816_v63 = vmul.f32 %v8207_v38, %v8207_v38  ;;  %v2848_v3 = vadd.f32 %v2815_v55, %v2814_v11 }
 0x4e2   : > { %v2826_v18 = vmul.f32 %v8229_v23, %v8229_v23  ;;  %v2827_v6 = vmul.f32 %v8233_v17, %v8233_v17  ;;  %v2777_v49 = vadd.f32 %v2776_v36, %v8251_v27  ;;  %v2772_v31 = vadd.f32 %v2771_v9, %v8243_v41  ;;  %v2737_v9 = vld [vmem:[#allocation3 + $0x28] sm:$0xff] }
 0x4e3   : > { %v2822_v59 = vmul.f32 %v8221_v56, %v8221_v56  ;;  %v2845_v20 = vadd.f32 %v2844_v10, %v2813_v1  ;;  %v2821_v38 = vmul.f32 %v8219_v50, %v8219_v50  ;;  %v2817_v60 = vmul.f32 %v8211_v58, %v8211_v58  ;;  %v2739_v1 = vld [vmem:[#allocation3 + $0x38] sm:$0xff]  ;;  %v2738_v10 = vld [vmem:[#allocation3 + $0x30] sm:$0xff] }
 0x4e4   : > { %v2823_v23 = vmul.f32 %v8225_v61, %v8225_v61  ;;  %v2840_v17 = vadd.f32 %v2839_v24, %v2809_v19  ;;  %v2854_v22 = vadd.f32 %v2853_v2, %v2820_v57  ;;  %v2849_v8 = vadd.f32 %v2848_v3, %v2816_v63  ;;  %v2799_v63 = vld [vmem:[#allocation3 + $0x48] sm:$0xff]  ;;  %v2798_v3 = vld [vmem:[#allocation3 + $0x40] sm:$0xff] }
 0x4e5   : > { %2768 = vadd.xlane.f32.xlu1 %v2767_v13  ;;  %2763 = vadd.xlane.f32.xlu0 %v2762_v45  ;;  %v2828_v47 = vmul.f32 %v8231_v16, %v8231_v16  ;;  %v2863_v12 = vadd.f32 %v2827_v6, %v2826_v18  ;;  %v2824_v56 = vmul.f32 %v8223_v7, %v8223_v7 }
 0x4e6   : > { %v2834_v21 = vmul.f32 %v8245_v54, %v8245_v54  ;;  %v2835_v50 = vmul.f32 %v8249_v52, %v8249_v52  ;;  %v2858_v58 = vadd.f32 %v2823_v23, %v2822_v59  ;;  %v2830_v61 = vmul.f32 %v8237_v62, %v8237_v62  ;;  %v2801_v59 = vld [vmem:[#allocation3 + $0x58] sm:$0xff] }
 0x4e7   : > { %v2831_v33 = vmul.f32 %v8241_v53, %v8241_v53  ;;  %v2855_v16 = vadd.f32 %v2854_v22, %v2821_v38  ;;  %v2829_v35 = vmul.f32 %v8235_v43, %v8235_v43  ;;  %v2825_v7 = vmul.f32 %v8227_v34, %v8227_v34  ;;  %v2803_v22 = vld [vmem:[#allocation3 + $0x68] sm:$0xff] }
 0x4e8   : > { %v2850_v54 = vadd.f32 %v2849_v8, %v2817_v60  ;;  %v2864_v39 = vadd.f32 %v2863_v12, %v2828_v47  ;;  %v2836_v52 = vmul.f32 %v8247_v26, %v8247_v26  ;;  %v2873_v25 = vadd.f32 %v2835_v50, %v2834_v21  ;;  %v2802_v8 = vld [vmem:[#allocation3 + $0x60] sm:$0xff]  ;;  %v2805_v50 = vld [vmem:[#allocation3 + $0x78] sm:$0xff] }
 0x4e9   : > { %2778 = vadd.xlane.f32.xlu1 %v2777_v49  ;;  %2773 = vadd.xlane.f32.xlu0 %v2772_v31  ;;  %v2859_v28 = vadd.f32 %v2858_v58, %v2824_v56  ;;  %v2832_v62 = vmul.f32 %v8239_v48, %v8239_v48  ;;  %v2868_v53 = vadd.f32 %v2831_v33, %v2830_v61  ;;  %v2734_v48 = vld [vmem:[#allocation3 + $0x10] sm:$0xff] }
 0x4ea   : > { %v2865_v30 = vadd.f32 %v2864_v39, %v2829_v35  ;;  %v2837_v43 = vmul.f32 %v8251_v27, %v8251_v27  ;;  %v2833_v34 = vmul.f32 %v8243_v41, %v8243_v41  ;;  %v2874_v14 = vadd.f32 %v2873_v25, %v2836_v52  ;;  %v2733_v41 = vld [vmem:[#allocation3 + $0x8] sm:$0xff]  ;;  %v2804_v58 = vld [vmem:[#allocation3 + $0x70] sm:$0xff] }
 0x4eb   : > { %v2860_v5 = vadd.f32 %v2859_v28, %v2825_v7  ;;  %v2869_v26 = vadd.f32 %v2868_v53, %v2832_v62 }
 0x4ec   : > { %v2875_v42 = vadd.f32 %v2874_v14, %v2837_v43 }
 0x4ed   : > { %2846 = vadd.xlane.f32.xlu1 %v2845_v20  ;;  %2841 = vadd.xlane.f32.xlu0 %v2840_v17  ;;  %v2870_v51 = vadd.f32 %v2869_v26, %v2833_v34  ;;  %v2800_v20 = vld [vmem:[#allocation3 + $0x50] sm:$0xff] }
 0x4f1   : > { %2856 = vadd.xlane.f32.xlu1 %v2855_v16  ;;  %2851 = vadd.xlane.f32.xlu0 %v2850_v54 }
 0x4f5   : > { %2866 = vadd.xlane.f32.xlu1 %v2865_v30  ;;  %2861 = vadd.xlane.f32.xlu0 %v2860_v5 }
 0x4f9   : > { %2876 = vadd.xlane.f32.xlu1 %v2875_v42  ;;  %2871 = vadd.xlane.f32.xlu0 %v2870_v51 }
 0x56a   : > { %v2754_v46 = vpop.xlane.xlu1 %2753  ;;  %v2744_v40 = vpop.xlane.xlu0 %2743 }
 0x56b   : > { %v2782_v27 = vadd.f32 %v2754_v46, %v2734_v48  ;;  %v2780_v15 = vadd.f32 %v2744_v40, %v2732_v0 }
 0x56d   : > { %2791 = vst.msk [vmem:[#allocation3 + $0x10] sm:$0xff] %vm2788_vm3, %v2782_v27  ;;  %2789 = vst.msk [vmem:[#allocation3] sm:$0xff] %vm2788_vm3, %v2780_v15 }
 0x56e   : > { %v2759_v29 = vpop.xlane.xlu1 %2758  ;;  %v2749_v4 = vpop.xlane.xlu0 %2748 }
 0x56f   : > { %v2783_v32 = vadd.f32 %v2759_v29, %v2735_v44  ;;  %v2781_v36 = vadd.f32 %v2749_v4, %v2733_v41 }
 0x571   : > { %2792 = vst.msk [vmem:[#allocation3 + $0x18] sm:$0xff] %vm2788_vm3, %v2783_v32  ;;  %2790 = vst.msk [vmem:[#allocation3 + $0x8] sm:$0xff] %vm2788_vm3, %v2781_v36 }
 0x572   : > { %v2769_v11 = vpop.xlane.xlu1 %2768  ;;  %v2764_v13 = vpop.xlane.xlu0 %2763 }
 0x573   : > { %v2785_v45 = vadd.f32 %v2769_v11, %v2737_v9  ;;  %v2784_v55 = vadd.f32 %v2764_v13, %v2736_v37 }
 0x574   : > { %v2896_v7 = vld [vmem:[#allocation3] sm:$0xff] (!%p6944_p12)  ;;  %v2898_v30 = vld [vmem:[#allocation3 + $0x10] sm:$0xff] (!%p6944_p12) }
 0x575   : > { %2794 = vst.msk [vmem:[#allocation3 + $0x28] sm:$0xff] %vm2788_vm3, %v2785_v45  ;;  %2793 = vst.msk [vmem:[#allocation3 + $0x20] sm:$0xff] %vm2788_vm3, %v2784_v55  ;;  %v8385_v39 = vmul.f32 (!%p6944_p12), 0.00048828125, %v2896_v7  ;;  %v8391_v5 = vmul.f32 (!%p6944_p12), 0.00048828125, %v2898_v30  ;;  %v2955_v30 = vld [vmem:[%s9836_s29 + $0x18] sm:$0xff] (!%p6944_p12) }
 0x576   : > { %v2779_v19 = vpop.xlane.xlu1 %2778  ;;  %v2774_v57 = vpop.xlane.xlu0 %2773 }
 0x577   : > { %v2787_v24 = vadd.f32 %v2779_v19, %v2739_v1  ;;  %v2786_v2 = vadd.f32 %v2774_v57, %v2738_v10  ;;  %v2928_v34 = vmul.f32 (!%p6944_p12), %v8385_v39, %v8385_v39  ;;  %v2930_v15 = vmul.f32 (!%p6944_p12), %v8391_v5, %v8391_v5 }
 0x578   : > { %v2897_v25 = vld [vmem:[#allocation3 + $0x8] sm:$0xff] (!%p6944_p12)  ;;  %v2899_v26 = vld [vmem:[#allocation3 + $0x18] sm:$0xff] (!%p6944_p12) }
 0x579   : > { %2796 = vst.msk [vmem:[#allocation3 + $0x38] sm:$0xff] %vm2788_vm3, %v2787_v24  ;;  %2795 = vst.msk [vmem:[#allocation3 + $0x30] sm:$0xff] %vm2788_vm3, %v2786_v2  ;;  %v8387_v62 = vmul.f32 (!%p6944_p12), 0.00048828125, %v2897_v25  ;;  %v8395_v48 = vmul.f32 (!%p6944_p12), 0.00048828125, %v2899_v26  ;;  %v2954_v25 = vld [vmem:[%s9836_s29 + $0x10] sm:$0xff] (!%p6944_p12)  ;;  %v2992_v26 = vld [vmem:[%s9837_s13] sm:$0xff] (!%p6944_p12) }
 0x57a   : > { %v2847_v18 = vpop.xlane.xlu1 %2846  ;;  %v2842_v6 = vpop.xlane.xlu0 %2841 }
 0x57b   : > { %v2879_v49 = vadd.f32 %v2847_v18, %v2799_v63  ;;  %v2878_v31 = vadd.f32 %v2842_v6, %v2798_v3  ;;  %v2929_v51 = vmul.f32 (!%p6944_p12), %v8387_v62, %v8387_v62  ;;  %v2931_v36 = vmul.f32 (!%p6944_p12), %v8395_v48, %v8395_v48 }
 0x57c   : > { %v2900_v46 = vld [vmem:[#allocation3 + $0x20] sm:$0xff] (!%p6944_p12)  ;;  %v2901_v29 = vld [vmem:[#allocation3 + $0x28] sm:$0xff] (!%p6944_p12) }
 0x57d   : > { %2887 = vst.msk [vmem:[#allocation3 + $0x48] sm:$0xff] %vm2788_vm3, %v2879_v49  ;;  %2886 = vst.msk [vmem:[#allocation3 + $0x40] sm:$0xff] %vm2788_vm3, %v2878_v31  ;;  %v8399_v44 = vmul.f32 (!%p6944_p12), 0.00048828125, %v2900_v46  ;;  %v8403_v9 = vmul.f32 (!%p6944_p12), 0.00048828125, %v2901_v29 }
 0x57e   : > { %v2857_v38 = vpop.xlane.xlu1 %2856  ;;  %v2852_v60 = vpop.xlane.xlu0 %2851 }
 0x57f   : > { %v2881_v23 = vadd.f32 %v2857_v38, %v2801_v59  ;;  %v2880_v17 = vadd.f32 %v2852_v60, %v2800_v20  ;;  %v2932_v1 = vmul.f32 (!%p6944_p12), %v8399_v44, %v8399_v44  ;;  %v2933_v2 = vmul.f32 (!%p6944_p12), %v8403_v9, %v8403_v9 }
 0x580   : > { %v2902_v11 = vld [vmem:[#allocation3 + $0x30] sm:$0xff] (!%p6944_p12)  ;;  %v2903_v19 = vld [vmem:[#allocation3 + $0x38] sm:$0xff] (!%p6944_p12) }
 0x581   : > { %2889 = vst.msk [vmem:[#allocation3 + $0x58] sm:$0xff] %vm2788_vm3, %v2881_v23  ;;  %2888 = vst.msk [vmem:[#allocation3 + $0x50] sm:$0xff] %vm2788_vm3, %v2880_v17  ;;  %v8407_v10 = vmul.f32 (!%p6944_p12), 0.00048828125, %v2902_v11  ;;  %v8413_v60 = vmul.f32 (!%p6944_p12), 0.00048828125, %v2903_v19  ;;  %v2995_v11 = vld [vmem:[%s9837_s13 + $0x18] sm:$0xff] (!%p6944_p12) }
 0x582   : > { %v2867_v47 = vpop.xlane.xlu1 %2866  ;;  %v2862_v12 = vpop.xlane.xlu0 %2861 }
 0x583   : > { %v2883_v56 = vadd.f32 %v2867_v47, %v2803_v22  ;;  %v2882_v21 = vadd.f32 %v2862_v12, %v2802_v8  ;;  %2895 = sbr.rel (%p6944_p12) target bundleno = 1452 (0x5ac), region = 108  ;;  %v2934_v49 = vmul.f32 (!%p6944_p12), %v8407_v10, %v8407_v10 }
 0x584   : > { %v2912_v54 = vld [vmem:[#allocation3 + $0x40] sm:$0xff] (!%p6944_p12)  ;;  %v2913_v28 = vld [vmem:[#allocation3 + $0x48] sm:$0xff] (!%p6944_p12) }
 0x585   : > { %2891 = vst.msk [vmem:[#allocation3 + $0x68] sm:$0xff] %vm2788_vm3, %v2883_v56  ;;  %2890 = vst.msk [vmem:[#allocation3 + $0x60] sm:$0xff] %vm2788_vm3, %v2882_v21  ;;  %v2920_v52 = vmul.f32 (!%p6944_p12), 0.00048828125, %v2912_v54  ;;  %v2921_v53 = vmul.f32 (!%p6944_p12), 0.00048828125, %v2913_v28  ;;  %v2953_v54 = vld [vmem:[%s9836_s29 + $0x8] sm:$0xff] (!%p6944_p12) }
 0x586   : > { %v2877_v61 = vpop.xlane.xlu1 %2876  ;;  %v2872_v33 = vpop.xlane.xlu0 %2871 }
 0x587   : > { %v2885_v16 = vadd.f32 %v2877_v61, %v2805_v50  ;;  %v2884_v35 = vadd.f32 %v2872_v33, %v2804_v58  ;;  %v2936_v27 = vsub.f32 (!%p6944_p12), %v2920_v52, %v2928_v34  ;;  %v2937_v32 = vsub.f32 (!%p6944_p12), %v2921_v53, %v2929_v51 }
 0x588   : > { %v2914_v43 = vld [vmem:[#allocation3 + $0x50] sm:$0xff] (!%p6944_p12)  ;;  %v2915_v42 = vld [vmem:[#allocation3 + $0x58] sm:$0xff] (!%p6944_p12)  ;;  %v2935_v50 = vmul.f32 (!%p6944_p12), %v8413_v60, %v8413_v60 }
 0x589   : > { %2893 = vst.msk [vmem:[#allocation3 + $0x78] sm:$0xff] %vm2788_vm3, %v2885_v16  ;;  %2892 = vst.msk [vmem:[#allocation3 + $0x70] sm:$0xff] %vm2788_vm3, %v2884_v35  ;;  %v2922_v14 = vmul.f32 (!%p6944_p12), 0.00048828125, %v2914_v43  ;;  %v2923_v0 = vmul.f32 (!%p6944_p12), 0.00048828125, %v2915_v42  ;;  %v2944_v45 = vmax.f32 (!%p6944_p12), %v2936_v27, 0.0  ;;  %v2945_v57 = vmax.f32 (!%p6944_p12), %v2937_v32, 0.0 }
 0x58a   : > { %v2952_v35 = vld [vmem:[%s9836_s29] sm:$0xff] }
 0x58b   : > { %v2938_v55 = vsub.f32 %v2922_v14, %v2930_v15  ;;  %v2939_v24 = vsub.f32 %v2923_v0, %v2931_v36  ;;  %v2960_v3 = vadd.f32 1e-05, %v2944_v45  ;;  %v2961_v59 = vadd.f32 1e-05, %v2945_v57  ;;  %v2956_v14 = vld [vmem:[%s9836_s29 + $0x20] sm:$0xff]  ;;  %v2957_v0 = vld [vmem:[%s9836_s29 + $0x28] sm:$0xff] }
 0x58c   : > { %v2916_v40 = vld [vmem:[#allocation3 + $0x60] sm:$0xff]  ;;  %v2917_v4 = vld [vmem:[#allocation3 + $0x68] sm:$0xff] }
 0x58d   : > { %v2924_v41 = vmul.f32 0.00048828125, %v2916_v40  ;;  %v2925_v37 = vmul.f32 0.00048828125, %v2917_v4  ;;  %v2946_v18 = vmax.f32 %v2938_v55, 0.0  ;;  %v2947_v20 = vmax.f32 %v2939_v24, 0.0  ;;  %v2993_v40 = vld [vmem:[%s9837_s13 + $0x8] sm:$0xff]  ;;  %v2994_v4 = vld [vmem:[%s9837_s13 + $0x10] sm:$0xff] }
 0x58e   : > { %6527 = vrsqrt.f32 %v2960_v3  ;;  %v2997_v24 = vld [vmem:[%s9837_s13 + $0x28] sm:$0xff]  ;;  %v2998_v3 = vld [vmem:[%s9837_s13 + $0x30] sm:$0xff] }
 0x58f   : > { %v2940_v6 = vsub.f32 %v2924_v41, %v2932_v1  ;;  %v2941_v38 = vsub.f32 %v2925_v37, %v2933_v2  ;;  %v2962_v23 = vadd.f32 1e-05, %v2946_v18  ;;  %6529 = vrsqrt.f32 %v2961_v59  ;;  %v2958_v41 = vld [vmem:[%s9836_s29 + $0x30] sm:$0xff]  ;;  %v2996_v1 = vld [vmem:[%s9837_s13 + $0x20] sm:$0xff] }
 0x590   : > { %v2918_v13 = vld [vmem:[#allocation3 + $0x70] sm:$0xff]  ;;  %v2919_v31 = vld [vmem:[#allocation3 + $0x78] sm:$0xff]  ;;  %v2963_v8 = vadd.f32 1e-05, %v2947_v20 }
 0x591   : > { %v2926_v63 = vmul.f32 0.00048828125, %v2918_v13  ;;  %v2948_v17 = vmax.f32 %v2940_v6, 0.0  ;;  %v2949_v47 = vmax.f32 %v2941_v38, 0.0  ;;  %v2927_v12 = vmul.f32 0.00048828125, %v2919_v31 }
 0x592   : > { %6531 = vrsqrt.f32 %v2962_v23 }
 0x593   : > { %v2942_v22 = vsub.f32 %v2926_v63, %v2934_v49  ;;  %v2964_v56 = vadd.f32 1e-05, %v2948_v17  ;;  %6533 = vrsqrt.f32 %v2963_v8  ;;  %v2965_v58 = vadd.f32 1e-05, %v2949_v47 }
 0x594   : > { %v2943_v33 = vsub.f32 %v2927_v12, %v2935_v50 }
 0x595   : > { %v2950_v21 = vmax.f32 %v2942_v22, 0.0  ;;  %6535 = vrsqrt.f32 %v2964_v56 }
 0x596   : > { %6537 = vrsqrt.f32 %v2965_v58  ;;  %v2951_v16 = vmax.f32 %v2943_v33, 0.0 }
 0x597   : > { %v2966_v61 = vadd.f32 1e-05, %v2950_v21 }
 0x598   : > { %v2967_v7 = vadd.f32 1e-05, %v2951_v16  ;;  %v6528_v52 = vpop.eup %6527 }
 0x599   : > { %6539 = vrsqrt.f32 %v2966_v61  ;;  %v6530_v28 = vpop.eup %6529  ;;  %v2976_v53 = vmul.f32 %v6528_v52, %v2952_v35 }
 0x59a   : > { %6541 = vrsqrt.f32 %v2967_v7  ;;  %v2977_v34 = vmul.f32 %v6530_v28, %v2953_v54 }
 0x59b   : > { %2984 = vst.msk [vmem:[#allocation3] sm:$0xff] %vm2788_vm3, %v2976_v53  ;;  %v3000_v46 = vmul.f32 %v2976_v53, %v8385_v39 }
 0x59c   : > { %v6532_v43 = vpop.eup %6531  ;;  %2985 = vst.msk [vmem:[#allocation3 + $0x8] sm:$0xff] %vm2788_vm3, %v2977_v34  ;;  %v3001_v29 = vmul.f32 %v2977_v34, %v8387_v62 }
 0x59d   : > { %v6534_v42 = vpop.eup %6533  ;;  %v2978_v51 = vmul.f32 %v6532_v43, %v2954_v25  ;;  %v3008_v36 = vsub.f32 %v2992_v26, %v3000_v46 }
 0x59e   : > { %v2979_v15 = vmul.f32 %v6534_v42, %v2955_v30  ;;  %v3009_v62 = vsub.f32 %v2993_v40, %v3001_v29 }
 0x59f   : > { %v6536_v27 = vpop.eup %6535  ;;  %2986 = vst.msk [vmem:[#allocation3 + $0x10] sm:$0xff] %vm2788_vm3, %v2978_v51  ;;  %v3002_v37 = vmul.f32 %v2978_v51, %v8391_v5  ;;  %3016 = vst.msk [vmem:[#allocation3 + $0x40] sm:$0xff] %vm2788_vm3, %v3008_v36 }
 0x5a0   : > { %v6538_v32 = vpop.eup %6537  ;;  %v2980_v39 = vmul.f32 %v6536_v27, %v2956_v14  ;;  %2987 = vst.msk [vmem:[#allocation3 + $0x18] sm:$0xff] %vm2788_vm3, %v2979_v15  ;;  %v3003_v55 = vmul.f32 %v2979_v15, %v8395_v48  ;;  %v2959_v48 = vld [vmem:[%s9836_s29 + $0x38] sm:$0xff]  ;;  %3017 = vst.msk [vmem:[#allocation3 + $0x48] sm:$0xff] %vm2788_vm3, %v3009_v62 }
 0x5a1   : > { %v2981_v45 = vmul.f32 %v6538_v32, %v2957_v0  ;;  %v3010_v5 = vsub.f32 %v2994_v4, %v3002_v37 }
 0x5a2   : > { %2988 = vst.msk [vmem:[#allocation3 + $0x20] sm:$0xff] %vm2788_vm3, %v2980_v39  ;;  %v3004_v57 = vmul.f32 %v2980_v39, %v8399_v44  ;;  %v3011_v2 = vsub.f32 %v2995_v11, %v3003_v55 }
 0x5a3   : > { %v6540_v13 = vpop.eup %6539  ;;  %2989 = vst.msk [vmem:[#allocation3 + $0x28] sm:$0xff] %vm2788_vm3, %v2981_v45  ;;  %v3005_v63 = vmul.f32 %v2981_v45, %v8403_v9  ;;  %3018 = vst.msk [vmem:[#allocation3 + $0x50] sm:$0xff] %vm2788_vm3, %v3010_v5  ;;  %v2999_v9 = vld [vmem:[%s9837_s13 + $0x38] sm:$0xff] }
 0x5a4   : > { %v2982_v19 = vmul.f32 %v6540_v13, %v2958_v41  ;;  %v3012_v44 = vsub.f32 %v2996_v1, %v3004_v57  ;;  %v6542_v6 = vpop.eup %6541  ;;  %3019 = vst.msk [vmem:[#allocation3 + $0x58] sm:$0xff] %vm2788_vm3, %v3011_v2 }
 0x5a5   : > { %v3013_v49 = vsub.f32 %v2997_v24, %v3005_v63  ;;  %v2983_v31 = vmul.f32 %v6542_v6, %v2959_v48 }
 0x5a6   : > { %2990 = vst.msk [vmem:[#allocation3 + $0x30] sm:$0xff] %vm2788_vm3, %v2982_v19  ;;  %v3006_v18 = vmul.f32 %v2982_v19, %v8407_v10  ;;  %3020 = vst.msk [vmem:[#allocation3 + $0x60] sm:$0xff] %vm2788_vm3, %v3012_v44 }
 0x5a7   : > { %3021 = vst.msk [vmem:[#allocation3 + $0x68] sm:$0xff] %vm2788_vm3, %v3013_v49  ;;  %2991 = vst.msk [vmem:[#allocation3 + $0x38] sm:$0xff] %vm2788_vm3, %v2983_v31  ;;  %v3007_v10 = vmul.f32 %v2983_v31, %v8413_v60 }
 0x5a8   : > { %v3014_v59 = vsub.f32 %v2998_v3, %v3006_v18 }
 0x5a9   : > { %v3015_v20 = vsub.f32 %v2999_v9, %v3007_v10 }
 0x5aa   : > { %3022 = vst.msk [vmem:[#allocation3 + $0x70] sm:$0xff] %vm2788_vm3, %v3014_v59 }
 0x5ab   : > { %3023 = vst.msk [vmem:[#allocation3 + $0x78] sm:$0xff] %vm2788_vm3, %v3015_v20 }
 0x5ac PF: > { %p6332_p13 = scmp.ne.s32.totalorder %s6687_s23, 2 }
 0x5ad   : > { %v9838_v38 = vld [vmem:[#allocation12_spill] sm:$0xff] (!%p6332_p13)  ;;  %v9839_v23 = vld [vmem:[#allocation14_spill] sm:$0xff] (!%p6332_p13)  ;;  %v3414_v17 = vld [vmem:[#allocation2] sm:$0xff] (!%p6332_p13)  ;;  %v6713_v47 = vmov (!%p6332_p13), 0   ;;  %s9870_s30 = sld [smem:[#allocation69_spill]] (!%p6332_p13)  ;;  %s9871_s10 = sld [smem:[#allocation65_spill]] (!%p6332_p13) }
 0x5ae   : > { %3027 = sbr.rel (%p6332_p13) target bundleno = 2455 (0x997), region = 112  ;;  %3188 = vmatprep.subr.bf16.mxu0 (!%p6332_p13), %v9838_v38  ;;  %3301 = vmatprep.subr.bf16.mxu1 (!%p6332_p13), %v9839_v23  ;;  %v3044_v22 = vld [vmem:[%s9625_s2] sm:$0xff] (!%p6332_p13)  ;;  %v9841_v60 = vld [vmem:[#allocation13_spill] sm:$0xff] (!%p6332_p13)  ;;  %v9842_v12 = vld [vmem:[#allocation16_spill] sm:$0xff] (!%p6332_p13)  ;;  %s9872_s5 = sld [smem:[#allocation68_spill]] (!%p6332_p13)  ;;  %vm4304_vm4 = vcmask (!%p6332_p13), 523264  }
 0x5af   : > { %v9840_v8 = vld [vmem:[#allocation11_spill] sm:$0xff] (!%p6332_p13)  ;;  %3302 = vmatpush1.bf16.msra.mxu1 (!%p6332_p13), %v9841_v60  ;;  %6544 = vset.pattern.permute.xlu1 (!%p6332_p13), %v6713_v47  ;;  %v9843_v56 = vld [vmem:[#allocation18_spill] sm:$0xff] (!%p6332_p13)  ;;  %v3415_v21 = vld [vmem:[#allocation2 + $0x8] sm:$0xff] (!%p6332_p13) }
 0x5b0   : > { %3189 = vmatpush1.bf16.msra.mxu0 (!%p6332_p13), %v9840_v8  ;;  %6543 = vset.pattern.permute.xlu0 (!%p6332_p13), %v6713_v47  ;;  %v3045_v50 = vld [vmem:[%s9625_s2 + $0x8] sm:$0xff] (!%p6332_p13)  ;;  %v9844_v58 = vld [vmem:[#allocation15_spill] sm:$0xff] (!%p6332_p13)  ;;  %v9845_v61 = vld [vmem:[#allocation17_spill] sm:$0xff] (!%p6332_p13) }
 0x5b1   : > { %3432 = vperm.xlu1 (!%p6332_p13), %6544, %v3414_v17   ;;  %3062 = vperm.xlu0 (!%p6332_p13), %6543, %v3044_v22   ;;  %v9846_v33 = vld [vmem:[#allocation20_spill] sm:$0xff] (!%p6332_p13)  ;;  %v9847_v16 = vld [vmem:[#allocation22_spill] sm:$0xff] (!%p6332_p13)  ;;  %v3046_v7 = vld [vmem:[%s9625_s2 + $0x10] sm:$0xff] (!%p6332_p13) }
 0x5b2   : > { %3190 = vmatprep.subr.bf16.mxu0 (!%p6332_p13), %v9842_v12  ;;  %3303 = vmatprep.subr.bf16.mxu1 (!%p6332_p13), %v9843_v56  ;;  %v3047_v35 = vld [vmem:[%s9625_s2 + $0x18] sm:$0xff] (!%p6332_p13)  ;;  %v9848_v54 = vld [vmem:[#allocation19_spill] sm:$0xff] (!%p6332_p13)  ;;  %v9849_v52 = vld [vmem:[#allocation21_spill] sm:$0xff] (!%p6332_p13) }
 0x5b3   : > { %3304 = vmatpush1.bf16.msra.mxu1 (!%p6332_p13), %v9845_v61  ;;  %3220 = vmatprep.mubr.bf16.mxu0 (!%p6332_p13), %v6713_v47  ;;  %v9850_v25 = vld [vmem:[#allocation24_spill] sm:$0xff] (!%p6332_p13)  ;;  %v9851_v28 = vld [vmem:[#allocation26_spill] sm:$0xff] (!%p6332_p13)  ;;  %v3575_v30 = vld [vmem:[#allocation2 + $0x80] sm:$0xff] (!%p6332_p13) }
 0x5b4   : > { %3191 = vmatpush1.bf16.msra.mxu0 (!%p6332_p13), %v9844_v58  ;;  %3305 = vmatprep.subr.bf16.mxu1 (!%p6332_p13), %v9847_v16  ;;  %v3576_v53 = vld [vmem:[#allocation2 + $0x88] sm:$0xff] (!%p6332_p13)  ;;  %v9852_v43 = vld [vmem:[#allocation23_spill] sm:$0xff] (!%p6332_p13)  ;;  %v9853_v34 = vld [vmem:[#allocation25_spill] sm:$0xff] (!%p6332_p13) }
 0x5b5   : > { %3192 = vmatprep.subr.bf16.mxu0 %v9846_v33  ;;  %3437 = vperm.xlu1 %6544, %v3415_v21   ;;  %v9854_v14 = vld [vmem:[#allocation28_spill] sm:$0xff]  ;;  %v9855_v26 = vld [vmem:[#allocation30_spill] sm:$0xff]  ;;  %v3416_v51 = vld [vmem:[#allocation2 + $0x10] sm:$0xff]  ;;  %vm4419_vm5 = vcmask (!%p6937_p9), 7168  }
 0x5b6   : > { %3067 = vperm.xlu0 %6543, %v3045_v50   ;;  %3333 = vmatprep.mubr.bf16.mxu1 %v6713_v47  ;;  %v3417_v42 = vld [vmem:[#allocation2 + $0x18] sm:$0xff]  ;;  %v9856_v0 = vld [vmem:[#allocation27_spill] sm:$0xff]  ;;  %v9857_v46 = vld [vmem:[#allocation29_spill] sm:$0xff] }
 0x5b7   : > { %3306 = vmatpush1.bf16.msra.mxu1 %v9849_v52  ;;  %v9858_v40 = vld [vmem:[#allocation32_spill] sm:$0xff]  ;;  %v9859_v27 = vld [vmem:[#allocation34_spill] sm:$0xff]  ;;  %v3048_v41 = vld [vmem:[%s9625_s2 + $0x20] sm:$0xff] }
 0x5b8   : > { %3193 = vmatpush1.bf16.msra.mxu0 %v9848_v54  ;;  %3307 = vmatprep.subr.bf16.mxu1 %v9851_v28  ;;  %v3049_v15 = vld [vmem:[%s9625_s2 + $0x28] sm:$0xff]  ;;  %v9860_v29 = vld [vmem:[#allocation31_spill] sm:$0xff]  ;;  %v9861_v4 = vld [vmem:[#allocation33_spill] sm:$0xff] }
 0x5b9   : > { %3194 = vmatprep.subr.bf16.mxu0 %v9850_v25  ;;  %3077 = vperm.xlu1 %6544, %v3047_v35   ;;  %v9862_v32 = vld [vmem:[#allocation36_spill] sm:$0xff]  ;;  %v9863_v39 = vld [vmem:[#allocation38_spill] sm:$0xff]  ;;  %v3577_v37 = vld [vmem:[#allocation2 + $0x90] sm:$0xff] }
 0x5ba   : > { %3072 = vperm.xlu0 %6543, %v3046_v7   ;;  %v3578_v36 = vld [vmem:[#allocation2 + $0x98] sm:$0xff]  ;;  %v9864_v11 = vld [vmem:[#allocation35_spill] sm:$0xff]  ;;  %v9865_v13 = vld [vmem:[#allocation37_spill] sm:$0xff] }
 0x5bb   : > { %3308 = vmatpush1.bf16.msra.mxu1 %v9853_v34  ;;  %v9866_v45 = vld [vmem:[#allocation40_spill] sm:$0xff]  ;;  %v9867_v62 = vld [vmem:[#allocation42_spill] sm:$0xff]  ;;  %v3418_v1 = vld [vmem:[#allocation2 + $0x20] sm:$0xff] }
 0x5bc   : > { %3195 = vmatpush1.bf16.msra.mxu0 %v9852_v43  ;;  %3309 = vmatprep.subr.bf16.mxu1 %v9855_v26  ;;  %v3419_v55 = vld [vmem:[#allocation2 + $0x28] sm:$0xff]  ;;  %v6545_v19 = vld [vmem:[%s9624_s1] sm:$0xff]   ;;  %v9869_v57 = vld [vmem:[#allocation41_spill] sm:$0xff] }
 0x5bd   : > { %3196 = vmatprep.subr.bf16.mxu0 %v9854_v14  ;;  %3598 = vperm.xlu1 %6544, %v3576_v53   ;;  %v9868_v5 = vld [vmem:[#allocation39_spill] sm:$0xff]  ;;  %v3051_v24 = vld [vmem:[%s9625_s2 + $0x38] sm:$0xff]  ;;  %v3050_v48 = vld [vmem:[%s9625_s2 + $0x30] sm:$0xff] }
 0x5be   : > { %3593 = vperm.xlu0 %6543, %v3575_v30   ;;  %v3580_v2 = vld [vmem:[#allocation2 + $0xa8] sm:$0xff]  ;;  %v3579_v63 = vld [vmem:[#allocation2 + $0xa0] sm:$0xff]  ;;  %v3421_v44 = vld [vmem:[#allocation2 + $0x38] sm:$0xff] }
 0x5bf   : > { %3310 = vmatpush1.bf16.msra.mxu1 %v9857_v46  ;;  %v6546_v3 = vld [vmem:[%s9624_s1 + $0x8] sm:$0xff]   ;;  %v3420_v18 = vld [vmem:[#allocation2 + $0x30] sm:$0xff]  ;;  %v3052_v49 = vld [vmem:[%s9625_s2 + $0x40] sm:$0xff] }
 0x5c0   : > { %3197 = vmatpush1.bf16.msra.mxu0 %v9856_v0  ;;  %3311 = vmatprep.subr.bf16.mxu1 %v9859_v27  ;;  %v3053_v6 = vld [vmem:[%s9625_s2 + $0x48] sm:$0xff]  ;;  %v6547_v31 = vld [vmem:[%s9624_s1 + $0x10] sm:$0xff]   ;;  %v3582_v59 = vld [vmem:[#allocation2 + $0xb8] sm:$0xff] }
 0x5c1   : > { %3198 = vmatprep.subr.bf16.mxu0 %v9858_v40  ;;  %3447 = vperm.xlu1 %6544, %v3417_v42   ;;  %v3581_v9 = vld [vmem:[#allocation2 + $0xb0] sm:$0xff]  ;;  %v3423_v10 = vld [vmem:[#allocation2 + $0x48] sm:$0xff]  ;;  %v3422_v20 = vld [vmem:[#allocation2 + $0x40] sm:$0xff] }
 0x5c2   : > { %3442 = vperm.xlu0 %6543, %v3416_v51   ;;  %v6548_v38 = vld [vmem:[%s9624_s1 + $0x18] sm:$0xff]   ;;  %v3054_v17 = vld [vmem:[%s9625_s2 + $0x50] sm:$0xff]  ;;  %v3584_v22 = vld [vmem:[#allocation2 + $0xc8] sm:$0xff] }
 0x5c3   : > { %3312 = vmatpush1.bf16.msra.mxu1 %v9861_v4  ;;  %v3055_v23 = vld [vmem:[%s9625_s2 + $0x58] sm:$0xff]  ;;  %v3583_v8 = vld [vmem:[#allocation2 + $0xc0] sm:$0xff]  ;;  %v3424_v56 = vld [vmem:[#allocation2 + $0x50] sm:$0xff] }
 0x5c4   : > { %3199 = vmatpush1.bf16.msra.mxu0 %v9860_v29  ;;  %3313 = vmatprep.subr.bf16.mxu1 %v9863_v39  ;;  %v6549_v60 = vld [vmem:[%s9624_s1 + $0x20] sm:$0xff]   ;;  %v3425_v12 = vld [vmem:[#allocation2 + $0x58] sm:$0xff]  ;;  %v3057_v21 = vld [vmem:[%s9625_s2 + $0x68] sm:$0xff] }
 0x5c5   : > { %3200 = vmatprep.subr.bf16.mxu0 %v9862_v32  ;;  %3087 = vperm.xlu1 %6544, %v3049_v15   ;;  %v3056_v50 = vld [vmem:[%s9625_s2 + $0x60] sm:$0xff]  ;;  %v6550_v58 = vld [vmem:[%s9624_s1 + $0x28] sm:$0xff]   ;;  %v3586_v61 = vld [vmem:[#allocation2 + $0xd8] sm:$0xff] }
 0x5c6   : > { %3082 = vperm.xlu0 %6543, %v3048_v41   ;;  %v3585_v33 = vld [vmem:[#allocation2 + $0xd0] sm:$0xff]  ;;  %v3427_v16 = vld [vmem:[#allocation2 + $0x68] sm:$0xff]  ;;  %v3426_v35 = vld [vmem:[#allocation2 + $0x60] sm:$0xff] }
 0x5c7   : > { %3314 = vmatpush1.bf16.msra.mxu1 %v9865_v13  ;;  %v6551_v7 = vld [vmem:[%s9624_s1 + $0x30] sm:$0xff]   ;;  %v3059_v54 = vld [vmem:[%s9625_s2 + $0x78] sm:$0xff]  ;;  %v3588_v25 = vld [vmem:[#allocation2 + $0xe8] sm:$0xff] }
 0x5c8   : > { %3201 = vmatpush1.bf16.msra.mxu0 %v9864_v11  ;;  %3315 = vmatprep.subr.bf16.mxu1 %v9867_v62  ;;  %v3058_v52 = vld [vmem:[%s9625_s2 + $0x70] sm:$0xff]  ;;  %v3587_v28 = vld [vmem:[#allocation2 + $0xe0] sm:$0xff]  ;;  %v6552_v53 = vld [vmem:[%s9624_s1 + $0x38] sm:$0xff]  }
 0x5c9   : > { %3202 = vmatprep.subr.bf16.mxu0 %v9866_v45  ;;  %3608 = vperm.xlu1 %6544, %v3578_v36   ;;  %v3429_v30 = vld [vmem:[#allocation2 + $0x78] sm:$0xff]  ;;  %v3428_v43 = vld [vmem:[#allocation2 + $0x70] sm:$0xff]  ;;  %v3840_v26 = vld [vmem:[%s9629_s6 + $0x8] sm:$0xff] }
 0x5ca   : > { %3603 = vperm.xlu0 %6543, %v3577_v37   ;;  %v3590_v34 = vld [vmem:[#allocation2 + $0xf8] sm:$0xff]  ;;  %v3589_v14 = vld [vmem:[#allocation2 + $0xf0] sm:$0xff]  ;;  %v3839_v42 = vld [vmem:[%s9629_s6] sm:$0xff] }
 0x5cb   : > { %3316 = vmatpush1.bf16.msra.mxu1 %v9869_v57  ;;  %v4058_v51 = vld [vmem:[#allocation3 + $0x8] sm:$0xff]  ;;  %v4057_v0 = vld [vmem:[#allocation3] sm:$0xff]  ;;  %v3842_v46 = vld [vmem:[%s9629_s6 + $0x18] sm:$0xff] }
 0x5cc   : > { %3203 = vmatpush1.bf16.msra.mxu0 %v9868_v5  ;;  %v3841_v40 = vld [vmem:[%s9629_s6 + $0x10] sm:$0xff]  ;;  %v4139_v27 = vld [vmem:[#allocation3 + $0x48] sm:$0xff]  ;;  %v4138_v15 = vld [vmem:[#allocation3 + $0x40] sm:$0xff] }
 0x5cd   : > { %3457 = vperm.xlu1 %6544, %v3419_v55   ;;  %v4060_v41 = vld [vmem:[#allocation3 + $0x18] sm:$0xff]  ;;  %v4059_v29 = vld [vmem:[#allocation3 + $0x10] sm:$0xff]  ;;  %v3844_v4 = vld [vmem:[%s9629_s6 + $0x28] sm:$0xff] }
 0x5ce   : > { %3452 = vperm.xlu0 %6543, %v3418_v1   ;;  %3334 = vmatmul.mubr.bf16.vlgmr.msra.gmra.mrb[0].mxu1 %v6545_v19  ;;  %v3843_v32 = vld [vmem:[%s9629_s6 + $0x20] sm:$0xff]  ;;  %v4141_v39 = vld [vmem:[#allocation3 + $0x58] sm:$0xff]  ;;  %v4140_v36 = vld [vmem:[#allocation3 + $0x50] sm:$0xff] }
 0x5cf   : > { %3221 = vmatmul.mubr.bf16.vlgmr.msra.gmra.mrb[0].mxu0 %v6545_v19  ;;  %3343 = vmatprep.mubr.bf16.mxu1 %v6713_v47  ;;  %v4062_v37 = vld [vmem:[#allocation3 + $0x28] sm:$0xff]  ;;  %v4061_v11 = vld [vmem:[#allocation3 + $0x20] sm:$0xff]  ;;  %v3846_v13 = vld [vmem:[%s9629_s6 + $0x38] sm:$0xff] }
 0x5d0   : > { %3230 = vmatprep.mubr.bf16.mxu0 %v6713_v47  ;;  %v3845_v45 = vld [vmem:[%s9629_s6 + $0x30] sm:$0xff]  ;;  %v4143_v62 = vld [vmem:[#allocation3 + $0x68] sm:$0xff]  ;;  %v4142_v55 = vld [vmem:[#allocation3 + $0x60] sm:$0xff] }
 0x5d1   : > { %3097 = vperm.xlu1 %6544, %v3051_v24   ;;  %v4064_v1 = vld [vmem:[#allocation3 + $0x38] sm:$0xff]  ;;  %v4063_v19 = vld [vmem:[#allocation3 + $0x30] sm:$0xff]  ;;  %v4271_v24 = vld [vmem:[%s9870_s30 + $0x8] sm:$0xff] }
 0x5d2   : > { %3092 = vperm.xlu0 %6543, %v3050_v48   ;;  %v4145_v5 = vld [vmem:[#allocation3 + $0x78] sm:$0xff]  ;;  %v4144_v57 = vld [vmem:[#allocation3 + $0x70] sm:$0xff]  ;;  %v4270_v48 = vld [vmem:[%s9870_s30] sm:$0xff] }
 0x5d5   : > { %3618 = vperm.xlu1 %6544, %v3580_v2   ;;  %v4273_v2 = vld [vmem:[%s9870_s30 + $0x18] sm:$0xff] }
 0x5d6   : > { %3613 = vperm.xlu0 %6543, %v3579_v63   ;;  %3344 = vmatmul.mubr.bf16.gmra.mrb[4].mxu1 %v6546_v3  ;;  %v4272_v63 = vld [vmem:[%s9870_s30 + $0x10] sm:$0xff] }
 0x5d7   : > { %3231 = vmatmul.mubr.bf16.gmra.mrb[4].mxu0 %v6546_v3  ;;  %3353 = vmatprep.mubr.bf16.mxu1 %v6713_v47 }
 0x5d8   : > { %3240 = vmatprep.mubr.bf16.mxu0 %v6713_v47 }
 0x5d9   : > { %3467 = vperm.xlu1 %6544, %v3421_v44  }
 0x5da   : > { %3462 = vperm.xlu0 %6543, %v3420_v18  }
 0x5dd   : > { %3107 = vperm.xlu1 %6544, %v3053_v6  }
 0x5de   : > { %3102 = vperm.xlu0 %6543, %v3052_v49   ;;  %3354 = vmatmul.mubr.bf16.gmra.mrb[8].mxu1 %v6547_v31 }
 0x5df   : > { %3241 = vmatmul.mubr.bf16.gmra.mrb[8].mxu0 %v6547_v31  ;;  %3363 = vmatprep.mubr.bf16.mxu1 %v6713_v47 }
 0x5e0   : > { %3250 = vmatprep.mubr.bf16.mxu0 %v6713_v47 }
 0x5e1   : > { %3628 = vperm.xlu1 %6544, %v3582_v59  }
 0x5e2   : > { %3623 = vperm.xlu0 %6543, %v3581_v9  }
 0x5e5   : > { %3477 = vperm.xlu1 %6544, %v3423_v10  }
 0x5e6   : > { %3472 = vperm.xlu0 %6543, %v3422_v20   ;;  %3364 = vmatmul.mubr.bf16.gmra.mrb[12].mxu1 %v6548_v38 }
 0x5e7   : > { %3251 = vmatmul.mubr.bf16.gmra.mrb[12].mxu0 %v6548_v38  ;;  %3373 = vmatprep.mubr.bf16.mxu1 %v6713_v47 }
 0x5e8   : > { %3260 = vmatprep.mubr.bf16.mxu0 %v6713_v47 }
 0x5e9   : > { %3117 = vperm.xlu1 %6544, %v3055_v23  }
 0x5ea   : > { %3112 = vperm.xlu0 %6543, %v3054_v17  }
 0x5ed   : > { %3638 = vperm.xlu1 %6544, %v3584_v22  }
 0x5ee   : > { %3633 = vperm.xlu0 %6543, %v3583_v8   ;;  %3374 = vmatmul.mubr.bf16.gmra.mrb[16].mxu1 %v6549_v60 }
 0x5ef   : > { %3261 = vmatmul.mubr.bf16.gmra.mrb[16].mxu0 %v6549_v60  ;;  %3383 = vmatprep.mubr.bf16.mxu1 %v6713_v47 }
 0x5f0   : > { %3270 = vmatprep.mubr.bf16.mxu0 %v6713_v47 }
 0x5f1   : > { %3487 = vperm.xlu1 %6544, %v3425_v12  }
 0x5f2   : > { %3482 = vperm.xlu0 %6543, %v3424_v56  }
 0x5f5   : > { %3127 = vperm.xlu1 %6544, %v3057_v21  }
 0x5f6   : > { %3122 = vperm.xlu0 %6543, %v3056_v50   ;;  %3384 = vmatmul.mubr.bf16.gmra.mrb[20].mxu1 %v6550_v58 }
 0x5f7   : > { %3271 = vmatmul.mubr.bf16.gmra.mrb[20].mxu0 %v6550_v58  ;;  %3393 = vmatprep.mubr.bf16.mxu1 %v6713_v47 }
 0x5f8   : > { %3280 = vmatprep.mubr.bf16.mxu0 %v6713_v47 }
 0x5f9   : > { %3648 = vperm.xlu1 %6544, %v3586_v61  }
 0x5fa   : > { %3643 = vperm.xlu0 %6543, %v3585_v33  }
 0x5fd   : > { %3497 = vperm.xlu1 %6544, %v3427_v16  }
 0x5fe   : > { %3492 = vperm.xlu0 %6543, %v3426_v35   ;;  %3394 = vmatmul.mubr.bf16.gmra.mrb[24].mxu1 %v6551_v7 }
 0x5ff   : > { %3281 = vmatmul.mubr.bf16.gmra.mrb[24].mxu0 %v6551_v7  ;;  %3403 = vmatprep.mubr.bf16.mxu1 %v6713_v47 }
 0x600   : > { %3290 = vmatprep.mubr.bf16.mxu0 %v6713_v47 }
 0x601   : > { %3137 = vperm.xlu1 %6544, %v3059_v54  }
 0x602   : > { %3132 = vperm.xlu0 %6543, %v3058_v52  }
 0x605   : > { %3658 = vperm.xlu1 %6544, %v3588_v25  }
 0x606   : > { %3653 = vperm.xlu0 %6543, %v3587_v28   ;;  %3404 = vmatmul.mubr.bf16.gmra.mrb[28].mxu1 %v6552_v53 }
 0x607   : > { %3291 = vmatmul.mubr.bf16.gmra.mrb[28].mxu0 %v6552_v53  ;;  %4016 = vmatprep.mubr.bf16.mxu1 %v6713_v47 }
 0x608   : > { %3943 = vmatprep.mubr.bf16.mxu0 %v6713_v47 }
 0x609   : > { %3507 = vperm.xlu1 %6544, %v3429_v30  }
 0x60a   : > { %3502 = vperm.xlu0 %6543, %v3428_v43  }
 0x60d   : > { %3668 = vperm.xlu1 %6544, %v3590_v34  }
 0x60e   : > { %3663 = vperm.xlu0 %6543, %v3589_v14  }
 0x611   : > { %3854 = vperm.xlu1 %6544, %v3840_v26  }
 0x612   : > { %3849 = vperm.xlu0 %6543, %v3839_v42  }
 0x615   : > { %4072 = vperm.xlu1 %6544, %v4058_v51  }
 0x616   : > { %4067 = vperm.xlu0 %6543, %v4057_v0  }
 0x619   : > { %3864 = vperm.xlu1 %6544, %v3842_v46  }
 0x61a   : > { %3859 = vperm.xlu0 %6543, %v3841_v40  }
 0x61d   : > { %4153 = vperm.xlu1 %6544, %v4139_v27  }
 0x61e   : > { %4148 = vperm.xlu0 %6543, %v4138_v15  }
 0x621   : > { %4082 = vperm.xlu1 %6544, %v4060_v41  }
 0x622   : > { %4077 = vperm.xlu0 %6543, %v4059_v29  }
 0x625   : > { %3874 = vperm.xlu1 %6544, %v3844_v4  }
 0x626   : > { %3869 = vperm.xlu0 %6543, %v3843_v32  }
 0x629   : > { %4163 = vperm.xlu1 %6544, %v4141_v39  }
 0x62a   : > { %4158 = vperm.xlu0 %6543, %v4140_v36  }
 0x62d   : > { %4092 = vperm.xlu1 %6544, %v4062_v37  }
 0x62e   : > { %4087 = vperm.xlu0 %6543, %v4061_v11  }
 0x630   : > { %v3433_v3 = vpop.permute.xlu1 %3432  ;;  %v3063_v44 = vpop.permute.xlu0 %3062 }
 0x631   : > { %3884 = vperm.xlu1 %6544, %v3846_v13  }
 0x632   : > { %3879 = vperm.xlu0 %6543, %v3845_v45  }
 0x634   : > { %v3438_v18 = vpop.permute.xlu1 %3437 }
 0x635   : > { %4173 = vperm.xlu1 %6544, %v4143_v62   ;;  %v3068_v6 = vpop.permute.xlu0 %3067 }
 0x636   : > { %4168 = vperm.xlu0 %6543, %v4142_v55  }
 0x638   : > { %v8650_v49 = vpop.permute.xlu1 %3077 }
 0x639   : > { %4102 = vperm.xlu1 %6544, %v4064_v1   ;;  %v8652_v31 = vpop.permute.xlu0 %3072 }
 0x63a   : > { %4097 = vperm.xlu0 %6543, %v4063_v19  }
 0x63c   : > { %v8654_v59 = vpop.permute.xlu1 %3598 }
 0x63d   : > { %4183 = vperm.xlu1 %6544, %v4145_v5   ;;  %v3594_v9 = vpop.permute.xlu0 %3593 }
 0x63e   : > { %4178 = vperm.xlu0 %6543, %v4144_v57  }
 0x640   : > { %v8656_v10 = vpop.permute.xlu1 %3447 }
 0x641   : > { %4281 = vperm.xlu1 %6544, %v4271_v24   ;;  %v8658_v20 = vpop.permute.xlu0 %3442 }
 0x642   : > { %4276 = vperm.xlu0 %6543, %v4270_v48  }
 0x644   : > { %v8660_v38 = vpop.permute.xlu1 %3087 }
 0x645   : > { %4291 = vperm.xlu1 %6544, %v4273_v2   ;;  %v8662_v23 = vpop.permute.xlu0 %3082 }
 0x646   : > { %4286 = vperm.xlu0 %6543, %v4272_v63  }
 0x648   : > { %v8664_v17 = vpop.permute.xlu1 %3608 }
 0x649   : > { %v8666_v22 = vpop.permute.xlu0 %3603 }
 0x64c   : > { %v8668_v8 = vpop.permute.xlu1 %3457 }
 0x64d   : > { %v8670_v60 = vpop.permute.xlu0 %3452 }
 0x650   : > { %v8672_v12 = vpop.permute.xlu1 %3097 }
 0x651   : > { %v8674_v56 = vpop.permute.xlu0 %3092 }
 0x654   : > { %v8676_v21 = vpop.permute.xlu1 %3618 }
 0x655   : > { %v8678_v50 = vpop.permute.xlu0 %3613 }
 0x658   : > { %v8680_v58 = vpop.permute.xlu1 %3467 }
 0x659   : > { %v8682_v61 = vpop.permute.xlu0 %3462 }
 0x65c   : > { %v8684_v33 = vpop.permute.xlu1 %3107 }
 0x65d   : > { %v8686_v16 = vpop.permute.xlu0 %3102 }
 0x660   : > { %v8688_v35 = vpop.permute.xlu1 %3628 }
 0x661   : > { %v8690_v7 = vpop.permute.xlu0 %3623 }
 0x664   : > { %v8692_v54 = vpop.permute.xlu1 %3477 }
 0x665   : > { %v8694_v52 = vpop.permute.xlu0 %3472 }
 0x668   : > { %v8696_v25 = vpop.permute.xlu1 %3117 }
 0x669   : > { %v8698_v28 = vpop.permute.xlu0 %3112 }
 0x66c   : > { %v8700_v55 = vpop.permute.xlu1 %3638 }
 0x66d   : > { %v8702_v1 = vpop.permute.xlu0 %3633 }
 0x6a1   : > { %v3335_v30 = vpop.f32.mrb[0].mxu1 }
 0x6a2   : > { %v3222_v53 = vpop.f32.mrb[0].mxu0  ;;  %v3336_v34 = vadd.f32 %v3335_v30, %v3063_v44  ;;  %v3337_v26 = vpop.f32.mrb[1].mxu1 }
 0x6a3   : > { %v3223_v43 = vadd.f32 %v3222_v53, %v3063_v44  ;;  %v3224_v14 = vpop.f32.mrb[1].mxu0  ;;  %v3338_v51 = vadd.f32 %v3337_v26, %v3063_v44  ;;  %v3339_v46 = vpop.f32.mrb[2].mxu1 }
 0x6a4   : > { %v3225_v42 = vadd.f32 %v3224_v14, %v3063_v44  ;;  %v3226_v0 = vpop.f32.mrb[2].mxu0  ;;  %v3512_v27 = vmul.f32 %v3433_v3, %v3336_v34  ;;  %v3340_v41 = vadd.f32 %v3339_v46, %v3068_v6  ;;  %v3341_v39 = vpop.f32.mrb[3].mxu1 }
 0x6a5   : > { %v3510_v40 = vmul.f32 %v3433_v3, %v3223_v43  ;;  %v3227_v15 = vadd.f32 %v3226_v0, %v3068_v6  ;;  %v3513_v4 = vmul.f32 %v3433_v3, %v3338_v51  ;;  %v3228_v32 = vpop.f32.mrb[3].mxu0  ;;  %v3342_v62 = vadd.f32 %v3341_v39, %v3068_v6 }
 0x6a6   : > { %v3511_v29 = vmul.f32 %v3433_v3, %v3225_v42  ;;  %v3673_v37 = vadd.f32 %v3594_v9, %v3512_v27  ;;  %v3516_v13 = vmul.f32 %v3438_v18, %v3340_v41  ;;  %v3229_v45 = vadd.f32 %v3228_v32, %v3068_v6 }
 0x6a7   : > { %v3671_v36 = vadd.f32 %v3594_v9, %v3510_v40  ;;  %v3514_v11 = vmul.f32 %v3438_v18, %v3227_v15  ;;  %v3674_v5 = vadd.f32 %v3594_v9, %v3513_v4  ;;  %v3517_v3 = vmul.f32 %v3438_v18, %v3342_v62 }
 0x6a8   : > { %v3672_v19 = vadd.f32 %v3594_v9, %v3511_v29  ;;  %v3677_v24 = vadd.f32 %v8654_v59, %v3516_v13  ;;  %v3737_v2 = vmax.f32 %v3673_v37, 0.0  ;;  %v3515_v63 = vmul.f32 %v3438_v18, %v3229_v45 }
 0x6a9   : > { %v3675_v57 = vadd.f32 %v8654_v59, %v3514_v11  ;;  %v3735_v48 = vmax.f32 %v3671_v36, 0.0  ;;  %v3345_v53 = vpop.f32.mrb[4].mxu1  ;;  %v3678_v42 = vadd.f32 %v8654_v59, %v3517_v3  ;;  %v3738_v62 = vmax.f32 %v3674_v5, 0.0 }
 0x6aa   : > { %v3232_v44 = vpop.f32.mrb[4].mxu0  ;;  %v3741_v43 = vmax.f32 %v3677_v24, 0.0  ;;  %v3346_v34 = vadd.f32 %v3345_v53, %v8652_v31  ;;  %v3347_v26 = vpop.f32.mrb[5].mxu1  ;;  %v3676_v9 = vadd.f32 %v8654_v59, %v3515_v63  ;;  %v3736_v45 = vmax.f32 %v3672_v19, 0.0 }
 0x6ab   : > { %v3739_v30 = vmax.f32 %v3675_v57, 0.0  ;;  %v3233_v6 = vadd.f32 %v3232_v44, %v8652_v31  ;;  %v3234_v14 = vpop.f32.mrb[5].mxu0  ;;  %v3348_v0 = vadd.f32 %v3347_v26, %v8652_v31  ;;  %v3349_v18 = vpop.f32.mrb[6].mxu1  ;;  %v3742_v4 = vmax.f32 %v3678_v42, 0.0 }
 0x6ac   : > { %v3235_v51 = vadd.f32 %v3234_v14, %v8652_v31  ;;  %v3236_v46 = vpop.f32.mrb[6].mxu0  ;;  %v3801_v27 = vpack.c.bf16 %v3741_v43, %v3737_v2  ;;  %v3520_v41 = vmul.f32 %v8658_v20, %v3346_v34  ;;  %v3740_v29 = vmax.f32 %v3676_v9, 0.0  ;;  %v3351_v59 = vpop.f32.mrb[7].mxu1 }
 0x6ad   : > { %v3799_v40 = vpack.c.bf16 %v3739_v30, %v3735_v48  ;;  %v3518_v15 = vmul.f32 %v8658_v20, %v3233_v6  ;;  %v3521_v39 = vmul.f32 %v8658_v20, %v3348_v0  ;;  %v3238_v36 = vpop.f32.mrb[7].mxu0  ;;  %v3237_v11 = vadd.f32 %v3236_v46, %v8650_v49  ;;  %v8722_v48 = vpop.permute.xlu1 %3487 }
 0x6ae   : > { %v3519_v32 = vmul.f32 %v8658_v20, %v3235_v51  ;;  %v3681_v31 = vadd.f32 %v8666_v22, %v3520_v41  ;;  %v3350_v13 = vadd.f32 %v3349_v18, %v8650_v49  ;;  %v3239_v57 = vadd.f32 %v3238_v36, %v8650_v49  ;;  %v8724_v2 = vpop.permute.xlu0 %3482 }
 0x6af   : > { %v3679_v37 = vadd.f32 %v8666_v22, %v3518_v15  ;;  %v3352_v24 = vadd.f32 %v3351_v59, %v8650_v49  ;;  %v8730_v63 = vadd.f32 %v8666_v22, %v3521_v39  ;;  %v3522_v3 = vmul.f32 %v8656_v10, %v3237_v11 }
 0x6b0   : > { %v8727_v20 = vadd.f32 %v8666_v22, %v3519_v32  ;;  %v3524_v44 = vmul.f32 %v8656_v10, %v3350_v13  ;;  %v3745_v5 = vmax.f32 %v3681_v31, 0.0  ;;  %v3523_v53 = vmul.f32 %v8656_v10, %v3239_v57 }
 0x6b1   : > { %v3743_v19 = vmax.f32 %v3679_v37, 0.0  ;;  %v3525_v49 = vmul.f32 %v8656_v10, %v3352_v24  ;;  %v3355_v43 = vpop.f32.mrb[8].mxu1  ;;  %v3683_v6 = vadd.f32 %v8664_v17, %v3522_v3  ;;  %v3800_v14 = vpack.c.bf16 %v3740_v29, %v3736_v45 }
 0x6b2   : > { %v3242_v30 = vpop.f32.mrb[8].mxu0  ;;  %v3685_v34 = vadd.f32 %v8664_v17, %v3524_v44  ;;  %v3802_v26 = vpack.c.bf16 %v3742_v4, %v3738_v62  ;;  %v3357_v9 = vpop.f32.mrb[9].mxu1  ;;  %v3684_v42 = vadd.f32 %v8664_v17, %v3523_v53  ;;  %v3356_v46 = vadd.f32 %v3355_v43, %v8662_v23 }
 0x6b3   : > { %v3244_v22 = vpop.f32.mrb[9].mxu0  ;;  %v3686_v51 = vadd.f32 %v8664_v17, %v3525_v49  ;;  %v3243_v0 = vadd.f32 %v3242_v30, %v8662_v23  ;;  %v3359_v10 = vpop.f32.mrb[10].mxu1  ;;  %v3747_v15 = vmax.f32 %v3683_v6, 0.0  ;;  %3911 = vmatprep.subr.bf16.mxu0 %v3800_v14  ;;  %v3358_v29 = vadd.f32 %v3357_v9, %v8662_v23 }
 0x6b4   : > { %v3246_v18 = vpop.f32.mrb[10].mxu0  ;;  %v3749_v41 = vmax.f32 %v3685_v34, 0.0  ;;  %3984 = vmatprep.subr.bf16.mxu1 %v3802_v26  ;;  %v3245_v32 = vadd.f32 %v3244_v22, %v8662_v23  ;;  %v3748_v4 = vmax.f32 %v3684_v42, 0.0  ;;  %3912 = vmatpush1.bf16.msra.mxu0 %v3799_v40  ;;  %v3528_v36 = vmul.f32 %v8670_v60, %v3356_v46  ;;  %v3361_v37 = vpop.f32.mrb[11].mxu1 }
 0x6b5   : > { %v3750_v39 = vmax.f32 %v3686_v51, 0.0  ;;  %3985 = vmatpush1.bf16.msra.mxu1 %v3801_v27  ;;  %v3526_v17 = vmul.f32 %v8670_v60, %v3243_v0  ;;  %v3248_v59 = vpop.f32.mrb[11].mxu0  ;;  %v3803_v31 = vpack.c.bf16 %v3747_v15, %v3743_v19  ;;  %v3529_v45 = vmul.f32 %v8670_v60, %v3358_v29  ;;  %v8752_v27 = vpop.permute.xlu1 %3127 }
 0x6b6   : > { %v3805_v11 = vpack.c.bf16 %v3749_v41, %v3745_v5  ;;  %v3527_v13 = vmul.f32 %v8670_v60, %v3245_v32  ;;  %v3689_v23 = vadd.f32 %v8678_v50, %v3528_v36  ;;  %v3247_v57 = vadd.f32 %v3246_v18, %v8660_v38  ;;  %v8754_v24 = vpop.permute.xlu0 %3122 }
 0x6b7   : > { %v3687_v62 = vadd.f32 %v8678_v50, %v3526_v17  ;;  %v3360_v40 = vadd.f32 %v3359_v10, %v8660_v38  ;;  %v3744_v3 = vmax.f32 %v8727_v20, 0.0  ;;  %v3746_v44 = vmax.f32 %v8730_v63, 0.0 }
 0x6b8   : > { %v3249_v19 = vadd.f32 %v3248_v59, %v8660_v38  ;;  %v3362_v60 = vadd.f32 %v3361_v37, %v8660_v38  ;;  %v8761_v5 = vadd.f32 %v8678_v50, %v3527_v13  ;;  %v8764_v53 = vadd.f32 %v8678_v50, %v3529_v45 }
 0x6b9   : > { %v3530_v49 = vmul.f32 %v8668_v8, %v3247_v57  ;;  %v3532_v30 = vmul.f32 %v8668_v8, %v3360_v40  ;;  %v3365_v6 = vpop.f32.mrb[12].mxu1  ;;  %v3751_v34 = vmax.f32 %v3687_v62, 0.0  ;;  %v3753_v20 = vmax.f32 %v3689_v23, 0.0  ;;  %v8782_v23 = vpop.permute.xlu1 %3648 }
 0x6ba   : > { %v3252_v43 = vpop.f32.mrb[12].mxu0  ;;  %v3531_v63 = vmul.f32 %v8668_v8, %v3249_v19  ;;  %v3533_v14 = vmul.f32 %v8668_v8, %v3362_v60  ;;  %v3367_v38 = vpop.f32.mrb[13].mxu1  ;;  %v3804_v50 = vpack.c.bf16 %v3748_v4, %v3744_v3  ;;  %v3806_v42 = vpack.c.bf16 %v3750_v39, %v3746_v44 }
 0x6bb   : > { %v3254_v26 = vpop.f32.mrb[13].mxu0  ;;  %v3691_v22 = vadd.f32 %v8676_v21, %v3530_v49  ;;  %v3693_v9 = vadd.f32 %v8676_v21, %v3532_v30  ;;  %v3369_v0 = vpop.f32.mrb[14].mxu1  ;;  %v3253_v10 = vadd.f32 %v3252_v43, %v8674_v56  ;;  %v3366_v15 = vadd.f32 %v3365_v6, %v8674_v56 }
 0x6bc   : > { %v3256_v51 = vpop.f32.mrb[14].mxu0  ;;  %v3692_v46 = vadd.f32 %v8676_v21, %v3531_v63  ;;  %v3694_v18 = vadd.f32 %v8676_v21, %v3533_v14  ;;  %3913 = vmatprep.subr.bf16.mxu0 %v3804_v50  ;;  %3986 = vmatprep.subr.bf16.mxu1 %v3806_v42  ;;  %v3255_v32 = vadd.f32 %v3254_v26, %v8674_v56  ;;  %v3371_v39 = vpop.f32.mrb[15].mxu1  ;;  %v3752_v3 = vmax.f32 %v8761_v5, 0.0 }
 0x6bd   : > { %v3755_v41 = vmax.f32 %v3691_v22, 0.0  ;;  %v3757_v8 = vmax.f32 %v3693_v9, 0.0  ;;  %v3368_v29 = vadd.f32 %v3367_v38, %v8674_v56  ;;  %v3258_v4 = vpop.f32.mrb[15].mxu0  ;;  %3914 = vmatpush1.bf16.msra.mxu0 %v3803_v31  ;;  %3987 = vmatpush1.bf16.msra.mxu1 %v3805_v11  ;;  %v3534_v21 = vmul.f32 %v8682_v61, %v3253_v10  ;;  %v8784_v57 = vpop.permute.xlu0 %3643 }
 0x6be   : > { %v3756_v17 = vmax.f32 %v3692_v46, 0.0  ;;  %v3758_v36 = vmax.f32 %v3694_v18, 0.0  ;;  %v3536_v59 = vmul.f32 %v8682_v61, %v3366_v15  ;;  %v3535_v45 = vmul.f32 %v8682_v61, %v3255_v32 }
 0x6bf   : > { %v3807_v37 = vpack.c.bf16 %v3755_v41, %v3751_v34  ;;  %v3809_v13 = vpack.c.bf16 %v3757_v8, %v3753_v20  ;;  %v3537_v62 = vmul.f32 %v8682_v61, %v3368_v29  ;;  %v3695_v56 = vadd.f32 %v8690_v7, %v3534_v21 }
 0x6c0   : > { %v3697_v40 = vadd.f32 %v8690_v7, %v3536_v59  ;;  %v3257_v31 = vadd.f32 %v3256_v51, %v8672_v12  ;;  %v3370_v11 = vadd.f32 %v3369_v0, %v8672_v12  ;;  %v3754_v44 = vmax.f32 %v8764_v53, 0.0 }
 0x6c1   : > { %v3259_v19 = vadd.f32 %v3258_v4, %v8672_v12  ;;  %v3372_v61 = vadd.f32 %v3371_v39, %v8672_v12  ;;  %v3375_v49 = vpop.f32.mrb[16].mxu1  ;;  %v8795_v30 = vadd.f32 %v8690_v7, %v3535_v45  ;;  %v8798_v43 = vadd.f32 %v8690_v7, %v3537_v62  ;;  %v8814_v39 = vpop.permute.xlu1 %3497 }
 0x6c2   : > { %v3262_v60 = vpop.f32.mrb[16].mxu0  ;;  %v3538_v6 = vmul.f32 %v8680_v58, %v3257_v31  ;;  %v3540_v34 = vmul.f32 %v8680_v58, %v3370_v11  ;;  %v3377_v5 = vpop.f32.mrb[17].mxu1  ;;  %v3759_v63 = vmax.f32 %v3695_v56, 0.0  ;;  %v3761_v53 = vmax.f32 %v3697_v40, 0.0 }
 0x6c3   : > { %v3264_v20 = vpop.f32.mrb[17].mxu0  ;;  %v3539_v14 = vmul.f32 %v8680_v58, %v3259_v19  ;;  %v3541_v12 = vmul.f32 %v8680_v58, %v3372_v61  ;;  %v3379_v38 = vpop.f32.mrb[18].mxu1  ;;  %v3808_v7 = vpack.c.bf16 %v3756_v17, %v3752_v3  ;;  %v3810_v50 = vpack.c.bf16 %v3758_v36, %v3754_v44 }
 0x6c4   : > { %v3266_v26 = vpop.f32.mrb[18].mxu0  ;;  %v3699_v22 = vadd.f32 %v8688_v35, %v3538_v6  ;;  %v3701_v9 = vadd.f32 %v8688_v35, %v3540_v34  ;;  %v3263_v0 = vadd.f32 %v3262_v60, %v8686_v16  ;;  %v3376_v46 = vadd.f32 %v3375_v49, %v8686_v16  ;;  %v3381_v10 = vpop.f32.mrb[19].mxu1 }
 0x6c5   : > { %v3700_v42 = vadd.f32 %v8688_v35, %v3539_v14  ;;  %v3702_v51 = vadd.f32 %v8688_v35, %v3541_v12  ;;  %v3268_v18 = vpop.f32.mrb[19].mxu0  ;;  %3915 = vmatprep.subr.bf16.mxu0 %v3808_v7  ;;  %3988 = vmatprep.subr.bf16.mxu1 %v3810_v50  ;;  %v3265_v41 = vadd.f32 %v3264_v20, %v8686_v16  ;;  %v8816_v17 = vpop.permute.xlu0 %3492  ;;  %v3760_v31 = vmax.f32 %v8795_v30, 0.0 }
 0x6c6   : > { %v3763_v15 = vmax.f32 %v3699_v22, 0.0  ;;  %v3765_v58 = vmax.f32 %v3701_v9, 0.0  ;;  %v3378_v8 = vadd.f32 %v3377_v5, %v8686_v16  ;;  %3916 = vmatpush1.bf16.msra.mxu0 %v3807_v37  ;;  %3989 = vmatpush1.bf16.msra.mxu1 %v3809_v13  ;;  %v3542_v35 = vmul.f32 %v8694_v52, %v3263_v0  ;;  %v8846_v0 = vpop.permute.xlu1 %3137 }
 0x6c7   : > { %v3764_v32 = vmax.f32 %v3700_v42, 0.0  ;;  %v3766_v29 = vmax.f32 %v3702_v51, 0.0  ;;  %v3544_v4 = vmul.f32 %v8694_v52, %v3376_v46  ;;  %v3543_v59 = vmul.f32 %v8694_v52, %v3265_v41 }
 0x6c8   : > { %v3811_v36 = vpack.c.bf16 %v3763_v15, %v3759_v63  ;;  %v3813_v21 = vpack.c.bf16 %v3765_v58, %v3761_v53  ;;  %v3545_v45 = vmul.f32 %v8694_v52, %v3378_v8  ;;  %v3703_v16 = vadd.f32 %v8702_v1, %v3542_v35 }
 0x6c9   : > { %v3705_v62 = vadd.f32 %v8702_v1, %v3544_v4  ;;  %v3267_v37 = vadd.f32 %v3266_v26, %v8684_v33  ;;  %v3380_v13 = vadd.f32 %v3379_v38, %v8684_v33  ;;  %v3385_v40 = vpop.f32.mrb[20].mxu1  ;;  %v3762_v11 = vmax.f32 %v8798_v43, 0.0  ;;  %v8848_v46 = vpop.permute.xlu0 %3132 }
 0x6ca   : > { %v3272_v56 = vpop.f32.mrb[20].mxu0  ;;  %v3269_v3 = vadd.f32 %v3268_v18, %v8684_v33  ;;  %v3382_v44 = vadd.f32 %v3381_v10, %v8684_v33  ;;  %v3387_v52 = vpop.f32.mrb[21].mxu1  ;;  %v8829_v61 = vadd.f32 %v8702_v1, %v3543_v59  ;;  %v8832_v60 = vadd.f32 %v8702_v1, %v3545_v45 }
 0x6cb   : > { %v3274_v19 = vpop.f32.mrb[21].mxu0  ;;  %v3546_v49 = vmul.f32 %v8692_v54, %v3267_v37  ;;  %v3548_v6 = vmul.f32 %v8692_v54, %v3380_v13  ;;  %v3389_v30 = vpop.f32.mrb[22].mxu1  ;;  %v3767_v20 = vmax.f32 %v3703_v16, 0.0  ;;  %v3769_v43 = vmax.f32 %v3705_v62, 0.0 }
 0x6cc   : > { %v3276_v34 = vpop.f32.mrb[22].mxu0  ;;  %v3547_v5 = vmul.f32 %v8692_v54, %v3269_v3  ;;  %v3549_v33 = vmul.f32 %v8692_v54, %v3382_v44  ;;  %v3391_v53 = vpop.f32.mrb[23].mxu1  ;;  %v3812_v1 = vpack.c.bf16 %v3764_v32, %v3760_v31  ;;  %v3814_v26 = vpack.c.bf16 %v3766_v29, %v3762_v11 }
 0x6cd   : > { %v3278_v63 = vpop.f32.mrb[23].mxu0  ;;  %v3707_v14 = vadd.f32 %v8700_v55, %v3546_v49  ;;  %v3709_v12 = vadd.f32 %v8700_v55, %v3548_v6  ;;  %v3273_v9 = vadd.f32 %v3272_v56, %v8698_v28  ;;  %v3386_v7 = vadd.f32 %v3385_v40, %v8698_v28 }
 0x6ce   : > { %v3708_v38 = vadd.f32 %v8700_v55, %v3547_v5  ;;  %v3710_v22 = vadd.f32 %v8700_v55, %v3549_v33  ;;  %3917 = vmatprep.subr.bf16.mxu0 %v3812_v1  ;;  %3990 = vmatprep.subr.bf16.mxu1 %v3814_v26  ;;  %v3275_v54 = vadd.f32 %v3274_v19, %v8698_v28  ;;  %v3768_v16 = vmax.f32 %v8829_v61, 0.0  ;;  %v3659_v33 = vpop.permute.xlu1 %3658 }
 0x6cf   : > { %v3771_v50 = vmax.f32 %v3707_v14, 0.0  ;;  %v3773_v42 = vmax.f32 %v3709_v12, 0.0  ;;  %v3388_v51 = vadd.f32 %v3387_v52, %v8698_v28  ;;  %3918 = vmatpush1.bf16.msra.mxu0 %v3811_v36  ;;  %3991 = vmatpush1.bf16.msra.mxu1 %v3813_v21  ;;  %v3550_v55 = vmul.f32 %v8724_v2, %v3273_v9 }
 0x6d0   : > { %v3772_v18 = vmax.f32 %v3708_v38, 0.0  ;;  %v3774_v10 = vmax.f32 %v3710_v22, 0.0  ;;  %v3552_v15 = vmul.f32 %v8724_v2, %v3386_v7  ;;  %v3551_v8 = vmul.f32 %v8724_v2, %v3275_v54 }
 0x6d1   : > { %v3815_v58 = vpack.c.bf16 %v3771_v50, %v3767_v20  ;;  %v3817_v41 = vpack.c.bf16 %v3773_v42, %v3769_v43  ;;  %v3553_v32 = vmul.f32 %v8724_v2, %v3388_v51  ;;  %v3395_v28 = vpop.f32.mrb[24].mxu1  ;;  %v3711_v35 = vadd.f32 %v8784_v57, %v3550_v55 }
 0x6d2   : > { %v3282_v29 = vpop.f32.mrb[24].mxu0  ;;  %v3713_v4 = vadd.f32 %v8784_v57, %v3552_v15  ;;  %v3277_v59 = vadd.f32 %v3276_v34, %v8696_v25  ;;  %v3390_v36 = vadd.f32 %v3389_v30, %v8696_v25  ;;  %v3397_v45 = vpop.f32.mrb[25].mxu1  ;;  %v3770_v62 = vmax.f32 %v8832_v60, 0.0 }
 0x6d3   : > { %v3284_v21 = vpop.f32.mrb[25].mxu0  ;;  %v3279_v37 = vadd.f32 %v3278_v63, %v8696_v25  ;;  %v3392_v2 = vadd.f32 %v3391_v53, %v8696_v25  ;;  %v3399_v56 = vpop.f32.mrb[26].mxu1  ;;  %v8863_v40 = vadd.f32 %v8784_v57, %v3551_v8  ;;  %v8866_v31 = vadd.f32 %v8784_v57, %v3553_v32 }
 0x6d4   : > { %v3286_v13 = vpop.f32.mrb[26].mxu0  ;;  %v3554_v11 = vmul.f32 %v8722_v48, %v3277_v59  ;;  %v3556_v3 = vmul.f32 %v8722_v48, %v3390_v36  ;;  %v3401_v19 = vpop.f32.mrb[27].mxu1  ;;  %v3775_v52 = vmax.f32 %v3711_v35, 0.0  ;;  %v3777_v61 = vmax.f32 %v3713_v4, 0.0 }
 0x6d5   : > { %v3288_v44 = vpop.f32.mrb[27].mxu0  ;;  %v3555_v60 = vmul.f32 %v8722_v48, %v3279_v37  ;;  %v3557_v25 = vmul.f32 %v8722_v48, %v3392_v2  ;;  %v3816_v34 = vpack.c.bf16 %v3772_v18, %v3768_v16  ;;  %v3818_v30 = vpack.c.bf16 %v3774_v10, %v3770_v62  ;;  %v3654_v63 = vpop.permute.xlu0 %3653 }
 0x6d6   : > { %v3715_v49 = vadd.f32 %v8782_v23, %v3554_v11  ;;  %v3717_v6 = vadd.f32 %v8782_v23, %v3556_v3  ;;  %v3283_v43 = vadd.f32 %v3282_v29, %v8754_v24  ;;  %v3396_v5 = vadd.f32 %v3395_v28, %v8754_v24 }
 0x6d7   : > { %v3716_v57 = vadd.f32 %v8782_v23, %v3555_v60  ;;  %v3718_v20 = vadd.f32 %v8782_v23, %v3557_v25  ;;  %3919 = vmatprep.subr.bf16.mxu0 %v3816_v34  ;;  %3992 = vmatprep.subr.bf16.mxu1 %v3818_v30  ;;  %v3285_v48 = vadd.f32 %v3284_v21, %v8754_v24  ;;  %v3776_v8 = vmax.f32 %v8863_v40, 0.0 }
 0x6d8   : > { %v3779_v53 = vmax.f32 %v3715_v49, 0.0  ;;  %v3781_v14 = vmax.f32 %v3717_v6, 0.0  ;;  %v3398_v12 = vadd.f32 %v3397_v45, %v8754_v24  ;;  %3920 = vmatpush1.bf16.msra.mxu0 %v3815_v58  ;;  %3993 = vmatpush1.bf16.msra.mxu1 %v3817_v41  ;;  %v3558_v23 = vmul.f32 %v8816_v17, %v3283_v43 }
 0x6d9   : > { %v3780_v1 = vmax.f32 %v3716_v57, 0.0  ;;  %v3782_v26 = vmax.f32 %v3718_v20, 0.0  ;;  %v3560_v38 = vmul.f32 %v8816_v17, %v3396_v5  ;;  %v3405_v9 = vpop.f32.mrb[28].mxu1  ;;  %v3559_v42 = vmul.f32 %v8816_v17, %v3285_v48  ;;  %v3503_v2 = vpop.permute.xlu0 %3502 }
 0x6da   : > { %v3292_v22 = vpop.f32.mrb[28].mxu0  ;;  %v3819_v7 = vpack.c.bf16 %v3779_v53, %v3775_v52  ;;  %v3821_v50 = vpack.c.bf16 %v3781_v14, %v3777_v61  ;;  %v3561_v54 = vmul.f32 %v8816_v17, %v3398_v12  ;;  %v3407_v18 = vpop.f32.mrb[29].mxu1  ;;  %v3719_v10 = vadd.f32 %v3654_v63, %v3558_v23 }
 0x6db   : > { %v3294_v51 = vpop.f32.mrb[29].mxu0  ;;  %v3721_v24 = vadd.f32 %v3654_v63, %v3560_v38  ;;  %v3287_v55 = vadd.f32 %v3286_v13, %v8752_v27  ;;  %v3400_v15 = vadd.f32 %v3399_v56, %v8752_v27  ;;  %v3409_v41 = vpop.f32.mrb[30].mxu1  ;;  %v3778_v32 = vmax.f32 %v8866_v31, 0.0 }
 0x6dc   : > { %v3296_v58 = vpop.f32.mrb[30].mxu0  ;;  %v3289_v29 = vadd.f32 %v3288_v44, %v8752_v27  ;;  %v3402_v28 = vadd.f32 %v3401_v19, %v8752_v27  ;;  %v3411_v17 = vpop.f32.mrb[31].mxu1  ;;  %v3720_v4 = vadd.f32 %v3654_v63, %v3559_v42  ;;  %v3722_v59 = vadd.f32 %v3654_v63, %v3561_v54 }
 0x6dd   : > { %v3298_v35 = vpop.f32.mrb[31].mxu0  ;;  %v3562_v36 = vmul.f32 %v8814_v39, %v3287_v55  ;;  %v3564_v21 = vmul.f32 %v8814_v39, %v3400_v15  ;;  %v3783_v45 = vmax.f32 %v3719_v10, 0.0  ;;  %v3785_v16 = vmax.f32 %v3721_v24, 0.0  ;;  %v3508_v19 = vpop.permute.xlu1 %3507 }
 0x6de   : > { %v3563_v62 = vmul.f32 %v8814_v39, %v3289_v29  ;;  %v3565_v37 = vmul.f32 %v8814_v39, %v3402_v28  ;;  %v3820_v40 = vpack.c.bf16 %v3780_v1, %v3776_v8  ;;  %v3822_v31 = vpack.c.bf16 %v3782_v26, %v3778_v32  ;;  %v3664_v63 = vpop.permute.xlu0 %3663 }
 0x6df   : > { %v3723_v13 = vadd.f32 %v3659_v33, %v3562_v36  ;;  %v3725_v56 = vadd.f32 %v3659_v33, %v3564_v21  ;;  %v3293_v3 = vadd.f32 %v3292_v22, %v8848_v46  ;;  %v3406_v44 = vadd.f32 %v3405_v9, %v8848_v46  ;;  %v6554_v36 = vld [vmem:[%s9871_s10 + $0x8] sm:$0xff]   ;;  %v6555_v21 = vld [vmem:[%s9871_s10 + $0x10] sm:$0xff]  }
 0x6e0   : > { %v3724_v27 = vadd.f32 %v3659_v33, %v3563_v62  ;;  %v3726_v11 = vadd.f32 %v3659_v33, %v3565_v37  ;;  %3921 = vmatprep.subr.bf16.mxu0 %v3820_v40  ;;  %3994 = vmatprep.subr.bf16.mxu1 %v3822_v31  ;;  %v3295_v60 = vadd.f32 %v3294_v51, %v8848_v46  ;;  %v3784_v53 = vmax.f32 %v3720_v4, 0.0 }
 0x6e1   : > { %v3787_v52 = vmax.f32 %v3723_v13, 0.0  ;;  %v3789_v61 = vmax.f32 %v3725_v56, 0.0  ;;  %v3408_v39 = vadd.f32 %v3407_v18, %v8848_v46  ;;  %3922 = vmatpush1.bf16.msra.mxu0 %v3819_v7  ;;  %3995 = vmatpush1.bf16.msra.mxu1 %v3821_v50  ;;  %v3566_v25 = vmul.f32 %v3503_v2, %v3293_v3  ;;  %v3669_v38 = vpop.permute.xlu1 %3668 }
 0x6e2   : > { %v3568_v49 = vmul.f32 %v3503_v2, %v3406_v44  ;;  %v3567_v30 = vmul.f32 %v3503_v2, %v3295_v60  ;;  %v3788_v20 = vmax.f32 %v3724_v27, 0.0  ;;  %v3790_v43 = vmax.f32 %v3726_v11, 0.0  ;;  %v3850_v62 = vpop.permute.xlu0 %3849 }
 0x6e3   : > { %v3823_v6 = vpack.c.bf16 %v3787_v52, %v3783_v45  ;;  %v3825_v34 = vpack.c.bf16 %v3789_v61, %v3785_v16  ;;  %v3569_v57 = vmul.f32 %v3503_v2, %v3408_v39  ;;  %v3297_v5 = vadd.f32 %v3296_v58, %v8846_v0  ;;  %v6556_v45 = vld [vmem:[%s9871_s10 + $0x18] sm:$0xff]  }
 0x6e4   : > { %v3410_v33 = vadd.f32 %v3409_v41, %v8846_v0  ;;  %v3786_v14 = vmax.f32 %v3722_v59, 0.0  ;;  %v3299_v48 = vadd.f32 %v3298_v35, %v8846_v0  ;;  %v3412_v46 = vadd.f32 %v3411_v17, %v8846_v0  ;;  %v6553_v59 = vld [vmem:[%s9871_s10] sm:$0xff]  }
 0x6e5   : > { %v3727_v12 = vadd.f32 %v3664_v63, %v3566_v25  ;;  %v3729_v1 = vadd.f32 %v3664_v63, %v3568_v49  ;;  %v3570_v26 = vmul.f32 %v3508_v19, %v3297_v5  ;;  %v3728_v22 = vadd.f32 %v3664_v63, %v3567_v30  ;;  %v3855_v16 = vpop.permute.xlu1 %3854 }
 0x6e6   : > { %v3572_v23 = vmul.f32 %v3508_v19, %v3410_v33  ;;  %v3730_v9 = vadd.f32 %v3664_v63, %v3569_v57  ;;  %v3571_v7 = vmul.f32 %v3508_v19, %v3299_v48  ;;  %v3573_v50 = vmul.f32 %v3508_v19, %v3412_v46  ;;  %v4068_v2 = vpop.permute.xlu0 %4067 }
 0x6e7   : > { %v3731_v42 = vadd.f32 %v3669_v38, %v3570_v26  ;;  %v3824_v51 = vpack.c.bf16 %v3788_v20, %v3784_v53  ;;  %v3826_v18 = vpack.c.bf16 %v3790_v43, %v3786_v14  ;;  %v3791_v55 = vmax.f32 %v3727_v12, 0.0 }
 0x6e8   : > { %v3733_v54 = vadd.f32 %v3669_v38, %v3572_v23  ;;  %v3732_v10 = vadd.f32 %v3669_v38, %v3571_v7  ;;  %v3734_v24 = vadd.f32 %v3669_v38, %v3573_v50  ;;  %v3793_v15 = vmax.f32 %v3729_v1, 0.0 }
 0x6e9   : > { %v3795_v58 = vmax.f32 %v3731_v42, 0.0  ;;  %3923 = vmatprep.subr.bf16.mxu0 %v3824_v51  ;;  %3996 = vmatprep.subr.bf16.mxu1 %v3826_v18  ;;  %v3792_v0 = vmax.f32 %v3728_v22, 0.0  ;;  %v3794_v8 = vmax.f32 %v3730_v9, 0.0  ;;  %v4073_v37 = vpop.permute.xlu1 %4072 }
 0x6ea   : > { %v3797_v41 = vmax.f32 %v3733_v54, 0.0  ;;  %v3796_v32 = vmax.f32 %v3732_v10, 0.0  ;;  %v3798_v29 = vmax.f32 %v3734_v24, 0.0  ;;  %3924 = vmatpush1.bf16.msra.mxu0 %v3823_v6  ;;  %3997 = vmatpush1.bf16.msra.mxu1 %v3825_v34  ;;  %v3860_v56 = vpop.permute.xlu0 %3859 }
 0x6eb   : > { %v3827_v28 = vpack.c.bf16 %v3795_v58, %v3791_v55 }
 0x6ec   : > { %v3829_v35 = vpack.c.bf16 %v3797_v41, %v3793_v15  ;;  %v3828_v17 = vpack.c.bf16 %v3796_v32, %v3792_v0  ;;  %v3830_v4 = vpack.c.bf16 %v3798_v29, %v3794_v8 }
 0x6ed   : > { %v8922_v13 = vpop.permute.xlu1 %3864 }
 0x6ee   : > { %3925 = vmatprep.subr.bf16.mxu0 %v3828_v17  ;;  %3998 = vmatprep.subr.bf16.mxu1 %v3830_v4  ;;  %v4149_v31 = vpop.permute.xlu0 %4148 }
 0x6ef   : > { %3926 = vmatpush1.bf16.msra.mxu0 %v3827_v28  ;;  %3999 = vmatpush1.bf16.msra.mxu1 %v3829_v35 }
 0x6f1   : > { %v4154_v40 = vpop.permute.xlu1 %4153 }
 0x6f2   : > { %3944 = vmatmul.mubr.bf16.vlgmr.msra.gmra.mrb[32].mxu0 %v6553_v59  ;;  %4017 = vmatmul.mubr.bf16.vlgmr.msra.gmra.mrb[32].mxu1 %v6553_v59  ;;  %v8926_v11 = vpop.permute.xlu0 %4077 }
 0x6f3   : > { %3953 = vmatprep.mubr.bf16.mxu0 %v6713_v47  ;;  %4026 = vmatprep.mubr.bf16.mxu1 %v6713_v47 }
 0x6f5   : > { %v8924_v27 = vpop.permute.xlu1 %4082 }
 0x6f6   : > { %v8930_v44 = vpop.permute.xlu0 %3869 }
 0x6f9   : > { %v8928_v3 = vpop.permute.xlu1 %3874 }
 0x6fa   : > { %3954 = vmatmul.mubr.bf16.gmra.mrb[36].mxu0 %v6554_v36  ;;  %4027 = vmatmul.mubr.bf16.gmra.mrb[36].mxu1 %v6554_v36  ;;  %v8934_v52 = vpop.permute.xlu0 %4158 }
 0x6fb   : > { %3963 = vmatprep.mubr.bf16.mxu0 %v6713_v47  ;;  %4036 = vmatprep.mubr.bf16.mxu1 %v6713_v47 }
 0x6fd   : > { %v8932_v19 = vpop.permute.xlu1 %4163 }
 0x6fe   : > { %v8938_v60 = vpop.permute.xlu0 %4087 }
 0x701   : > { %v8936_v61 = vpop.permute.xlu1 %4092 }
 0x702   : > { %3964 = vmatmul.mubr.bf16.gmra.mrb[40].mxu0 %v6555_v21  ;;  %4037 = vmatmul.mubr.bf16.gmra.mrb[40].mxu1 %v6555_v21  ;;  %v8942_v51 = vpop.permute.xlu0 %3879 }
 0x703   : > { %3973 = vmatprep.mubr.bf16.mxu0 %v6713_v47  ;;  %4046 = vmatprep.mubr.bf16.mxu1 %v6713_v47 }
 0x705   : > { %v8940_v54 = vpop.permute.xlu1 %3884 }
 0x70a   : > { %3974 = vmatmul.mubr.bf16.gmra.mrb[44].mxu0 %v6556_v45  ;;  %4047 = vmatmul.mubr.bf16.gmra.mrb[44].mxu1 %v6556_v45 }
 0x70b   : > { %4343 = vmatprep.mubr.bf16.mxu0 %v6713_v47  ;;  %4396 = vmatprep.mubr.bf16.mxu1 %v6713_v47 }
 0x7c5   : > { %v3945_v39 = vpop.f32.mrb[32].mxu0  ;;  %v4018_v25 = vpop.f32.mrb[32].mxu1 }
 0x7c6   : > { %v3946_v49 = vadd.f32 %v3945_v39, %v3850_v62  ;;  %v4019_v6 = vadd.f32 %v4018_v25, %v3850_v62  ;;  %v3947_v34 = vpop.f32.mrb[33].mxu0  ;;  %v4020_v30 = vpop.f32.mrb[33].mxu1 }
 0x7c7   : > { %v3948_v57 = vadd.f32 %v3947_v34, %v3850_v62  ;;  %v4021_v20 = vadd.f32 %v4020_v30, %v3850_v62  ;;  %v3949_v43 = vpop.f32.mrb[34].mxu0  ;;  %v4022_v5 = vpop.f32.mrb[34].mxu1 }
 0x7c8   : > { %v4105_v33 = vmul.f32 %v4068_v2, %v3946_v49  ;;  %v4107_v63 = vmul.f32 %v4068_v2, %v4019_v6  ;;  %v3950_v53 = vadd.f32 %v3949_v43, %v3855_v16  ;;  %v4023_v14 = vadd.f32 %v4022_v5, %v3855_v16  ;;  %v3951_v48 = vpop.f32.mrb[35].mxu0  ;;  %v4024_v46 = vpop.f32.mrb[35].mxu1 }
 0x7c9   : > { %v4106_v12 = vmul.f32 %v4068_v2, %v3948_v57  ;;  %v4108_v1 = vmul.f32 %v4068_v2, %v4021_v20  ;;  %v3952_v26 = vadd.f32 %v3951_v48, %v3855_v16  ;;  %v4025_v23 = vadd.f32 %v4024_v46, %v3855_v16 }
 0x7ca   : > { %v4186_v38 = vadd.f32 %v4149_v31, %v4105_v33  ;;  %v4188_v22 = vadd.f32 %v4149_v31, %v4107_v63  ;;  %v4109_v9 = vmul.f32 %v4073_v37, %v3950_v53  ;;  %v4111_v7 = vmul.f32 %v4073_v37, %v4023_v14  ;;  %v8956_v14 = vpop.permute.xlu1 %4173 }
 0x7cb   : > { %v4110_v50 = vmul.f32 %v4073_v37, %v3952_v26  ;;  %v4112_v42 = vmul.f32 %v4073_v37, %v4025_v23  ;;  %v4187_v18 = vadd.f32 %v4149_v31, %v4106_v12  ;;  %v4189_v10 = vadd.f32 %v4149_v31, %v4108_v1 }
 0x7cc   : > { %v4190_v24 = vadd.f32 %v4154_v40, %v4109_v9  ;;  %v4192_v55 = vadd.f32 %v4154_v40, %v4111_v7  ;;  %v4218_v15 = vmax.f32 %v4186_v38, 0.0  ;;  %v4220_v58 = vmax.f32 %v4188_v22, 0.0 }
 0x7cd   : > { %v4191_v41 = vadd.f32 %v4154_v40, %v4110_v50  ;;  %v4193_v0 = vadd.f32 %v4154_v40, %v4112_v42  ;;  %v3955_v8 = vpop.f32.mrb[36].mxu0  ;;  %v4028_v32 = vpop.f32.mrb[36].mxu1  ;;  %v4219_v33 = vmax.f32 %v4187_v18, 0.0  ;;  %v4221_v48 = vmax.f32 %v4189_v10, 0.0 }
 0x7ce   : > { %v4222_v29 = vmax.f32 %v4190_v24, 0.0  ;;  %v4224_v28 = vmax.f32 %v4192_v55, 0.0  ;;  %v3956_v35 = vadd.f32 %v3955_v8, %v3860_v56  ;;  %v4029_v17 = vadd.f32 %v4028_v32, %v3860_v56  ;;  %v3957_v4 = vpop.f32.mrb[37].mxu0  ;;  %v4030_v59 = vpop.f32.mrb[37].mxu1 }
 0x7cf   : > { %v4223_v36 = vmax.f32 %v4191_v41, 0.0  ;;  %v4225_v21 = vmax.f32 %v4193_v0, 0.0  ;;  %v3958_v45 = vadd.f32 %v3957_v4, %v3860_v56  ;;  %v4031_v16 = vadd.f32 %v4030_v59, %v3860_v56  ;;  %v3959_v62 = vpop.f32.mrb[38].mxu0  ;;  %v4032_v37 = vpop.f32.mrb[38].mxu1 }
 0x7d0   : > { %v4250_v2 = vpack.c.bf16 %v4222_v29, %v4218_v15  ;;  %v4252_v31 = vpack.c.bf16 %v4224_v28, %v4220_v58  ;;  %v4113_v39 = vmul.f32 %v8926_v11, %v3956_v35  ;;  %v4115_v40 = vmul.f32 %v8926_v11, %v4029_v17  ;;  %v3961_v25 = vpop.f32.mrb[39].mxu0  ;;  %v4034_v49 = vpop.f32.mrb[39].mxu1 }
 0x7d1   : > { %v4114_v6 = vmul.f32 %v8926_v11, %v3958_v45  ;;  %v4116_v34 = vmul.f32 %v8926_v11, %v4031_v16  ;;  %v3960_v30 = vadd.f32 %v3959_v62, %v8922_v13  ;;  %v4033_v57 = vadd.f32 %v4032_v37, %v8922_v13  ;;  %v4169_v11 = vpop.permute.xlu0 %4168 }
 0x7d2   : > { %v4194_v56 = vadd.f32 %v8934_v52, %v4113_v39  ;;  %v4196_v20 = vadd.f32 %v8934_v52, %v4115_v40  ;;  %v3962_v43 = vadd.f32 %v3961_v25, %v8922_v13  ;;  %v4035_v5 = vadd.f32 %v4034_v49, %v8922_v13  ;;  %v4103_v39 = vpop.permute.xlu1 %4102 }
 0x7d3   : > { %v4117_v63 = vmul.f32 %v8924_v27, %v3960_v30  ;;  %v4119_v53 = vmul.f32 %v8924_v27, %v4033_v57  ;;  %v8959_v46 = vadd.f32 %v8934_v52, %v4114_v6  ;;  %v8964_v23 = vadd.f32 %v8934_v52, %v4116_v34 }
 0x7d4   : > { %v4118_v12 = vmul.f32 %v8924_v27, %v3962_v43  ;;  %v4120_v1 = vmul.f32 %v8924_v27, %v4035_v5  ;;  %v4226_v26 = vmax.f32 %v4194_v56, 0.0  ;;  %v4228_v7 = vmax.f32 %v4196_v20, 0.0 }
 0x7d5   : > { %v4198_v13 = vadd.f32 %v8932_v19, %v4117_v63  ;;  %v4200_v38 = vadd.f32 %v8932_v19, %v4119_v53  ;;  %v3965_v22 = vpop.f32.mrb[40].mxu0  ;;  %v4038_v9 = vpop.f32.mrb[40].mxu1  ;;  %v4251_v42 = vpack.c.bf16 %v4223_v36, %v4219_v33  ;;  %v4253_v18 = vpack.c.bf16 %v4225_v21, %v4221_v48 }
 0x7d6   : > { %v4199_v50 = vadd.f32 %v8932_v19, %v4118_v12  ;;  %v3967_v10 = vpop.f32.mrb[41].mxu0  ;;  %v4040_v24 = vpop.f32.mrb[41].mxu1  ;;  %v3966_v27 = vadd.f32 %v3965_v22, %v8930_v44  ;;  %v4039_v52 = vadd.f32 %v4038_v9, %v8930_v44  ;;  %v4201_v0 = vadd.f32 %v8932_v19, %v4120_v1 }
 0x7d7   : > { %v4230_v55 = vmax.f32 %v4198_v13, 0.0  ;;  %v4232_v15 = vmax.f32 %v4200_v38, 0.0  ;;  %v3969_v58 = vpop.f32.mrb[42].mxu0  ;;  %v4042_v41 = vpop.f32.mrb[42].mxu1  ;;  %4311 = vmatprep.subr.bf16.mxu0 %v4251_v42  ;;  %4364 = vmatprep.subr.bf16.mxu1 %v4253_v18  ;;  %v3968_v8 = vadd.f32 %v3967_v10, %v8930_v44  ;;  %v4041_v32 = vadd.f32 %v4040_v24, %v8930_v44 }
 0x7d8   : > { %v3971_v29 = vpop.f32.mrb[43].mxu0  ;;  %v4044_v28 = vpop.f32.mrb[43].mxu1  ;;  %v4231_v4 = vmax.f32 %v4199_v50, 0.0  ;;  %4312 = vmatpush1.bf16.msra.mxu0 %v4250_v2  ;;  %4365 = vmatpush1.bf16.msra.mxu1 %v4252_v31  ;;  %v4121_v59 = vmul.f32 %v8938_v60, %v3966_v27  ;;  %v4123_v36 = vmul.f32 %v8938_v60, %v4039_v52  ;;  %v3970_v45 = vadd.f32 %v3969_v58, %v8928_v3 }
 0x7d9   : > { %v4254_v35 = vpack.c.bf16 %v4230_v55, %v4226_v26  ;;  %v4256_v17 = vpack.c.bf16 %v4232_v15, %v4228_v7  ;;  %v4122_v21 = vmul.f32 %v8938_v60, %v3968_v8  ;;  %v4124_v19 = vmul.f32 %v8938_v60, %v4041_v32  ;;  %v4098_v2 = vpop.permute.xlu0 %4097 }
 0x7da   : > { %v4202_v16 = vadd.f32 %v4169_v11, %v4121_v59  ;;  %v4043_v44 = vadd.f32 %v4042_v41, %v8928_v3  ;;  %v3972_v62 = vadd.f32 %v3971_v29, %v8928_v3  ;;  %v4045_v37 = vadd.f32 %v4044_v28, %v8928_v3  ;;  %v4184_v59 = vpop.permute.xlu1 %4183 }
 0x7db   : > { %v4227_v31 = vmax.f32 %v8959_v46, 0.0  ;;  %v4233_v40 = vmax.f32 %v4201_v0, 0.0  ;;  %v4204_v25 = vadd.f32 %v4169_v11, %v4123_v36  ;;  %v4125_v49 = vmul.f32 %v8936_v61, %v3970_v45 }
 0x7dc   : > { %v4203_v6 = vadd.f32 %v4169_v11, %v4122_v21  ;;  %v4127_v60 = vmul.f32 %v8936_v61, %v4043_v44  ;;  %v4126_v34 = vmul.f32 %v8936_v61, %v3972_v62  ;;  %v4128_v30 = vmul.f32 %v8936_v61, %v4045_v37 }
 0x7dd   : > { %v3975_v57 = vpop.f32.mrb[44].mxu0  ;;  %v4048_v56 = vpop.f32.mrb[44].mxu1  ;;  %v4229_v20 = vmax.f32 %v8964_v23, 0.0  ;;  %v4234_v3 = vmax.f32 %v4202_v16, 0.0  ;;  %v4205_v43 = vadd.f32 %v4169_v11, %v4124_v19  ;;  %v4206_v5 = vadd.f32 %v8956_v14, %v4125_v49 }
 0x7de   : > { %v3977_v33 = vpop.f32.mrb[45].mxu0  ;;  %v4050_v63 = vpop.f32.mrb[45].mxu1  ;;  %v4208_v53 = vadd.f32 %v8956_v14, %v4127_v60  ;;  %v4207_v48 = vadd.f32 %v8956_v14, %v4126_v34  ;;  %v4209_v46 = vadd.f32 %v8956_v14, %v4128_v30  ;;  %v4255_v12 = vpack.c.bf16 %v4231_v4, %v4227_v31 }
 0x7df   : > { %v3979_v1 = vpop.f32.mrb[46].mxu0  ;;  %v4052_v26 = vpop.f32.mrb[46].mxu1  ;;  %v4238_v61 = vmax.f32 %v4206_v5, 0.0  ;;  %v4257_v13 = vpack.c.bf16 %v4233_v40, %v4229_v20  ;;  %v3976_v38 = vadd.f32 %v3975_v57, %v8942_v51  ;;  %v4049_v23 = vadd.f32 %v4048_v56, %v8942_v51 }
 0x7e0   : > { %v3981_v11 = vpop.f32.mrb[47].mxu0  ;;  %v4054_v22 = vpop.f32.mrb[47].mxu1  ;;  %v4236_v9 = vmax.f32 %v4204_v25, 0.0  ;;  %v4235_v7 = vmax.f32 %v4203_v6, 0.0  ;;  %v4240_v50 = vmax.f32 %v4208_v53, 0.0  ;;  %4313 = vmatprep.subr.bf16.mxu0 %v4255_v12  ;;  %v3978_v42 = vadd.f32 %v3977_v33, %v8942_v51 }
 0x7e1   : > { %v4237_v18 = vmax.f32 %v4205_v43, 0.0  ;;  %v4258_v10 = vpack.c.bf16 %v4238_v61, %v4234_v3  ;;  %4366 = vmatprep.subr.bf16.mxu1 %v4257_v13  ;;  %4314 = vmatpush1.bf16.msra.mxu0 %v4254_v35  ;;  %v4129_v14 = vmul.f32 %v4098_v2, %v3976_v38  ;;  %v4131_v24 = vmul.f32 %v4098_v2, %v4049_v23  ;;  %v4179_v58 = vpop.permute.xlu0 %4178  ;;  %v6557_v3 = vld [vmem:[%s9872_s5] sm:$0xff]   ;;  %v6558_v43 = vld [vmem:[%s9872_s5 + $0x8] sm:$0xff]   ;;  %v4282_v5 = vpop.permute.xlu1 %4281 }
 0x7e2   : > { %v4260_v55 = vpack.c.bf16 %v4240_v50, %v4236_v9  ;;  %4367 = vmatpush1.bf16.msra.mxu1 %v4256_v17  ;;  %v4130_v15 = vmul.f32 %v4098_v2, %v3978_v42  ;;  %v4051_v27 = vadd.f32 %v4050_v63, %v8942_v51  ;;  %v3980_v52 = vadd.f32 %v3979_v1, %v8940_v54 }
 0x7e3   : > { %v4239_v41 = vmax.f32 %v4207_v48, 0.0  ;;  %v4241_v0 = vmax.f32 %v4209_v46, 0.0  ;;  %v4053_v8 = vadd.f32 %v4052_v26, %v8940_v54  ;;  %v3982_v32 = vadd.f32 %v3981_v11, %v8940_v54 }
 0x7e4   : > { %v4210_v29 = vadd.f32 %v4179_v58, %v4129_v14  ;;  %v4132_v28 = vmul.f32 %v4098_v2, %v4051_v27  ;;  %v4133_v4 = vmul.f32 %v4103_v39, %v3980_v52  ;;  %v4055_v35 = vadd.f32 %v4054_v22, %v8940_v54 }
 0x7e5   : > { %v4212_v36 = vadd.f32 %v4179_v58, %v4131_v24  ;;  %v4211_v17 = vadd.f32 %v4179_v58, %v4130_v15  ;;  %v4135_v21 = vmul.f32 %v4103_v39, %v4053_v8  ;;  %v4134_v19 = vmul.f32 %v4103_v39, %v3982_v32  ;;  %v4277_v33 = vpop.permute.xlu0 %4276  ;;  %v4292_v50 = vpop.permute.xlu1 %4291 }
 0x7e6   : > { %v4213_v51 = vadd.f32 %v4179_v58, %v4132_v28  ;;  %v4214_v45 = vadd.f32 %v4184_v59, %v4133_v4  ;;  %v4136_v16 = vmul.f32 %v4103_v39, %v4055_v35  ;;  %v4259_v37 = vpack.c.bf16 %v4239_v41, %v4235_v7 }
 0x7e7   : > { %v4216_v44 = vadd.f32 %v4184_v59, %v4135_v21  ;;  %v4215_v62 = vadd.f32 %v4184_v59, %v4134_v19  ;;  %v4261_v31 = vpack.c.bf16 %v4241_v0, %v4237_v18  ;;  %v4242_v40 = vmax.f32 %v4210_v29, 0.0 }
 0x7e8   : > { %v4246_v25 = vmax.f32 %v4214_v45, 0.0  ;;  %v4217_v49 = vadd.f32 %v4184_v59, %v4136_v16  ;;  %v4244_v6 = vmax.f32 %v4212_v36, 0.0  ;;  %v4243_v2 = vmax.f32 %v4211_v17, 0.0  ;;  %4315 = vmatprep.subr.bf16.mxu0 %v4259_v37 }
 0x7e9   : > { %v4248_v60 = vmax.f32 %v4216_v44, 0.0  ;;  %v4247_v34 = vmax.f32 %v4215_v62, 0.0  ;;  %4368 = vmatprep.subr.bf16.mxu1 %v4261_v31  ;;  %v4245_v54 = vmax.f32 %v4213_v51, 0.0  ;;  %4316 = vmatpush1.bf16.msra.mxu0 %v4258_v10  ;;  %v4287_v42 = vpop.permute.xlu0 %4286  ;;  %v6714_v35 = vmov (!%p6937_p9), 0.0  }
 0x7ea   : > { %v4262_v30 = vpack.c.bf16 %v4246_v25, %v4242_v40  ;;  %v4249_v57 = vmax.f32 %v4217_v49, 0.0  ;;  %4369 = vmatpush1.bf16.msra.mxu1 %v4260_v55  ;;  %4420 = vst.msk [vmem:[#allocation4] sm:$0xff] (!%p6937_p9), %vm4419_vm5, %v6714_v35  ;;  %4421 = vst.msk [vmem:[#allocation4 + $0x8] sm:$0xff] (!%p6937_p9), %vm4419_vm5, %v6714_v35 }
 0x7eb   : > { %v4264_v56 = vpack.c.bf16 %v4248_v60, %v4244_v6  ;;  %v4263_v39 = vpack.c.bf16 %v4247_v34, %v4243_v2  ;;  %4422 = vst.msk [vmem:[#allocation4 + $0x10] sm:$0xff] (!%p6937_p9), %vm4419_vm5, %v6714_v35  ;;  %4423 = vst.msk [vmem:[#allocation4 + $0x18] sm:$0xff] (!%p6937_p9), %vm4419_vm5, %v6714_v35 }
 0x7ec   : > { %v4265_v20 = vpack.c.bf16 %v4249_v57, %v4245_v54  ;;  %4424 = vst.msk [vmem:[#allocation4 + $0x20] sm:$0xff] (!%p6937_p9), %vm4419_vm5, %v6714_v35  ;;  %4425 = vst.msk [vmem:[#allocation4 + $0x28] sm:$0xff] (!%p6937_p9), %vm4419_vm5, %v6714_v35 }
 0x7ed   : > { %4317 = vmatprep.subr.bf16.mxu0 %v4263_v39  ;;  %4426 = vst.msk [vmem:[#allocation4 + $0x30] sm:$0xff] (!%p6937_p9), %vm4419_vm5, %v6714_v35  ;;  %4427 = vst.msk [vmem:[#allocation4 + $0x38] sm:$0xff] (!%p6937_p9), %vm4419_vm5, %v6714_v35 }
 0x7ee   : > { %4370 = vmatprep.subr.bf16.mxu1 %v4265_v20  ;;  %4318 = vmatpush1.bf16.msra.mxu0 %v4262_v30 }
 0x7ef   : > { %4371 = vmatpush1.bf16.msra.mxu1 %v4264_v56 }
 0x7f1   : > { %6347 = vmatmul.mubr.msk.bf16.vlgmr.msra.gmra.mrb[48].mxu0 %vm4304_vm4, %v6557_v3 }
 0x7f2   : > { %6349 = vmatmul.mubr.msk.bf16.vlgmr.msra.gmra.mrb[48].mxu1 %vm4304_vm4, %v6557_v3  ;;  %4353 = vmatprep.mubr.bf16.mxu0 %v6713_v47 }
 0x7f3   : > { %4406 = vmatprep.mubr.bf16.mxu1 %v6713_v47 }
 0x7f9   : > { %6348 = vmatmul.mubr.msk.bf16.gmra.mrb[52].mxu0 %vm4304_vm4, %v6558_v43 }
 0x7fa   : > { %6350 = vmatmul.mubr.msk.bf16.gmra.mrb[52].mxu1 %vm4304_vm4, %v6558_v43 }
 0x8c4   : > { %v4345_v63 = vpop.f32.mrb[48].mxu0 }
 0x8c5   : > { %v4346_v53 = vadd.f32 %v4345_v63, %v4277_v33  ;;  %v4398_v48 = vpop.f32.mrb[48].mxu1  ;;  %v4347_v46 = vpop.f32.mrb[49].mxu0 }
 0x8c6   : > { %v4399_v12 = vadd.f32 %v4398_v48, %v4277_v33  ;;  %v4348_v1 = vadd.f32 %v4347_v46, %v4277_v33  ;;  %v4400_v26 = vpop.f32.mrb[49].mxu1  ;;  %v4349_v61 = vpop.f32.mrb[50].mxu0 }
 0x8c7   : > { %v4401_v13 = vadd.f32 %v4400_v26, %v4277_v33  ;;  %v4350_v38 = vadd.f32 %v4349_v61, %v4282_v5  ;;  %v4402_v23 = vpop.f32.mrb[50].mxu1  ;;  %v4351_v47 = vpop.f32.mrb[51].mxu0 }
 0x8c8   : > { %v4403_v11 = vadd.f32 %v4402_v23, %v4282_v5  ;;  %v4352_v22 = vadd.f32 %v4351_v47, %v4282_v5  ;;  %v4404_v9 = vpop.f32.mrb[51].mxu1 }
 0x8c9   : > { %v4405_v7 = vadd.f32 %v4404_v9, %v4282_v5 }
 0x8cb   : > { %4418 = sbr.rel (%p6937_p9) target bundleno = 2258 (0x8d2), region = 116 }
 0x8cc   : > { %v4355_v18 = vpop.f32.mrb[52].mxu0 }
 0x8cd   : > { %v4356_v10 = vadd.f32 %v4355_v18, %v4287_v42  ;;  %v4408_v14 = vpop.f32.mrb[52].mxu1  ;;  %v4357_v24 = vpop.f32.mrb[53].mxu0 }
 0x8ce   : > { %v4409_v55 = vadd.f32 %v4408_v14, %v4287_v42  ;;  %v4358_v15 = vadd.f32 %v4357_v24, %v4287_v42  ;;  %v4410_v27 = vpop.f32.mrb[53].mxu1  ;;  %v4359_v52 = vpop.f32.mrb[54].mxu0 }
 0x8cf   : > { %v4411_v58 = vadd.f32 %v4410_v27, %v4287_v42  ;;  %v4360_v41 = vadd.f32 %v4359_v52, %v4292_v50  ;;  %v4412_v0 = vpop.f32.mrb[54].mxu1  ;;  %v4361_v8 = vpop.f32.mrb[55].mxu0 }
 0x8d0   : > { %v4413_v32 = vadd.f32 %v4412_v0, %v4292_v50  ;;  %v4362_v29 = vadd.f32 %v4361_v8, %v4292_v50  ;;  %v4414_v28 = vpop.f32.mrb[55].mxu1 }
 0x8d1   : > { %v4415_v4 = vadd.f32 %v4414_v28, %v4292_v50 }
 0x8d2 PF: > { %v4442_v59 = vadd.f32 %v4358_v15, %v4356_v10  ;;  %v4432_v36 = vadd.f32 %v4348_v1, %v4346_v53  ;;  %v4447_v17 = vadd.f32 %v4362_v29, %v4360_v41  ;;  %v4437_v21 = vadd.f32 %v4352_v22, %v4350_v38  ;;  %v4430_v47 = vld [vmem:[#allocation4 + $0x10] sm:$0xff]  ;;  %v4431_v42 = vld [vmem:[#allocation4 + $0x18] sm:$0xff]  ;;  %v4429_v18 = vld [vmem:[#allocation4 + $0x8] sm:$0xff]  ;;  %s9873_s26 = sld [smem:[#allocation70_spill]] (!%p6944_p12)  ;;  %s9875_s10 = sld [smem:[#allocation71_spill]] (!%p6944_p12) }
 0x8d3   : > { %v4470_v19 = vmul.f32 %v4350_v38, %v4350_v38  ;;  %v4471_v51 = vmul.f32 %v4352_v22, %v4352_v22  ;;  %v4472_v45 = vmul.f32 %v4403_v11, %v4403_v11  ;;  %v4466_v40 = vmul.f32 %v4346_v53, %v4346_v53  ;;  %v4462_v27 = vld [vmem:[#allocation4 + $0x20] sm:$0xff]  ;;  %v4465_v8 = vld [vmem:[#allocation4 + $0x38] sm:$0xff] }
 0x8d4   : > { %v4443_v16 = vadd.f32 %v4442_v59, %v4409_v55  ;;  %v4433_v44 = vadd.f32 %v4432_v36, %v4399_v12  ;;  %v4448_v62 = vadd.f32 %v4447_v17, %v4413_v32  ;;  %v4438_v37 = vadd.f32 %v4437_v21, %v4403_v11  ;;  %v4428_v11 = vld [vmem:[#allocation4] sm:$0xff] }
 0x8d5   : > { %v4487_v31 = vadd.f32 %v4471_v51, %v4470_v19  ;;  %v4467_v25 = vmul.f32 %v4348_v1, %v4348_v1  ;;  %v4468_v49 = vmul.f32 %v4399_v12, %v4399_v12  ;;  %v4473_v34 = vmul.f32 %v4405_v7, %v4405_v7 }
 0x8d6   : > { %v4444_v6 = vadd.f32 %v4443_v16, %v4411_v58  ;;  %v4434_v2 = vadd.f32 %v4433_v44, %v4401_v13  ;;  %v4449_v60 = vadd.f32 %v4448_v62, %v4415_v4  ;;  %v4439_v54 = vadd.f32 %v4438_v37, %v4405_v7 }
 0x8d7   : > { %v4488_v30 = vadd.f32 %v4487_v31, %v4472_v45  ;;  %v4482_v57 = vadd.f32 %v4467_v25, %v4466_v40  ;;  %v4478_v56 = vmul.f32 %v4360_v41, %v4360_v41  ;;  %v4469_v39 = vmul.f32 %v4401_v13, %v4401_v13 }
 0x8d8   : > { %4445 = vadd.xlane.f32.xlu1 %v4444_v6  ;;  %4435 = vadd.xlane.f32.xlu0 %v4434_v2  ;;  %v4479_v20 = vmul.f32 %v4362_v29, %v4362_v29  ;;  %v4480_v3 = vmul.f32 %v4413_v32, %v4413_v32  ;;  %v4474_v5 = vmul.f32 %v4356_v10, %v4356_v10  ;;  %vm4456_vm6 = vcmask 7168   ;;  %v4464_v32 = vld [vmem:[#allocation4 + $0x30] sm:$0xff]  ;;  %s9874_s30 = smov (!%p6944_p12), %s9873_s26 }
 0x8d9   : > { %v4483_v43 = vadd.f32 %v4482_v57, %v4468_v49  ;;  %v4475_v33 = vmul.f32 %v4358_v15, %v4358_v15  ;;  %v4476_v53 = vmul.f32 %v4409_v55, %v4409_v55  ;;  %v4489_v48 = vadd.f32 %v4488_v30, %v4473_v34  ;;  %v4463_v15 = vld [vmem:[#allocation4 + $0x28] sm:$0xff] }
 0x8da   : > { %v4497_v63 = vadd.f32 %v4479_v20, %v4478_v56  ;;  %v4481_v46 = vmul.f32 %v4415_v4, %v4415_v4  ;;  %v4477_v61 = vmul.f32 %v4411_v58, %v4411_v58 }
 0x8db   : > { %v4492_v12 = vadd.f32 %v4475_v33, %v4474_v5  ;;  %v4484_v1 = vadd.f32 %v4483_v43, %v4469_v39 }
 0x8dc   : > { %4450 = vadd.xlane.f32.xlu1 %v4449_v60  ;;  %4440 = vadd.xlane.f32.xlu0 %v4439_v54  ;;  %v4498_v26 = vadd.f32 %v4497_v63, %v4480_v3 }
 0x8dd   : > { %v4493_v38 = vadd.f32 %v4492_v12, %v4476_v53  ;;  %v4541_v12 = vld [vmem:[%s9874_s30 + $0x8] sm:$0xff] (!%p6944_p12) }
 0x8de   : > { %v4499_v23 = vadd.f32 %v4498_v26, %v4481_v46  ;;  %v4540_v46 = vld [vmem:[%s9873_s26] sm:$0xff] (!%p6944_p12)  ;;  %v4542_v26 = vld [vmem:[%s9874_s30 + $0x10] sm:$0xff] (!%p6944_p12) }
 0x8df   : > { %v4494_v13 = vadd.f32 %v4493_v38, %v4477_v61 }
 0x8e0   : > { %4490 = vadd.xlane.f32.xlu1 %v4489_v48  ;;  %4485 = vadd.xlane.f32.xlu0 %v4484_v1 }
 0x8e4   : > { %4500 = vadd.xlane.f32.xlu1 %v4499_v23  ;;  %4495 = vadd.xlane.f32.xlu0 %v4494_v13  ;;  %v4543_v23 = vld [vmem:[%s9874_s30 + $0x18] sm:$0xff] (!%p6944_p12) }
 0x965   : > { %v4446_v22 = vpop.xlane.xlu1 %4445  ;;  %v4436_v9 = vpop.xlane.xlu0 %4435 }
 0x966   : > { %v4454_v7 = vadd.f32 %v4446_v22, %v4430_v47  ;;  %v4452_v50 = vadd.f32 %v4436_v9, %v4428_v11  ;;  %v4560_v11 = vld [vmem:[%s9875_s10] sm:$0xff] (!%p6944_p12) }
 0x968   : > { %4459 = vst.msk [vmem:[#allocation4 + $0x10] sm:$0xff] %vm4456_vm6, %v4454_v7  ;;  %4457 = vst.msk [vmem:[#allocation4] sm:$0xff] %vm4456_vm6, %v4452_v50  ;;  %v4561_v50 = vld [vmem:[%s9875_s10 + $0x8] sm:$0xff] (!%p6944_p12) }
 0x969   : > { %v4451_v10 = vpop.xlane.xlu1 %4450  ;;  %v4441_v14 = vpop.xlane.xlu0 %4440 }
 0x96a   : > { %v4455_v24 = vadd.f32 %v4451_v10, %v4431_v42  ;;  %v4453_v55 = vadd.f32 %v4441_v14, %v4429_v18  ;;  %v4562_v10 = vld [vmem:[%s9875_s10 + $0x10] sm:$0xff] (!%p6944_p12) }
 0x96c   : > { %4460 = vst.msk [vmem:[#allocation4 + $0x18] sm:$0xff] %vm4456_vm6, %v4455_v24  ;;  %4458 = vst.msk [vmem:[#allocation4 + $0x8] sm:$0xff] %vm4456_vm6, %v4453_v55  ;;  %v4563_v55 = vld [vmem:[%s9875_s10 + $0x18] sm:$0xff] (!%p6944_p12) }
 0x96d   : > { %v4491_v52 = vpop.xlane.xlu1 %4490  ;;  %v4486_v58 = vpop.xlane.xlu0 %4485 }
 0x96e   : > { %v4503_v41 = vadd.f32 %v4491_v52, %v4463_v15  ;;  %v4502_v0 = vadd.f32 %v4486_v58, %v4462_v27  ;;  %4511 = sbr.rel (%p6944_p12) target bundleno = 2455 (0x997), region = 120 }
 0x96f   : > { %v4512_v59 = vld [vmem:[#allocation4] sm:$0xff] (!%p6944_p12)  ;;  %v4514_v44 = vld [vmem:[#allocation4 + $0x10] sm:$0xff] (!%p6944_p12) }
 0x970   : > { %4507 = vst.msk [vmem:[#allocation4 + $0x28] sm:$0xff] %vm4456_vm6, %v4503_v41  ;;  %4506 = vst.msk [vmem:[#allocation4 + $0x20] sm:$0xff] %vm4456_vm6, %v4502_v0  ;;  %v4516_v17 = vmul.f32 (!%p6944_p12), 0.00048828125, %v4512_v59  ;;  %v4518_v31 = vmul.f32 (!%p6944_p12), 0.00048828125, %v4514_v44 }
 0x971   : > { %v4501_v29 = vpop.xlane.xlu1 %4500  ;;  %v4496_v28 = vpop.xlane.xlu0 %4495 }
 0x972   : > { %v4505_v4 = vadd.f32 %v4501_v29, %v4465_v8  ;;  %v4504_v35 = vadd.f32 %v4496_v28, %v4464_v32  ;;  %v4528_v37 = vmul.f32 (!%p6944_p12), %v4516_v17, %v4516_v17  ;;  %v4530_v54 = vmul.f32 (!%p6944_p12), %v4518_v31, %v4518_v31 }
 0x973   : > { %v4513_v19 = vld [vmem:[#allocation4 + $0x8] sm:$0xff] (!%p6944_p12)  ;;  %v4515_v25 = vld [vmem:[#allocation4 + $0x18] sm:$0xff] (!%p6944_p12) }
 0x974   : > { %4509 = vst.msk [vmem:[#allocation4 + $0x38] sm:$0xff] %vm4456_vm6, %v4505_v4  ;;  %4508 = vst.msk [vmem:[#allocation4 + $0x30] sm:$0xff] %vm4456_vm6, %v4504_v35  ;;  %v4517_v45 = vmul.f32 (!%p6944_p12), 0.00048828125, %v4513_v19  ;;  %v4519_v2 = vmul.f32 (!%p6944_p12), 0.00048828125, %v4515_v25 }
 0x976   : > { %v4529_v6 = vmul.f32 %v4517_v45, %v4517_v45  ;;  %v4531_v57 = vmul.f32 %v4519_v2, %v4519_v2 }
 0x977   : > { %v4520_v36 = vld [vmem:[#allocation4 + $0x20] sm:$0xff]  ;;  %v4521_v51 = vld [vmem:[#allocation4 + $0x28] sm:$0xff] }
 0x978   : > { %v4524_v21 = vmul.f32 0.00048828125, %v4520_v36  ;;  %v4525_v16 = vmul.f32 0.00048828125, %v4521_v51 }
 0x97a   : > { %v4532_v34 = vsub.f32 %v4524_v21, %v4528_v37  ;;  %v4533_v30 = vsub.f32 %v4525_v16, %v4529_v6 }
 0x97b   : > { %v4522_v62 = vld [vmem:[#allocation4 + $0x30] sm:$0xff]  ;;  %v4523_v49 = vld [vmem:[#allocation4 + $0x38] sm:$0xff] }
 0x97c   : > { %v4526_v40 = vmul.f32 0.00048828125, %v4522_v62  ;;  %v4527_v60 = vmul.f32 0.00048828125, %v4523_v49  ;;  %v4536_v56 = vmax.f32 %v4532_v34, 0.0  ;;  %v4537_v20 = vmax.f32 %v4533_v30, 0.0 }
 0x97e   : > { %v4534_v39 = vsub.f32 %v4526_v40, %v4530_v54  ;;  %v4535_v3 = vsub.f32 %v4527_v60, %v4531_v57  ;;  %v4544_v43 = vadd.f32 1e-05, %v4536_v56  ;;  %v4545_v33 = vadd.f32 1e-05, %v4537_v20 }
 0x980   : > { %v4538_v5 = vmax.f32 %v4534_v39, 0.0  ;;  %v4539_v63 = vmax.f32 %v4535_v3, 0.0  ;;  %6559 = vrsqrt.f32 %v4544_v43 }
 0x981   : > { %6561 = vrsqrt.f32 %v4545_v33 }
 0x982   : > { %v4546_v53 = vadd.f32 1e-05, %v4538_v5  ;;  %v4547_v48 = vadd.f32 1e-05, %v4539_v63 }
 0x984   : > { %6563 = vrsqrt.f32 %v4546_v53 }
 0x985   : > { %6565 = vrsqrt.f32 %v4547_v48 }
 0x98a   : > { %v6560_v1 = vpop.eup %6559 }
 0x98b   : > { %v6562_v61 = vpop.eup %6561  ;;  %v4552_v38 = vmul.f32 %v6560_v1, %v4540_v46 }
 0x98c   : > { %v4553_v47 = vmul.f32 %v6562_v61, %v4541_v12 }
 0x98d   : > { %4556 = vst.msk [vmem:[#allocation4] sm:$0xff] %vm4456_vm6, %v4552_v38  ;;  %v4564_v7 = vmul.f32 %v4552_v38, %v4516_v17 }
 0x98e   : > { %v6564_v13 = vpop.eup %6563  ;;  %4557 = vst.msk [vmem:[#allocation4 + $0x8] sm:$0xff] %vm4456_vm6, %v4553_v47  ;;  %v4565_v18 = vmul.f32 %v4553_v47, %v4517_v45 }
 0x98f   : > { %v6566_v22 = vpop.eup %6565  ;;  %v4554_v9 = vmul.f32 %v6564_v13, %v4542_v26  ;;  %v4568_v14 = vsub.f32 %v4560_v11, %v4564_v7 }
 0x990   : > { %v4555_v42 = vmul.f32 %v6566_v22, %v4543_v23  ;;  %v4569_v15 = vsub.f32 %v4561_v50, %v4565_v18 }
 0x991   : > { %4558 = vst.msk [vmem:[#allocation4 + $0x10] sm:$0xff] %vm4456_vm6, %v4554_v9  ;;  %v4566_v24 = vmul.f32 %v4554_v9, %v4518_v31  ;;  %4572 = vst.msk [vmem:[#allocation4 + $0x20] sm:$0xff] %vm4456_vm6, %v4568_v14 }
 0x992   : > { %4559 = vst.msk [vmem:[#allocation4 + $0x18] sm:$0xff] %vm4456_vm6, %v4555_v42  ;;  %v4567_v27 = vmul.f32 %v4555_v42, %v4519_v2  ;;  %4573 = vst.msk [vmem:[#allocation4 + $0x28] sm:$0xff] %vm4456_vm6, %v4569_v15 }
 0x993   : > { %v4570_v52 = vsub.f32 %v4562_v10, %v4566_v24 }
 0x994   : > { %v4571_v58 = vsub.f32 %v4563_v55, %v4567_v27 }
 0x995   : > { %4574 = vst.msk [vmem:[#allocation4 + $0x30] sm:$0xff] %vm4456_vm6, %v4570_v52 }
 0x996   : > { %4575 = vst.msk [vmem:[#allocation4 + $0x38] sm:$0xff] %vm4456_vm6, %v4571_v58 }
 0x997 PF: > { %p6351_p1 = scmp.ne.s32.totalorder %s6687_s23, 3 }
 0x998   : > { %v9876_v41 = vld [vmem:[#allocation12_spill] sm:$0xff] (!%p6351_p1)  ;;  %v9877_v0 = vld [vmem:[#allocation14_spill] sm:$0xff] (!%p6351_p1)  ;;  %v4966_v8 = vld [vmem:[#allocation2] sm:$0xff] (!%p6351_p1)  ;;  %v6715_v4 = vmov (!%p6351_p1), 0   ;;  %s9908_s11 = sld [smem:[#allocation69_spill]] (!%p6351_p1)  ;;  %s9909_s22 = sld [smem:[#allocation73_spill]] (!%p6351_p1) }
 0x999   : > { %4579 = sbr.rel (%p6351_p1) target bundleno = 3505 (0xdb1), region = 124  ;;  %4740 = vmatprep.subr.bf16.mxu0 (!%p6351_p1), %v9876_v41  ;;  %4853 = vmatprep.subr.bf16.mxu1 (!%p6351_p1), %v9877_v0  ;;  %v4596_v32 = vld [vmem:[%s9625_s2] sm:$0xff] (!%p6351_p1)  ;;  %v9879_v28 = vld [vmem:[#allocation13_spill] sm:$0xff] (!%p6351_p1)  ;;  %v9880_v35 = vld [vmem:[#allocation16_spill] sm:$0xff] (!%p6351_p1)  ;;  %vm5856_vm7 = vcmask (!%p6351_p1), 523264   ;;  %s9912_s26 = sld [smem:[#allocation72_spill]] (!%p6351_p1) }
 0x99a   : > { %v9878_v29 = vld [vmem:[#allocation11_spill] sm:$0xff] (!%p6351_p1)  ;;  %4854 = vmatpush1.bf16.msra.mxu1 (!%p6351_p1), %v9879_v28  ;;  %6568 = vset.pattern.permute.xlu1 (!%p6351_p1), %v6715_v4  ;;  %v9881_v59 = vld [vmem:[#allocation18_spill] sm:$0xff] (!%p6351_p1)  ;;  %v4967_v36 = vld [vmem:[#allocation2 + $0x8] sm:$0xff] (!%p6351_p1)  ;;  %vm6081_vm8 = vcmask (!%p6351_p1), 261120  }
 0x99b   : > { %4741 = vmatpush1.bf16.msra.mxu0 (!%p6351_p1), %v9878_v29  ;;  %6567 = vset.pattern.permute.xlu0 (!%p6351_p1), %v6715_v4  ;;  %v4597_v17 = vld [vmem:[%s9625_s2 + $0x8] sm:$0xff] (!%p6351_p1)  ;;  %v9882_v21 = vld [vmem:[#allocation15_spill] sm:$0xff] (!%p6351_p1)  ;;  %v9883_v19 = vld [vmem:[#allocation17_spill] sm:$0xff] (!%p6351_p1) }
 0x99c   : > { %4984 = vperm.xlu1 (!%p6351_p1), %6568, %v4966_v8   ;;  %4614 = vperm.xlu0 (!%p6351_p1), %6567, %v4596_v32   ;;  %v9884_v51 = vld [vmem:[#allocation20_spill] sm:$0xff] (!%p6351_p1)  ;;  %v9885_v45 = vld [vmem:[#allocation22_spill] sm:$0xff] (!%p6351_p1)  ;;  %v4598_v44 = vld [vmem:[%s9625_s2 + $0x10] sm:$0xff] (!%p6351_p1) }
 0x99d   : > { %4742 = vmatprep.subr.bf16.mxu0 (!%p6351_p1), %v9880_v35  ;;  %4855 = vmatprep.subr.bf16.mxu1 (!%p6351_p1), %v9881_v59  ;;  %v4599_v16 = vld [vmem:[%s9625_s2 + $0x18] sm:$0xff] (!%p6351_p1)  ;;  %v9886_v62 = vld [vmem:[#allocation19_spill] sm:$0xff] (!%p6351_p1)  ;;  %v9887_v37 = vld [vmem:[#allocation21_spill] sm:$0xff] (!%p6351_p1) }
 0x99e   : > { %4856 = vmatpush1.bf16.msra.mxu1 (!%p6351_p1), %v9883_v19  ;;  %4772 = vmatprep.mubr.bf16.mxu0 (!%p6351_p1), %v6715_v4  ;;  %v9888_v31 = vld [vmem:[#allocation24_spill] sm:$0xff] (!%p6351_p1)  ;;  %v9889_v40 = vld [vmem:[#allocation26_spill] sm:$0xff] (!%p6351_p1)  ;;  %v5127_v49 = vld [vmem:[#allocation2 + $0x80] sm:$0xff] (!%p6351_p1) }
 0x99f   : > { %4743 = vmatpush1.bf16.msra.mxu0 (!%p6351_p1), %v9882_v21  ;;  %4857 = vmatprep.subr.bf16.mxu1 (!%p6351_p1), %v9885_v45  ;;  %v5128_v25 = vld [vmem:[#allocation2 + $0x88] sm:$0xff] (!%p6351_p1)  ;;  %v9890_v6 = vld [vmem:[#allocation23_spill] sm:$0xff] (!%p6351_p1)  ;;  %v9891_v2 = vld [vmem:[#allocation25_spill] sm:$0xff] (!%p6351_p1) }
 0x9a0   : > { %4744 = vmatprep.subr.bf16.mxu0 %v9884_v51  ;;  %4989 = vperm.xlu1 %6568, %v4967_v36   ;;  %v9892_v60 = vld [vmem:[#allocation28_spill] sm:$0xff]  ;;  %v9893_v34 = vld [vmem:[#allocation30_spill] sm:$0xff]  ;;  %v4968_v30 = vld [vmem:[#allocation2 + $0x10] sm:$0xff] }
 0x9a1   : > { %4619 = vperm.xlu0 %6567, %v4597_v17   ;;  %4885 = vmatprep.mubr.bf16.mxu1 %v6715_v4  ;;  %v4969_v54 = vld [vmem:[#allocation2 + $0x18] sm:$0xff]  ;;  %v9894_v57 = vld [vmem:[#allocation27_spill] sm:$0xff]  ;;  %v9895_v56 = vld [vmem:[#allocation29_spill] sm:$0xff] }
 0x9a2   : > { %4858 = vmatpush1.bf16.msra.mxu1 %v9887_v37  ;;  %v9896_v39 = vld [vmem:[#allocation32_spill] sm:$0xff]  ;;  %v9897_v20 = vld [vmem:[#allocation34_spill] sm:$0xff]  ;;  %v4600_v43 = vld [vmem:[%s9625_s2 + $0x20] sm:$0xff] }
 0x9a3   : > { %4745 = vmatpush1.bf16.msra.mxu0 %v9886_v62  ;;  %4859 = vmatprep.subr.bf16.mxu1 %v9889_v40  ;;  %v4601_v3 = vld [vmem:[%s9625_s2 + $0x28] sm:$0xff]  ;;  %v9898_v5 = vld [vmem:[#allocation31_spill] sm:$0xff]  ;;  %v9899_v33 = vld [vmem:[#allocation33_spill] sm:$0xff] }
 0x9a4   : > { %4746 = vmatprep.subr.bf16.mxu0 %v9888_v31  ;;  %4629 = vperm.xlu1 %6568, %v4599_v16   ;;  %v9900_v63 = vld [vmem:[#allocation36_spill] sm:$0xff]  ;;  %v9901_v53 = vld [vmem:[#allocation38_spill] sm:$0xff]  ;;  %v5129_v46 = vld [vmem:[#allocation2 + $0x90] sm:$0xff] }
 0x9a5   : > { %4624 = vperm.xlu0 %6567, %v4598_v44   ;;  %v5130_v48 = vld [vmem:[#allocation2 + $0x98] sm:$0xff]  ;;  %v9902_v12 = vld [vmem:[#allocation35_spill] sm:$0xff]  ;;  %v9903_v1 = vld [vmem:[#allocation37_spill] sm:$0xff] }
 0x9a6   : > { %4860 = vmatpush1.bf16.msra.mxu1 %v9891_v2  ;;  %v9904_v26 = vld [vmem:[#allocation40_spill] sm:$0xff]  ;;  %v9905_v61 = vld [vmem:[#allocation42_spill] sm:$0xff]  ;;  %v4970_v23 = vld [vmem:[#allocation2 + $0x20] sm:$0xff] }
 0x9a7   : > { %4747 = vmatpush1.bf16.msra.mxu0 %v9890_v6  ;;  %4861 = vmatprep.subr.bf16.mxu1 %v9893_v34  ;;  %v4971_v38 = vld [vmem:[#allocation2 + $0x28] sm:$0xff]  ;;  %v6569_v13 = vld [vmem:[%s9624_s1] sm:$0xff]   ;;  %v9907_v11 = vld [vmem:[#allocation41_spill] sm:$0xff] }
 0x9a8   : > { %4748 = vmatprep.subr.bf16.mxu0 %v9892_v60  ;;  %5150 = vperm.xlu1 %6568, %v5128_v25   ;;  %v9906_v47 = vld [vmem:[#allocation39_spill] sm:$0xff]  ;;  %v4603_v22 = vld [vmem:[%s9625_s2 + $0x38] sm:$0xff]  ;;  %v4602_v9 = vld [vmem:[%s9625_s2 + $0x30] sm:$0xff] }
 0x9a9   : > { %5145 = vperm.xlu0 %6567, %v5127_v49   ;;  %v5132_v7 = vld [vmem:[#allocation2 + $0xa8] sm:$0xff]  ;;  %v5131_v50 = vld [vmem:[#allocation2 + $0xa0] sm:$0xff]  ;;  %v4973_v18 = vld [vmem:[#allocation2 + $0x38] sm:$0xff] }
 0x9aa   : > { %4862 = vmatpush1.bf16.msra.mxu1 %v9895_v56  ;;  %v6570_v42 = vld [vmem:[%s9624_s1 + $0x8] sm:$0xff]   ;;  %v4972_v10 = vld [vmem:[#allocation2 + $0x30] sm:$0xff]  ;;  %v4604_v24 = vld [vmem:[%s9625_s2 + $0x40] sm:$0xff] }
 0x9ab   : > { %4749 = vmatpush1.bf16.msra.mxu0 %v9894_v57  ;;  %4863 = vmatprep.subr.bf16.mxu1 %v9897_v20  ;;  %v4605_v14 = vld [vmem:[%s9625_s2 + $0x48] sm:$0xff]  ;;  %v6571_v55 = vld [vmem:[%s9624_s1 + $0x10] sm:$0xff]   ;;  %v5134_v15 = vld [vmem:[#allocation2 + $0xb8] sm:$0xff] }
 0x9ac   : > { %4750 = vmatprep.subr.bf16.mxu0 %v9896_v39  ;;  %4999 = vperm.xlu1 %6568, %v4969_v54   ;;  %v5133_v27 = vld [vmem:[#allocation2 + $0xb0] sm:$0xff]  ;;  %v4975_v52 = vld [vmem:[#allocation2 + $0x48] sm:$0xff]  ;;  %v4974_v58 = vld [vmem:[#allocation2 + $0x40] sm:$0xff] }
 0x9ad   : > { %4994 = vperm.xlu0 %6567, %v4968_v30   ;;  %v6572_v41 = vld [vmem:[%s9624_s1 + $0x18] sm:$0xff]   ;;  %v4606_v8 = vld [vmem:[%s9625_s2 + $0x50] sm:$0xff]  ;;  %v5136_v32 = vld [vmem:[#allocation2 + $0xc8] sm:$0xff] }
 0x9ae   : > { %4864 = vmatpush1.bf16.msra.mxu1 %v9899_v33  ;;  %v4607_v0 = vld [vmem:[%s9625_s2 + $0x58] sm:$0xff]  ;;  %v5135_v29 = vld [vmem:[#allocation2 + $0xc0] sm:$0xff]  ;;  %v4976_v59 = vld [vmem:[#allocation2 + $0x50] sm:$0xff] }
 0x9af   : > { %4751 = vmatpush1.bf16.msra.mxu0 %v9898_v5  ;;  %4865 = vmatprep.subr.bf16.mxu1 %v9901_v53  ;;  %v6573_v28 = vld [vmem:[%s9624_s1 + $0x20] sm:$0xff]   ;;  %v4977_v35 = vld [vmem:[#allocation2 + $0x58] sm:$0xff]  ;;  %v4609_v36 = vld [vmem:[%s9625_s2 + $0x68] sm:$0xff] }
 0x9b0   : > { %4752 = vmatprep.subr.bf16.mxu0 %v9900_v63  ;;  %4639 = vperm.xlu1 %6568, %v4601_v3   ;;  %v4608_v17 = vld [vmem:[%s9625_s2 + $0x60] sm:$0xff]  ;;  %v6574_v21 = vld [vmem:[%s9624_s1 + $0x28] sm:$0xff]   ;;  %v5138_v19 = vld [vmem:[#allocation2 + $0xd8] sm:$0xff] }
 0x9b1   : > { %4634 = vperm.xlu0 %6567, %v4600_v43   ;;  %v5137_v51 = vld [vmem:[#allocation2 + $0xd0] sm:$0xff]  ;;  %v4979_v45 = vld [vmem:[#allocation2 + $0x68] sm:$0xff]  ;;  %v4978_v16 = vld [vmem:[#allocation2 + $0x60] sm:$0xff] }
 0x9b2   : > { %4866 = vmatpush1.bf16.msra.mxu1 %v9903_v1  ;;  %v6575_v44 = vld [vmem:[%s9624_s1 + $0x30] sm:$0xff]   ;;  %v4611_v62 = vld [vmem:[%s9625_s2 + $0x78] sm:$0xff]  ;;  %v5140_v31 = vld [vmem:[#allocation2 + $0xe8] sm:$0xff] }
 0x9b3   : > { %4753 = vmatpush1.bf16.msra.mxu0 %v9902_v12  ;;  %4867 = vmatprep.subr.bf16.mxu1 %v9905_v61  ;;  %v4610_v37 = vld [vmem:[%s9625_s2 + $0x70] sm:$0xff]  ;;  %v5139_v40 = vld [vmem:[#allocation2 + $0xe0] sm:$0xff]  ;;  %v6576_v25 = vld [vmem:[%s9624_s1 + $0x38] sm:$0xff]  }
 0x9b4   : > { %4754 = vmatprep.subr.bf16.mxu0 %v9904_v26  ;;  %5160 = vperm.xlu1 %6568, %v5130_v48   ;;  %v4981_v49 = vld [vmem:[#allocation2 + $0x78] sm:$0xff]  ;;  %v4980_v6 = vld [vmem:[#allocation2 + $0x70] sm:$0xff]  ;;  %v5392_v34 = vld [vmem:[%s9629_s6 + $0x8] sm:$0xff] }
 0x9b5   : > { %5155 = vperm.xlu0 %6567, %v5129_v46   ;;  %v5142_v2 = vld [vmem:[#allocation2 + $0xf8] sm:$0xff]  ;;  %v5141_v60 = vld [vmem:[#allocation2 + $0xf0] sm:$0xff]  ;;  %v5391_v54 = vld [vmem:[%s9629_s6] sm:$0xff] }
 0x9b6   : > { %4868 = vmatpush1.bf16.msra.mxu1 %v9907_v11  ;;  %v5610_v30 = vld [vmem:[#allocation3 + $0x8] sm:$0xff]  ;;  %v5609_v57 = vld [vmem:[#allocation3] sm:$0xff]  ;;  %v5394_v56 = vld [vmem:[%s9629_s6 + $0x18] sm:$0xff] }
 0x9b7   : > { %4755 = vmatpush1.bf16.msra.mxu0 %v9906_v47  ;;  %v5393_v39 = vld [vmem:[%s9629_s6 + $0x10] sm:$0xff]  ;;  %v5691_v20 = vld [vmem:[#allocation3 + $0x48] sm:$0xff]  ;;  %v5690_v3 = vld [vmem:[#allocation3 + $0x40] sm:$0xff] }
 0x9b8   : > { %5009 = vperm.xlu1 %6568, %v4971_v38   ;;  %v5612_v43 = vld [vmem:[#allocation3 + $0x18] sm:$0xff]  ;;  %v5611_v5 = vld [vmem:[#allocation3 + $0x10] sm:$0xff]  ;;  %v5396_v33 = vld [vmem:[%s9629_s6 + $0x28] sm:$0xff] }
 0x9b9   : > { %5004 = vperm.xlu0 %6567, %v4970_v23   ;;  %4886 = vmatmul.mubr.bf16.vlgmr.msra.gmra.mrb[0].mxu1 %v6569_v13  ;;  %v5395_v63 = vld [vmem:[%s9629_s6 + $0x20] sm:$0xff]  ;;  %v5693_v53 = vld [vmem:[#allocation3 + $0x58] sm:$0xff]  ;;  %v5692_v48 = vld [vmem:[#allocation3 + $0x50] sm:$0xff] }
 0x9ba   : > { %4773 = vmatmul.mubr.bf16.vlgmr.msra.gmra.mrb[0].mxu0 %v6569_v13  ;;  %4895 = vmatprep.mubr.bf16.mxu1 %v6715_v4  ;;  %v5614_v46 = vld [vmem:[#allocation3 + $0x28] sm:$0xff]  ;;  %v5613_v12 = vld [vmem:[#allocation3 + $0x20] sm:$0xff]  ;;  %v5398_v1 = vld [vmem:[%s9629_s6 + $0x38] sm:$0xff] }
 0x9bb   : > { %4782 = vmatprep.mubr.bf16.mxu0 %v6715_v4  ;;  %v5397_v26 = vld [vmem:[%s9629_s6 + $0x30] sm:$0xff]  ;;  %v5695_v61 = vld [vmem:[#allocation3 + $0x68] sm:$0xff]  ;;  %v5694_v38 = vld [vmem:[#allocation3 + $0x60] sm:$0xff] }
 0x9bc   : > { %4649 = vperm.xlu1 %6568, %v4603_v22   ;;  %v5616_v23 = vld [vmem:[#allocation3 + $0x38] sm:$0xff]  ;;  %v5615_v13 = vld [vmem:[#allocation3 + $0x30] sm:$0xff]  ;;  %v5823_v22 = vld [vmem:[%s9908_s11 + $0x8] sm:$0xff] }
 0x9bd   : > { %4644 = vperm.xlu0 %6567, %v4602_v9   ;;  %v5697_v47 = vld [vmem:[#allocation3 + $0x78] sm:$0xff]  ;;  %v5696_v11 = vld [vmem:[#allocation3 + $0x70] sm:$0xff]  ;;  %v5822_v9 = vld [vmem:[%s9908_s11] sm:$0xff] }
 0x9c0   : > { %5170 = vperm.xlu1 %6568, %v5132_v7   ;;  %v5970_v7 = vld [vmem:[#allocation4 + $0x8] sm:$0xff] }
 0x9c1   : > { %5165 = vperm.xlu0 %6567, %v5131_v50   ;;  %4896 = vmatmul.mubr.bf16.gmra.mrb[4].mxu1 %v6570_v42  ;;  %v5969_v50 = vld [vmem:[#allocation4] sm:$0xff] }
 0x9c2   : > { %4783 = vmatmul.mubr.bf16.gmra.mrb[4].mxu0 %v6570_v42  ;;  %4905 = vmatprep.mubr.bf16.mxu1 %v6715_v4  ;;  %v5825_v42 = vld [vmem:[%s9908_s11 + $0x18] sm:$0xff] }
 0x9c3   : > { %4792 = vmatprep.mubr.bf16.mxu0 %v6715_v4 }
 0x9c4   : > { %5019 = vperm.xlu1 %6568, %v4973_v18   ;;  %v5824_v18 = vld [vmem:[%s9908_s11 + $0x10] sm:$0xff]  ;;  %s9910_s11 = sld [smem:[#allocation65_spill]] }
 0x9c5   : > { %5014 = vperm.xlu0 %6567, %v4972_v10   ;;  %v6011_v10 = vld [vmem:[#allocation4 + $0x28] sm:$0xff] }
 0x9c8   : > { %4659 = vperm.xlu1 %6568, %v4605_v14   ;;  %v6010_v14 = vld [vmem:[#allocation4 + $0x20] sm:$0xff] }
 0x9c9   : > { %4654 = vperm.xlu0 %6567, %v4604_v24   ;;  %4906 = vmatmul.mubr.bf16.gmra.mrb[8].mxu1 %v6571_v55 }
 0x9ca   : > { %4793 = vmatmul.mubr.bf16.gmra.mrb[8].mxu0 %v6571_v55  ;;  %4915 = vmatprep.mubr.bf16.mxu1 %v6715_v4 }
 0x9cb   : > { %4802 = vmatprep.mubr.bf16.mxu0 %v6715_v4 }
 0x9cc   : > { %5180 = vperm.xlu1 %6568, %v5134_v15   ;;  %v5972_v15 = vld [vmem:[#allocation4 + $0x18] sm:$0xff] }
 0x9cd   : > { %5175 = vperm.xlu0 %6567, %v5133_v27   ;;  %v5971_v27 = vld [vmem:[#allocation4 + $0x10] sm:$0xff] }
 0x9d0   : > { %5029 = vperm.xlu1 %6568, %v4975_v52  }
 0x9d1   : > { %5024 = vperm.xlu0 %6567, %v4974_v58   ;;  %4916 = vmatmul.mubr.bf16.gmra.mrb[12].mxu1 %v6572_v41 }
 0x9d2   : > { %4803 = vmatmul.mubr.bf16.gmra.mrb[12].mxu0 %v6572_v41  ;;  %4925 = vmatprep.mubr.bf16.mxu1 %v6715_v4  ;;  %v6013_v41 = vld [vmem:[#allocation4 + $0x38] sm:$0xff] }
 0x9d3   : > { %4812 = vmatprep.mubr.bf16.mxu0 %v6715_v4 }
 0x9d4   : > { %4669 = vperm.xlu1 %6568, %v4607_v0   ;;  %v6012_v0 = vld [vmem:[#allocation4 + $0x30] sm:$0xff] }
 0x9d5   : > { %4664 = vperm.xlu0 %6567, %v4606_v8   ;;  %v6075_v8 = vld [vmem:[%s9909_s22] sm:$0x7]  ;;  %s9911_s22 = sld [smem:[#allocation68_spill]] }
 0x9d8   : > { %5190 = vperm.xlu1 %6568, %v5136_v32  }
 0x9d9   : > { %5185 = vperm.xlu0 %6567, %v5135_v29   ;;  %4926 = vmatmul.mubr.bf16.gmra.mrb[16].mxu1 %v6573_v28 }
 0x9da   : > { %4813 = vmatmul.mubr.bf16.gmra.mrb[16].mxu0 %v6573_v28  ;;  %4935 = vmatprep.mubr.bf16.mxu1 %v6715_v4 }
 0x9db   : > { %4822 = vmatprep.mubr.bf16.mxu0 %v6715_v4 }
 0x9dc   : > { %5039 = vperm.xlu1 %6568, %v4977_v35  }
 0x9dd   : > { %5034 = vperm.xlu0 %6567, %v4976_v59  }
 0x9e0   : > { %4679 = vperm.xlu1 %6568, %v4609_v36  }
 0x9e1   : > { %4674 = vperm.xlu0 %6567, %v4608_v17   ;;  %4936 = vmatmul.mubr.bf16.gmra.mrb[20].mxu1 %v6574_v21 }
 0x9e2   : > { %4823 = vmatmul.mubr.bf16.gmra.mrb[20].mxu0 %v6574_v21  ;;  %4945 = vmatprep.mubr.bf16.mxu1 %v6715_v4 }
 0x9e3   : > { %4832 = vmatprep.mubr.bf16.mxu0 %v6715_v4 }
 0x9e4   : > { %5200 = vperm.xlu1 %6568, %v5138_v19  }
 0x9e5   : > { %5195 = vperm.xlu0 %6567, %v5137_v51  }
 0x9e8   : > { %5049 = vperm.xlu1 %6568, %v4979_v45  }
 0x9e9   : > { %5044 = vperm.xlu0 %6567, %v4978_v16   ;;  %4946 = vmatmul.mubr.bf16.gmra.mrb[24].mxu1 %v6575_v44 }
 0x9ea   : > { %4833 = vmatmul.mubr.bf16.gmra.mrb[24].mxu0 %v6575_v44  ;;  %4955 = vmatprep.mubr.bf16.mxu1 %v6715_v4 }
 0x9eb   : > { %4842 = vmatprep.mubr.bf16.mxu0 %v6715_v4 }
 0x9ec   : > { %4689 = vperm.xlu1 %6568, %v4611_v62  }
 0x9ed   : > { %4684 = vperm.xlu0 %6567, %v4610_v37  }
 0x9f0   : > { %5210 = vperm.xlu1 %6568, %v5140_v31  }
 0x9f1   : > { %5205 = vperm.xlu0 %6567, %v5139_v40   ;;  %4956 = vmatmul.mubr.bf16.gmra.mrb[28].mxu1 %v6576_v25 }
 0x9f2   : > { %4843 = vmatmul.mubr.bf16.gmra.mrb[28].mxu0 %v6576_v25  ;;  %5568 = vmatprep.mubr.bf16.mxu1 %v6715_v4 }
 0x9f3   : > { %5495 = vmatprep.mubr.bf16.mxu0 %v6715_v4 }
 0x9f4   : > { %5059 = vperm.xlu1 %6568, %v4981_v49  }
 0x9f5   : > { %5054 = vperm.xlu0 %6567, %v4980_v6  }
 0x9f8   : > { %5220 = vperm.xlu1 %6568, %v5142_v2  }
 0x9f9   : > { %5215 = vperm.xlu0 %6567, %v5141_v60  }
 0x9fc   : > { %5406 = vperm.xlu1 %6568, %v5392_v34  }
 0x9fd   : > { %5401 = vperm.xlu0 %6567, %v5391_v54  }
 0xa00   : > { %5624 = vperm.xlu1 %6568, %v5610_v30  }
 0xa01   : > { %5619 = vperm.xlu0 %6567, %v5609_v57  }
 0xa04   : > { %5416 = vperm.xlu1 %6568, %v5394_v56  }
 0xa05   : > { %5411 = vperm.xlu0 %6567, %v5393_v39  }
 0xa08   : > { %5705 = vperm.xlu1 %6568, %v5691_v20  }
 0xa09   : > { %5700 = vperm.xlu0 %6567, %v5690_v3  }
 0xa0c   : > { %5634 = vperm.xlu1 %6568, %v5612_v43  }
 0xa0d   : > { %5629 = vperm.xlu0 %6567, %v5611_v5  }
 0xa10   : > { %5426 = vperm.xlu1 %6568, %v5396_v33  }
 0xa11   : > { %5421 = vperm.xlu0 %6567, %v5395_v63  }
 0xa14   : > { %5715 = vperm.xlu1 %6568, %v5693_v53  }
 0xa15   : > { %5710 = vperm.xlu0 %6567, %v5692_v48  }
 0xa18   : > { %5644 = vperm.xlu1 %6568, %v5614_v46  }
 0xa19   : > { %5639 = vperm.xlu0 %6567, %v5613_v12  }
 0xa1b   : > { %v4985_v24 = vpop.permute.xlu1 %4984  ;;  %v4615_v55 = vpop.permute.xlu0 %4614 }
 0xa1c   : > { %5436 = vperm.xlu1 %6568, %v5398_v1  }
 0xa1d   : > { %5431 = vperm.xlu0 %6567, %v5397_v26  }
 0xa1f   : > { %v9213_v52 = vpop.permute.xlu1 %4989 }
 0xa20   : > { %5725 = vperm.xlu1 %6568, %v5695_v61   ;;  %v4620_v58 = vpop.permute.xlu0 %4619 }
 0xa21   : > { %5720 = vperm.xlu0 %6567, %v5694_v38  }
 0xa23   : > { %v9218_v32 = vpop.permute.xlu1 %4629 }
 0xa24   : > { %5654 = vperm.xlu1 %6568, %v5616_v23   ;;  %v9220_v29 = vpop.permute.xlu0 %4624 }
 0xa25   : > { %5649 = vperm.xlu0 %6567, %v5615_v13  }
 0xa27   : > { %v9222_v28 = vpop.permute.xlu1 %5150 }
 0xa28   : > { %5735 = vperm.xlu1 %6568, %v5697_v47   ;;  %v5146_v35 = vpop.permute.xlu0 %5145 }
 0xa29   : > { %5730 = vperm.xlu0 %6567, %v5696_v11  }
 0xa2b   : > { %v9224_v59 = vpop.permute.xlu1 %4999 }
 0xa2c   : > { %5833 = vperm.xlu1 %6568, %v5823_v22   ;;  %v9226_v36 = vpop.permute.xlu0 %4994 }
 0xa2d   : > { %5828 = vperm.xlu0 %6567, %v5822_v9  }
 0xa2f   : > { %v9228_v17 = vpop.permute.xlu1 %4639 }
 0xa30   : > { %5980 = vperm.xlu1 %6568, %v5970_v7   ;;  %v9230_v21 = vpop.permute.xlu0 %4634 }
 0xa31   : > { %5975 = vperm.xlu0 %6567, %v5969_v50  }
 0xa33   : > { %v9232_v19 = vpop.permute.xlu1 %5160 }
 0xa34   : > { %5843 = vperm.xlu1 %6568, %v5825_v42   ;;  %v9234_v51 = vpop.permute.xlu0 %5155 }
 0xa35   : > { %5838 = vperm.xlu0 %6567, %v5824_v18  }
 0xa37   : > { %v9236_v45 = vpop.permute.xlu1 %5009 }
 0xa38   : > { %6021 = vperm.xlu1 %6568, %v6011_v10   ;;  %v9238_v16 = vpop.permute.xlu0 %5004 }
 0xa39   : > { %6016 = vperm.xlu0 %6567, %v6010_v14  }
 0xa3b   : > { %v9240_v44 = vpop.permute.xlu1 %4649 }
 0xa3c   : > { %5990 = vperm.xlu1 %6568, %v5972_v15   ;;  %v9242_v62 = vpop.permute.xlu0 %4644 }
 0xa3d   : > { %5985 = vperm.xlu0 %6567, %v5971_v27  }
 0xa3f   : > { %v9244_v37 = vpop.permute.xlu1 %5170 }
 0xa40   : > { %6031 = vperm.xlu1 %6568, %v6013_v41   ;;  %v9246_v31 = vpop.permute.xlu0 %5165 }
 0xa41   : > { %6026 = vperm.xlu0 %6567, %v6012_v0  }
 0xa43   : > { %v9248_v40 = vpop.permute.xlu1 %5019 }
 0xa44   : > { %v9250_v25 = vpop.permute.xlu0 %5014 }
 0xa45   : > { %6078 = vperm.xlu0 %6567, %v6075_v8  }
 0xa47   : > { %v9252_v49 = vpop.permute.xlu1 %4659 }
 0xa48   : > { %v9254_v6 = vpop.permute.xlu0 %4654 }
 0xa4b   : > { %v9256_v2 = vpop.permute.xlu1 %5180 }
 0xa4c   : > { %v9258_v60 = vpop.permute.xlu0 %5175 }
 0xa4f   : > { %v9260_v34 = vpop.permute.xlu1 %5029 }
 0xa50   : > { %v9262_v54 = vpop.permute.xlu0 %5024 }
 0xa53   : > { %v9264_v30 = vpop.permute.xlu1 %4669 }
 0xa54   : > { %v9266_v57 = vpop.permute.xlu0 %4664 }
 0xa57   : > { %v9270_v42 = vpop.permute.xlu1 %5190 }
 0xa58   : > { %v9272_v18 = vpop.permute.xlu0 %5185 }
 0xa8c   : > { %v4887_v39 = vpop.f32.mrb[0].mxu1 }
 0xa8d   : > { %v4774_v56 = vpop.f32.mrb[0].mxu0  ;;  %v4888_v3 = vadd.f32 %v4887_v39, %v4615_v55  ;;  %v4889_v5 = vpop.f32.mrb[1].mxu1 }
 0xa8e   : > { %v4775_v20 = vadd.f32 %v4774_v56, %v4615_v55  ;;  %v4776_v43 = vpop.f32.mrb[1].mxu0  ;;  %v4890_v63 = vadd.f32 %v4889_v5, %v4615_v55  ;;  %v4891_v48 = vpop.f32.mrb[2].mxu1 }
 0xa8f   : > { %v4777_v33 = vadd.f32 %v4776_v43, %v4615_v55  ;;  %v4778_v53 = vpop.f32.mrb[2].mxu0  ;;  %v5064_v12 = vmul.f32 %v4985_v24, %v4888_v3  ;;  %v4892_v26 = vadd.f32 %v4891_v48, %v4620_v58  ;;  %v4893_v13 = vpop.f32.mrb[3].mxu1 }
 0xa90   : > { %v5062_v46 = vmul.f32 %v4985_v24, %v4775_v20  ;;  %v4779_v1 = vadd.f32 %v4778_v53, %v4620_v58  ;;  %v5065_v38 = vmul.f32 %v4985_v24, %v4890_v63  ;;  %v4780_v23 = vpop.f32.mrb[3].mxu0  ;;  %v4894_v50 = vadd.f32 %v4893_v13, %v4620_v58 }
 0xa91   : > { %v5063_v61 = vmul.f32 %v4985_v24, %v4777_v33  ;;  %v5225_v11 = vadd.f32 %v5146_v35, %v5064_v12  ;;  %v5068_v9 = vmul.f32 %v9213_v52, %v4892_v26  ;;  %v4781_v7 = vadd.f32 %v4780_v23, %v4620_v58 }
 0xa92   : > { %v5223_v47 = vadd.f32 %v5146_v35, %v5062_v46  ;;  %v5066_v22 = vmul.f32 %v9213_v52, %v4779_v1  ;;  %v5226_v14 = vadd.f32 %v5146_v35, %v5065_v38  ;;  %v5069_v0 = vmul.f32 %v9213_v52, %v4894_v50 }
 0xa93   : > { %v5224_v10 = vadd.f32 %v5146_v35, %v5063_v61  ;;  %v5229_v24 = vadd.f32 %v9222_v28, %v5068_v9  ;;  %v5289_v27 = vmax.f32 %v5225_v11, 0.0  ;;  %v5067_v41 = vmul.f32 %v9213_v52, %v4781_v7 }
 0xa94   : > { %v5227_v55 = vadd.f32 %v9222_v28, %v5066_v22  ;;  %v5287_v15 = vmax.f32 %v5223_v47, 0.0  ;;  %v4897_v56 = vpop.f32.mrb[4].mxu1  ;;  %v5230_v33 = vadd.f32 %v9222_v28, %v5069_v0  ;;  %v5290_v50 = vmax.f32 %v5226_v14, 0.0 }
 0xa95   : > { %v4784_v8 = vpop.f32.mrb[4].mxu0  ;;  %v5293_v58 = vmax.f32 %v5229_v24, 0.0  ;;  %v4898_v3 = vadd.f32 %v4897_v56, %v9220_v29  ;;  %v4899_v35 = vpop.f32.mrb[5].mxu1  ;;  %v5228_v5 = vadd.f32 %v9222_v28, %v5067_v41  ;;  %v5288_v7 = vmax.f32 %v5224_v10, 0.0 }
 0xa96   : > { %v5291_v39 = vmax.f32 %v5227_v55, 0.0  ;;  %v4785_v20 = vadd.f32 %v4784_v8, %v9220_v29  ;;  %v4786_v43 = vpop.f32.mrb[5].mxu0  ;;  %v4900_v53 = vadd.f32 %v4899_v35, %v9220_v29  ;;  %v4901_v52 = vpop.f32.mrb[6].mxu1  ;;  %v5294_v38 = vmax.f32 %v5230_v33, 0.0 }
 0xa97   : > { %v4787_v63 = vadd.f32 %v4786_v43, %v9220_v29  ;;  %v4788_v48 = vpop.f32.mrb[6].mxu0  ;;  %v5353_v12 = vpack.c.bf16 %v5293_v58, %v5289_v27  ;;  %v5072_v26 = vmul.f32 %v9226_v36, %v4898_v3  ;;  %v5292_v61 = vmax.f32 %v5228_v5, 0.0  ;;  %v4903_v28 = vpop.f32.mrb[7].mxu1 }
 0xa98   : > { %v5351_v46 = vpack.c.bf16 %v5291_v39, %v5287_v15  ;;  %v5070_v1 = vmul.f32 %v9226_v36, %v4785_v20  ;;  %v5073_v13 = vmul.f32 %v9226_v36, %v4900_v53  ;;  %v4790_v47 = vpop.f32.mrb[7].mxu0  ;;  %v4789_v22 = vadd.f32 %v4788_v48, %v9218_v32  ;;  %v9294_v15 = vpop.permute.xlu1 %5039 }
 0xa99   : > { %v5071_v23 = vmul.f32 %v9226_v36, %v4787_v63  ;;  %v5233_v29 = vadd.f32 %v9234_v51, %v5072_v26  ;;  %v4902_v9 = vadd.f32 %v4901_v52, %v9218_v32  ;;  %v4791_v55 = vadd.f32 %v4790_v47, %v9218_v32  ;;  %v9296_v27 = vpop.permute.xlu0 %5034 }
 0xa9a   : > { %v5231_v11 = vadd.f32 %v9234_v51, %v5070_v1  ;;  %v4904_v24 = vadd.f32 %v4903_v28, %v9218_v32  ;;  %v9302_v41 = vadd.f32 %v9234_v51, %v5073_v13  ;;  %v5074_v0 = vmul.f32 %v9224_v59, %v4789_v22 }
 0xa9b   : > { %v9299_v36 = vadd.f32 %v9234_v51, %v5071_v23  ;;  %v5076_v8 = vmul.f32 %v9224_v59, %v4902_v9  ;;  %v5297_v14 = vmax.f32 %v5233_v29, 0.0  ;;  %v5075_v56 = vmul.f32 %v9224_v59, %v4791_v55 }
 0xa9c   : > { %v5295_v10 = vmax.f32 %v5231_v11, 0.0  ;;  %v5077_v32 = vmul.f32 %v9224_v59, %v4904_v24  ;;  %v4907_v58 = vpop.f32.mrb[8].mxu1  ;;  %v5235_v20 = vadd.f32 %v9232_v19, %v5074_v0  ;;  %v5352_v43 = vpack.c.bf16 %v5292_v61, %v5288_v7 }
 0xa9d   : > { %v4794_v39 = vpop.f32.mrb[8].mxu0  ;;  %v5237_v3 = vadd.f32 %v9232_v19, %v5076_v8  ;;  %v5354_v35 = vpack.c.bf16 %v5294_v38, %v5290_v50  ;;  %v4909_v5 = vpop.f32.mrb[9].mxu1  ;;  %v5236_v33 = vadd.f32 %v9232_v19, %v5075_v56  ;;  %v4908_v48 = vadd.f32 %v4907_v58, %v9230_v21 }
 0xa9e   : > { %v4796_v51 = vpop.f32.mrb[9].mxu0  ;;  %v5238_v63 = vadd.f32 %v9232_v19, %v5077_v32  ;;  %v4795_v53 = vadd.f32 %v4794_v39, %v9230_v21  ;;  %v4911_v59 = vpop.f32.mrb[10].mxu1  ;;  %v5299_v1 = vmax.f32 %v5235_v20, 0.0  ;;  %5463 = vmatprep.subr.bf16.mxu0 %v5352_v43  ;;  %v4910_v61 = vadd.f32 %v4909_v5, %v9230_v21 }
 0xa9f   : > { %v4798_v52 = vpop.f32.mrb[10].mxu0  ;;  %v5301_v26 = vmax.f32 %v5237_v3, 0.0  ;;  %5536 = vmatprep.subr.bf16.mxu1 %v5354_v35  ;;  %v4797_v23 = vadd.f32 %v4796_v51, %v9230_v21  ;;  %v5300_v38 = vmax.f32 %v5236_v33, 0.0  ;;  %5464 = vmatpush1.bf16.msra.mxu0 %v5351_v46  ;;  %v5080_v47 = vmul.f32 %v9238_v16, %v4908_v48  ;;  %v4913_v11 = vpop.f32.mrb[11].mxu1 }
 0xaa0   : > { %v5302_v13 = vmax.f32 %v5238_v63, 0.0  ;;  %5537 = vmatpush1.bf16.msra.mxu1 %v5353_v12  ;;  %v5078_v19 = vmul.f32 %v9238_v16, %v4795_v53  ;;  %v4800_v28 = vpop.f32.mrb[11].mxu0  ;;  %v5355_v29 = vpack.c.bf16 %v5299_v1, %v5295_v10  ;;  %v5081_v7 = vmul.f32 %v9238_v16, %v4910_v61  ;;  %v9324_v12 = vpop.permute.xlu1 %4679 }
 0xaa1   : > { %v5357_v22 = vpack.c.bf16 %v5301_v26, %v5297_v14  ;;  %v5079_v9 = vmul.f32 %v9238_v16, %v4797_v23  ;;  %v5241_v21 = vadd.f32 %v9246_v31, %v5080_v47  ;;  %v4799_v55 = vadd.f32 %v4798_v52, %v9228_v17  ;;  %v9326_v24 = vpop.permute.xlu0 %4674 }
 0xaa2   : > { %v5239_v50 = vadd.f32 %v9246_v31, %v5078_v19  ;;  %v4912_v46 = vadd.f32 %v4911_v59, %v9228_v17  ;;  %v5296_v0 = vmax.f32 %v9299_v36, 0.0  ;;  %v5298_v8 = vmax.f32 %v9302_v41, 0.0 }
 0xaa3   : > { %v4801_v10 = vadd.f32 %v4800_v28, %v9228_v17  ;;  %v4914_v16 = vadd.f32 %v4913_v11, %v9228_v17  ;;  %v9333_v14 = vadd.f32 %v9246_v31, %v5079_v9  ;;  %v9336_v56 = vadd.f32 %v9246_v31, %v5081_v7 }
 0xaa4   : > { %v5082_v32 = vmul.f32 %v9236_v45, %v4799_v55  ;;  %v5084_v39 = vmul.f32 %v9236_v45, %v4912_v46  ;;  %v4917_v20 = vpop.f32.mrb[12].mxu1  ;;  %v5303_v3 = vmax.f32 %v5239_v50, 0.0  ;;  %v5305_v36 = vmax.f32 %v5241_v21, 0.0  ;;  %v9354_v21 = vpop.permute.xlu1 %5200 }
 0xaa5   : > { %v4804_v58 = vpop.f32.mrb[12].mxu0  ;;  %v5083_v41 = vmul.f32 %v9236_v45, %v4801_v10  ;;  %v5085_v43 = vmul.f32 %v9236_v45, %v4914_v16  ;;  %v4919_v17 = vpop.f32.mrb[13].mxu1  ;;  %v5356_v31 = vpack.c.bf16 %v5300_v38, %v5296_v0  ;;  %v5358_v33 = vpack.c.bf16 %v5302_v13, %v5298_v8 }
 0xaa6   : > { %v4806_v35 = vpop.f32.mrb[13].mxu0  ;;  %v5243_v51 = vadd.f32 %v9244_v37, %v5082_v32  ;;  %v5245_v5 = vadd.f32 %v9244_v37, %v5084_v39  ;;  %v4921_v53 = vpop.f32.mrb[14].mxu1  ;;  %v4805_v59 = vadd.f32 %v4804_v58, %v9242_v62  ;;  %v4918_v1 = vadd.f32 %v4917_v20, %v9242_v62 }
 0xaa7   : > { %v4808_v63 = vpop.f32.mrb[14].mxu0  ;;  %v5244_v48 = vadd.f32 %v9244_v37, %v5083_v41  ;;  %v5246_v52 = vadd.f32 %v9244_v37, %v5085_v43  ;;  %5465 = vmatprep.subr.bf16.mxu0 %v5356_v31  ;;  %5538 = vmatprep.subr.bf16.mxu1 %v5358_v33  ;;  %v4807_v23 = vadd.f32 %v4806_v35, %v9242_v62  ;;  %v4923_v13 = vpop.f32.mrb[15].mxu1  ;;  %v5304_v0 = vmax.f32 %v9333_v14, 0.0 }
 0xaa8   : > { %v5307_v26 = vmax.f32 %v5243_v51, 0.0  ;;  %v5309_v45 = vmax.f32 %v5245_v5, 0.0  ;;  %v4920_v61 = vadd.f32 %v4919_v17, %v9242_v62  ;;  %v4810_v38 = vpop.f32.mrb[15].mxu0  ;;  %5466 = vmatpush1.bf16.msra.mxu0 %v5355_v29  ;;  %5539 = vmatpush1.bf16.msra.mxu1 %v5357_v22  ;;  %v5086_v37 = vmul.f32 %v9250_v25, %v4805_v59  ;;  %v9356_v55 = vpop.permute.xlu0 %5195 }
 0xaa9   : > { %v5308_v19 = vmax.f32 %v5244_v48, 0.0  ;;  %v5310_v47 = vmax.f32 %v5246_v52, 0.0  ;;  %v5088_v28 = vmul.f32 %v9250_v25, %v4918_v1  ;;  %v5087_v7 = vmul.f32 %v9250_v25, %v4807_v23 }
 0xaaa   : > { %v5359_v11 = vpack.c.bf16 %v5307_v26, %v5303_v3  ;;  %v5361_v9 = vpack.c.bf16 %v5309_v45, %v5305_v36  ;;  %v5089_v50 = vmul.f32 %v9250_v25, %v4920_v61  ;;  %v5247_v62 = vadd.f32 %v9258_v60, %v5086_v37 }
 0xaab   : > { %v5249_v46 = vadd.f32 %v9258_v60, %v5088_v28  ;;  %v4809_v29 = vadd.f32 %v4808_v63, %v9240_v44  ;;  %v4922_v22 = vadd.f32 %v4921_v53, %v9240_v44  ;;  %v5306_v8 = vmax.f32 %v9336_v56, 0.0 }
 0xaac   : > { %v4811_v10 = vadd.f32 %v4810_v38, %v9240_v44  ;;  %v4924_v25 = vadd.f32 %v4923_v13, %v9240_v44  ;;  %v4927_v32 = vpop.f32.mrb[16].mxu1  ;;  %v9367_v39 = vadd.f32 %v9258_v60, %v5087_v7  ;;  %v9370_v58 = vadd.f32 %v9258_v60, %v5089_v50  ;;  %v9386_v13 = vpop.permute.xlu1 %5049 }
 0xaad   : > { %v4814_v16 = vpop.f32.mrb[16].mxu0  ;;  %v5090_v20 = vmul.f32 %v9248_v40, %v4809_v29  ;;  %v5092_v3 = vmul.f32 %v9248_v40, %v4922_v22  ;;  %v4929_v14 = vpop.f32.mrb[17].mxu1  ;;  %v5311_v41 = vmax.f32 %v5247_v62, 0.0  ;;  %v5313_v56 = vmax.f32 %v5249_v46, 0.0 }
 0xaae   : > { %v4816_v36 = vpop.f32.mrb[17].mxu0  ;;  %v5091_v43 = vmul.f32 %v9248_v40, %v4811_v10  ;;  %v5093_v44 = vmul.f32 %v9248_v40, %v4924_v25  ;;  %v4931_v17 = vpop.f32.mrb[18].mxu1  ;;  %v5360_v60 = vpack.c.bf16 %v5308_v19, %v5304_v0  ;;  %v5362_v31 = vpack.c.bf16 %v5310_v47, %v5306_v8 }
 0xaaf   : > { %v4818_v35 = vpop.f32.mrb[18].mxu0  ;;  %v5251_v51 = vadd.f32 %v9256_v2, %v5090_v20  ;;  %v5253_v5 = vadd.f32 %v9256_v2, %v5092_v3  ;;  %v4815_v53 = vadd.f32 %v4814_v16, %v9254_v6  ;;  %v4928_v48 = vadd.f32 %v4927_v32, %v9254_v6  ;;  %v4933_v59 = vpop.f32.mrb[19].mxu1 }
 0xab0   : > { %v5252_v33 = vadd.f32 %v9256_v2, %v5091_v43  ;;  %v5254_v63 = vadd.f32 %v9256_v2, %v5093_v44  ;;  %v4820_v52 = vpop.f32.mrb[19].mxu0  ;;  %5467 = vmatprep.subr.bf16.mxu0 %v5360_v60  ;;  %5540 = vmatprep.subr.bf16.mxu1 %v5362_v31  ;;  %v4817_v26 = vadd.f32 %v4816_v36, %v9254_v6  ;;  %v9388_v19 = vpop.permute.xlu0 %5044  ;;  %v5312_v29 = vmax.f32 %v9367_v39, 0.0 }
 0xab1   : > { %v5315_v1 = vmax.f32 %v5251_v51, 0.0  ;;  %v5317_v40 = vmax.f32 %v5253_v5, 0.0  ;;  %v4930_v45 = vadd.f32 %v4929_v14, %v9254_v6  ;;  %5468 = vmatpush1.bf16.msra.mxu0 %v5359_v11  ;;  %5541 = vmatpush1.bf16.msra.mxu1 %v5361_v9  ;;  %v5094_v2 = vmul.f32 %v9262_v54, %v4815_v53  ;;  %v9418_v53 = vpop.permute.xlu1 %4689 }
 0xab2   : > { %v5316_v23 = vmax.f32 %v5252_v33, 0.0  ;;  %v5318_v61 = vmax.f32 %v5254_v63, 0.0  ;;  %v5096_v38 = vmul.f32 %v9262_v54, %v4928_v48  ;;  %v5095_v28 = vmul.f32 %v9262_v54, %v4817_v26 }
 0xab3   : > { %v5363_v47 = vpack.c.bf16 %v5315_v1, %v5311_v41  ;;  %v5365_v37 = vpack.c.bf16 %v5317_v40, %v5313_v56  ;;  %v5097_v7 = vmul.f32 %v9262_v54, %v4930_v45  ;;  %v5255_v6 = vadd.f32 %v9272_v18, %v5094_v2 }
 0xab4   : > { %v5257_v50 = vadd.f32 %v9272_v18, %v5096_v38  ;;  %v4819_v11 = vadd.f32 %v4818_v35, %v9252_v49  ;;  %v4932_v9 = vadd.f32 %v4931_v17, %v9252_v49  ;;  %v4937_v46 = vpop.f32.mrb[20].mxu1  ;;  %v5314_v22 = vmax.f32 %v9370_v58, 0.0  ;;  %v9420_v48 = vpop.permute.xlu0 %4684 }
 0xab5   : > { %v4824_v62 = vpop.f32.mrb[20].mxu0  ;;  %v4821_v0 = vadd.f32 %v4820_v52, %v9252_v49  ;;  %v4934_v8 = vadd.f32 %v4933_v59, %v9252_v49  ;;  %v4939_v54 = vpop.f32.mrb[21].mxu1  ;;  %v9401_v25 = vadd.f32 %v9272_v18, %v5095_v28  ;;  %v9404_v16 = vadd.f32 %v9272_v18, %v5097_v7 }
 0xab6   : > { %v4826_v10 = vpop.f32.mrb[21].mxu0  ;;  %v5098_v32 = vmul.f32 %v9260_v34, %v4819_v11  ;;  %v5100_v20 = vmul.f32 %v9260_v34, %v4932_v9  ;;  %v4941_v39 = vpop.f32.mrb[22].mxu1  ;;  %v5319_v36 = vmax.f32 %v5255_v6, 0.0  ;;  %v5321_v58 = vmax.f32 %v5257_v50, 0.0 }
 0xab7   : > { %v4828_v3 = vpop.f32.mrb[22].mxu0  ;;  %v5099_v14 = vmul.f32 %v9260_v34, %v4821_v0  ;;  %v5101_v49 = vmul.f32 %v9260_v34, %v4934_v8  ;;  %v5364_v43 = vpack.c.bf16 %v5316_v23, %v5312_v29  ;;  %v5366_v44 = vpack.c.bf16 %v5318_v61, %v5314_v22  ;;  %v4943_v35 = vpop.f32.mrb[23].mxu1 }
 0xab8   : > { %v5259_v41 = vadd.f32 %v9270_v42, %v5098_v32  ;;  %v5261_v56 = vadd.f32 %v9270_v42, %v5100_v20  ;;  %v4830_v18 = vpop.f32.mrb[23].mxu0  ;;  %v4825_v5 = vadd.f32 %v4824_v62, %v9266_v57  ;;  %v4938_v60 = vadd.f32 %v4937_v46, %v9266_v57 }
 0xab9   : > { %v5260_v17 = vadd.f32 %v9270_v42, %v5099_v14  ;;  %v5262_v51 = vadd.f32 %v9270_v42, %v5101_v49  ;;  %5469 = vmatprep.subr.bf16.mxu0 %v5364_v43  ;;  %5542 = vmatprep.subr.bf16.mxu1 %v5366_v44  ;;  %v4827_v34 = vadd.f32 %v4826_v10, %v9266_v57  ;;  %v5320_v6 = vmax.f32 %v9401_v25, 0.0  ;;  %v5211_v49 = vpop.permute.xlu1 %5210 }
 0xaba   : > { %v5323_v31 = vmax.f32 %v5259_v41, 0.0  ;;  %v5325_v33 = vmax.f32 %v5261_v56, 0.0  ;;  %v4940_v63 = vadd.f32 %v4939_v54, %v9266_v57  ;;  %5470 = vmatpush1.bf16.msra.mxu0 %v5363_v47  ;;  %5543 = vmatpush1.bf16.msra.mxu1 %v5365_v37  ;;  %v5102_v42 = vmul.f32 %v9296_v27, %v4825_v5  ;;  %v5206_v41 = vpop.permute.xlu0 %5205 }
 0xabb   : > { %v5324_v52 = vmax.f32 %v5260_v17, 0.0  ;;  %v5326_v59 = vmax.f32 %v5262_v51, 0.0  ;;  %v5104_v1 = vmul.f32 %v9296_v27, %v4938_v60  ;;  %v5103_v45 = vmul.f32 %v9296_v27, %v4827_v34 }
 0xabc   : > { %v5367_v40 = vpack.c.bf16 %v5323_v31, %v5319_v36  ;;  %v5369_v26 = vpack.c.bf16 %v5325_v33, %v5321_v58  ;;  %v5105_v23 = vmul.f32 %v9296_v27, %v4940_v63  ;;  %v4947_v57 = vpop.f32.mrb[24].mxu1  ;;  %v5263_v2 = vadd.f32 %v9356_v55, %v5102_v42 }
 0xabd   : > { %v4834_v61 = vpop.f32.mrb[24].mxu0  ;;  %v5265_v38 = vadd.f32 %v9356_v55, %v5104_v1  ;;  %v4829_v28 = vadd.f32 %v4828_v3, %v9264_v30  ;;  %v4942_v47 = vadd.f32 %v4941_v39, %v9264_v30  ;;  %v4949_v7 = vpop.f32.mrb[25].mxu1  ;;  %v5322_v50 = vmax.f32 %v9404_v16, 0.0 }
 0xabe   : > { %v4836_v37 = vpop.f32.mrb[25].mxu0  ;;  %v4831_v11 = vadd.f32 %v4830_v18, %v9264_v30  ;;  %v4944_v27 = vadd.f32 %v4943_v35, %v9264_v30  ;;  %v4951_v62 = vpop.f32.mrb[26].mxu1  ;;  %v9435_v46 = vadd.f32 %v9356_v55, %v5103_v45  ;;  %v9438_v29 = vadd.f32 %v9356_v55, %v5105_v23 }
 0xabf   : > { %v4838_v9 = vpop.f32.mrb[26].mxu0  ;;  %v5106_v22 = vmul.f32 %v9294_v15, %v4829_v28  ;;  %v5108_v0 = vmul.f32 %v9294_v15, %v4942_v47  ;;  %v5327_v8 = vmax.f32 %v5263_v2, 0.0  ;;  %v5329_v10 = vmax.f32 %v5265_v38, 0.0  ;;  %v4953_v30 = vpop.f32.mrb[27].mxu1 }
 0xac0   : > { %v5107_v54 = vmul.f32 %v9294_v15, %v4831_v11  ;;  %v5109_v25 = vmul.f32 %v9294_v15, %v4944_v27  ;;  %v4840_v16 = vpop.f32.mrb[27].mxu0  ;;  %v5368_v3 = vpack.c.bf16 %v5324_v52, %v5320_v6  ;;  %v5370_v39 = vpack.c.bf16 %v5326_v59, %v5322_v50  ;;  %v5055_v27 = vpop.permute.xlu0 %5054 }
 0xac1   : > { %v5267_v32 = vadd.f32 %v9354_v21, %v5106_v22  ;;  %v5269_v20 = vadd.f32 %v9354_v21, %v5108_v0  ;;  %v4835_v58 = vadd.f32 %v4834_v61, %v9326_v24  ;;  %v4948_v14 = vadd.f32 %v4947_v57, %v9326_v24 }
 0xac2   : > { %v5268_v55 = vadd.f32 %v9354_v21, %v5107_v54  ;;  %v5270_v36 = vadd.f32 %v9354_v21, %v5109_v25  ;;  %5471 = vmatprep.subr.bf16.mxu0 %v5368_v3  ;;  %5544 = vmatprep.subr.bf16.mxu1 %v5370_v39  ;;  %v4837_v43 = vadd.f32 %v4836_v37, %v9326_v24  ;;  %v5328_v45 = vmax.f32 %v9435_v46, 0.0 }
 0xac3   : > { %v5331_v56 = vmax.f32 %v5267_v32, 0.0  ;;  %v5333_v15 = vmax.f32 %v5269_v20, 0.0  ;;  %v4950_v44 = vadd.f32 %v4949_v7, %v9326_v24  ;;  %5472 = vmatpush1.bf16.msra.mxu0 %v5367_v40  ;;  %5545 = vmatpush1.bf16.msra.mxu1 %v5369_v26  ;;  %v5110_v21 = vmul.f32 %v9388_v19, %v4835_v58 }
 0xac4   : > { %v5332_v18 = vmax.f32 %v5268_v55, 0.0  ;;  %v5334_v35 = vmax.f32 %v5270_v36, 0.0  ;;  %v5112_v17 = vmul.f32 %v9388_v19, %v4948_v14  ;;  %v4957_v5 = vpop.f32.mrb[28].mxu1  ;;  %v5111_v33 = vmul.f32 %v9388_v19, %v4837_v43 }
 0xac5   : > { %v4844_v51 = vpop.f32.mrb[28].mxu0  ;;  %v5371_v60 = vpack.c.bf16 %v5331_v56, %v5327_v8  ;;  %v5373_v31 = vpack.c.bf16 %v5333_v15, %v5329_v10  ;;  %v5113_v34 = vmul.f32 %v9388_v19, %v4950_v44  ;;  %v4959_v52 = vpop.f32.mrb[29].mxu1  ;;  %v5271_v59 = vadd.f32 %v5206_v41, %v5110_v21 }
 0xac6   : > { %v4846_v63 = vpop.f32.mrb[29].mxu0  ;;  %v5273_v24 = vadd.f32 %v5206_v41, %v5112_v17  ;;  %v4839_v42 = vadd.f32 %v4838_v9, %v9324_v12  ;;  %v4952_v1 = vadd.f32 %v4951_v62, %v9324_v12  ;;  %v4961_v26 = vpop.f32.mrb[30].mxu1  ;;  %v5330_v23 = vmax.f32 %v9438_v29, 0.0 }
 0xac7   : > { %v4848_v40 = vpop.f32.mrb[30].mxu0  ;;  %v4841_v61 = vadd.f32 %v4840_v16, %v9324_v12  ;;  %v4954_v57 = vadd.f32 %v4953_v30, %v9324_v12  ;;  %v4963_v19 = vpop.f32.mrb[31].mxu1  ;;  %v5272_v38 = vadd.f32 %v5206_v41, %v5111_v33  ;;  %v5274_v28 = vadd.f32 %v5206_v41, %v5113_v34 }
 0xac8   : > { %v4850_v2 = vpop.f32.mrb[31].mxu0  ;;  %v5114_v47 = vmul.f32 %v9386_v13, %v4839_v42  ;;  %v5116_v37 = vmul.f32 %v9386_v13, %v4952_v1  ;;  %v5335_v7 = vmax.f32 %v5271_v59, 0.0  ;;  %v5337_v6 = vmax.f32 %v5273_v24, 0.0  ;;  %v5060_v10 = vpop.permute.xlu1 %5059 }
 0xac9   : > { %v5115_v50 = vmul.f32 %v9386_v13, %v4841_v61  ;;  %v5117_v11 = vmul.f32 %v9386_v13, %v4954_v57  ;;  %v5372_v46 = vpack.c.bf16 %v5332_v18, %v5328_v45  ;;  %v5374_v29 = vpack.c.bf16 %v5334_v35, %v5330_v23  ;;  %v5216_v41 = vpop.permute.xlu0 %5215 }
 0xaca   : > { %v5275_v9 = vadd.f32 %v5211_v49, %v5114_v47  ;;  %v5277_v62 = vadd.f32 %v5211_v49, %v5116_v37  ;;  %v4845_v0 = vadd.f32 %v4844_v51, %v9420_v48  ;;  %v4958_v8 = vadd.f32 %v4957_v5, %v9420_v48  ;;  %v6578_v47 = vld [vmem:[%s9910_s11 + $0x8] sm:$0xff]   ;;  %v6579_v37 = vld [vmem:[%s9910_s11 + $0x10] sm:$0xff]  }
 0xacb   : > { %v5276_v12 = vadd.f32 %v5211_v49, %v5115_v50  ;;  %v5278_v22 = vadd.f32 %v5211_v49, %v5117_v11  ;;  %5473 = vmatprep.subr.bf16.mxu0 %v5372_v46  ;;  %5546 = vmatprep.subr.bf16.mxu1 %v5374_v29  ;;  %v4847_v16 = vadd.f32 %v4846_v63, %v9420_v48  ;;  %v5336_v56 = vmax.f32 %v5272_v38, 0.0 }
 0xacc   : > { %v5339_v54 = vmax.f32 %v5275_v9, 0.0  ;;  %v5341_v25 = vmax.f32 %v5277_v62, 0.0  ;;  %v4960_v13 = vadd.f32 %v4959_v52, %v9420_v48  ;;  %5474 = vmatpush1.bf16.msra.mxu0 %v5371_v60  ;;  %5547 = vmatpush1.bf16.msra.mxu1 %v5373_v31  ;;  %v5118_v30 = vmul.f32 %v5055_v27, %v4845_v0  ;;  %v5221_v17 = vpop.permute.xlu1 %5220 }
 0xacd   : > { %v5120_v32 = vmul.f32 %v5055_v27, %v4958_v8  ;;  %v5119_v39 = vmul.f32 %v5055_v27, %v4847_v16  ;;  %v5340_v36 = vmax.f32 %v5276_v12, 0.0  ;;  %v5342_v58 = vmax.f32 %v5278_v22, 0.0  ;;  %v5402_v50 = vpop.permute.xlu0 %5401 }
 0xace   : > { %v5375_v20 = vpack.c.bf16 %v5339_v54, %v5335_v7  ;;  %v5377_v3 = vpack.c.bf16 %v5341_v25, %v5337_v6  ;;  %v5121_v55 = vmul.f32 %v5055_v27, %v4960_v13  ;;  %v4849_v14 = vadd.f32 %v4848_v40, %v9418_v53  ;;  %v6580_v7 = vld [vmem:[%s9910_s11 + $0x18] sm:$0xff]  }
 0xacf   : > { %v4962_v49 = vadd.f32 %v4961_v26, %v9418_v53  ;;  %v5338_v15 = vmax.f32 %v5274_v28, 0.0  ;;  %v4851_v43 = vadd.f32 %v4850_v2, %v9418_v53  ;;  %v4964_v48 = vadd.f32 %v4963_v19, %v9418_v53  ;;  %v6577_v28 = vld [vmem:[%s9910_s11] sm:$0xff]  }
 0xad0   : > { %v5279_v44 = vadd.f32 %v5216_v41, %v5118_v30  ;;  %v5281_v18 = vadd.f32 %v5216_v41, %v5120_v32  ;;  %v5122_v35 = vmul.f32 %v5060_v10, %v4849_v14  ;;  %v5280_v51 = vadd.f32 %v5216_v41, %v5119_v39  ;;  %v5407_v6 = vpop.permute.xlu1 %5406 }
 0xad1   : > { %v5124_v21 = vmul.f32 %v5060_v10, %v4962_v49  ;;  %v5282_v5 = vadd.f32 %v5216_v41, %v5121_v55  ;;  %v5123_v60 = vmul.f32 %v5060_v10, %v4851_v43  ;;  %v5125_v31 = vmul.f32 %v5060_v10, %v4964_v48  ;;  %v5620_v27 = vpop.permute.xlu0 %5619 }
 0xad2   : > { %v5283_v33 = vadd.f32 %v5221_v17, %v5122_v35  ;;  %v5376_v63 = vpack.c.bf16 %v5340_v36, %v5336_v56  ;;  %v5378_v52 = vpack.c.bf16 %v5342_v58, %v5338_v15  ;;  %v5343_v42 = vmax.f32 %v5279_v44, 0.0 }
 0xad3   : > { %v5285_v34 = vadd.f32 %v5221_v17, %v5124_v21  ;;  %v5284_v59 = vadd.f32 %v5221_v17, %v5123_v60  ;;  %v5286_v24 = vadd.f32 %v5221_v17, %v5125_v31  ;;  %v5345_v1 = vmax.f32 %v5281_v18, 0.0 }
 0xad4   : > { %v5347_v40 = vmax.f32 %v5283_v33, 0.0  ;;  %5475 = vmatprep.subr.bf16.mxu0 %v5376_v63  ;;  %5548 = vmatprep.subr.bf16.mxu1 %v5378_v52  ;;  %v5344_v53 = vmax.f32 %v5280_v51, 0.0  ;;  %v5346_v45 = vmax.f32 %v5282_v5, 0.0  ;;  %v5625_v11 = vpop.permute.xlu1 %5624 }
 0xad5   : > { %v5349_v26 = vmax.f32 %v5285_v34, 0.0  ;;  %v5348_v23 = vmax.f32 %v5284_v59, 0.0  ;;  %v5350_v61 = vmax.f32 %v5286_v24, 0.0  ;;  %5476 = vmatpush1.bf16.msra.mxu0 %v5375_v20  ;;  %5549 = vmatpush1.bf16.msra.mxu1 %v5377_v3  ;;  %v5412_v62 = vpop.permute.xlu0 %5411 }
 0xad6   : > { %v5379_v57 = vpack.c.bf16 %v5347_v40, %v5343_v42 }
 0xad7   : > { %v5381_v2 = vpack.c.bf16 %v5349_v26, %v5345_v1  ;;  %v5380_v19 = vpack.c.bf16 %v5348_v23, %v5344_v53  ;;  %v5382_v38 = vpack.c.bf16 %v5350_v61, %v5346_v45 }
 0xad8   : > { %v9494_v9 = vpop.permute.xlu1 %5416 }
 0xad9   : > { %5477 = vmatprep.subr.bf16.mxu0 %v5380_v19  ;;  %5550 = vmatprep.subr.bf16.mxu1 %v5382_v38  ;;  %v5701_v29 = vpop.permute.xlu0 %5700 }
 0xada   : > { %5478 = vmatpush1.bf16.msra.mxu0 %v5379_v57  ;;  %5551 = vmatpush1.bf16.msra.mxu1 %v5381_v2 }
 0xadc   : > { %v5706_v46 = vpop.permute.xlu1 %5705 }
 0xadd   : > { %5496 = vmatmul.mubr.bf16.vlgmr.msra.gmra.mrb[32].mxu0 %v6577_v28  ;;  %5569 = vmatmul.mubr.bf16.vlgmr.msra.gmra.mrb[32].mxu1 %v6577_v28  ;;  %v9498_v22 = vpop.permute.xlu0 %5629 }
 0xade   : > { %5505 = vmatprep.mubr.bf16.mxu0 %v6715_v4  ;;  %5578 = vmatprep.mubr.bf16.mxu1 %v6715_v4 }
 0xae0   : > { %v9496_v12 = vpop.permute.xlu1 %5634 }
 0xae1   : > { %v9502_v8 = vpop.permute.xlu0 %5421 }
 0xae4   : > { %v9500_v0 = vpop.permute.xlu1 %5426 }
 0xae5   : > { %5506 = vmatmul.mubr.bf16.gmra.mrb[36].mxu0 %v6578_v47  ;;  %5579 = vmatmul.mubr.bf16.gmra.mrb[36].mxu1 %v6578_v47  ;;  %v9506_v54 = vpop.permute.xlu0 %5710 }
 0xae6   : > { %5515 = vmatprep.mubr.bf16.mxu0 %v6715_v4  ;;  %5588 = vmatprep.mubr.bf16.mxu1 %v6715_v4 }
 0xae8   : > { %v9504_v10 = vpop.permute.xlu1 %5715 }
 0xae9   : > { %v9510_v16 = vpop.permute.xlu0 %5639 }
 0xaec   : > { %v9508_v25 = vpop.permute.xlu1 %5644 }
 0xaed   : > { %5516 = vmatmul.mubr.bf16.gmra.mrb[40].mxu0 %v6579_v37  ;;  %5589 = vmatmul.mubr.bf16.gmra.mrb[40].mxu1 %v6579_v37  ;;  %v9514_v63 = vpop.permute.xlu0 %5431 }
 0xaee   : > { %5525 = vmatprep.mubr.bf16.mxu0 %v6715_v4  ;;  %5598 = vmatprep.mubr.bf16.mxu1 %v6715_v4 }
 0xaf0   : > { %v9512_v34 = vpop.permute.xlu1 %5436 }
 0xaf5   : > { %5526 = vmatmul.mubr.bf16.gmra.mrb[44].mxu0 %v6580_v7  ;;  %5599 = vmatmul.mubr.bf16.gmra.mrb[44].mxu1 %v6580_v7 }
 0xaf6   : > { %5895 = vmatprep.mubr.bf16.mxu0 %v6715_v4  ;;  %5948 = vmatprep.mubr.bf16.mxu1 %v6715_v4 }
 0xbb0   : > { %v5497_v13 = vpop.f32.mrb[32].mxu0  ;;  %v5570_v30 = vpop.f32.mrb[32].mxu1 }
 0xbb1   : > { %v5498_v32 = vadd.f32 %v5497_v13, %v5402_v50  ;;  %v5571_v20 = vadd.f32 %v5570_v30, %v5402_v50  ;;  %v5499_v3 = vpop.f32.mrb[33].mxu0  ;;  %v5572_v39 = vpop.f32.mrb[33].mxu1 }
 0xbb2   : > { %v5500_v55 = vadd.f32 %v5499_v3, %v5402_v50  ;;  %v5573_v36 = vadd.f32 %v5572_v39, %v5402_v50  ;;  %v5501_v58 = vpop.f32.mrb[34].mxu0  ;;  %v5574_v14 = vpop.f32.mrb[34].mxu1 }
 0xbb3   : > { %v5657_v49 = vmul.f32 %v5620_v27, %v5498_v32  ;;  %v5659_v41 = vmul.f32 %v5620_v27, %v5571_v20  ;;  %v5502_v56 = vadd.f32 %v5501_v58, %v5407_v6  ;;  %v5575_v15 = vadd.f32 %v5574_v14, %v5407_v6  ;;  %v5503_v43 = vpop.f32.mrb[35].mxu0  ;;  %v5576_v48 = vpop.f32.mrb[35].mxu1 }
 0xbb4   : > { %v5658_v44 = vmul.f32 %v5620_v27, %v5500_v55  ;;  %v5660_v18 = vmul.f32 %v5620_v27, %v5573_v36  ;;  %v5504_v35 = vadd.f32 %v5503_v43, %v5407_v6  ;;  %v5577_v21 = vadd.f32 %v5576_v48, %v5407_v6 }
 0xbb5   : > { %v5738_v17 = vadd.f32 %v5701_v29, %v5657_v49  ;;  %v5740_v51 = vadd.f32 %v5701_v29, %v5659_v41  ;;  %v5661_v5 = vmul.f32 %v5625_v11, %v5502_v56  ;;  %v5663_v60 = vmul.f32 %v5625_v11, %v5575_v15  ;;  %v9528_v15 = vpop.permute.xlu1 %5725 }
 0xbb6   : > { %v5662_v31 = vmul.f32 %v5625_v11, %v5504_v35  ;;  %v5664_v33 = vmul.f32 %v5625_v11, %v5577_v21  ;;  %v5739_v52 = vadd.f32 %v5701_v29, %v5658_v44  ;;  %v5741_v59 = vadd.f32 %v5701_v29, %v5660_v18 }
 0xbb7   : > { %v5742_v24 = vadd.f32 %v5706_v46, %v5661_v5  ;;  %v5744_v42 = vadd.f32 %v5706_v46, %v5663_v60  ;;  %v5770_v1 = vmax.f32 %v5738_v17, 0.0  ;;  %v5772_v40 = vmax.f32 %v5740_v51, 0.0 }
 0xbb8   : > { %v5743_v26 = vadd.f32 %v5706_v46, %v5662_v31  ;;  %v5745_v53 = vadd.f32 %v5706_v46, %v5664_v33  ;;  %v5507_v45 = vpop.f32.mrb[36].mxu0  ;;  %v5580_v23 = vpop.f32.mrb[36].mxu1  ;;  %v5771_v49 = vmax.f32 %v5739_v52, 0.0  ;;  %v5773_v43 = vmax.f32 %v5741_v59, 0.0 }
 0xbb9   : > { %v5774_v61 = vmax.f32 %v5742_v24, 0.0  ;;  %v5776_v57 = vmax.f32 %v5744_v42, 0.0  ;;  %v5508_v2 = vadd.f32 %v5507_v45, %v5412_v62  ;;  %v5581_v19 = vadd.f32 %v5580_v23, %v5412_v62  ;;  %v5509_v38 = vpop.f32.mrb[37].mxu0  ;;  %v5582_v28 = vpop.f32.mrb[37].mxu1 }
 0xbba   : > { %v5775_v47 = vmax.f32 %v5743_v26, 0.0  ;;  %v5777_v37 = vmax.f32 %v5745_v53, 0.0  ;;  %v5510_v7 = vadd.f32 %v5509_v38, %v5412_v62  ;;  %v5583_v6 = vadd.f32 %v5582_v28, %v5412_v62  ;;  %v5511_v50 = vpop.f32.mrb[38].mxu0  ;;  %v5584_v11 = vpop.f32.mrb[38].mxu1 }
 0xbbb   : > { %v5802_v27 = vpack.c.bf16 %v5774_v61, %v5770_v1  ;;  %v5804_v29 = vpack.c.bf16 %v5776_v57, %v5772_v40  ;;  %v5665_v13 = vmul.f32 %v9498_v22, %v5508_v2  ;;  %v5667_v46 = vmul.f32 %v9498_v22, %v5581_v19  ;;  %v5513_v30 = vpop.f32.mrb[39].mxu0  ;;  %v5586_v32 = vpop.f32.mrb[39].mxu1 }
 0xbbc   : > { %v5666_v20 = vmul.f32 %v9498_v22, %v5510_v7  ;;  %v5668_v3 = vmul.f32 %v9498_v22, %v5583_v6  ;;  %v5512_v39 = vadd.f32 %v5511_v50, %v9494_v9  ;;  %v5585_v55 = vadd.f32 %v5584_v11, %v9494_v9  ;;  %v5721_v22 = vpop.permute.xlu0 %5720 }
 0xbbd   : > { %v5746_v62 = vadd.f32 %v9506_v54, %v5665_v13  ;;  %v5748_v36 = vadd.f32 %v9506_v54, %v5667_v46  ;;  %v5514_v58 = vadd.f32 %v5513_v30, %v9494_v9  ;;  %v5587_v14 = vadd.f32 %v5586_v32, %v9494_v9  ;;  %v5655_v13 = vpop.permute.xlu1 %5654 }
 0xbbe   : > { %v5669_v41 = vmul.f32 %v9496_v12, %v5512_v39  ;;  %v5671_v56 = vmul.f32 %v9496_v12, %v5585_v55  ;;  %v9531_v48 = vadd.f32 %v9506_v54, %v5666_v20  ;;  %v9536_v21 = vadd.f32 %v9506_v54, %v5668_v3 }
 0xbbf   : > { %v5670_v44 = vmul.f32 %v9496_v12, %v5514_v58  ;;  %v5672_v18 = vmul.f32 %v9496_v12, %v5587_v14  ;;  %v5778_v35 = vmax.f32 %v5746_v62, 0.0  ;;  %v5780_v60 = vmax.f32 %v5748_v36, 0.0 }
 0xbc0   : > { %v5750_v9 = vadd.f32 %v9504_v10, %v5669_v41  ;;  %v5752_v17 = vadd.f32 %v9504_v10, %v5671_v56  ;;  %v5517_v51 = vpop.f32.mrb[40].mxu0  ;;  %v5590_v5 = vpop.f32.mrb[40].mxu1  ;;  %v5803_v33 = vpack.c.bf16 %v5775_v47, %v5771_v49  ;;  %v5805_v52 = vpack.c.bf16 %v5777_v37, %v5773_v43 }
 0xbc1   : > { %v5751_v31 = vadd.f32 %v9504_v10, %v5670_v44  ;;  %v5519_v59 = vpop.f32.mrb[41].mxu0  ;;  %v5592_v24 = vpop.f32.mrb[41].mxu1  ;;  %v5518_v12 = vadd.f32 %v5517_v51, %v9502_v8  ;;  %v5591_v54 = vadd.f32 %v5590_v5, %v9502_v8  ;;  %v5753_v53 = vadd.f32 %v9504_v10, %v5672_v18 }
 0xbc2   : > { %v5782_v42 = vmax.f32 %v5750_v9, 0.0  ;;  %v5784_v1 = vmax.f32 %v5752_v17, 0.0  ;;  %v5521_v40 = vpop.f32.mrb[42].mxu0  ;;  %v5594_v26 = vpop.f32.mrb[42].mxu1  ;;  %5863 = vmatprep.subr.bf16.mxu0 %v5803_v33  ;;  %5916 = vmatprep.subr.bf16.mxu1 %v5805_v52  ;;  %v5520_v45 = vadd.f32 %v5519_v59, %v9502_v8  ;;  %v5593_v23 = vadd.f32 %v5592_v24, %v9502_v8 }
 0xbc3   : > { %v5523_v61 = vpop.f32.mrb[43].mxu0  ;;  %v5596_v57 = vpop.f32.mrb[43].mxu1  ;;  %v5783_v38 = vmax.f32 %v5751_v31, 0.0  ;;  %5864 = vmatpush1.bf16.msra.mxu0 %v5802_v27  ;;  %5917 = vmatpush1.bf16.msra.mxu1 %v5804_v29  ;;  %v5673_v28 = vmul.f32 %v9510_v16, %v5518_v12  ;;  %v5675_v47 = vmul.f32 %v9510_v16, %v5591_v54  ;;  %v5522_v7 = vadd.f32 %v5521_v40, %v9500_v0 }
 0xbc4   : > { %v5806_v2 = vpack.c.bf16 %v5782_v42, %v5778_v35  ;;  %v5808_v19 = vpack.c.bf16 %v5784_v1, %v5780_v60  ;;  %v5674_v37 = vmul.f32 %v9510_v16, %v5520_v45  ;;  %v5676_v10 = vmul.f32 %v9510_v16, %v5593_v23  ;;  %v5650_v27 = vpop.permute.xlu0 %5649 }
 0xbc5   : > { %v5754_v6 = vadd.f32 %v5721_v22, %v5673_v28  ;;  %v5595_v8 = vadd.f32 %v5594_v26, %v9500_v0  ;;  %v5524_v50 = vadd.f32 %v5523_v61, %v9500_v0  ;;  %v5597_v11 = vadd.f32 %v5596_v57, %v9500_v0  ;;  %v5736_v28 = vpop.permute.xlu1 %5735 }
 0xbc6   : > { %v5779_v29 = vmax.f32 %v9531_v48, 0.0  ;;  %v5785_v46 = vmax.f32 %v5753_v53, 0.0  ;;  %v5756_v30 = vadd.f32 %v5721_v22, %v5675_v47  ;;  %v5677_v32 = vmul.f32 %v9508_v25, %v5522_v7 }
 0xbc7   : > { %v5755_v20 = vadd.f32 %v5721_v22, %v5674_v37  ;;  %v5679_v16 = vmul.f32 %v9508_v25, %v5595_v8  ;;  %v5678_v3 = vmul.f32 %v9508_v25, %v5524_v50  ;;  %v5680_v39 = vmul.f32 %v9508_v25, %v5597_v11 }
 0xbc8   : > { %v5527_v55 = vpop.f32.mrb[44].mxu0  ;;  %v5600_v62 = vpop.f32.mrb[44].mxu1  ;;  %v5781_v36 = vmax.f32 %v9536_v21, 0.0  ;;  %v5786_v0 = vmax.f32 %v5754_v6, 0.0  ;;  %v5757_v58 = vadd.f32 %v5721_v22, %v5676_v10  ;;  %v5758_v14 = vadd.f32 %v9528_v15, %v5677_v32 }
 0xbc9   : > { %v5529_v49 = vpop.f32.mrb[45].mxu0  ;;  %v5602_v41 = vpop.f32.mrb[45].mxu1  ;;  %v5760_v56 = vadd.f32 %v9528_v15, %v5679_v16  ;;  %v5759_v43 = vadd.f32 %v9528_v15, %v5678_v3  ;;  %v5761_v48 = vadd.f32 %v9528_v15, %v5680_v39  ;;  %v5807_v44 = vpack.c.bf16 %v5783_v38, %v5779_v29 }
 0xbca   : > { %v5531_v18 = vpop.f32.mrb[46].mxu0  ;;  %v5604_v35 = vpop.f32.mrb[46].mxu1  ;;  %v5790_v25 = vmax.f32 %v5758_v14, 0.0  ;;  %v5809_v9 = vpack.c.bf16 %v5785_v46, %v5781_v36  ;;  %v5528_v17 = vadd.f32 %v5527_v55, %v9514_v63  ;;  %v5601_v21 = vadd.f32 %v5600_v62, %v9514_v63 }
 0xbcb   : > { %v5533_v22 = vpop.f32.mrb[47].mxu0  ;;  %v5606_v51 = vpop.f32.mrb[47].mxu1  ;;  %v5788_v5 = vmax.f32 %v5756_v30, 0.0  ;;  %v5787_v60 = vmax.f32 %v5755_v20, 0.0  ;;  %v5792_v31 = vmax.f32 %v5760_v56, 0.0  ;;  %5865 = vmatprep.subr.bf16.mxu0 %v5807_v44  ;;  %v5530_v33 = vadd.f32 %v5529_v49, %v9514_v63 }
 0xbcc   : > { %v5789_v52 = vmax.f32 %v5757_v58, 0.0  ;;  %v5810_v59 = vpack.c.bf16 %v5790_v25, %v5786_v0  ;;  %5918 = vmatprep.subr.bf16.mxu1 %v5809_v9  ;;  %5866 = vmatpush1.bf16.msra.mxu0 %v5806_v2  ;;  %v5681_v15 = vmul.f32 %v5650_v27, %v5528_v17  ;;  %v5683_v24 = vmul.f32 %v5650_v27, %v5601_v21  ;;  %v5731_v40 = vpop.permute.xlu0 %5730  ;;  %v6581_v0 = vld [vmem:[%s9911_s22] sm:$0xff]   ;;  %v6582_v58 = vld [vmem:[%s9911_s22 + $0x8] sm:$0xff]   ;;  %v5834_v14 = vpop.permute.xlu1 %5833 }
 0xbcd   : > { %v5812_v42 = vpack.c.bf16 %v5792_v31, %v5788_v5  ;;  %5919 = vmatpush1.bf16.msra.mxu1 %v5808_v19  ;;  %v5682_v1 = vmul.f32 %v5650_v27, %v5530_v33  ;;  %v5603_v12 = vadd.f32 %v5602_v41, %v9514_v63  ;;  %v5532_v54 = vadd.f32 %v5531_v18, %v9512_v34 }
 0xbce   : > { %v5791_v26 = vmax.f32 %v5759_v43, 0.0  ;;  %v5793_v53 = vmax.f32 %v5761_v48, 0.0  ;;  %v5605_v45 = vadd.f32 %v5604_v35, %v9512_v34  ;;  %v5534_v23 = vadd.f32 %v5533_v22, %v9512_v34 }
 0xbcf   : > { %v5762_v61 = vadd.f32 %v5731_v40, %v5681_v15  ;;  %v5684_v57 = vmul.f32 %v5650_v27, %v5603_v12  ;;  %v5685_v38 = vmul.f32 %v5655_v13, %v5532_v54  ;;  %v5607_v2 = vadd.f32 %v5606_v51, %v9512_v34 }
 0xbd0   : > { %v5764_v47 = vadd.f32 %v5731_v40, %v5683_v24  ;;  %v5763_v19 = vadd.f32 %v5731_v40, %v5682_v1  ;;  %v5687_v37 = vmul.f32 %v5655_v13, %v5605_v45  ;;  %v5686_v10 = vmul.f32 %v5655_v13, %v5534_v23  ;;  %v5829_v49 = vpop.permute.xlu0 %5828  ;;  %v5981_v41 = vpop.permute.xlu1 %5980 }
 0xbd1   : > { %v5765_v63 = vadd.f32 %v5731_v40, %v5684_v57  ;;  %v5766_v7 = vadd.f32 %v5736_v28, %v5685_v38  ;;  %v5688_v6 = vmul.f32 %v5655_v13, %v5607_v2  ;;  %v5811_v11 = vpack.c.bf16 %v5791_v26, %v5787_v60 }
 0xbd2   : > { %v5768_v8 = vadd.f32 %v5736_v28, %v5687_v37  ;;  %v5767_v50 = vadd.f32 %v5736_v28, %v5686_v10  ;;  %v5813_v29 = vpack.c.bf16 %v5793_v53, %v5789_v52  ;;  %v5794_v46 = vmax.f32 %v5762_v61, 0.0 }
 0xbd3   : > { %v5798_v30 = vmax.f32 %v5766_v7, 0.0  ;;  %v5769_v32 = vadd.f32 %v5736_v28, %v5688_v6  ;;  %v5796_v20 = vmax.f32 %v5764_v47, 0.0  ;;  %v5795_v27 = vmax.f32 %v5763_v19, 0.0  ;;  %5867 = vmatprep.subr.bf16.mxu0 %v5811_v11 }
 0xbd4   : > { %v5800_v16 = vmax.f32 %v5768_v8, 0.0  ;;  %v5799_v3 = vmax.f32 %v5767_v50, 0.0  ;;  %5920 = vmatprep.subr.bf16.mxu1 %v5813_v29  ;;  %v5797_v34 = vmax.f32 %v5765_v63, 0.0  ;;  %5868 = vmatpush1.bf16.msra.mxu0 %v5810_v59  ;;  %v5976_v56 = vpop.permute.xlu0 %5975  ;;  %v9582_v43 = vpop.permute.xlu1 %5843 }
 0xbd5   : > { %v5814_v39 = vpack.c.bf16 %v5798_v30, %v5794_v46  ;;  %v5801_v55 = vmax.f32 %v5769_v32, 0.0  ;;  %5921 = vmatpush1.bf16.msra.mxu1 %v5812_v42 }
 0xbd6   : > { %v5816_v62 = vpack.c.bf16 %v5800_v16, %v5796_v20  ;;  %v5815_v13 = vpack.c.bf16 %v5799_v3, %v5795_v27 }
 0xbd7   : > { %v5817_v36 = vpack.c.bf16 %v5801_v55, %v5797_v34 }
 0xbd8   : > { %5869 = vmatprep.subr.bf16.mxu0 %v5815_v13  ;;  %v5839_v48 = vpop.permute.xlu0 %5838  ;;  %v6022_v44 = vpop.permute.xlu1 %6021 }
 0xbd9   : > { %5922 = vmatprep.subr.bf16.mxu1 %v5817_v36  ;;  %5870 = vmatpush1.bf16.msra.mxu0 %v5814_v39 }
 0xbda   : > { %5923 = vmatpush1.bf16.msra.mxu1 %v5816_v62 }
 0xbdc   : > { %6366 = vmatmul.mubr.msk.bf16.vlgmr.msra.gmra.mrb[48].mxu0 %vm5856_vm7, %v6581_v0  ;;  %v6017_v18 = vpop.permute.xlu0 %6016  ;;  %v5991_v28 = vpop.permute.xlu1 %5990 }
 0xbdd   : > { %6368 = vmatmul.mubr.msk.bf16.vlgmr.msra.gmra.mrb[48].mxu1 %vm5856_vm7, %v6581_v0  ;;  %5905 = vmatprep.mubr.bf16.mxu0 %v6715_v4 }
 0xbde   : > { %5958 = vmatprep.mubr.bf16.mxu1 %v6715_v4 }
 0xbe0   : > { %v5986_v61 = vpop.permute.xlu0 %5985 }
 0xbe4   : > { %6367 = vmatmul.mubr.msk.bf16.gmra.mrb[52].mxu0 %vm5856_vm7, %v6582_v58 }
 0xbe5   : > { %6369 = vmatmul.mubr.msk.bf16.gmra.mrb[52].mxu1 %vm5856_vm7, %v6582_v58  ;;  %6117 = vmatprep.mubr.bf16.mxu0 %v6715_v4 }
 0xbe6   : > { %6158 = vmatprep.mubr.bf16.mxu1 %v6715_v4 }
 0xcaf   : > { %v5897_v35 = vpop.f32.mrb[48].mxu0 }
 0xcb0   : > { %v5898_v25 = vadd.f32 %v5897_v35, %v5829_v49  ;;  %v5950_v9 = vpop.f32.mrb[48].mxu1  ;;  %v5899_v17 = vpop.f32.mrb[49].mxu0 }
 0xcb1   : > { %v5951_v21 = vadd.f32 %v5950_v9, %v5829_v49  ;;  %v5900_v22 = vadd.f32 %v5899_v17, %v5829_v49  ;;  %v5952_v51 = vpop.f32.mrb[49].mxu1  ;;  %v5901_v5 = vpop.f32.mrb[50].mxu0 }
 0xcb2   : > { %v5993_v60 = vmul.f32 %v5976_v56, %v5898_v25  ;;  %v5953_v31 = vadd.f32 %v5952_v51, %v5829_v49  ;;  %v5902_v4 = vadd.f32 %v5901_v5, %v5834_v14  ;;  %v5954_v33 = vpop.f32.mrb[50].mxu1  ;;  %v5903_v52 = vpop.f32.mrb[51].mxu0 }
 0xcb3   : > { %v5995_v59 = vmul.f32 %v5976_v56, %v5951_v21  ;;  %v5994_v15 = vmul.f32 %v5976_v56, %v5900_v22  ;;  %v5955_v24 = vadd.f32 %v5954_v33, %v5834_v14  ;;  %v5904_v42 = vadd.f32 %v5903_v52, %v5834_v14  ;;  %v5956_v1 = vpop.f32.mrb[51].mxu1  ;;  %v6027_v49 = vpop.permute.xlu0 %6026 }
 0xcb4   : > { %v6034_v12 = vadd.f32 %v6017_v18, %v5993_v60  ;;  %v5996_v54 = vmul.f32 %v5976_v56, %v5953_v31  ;;  %v5997_v40 = vmul.f32 %v5981_v41, %v5902_v4  ;;  %v5957_v26 = vadd.f32 %v5956_v1, %v5834_v14  ;;  %v6032_v17 = vpop.permute.xlu1 %6031 }
 0xcb5   : > { %v6036_v53 = vadd.f32 %v6017_v18, %v5995_v59  ;;  %v5999_v45 = vmul.f32 %v5981_v41, %v5955_v24  ;;  %v5998_v23 = vmul.f32 %v5981_v41, %v5904_v42  ;;  %v6035_v57 = vadd.f32 %v6017_v18, %v5994_v15 }
 0xcb6   : > { %v6038_v38 = vadd.f32 %v6022_v44, %v5997_v40  ;;  %v6000_v2 = vmul.f32 %v5981_v41, %v5957_v26  ;;  %v6050_v47 = vmax.f32 %v6034_v12, 0.0  ;;  %v6037_v19 = vadd.f32 %v6017_v18, %v5996_v54 }
 0xcb7   : > { %v6040_v37 = vadd.f32 %v6022_v44, %v5999_v45  ;;  %v5907_v10 = vpop.f32.mrb[52].mxu0  ;;  %v6052_v63 = vmax.f32 %v6036_v53, 0.0  ;;  %v6039_v6 = vadd.f32 %v6022_v44, %v5998_v23  ;;  %v6051_v16 = vmax.f32 %v6035_v57, 0.0 }
 0xcb8   : > { %v6054_v7 = vmax.f32 %v6038_v38, 0.0  ;;  %v5908_v8 = vadd.f32 %v5907_v10, %v5839_v48  ;;  %v5960_v50 = vpop.f32.mrb[52].mxu1  ;;  %v5909_v11 = vpop.f32.mrb[53].mxu0  ;;  %v6041_v46 = vadd.f32 %v6022_v44, %v6000_v2  ;;  %v6053_v60 = vmax.f32 %v6037_v19, 0.0  ;;  %v6074_v2 = vld [vmem:[%s9912_s26] sm:$0x3] }
 0xcb9   : > { %v6056_v29 = vmax.f32 %v6040_v37, 0.0  ;;  %v5961_v30 = vadd.f32 %v5960_v50, %v5839_v48  ;;  %v5910_v32 = vadd.f32 %v5909_v11, %v5839_v48  ;;  %v5962_v20 = vpop.f32.mrb[53].mxu1  ;;  %v5911_v27 = vpop.f32.mrb[54].mxu0  ;;  %v6055_v41 = vmax.f32 %v6039_v6, 0.0 }
 0xcba   : > { %v6066_v3 = vpack.c.bf16 %v6054_v7, %v6050_v47  ;;  %v6001_v34 = vmul.f32 %v5986_v61, %v5908_v8  ;;  %v5963_v39 = vadd.f32 %v5962_v20, %v5839_v48  ;;  %v5964_v55 = vpop.f32.mrb[54].mxu1  ;;  %v5913_v62 = vpop.f32.mrb[55].mxu0  ;;  %v5912_v58 = vadd.f32 %v5911_v27, %v9582_v43 }
 0xcbb   : > { %v6068_v13 = vpack.c.bf16 %v6056_v29, %v6052_v63  ;;  %v6003_v36 = vmul.f32 %v5986_v61, %v5961_v30  ;;  %v6002_v0 = vmul.f32 %v5986_v61, %v5910_v32  ;;  %v5966_v14 = vpop.f32.mrb[55].mxu1  ;;  %v5965_v44 = vadd.f32 %v5964_v55, %v9582_v43 }
 0xcbc   : > { %v6004_v56 = vmul.f32 %v5986_v61, %v5963_v39  ;;  %v5914_v18 = vadd.f32 %v5913_v62, %v9582_v43  ;;  %v6057_v35 = vmax.f32 %v6041_v46, 0.0  ;;  %v6042_v25 = vadd.f32 %v6027_v49, %v6001_v34 }
 0xcbd   : > { %v6005_v9 = vmul.f32 %v5991_v28, %v5912_v58  ;;  %v5967_v48 = vadd.f32 %v5966_v14, %v9582_v43  ;;  %v6044_v21 = vadd.f32 %v6027_v49, %v6003_v36  ;;  %v6043_v22 = vadd.f32 %v6027_v49, %v6002_v0 }
 0xcbe   : > { %v6007_v51 = vmul.f32 %v5991_v28, %v5965_v44  ;;  %v6006_v5 = vmul.f32 %v5991_v28, %v5914_v18  ;;  %v6045_v31 = vadd.f32 %v6027_v49, %v6004_v56  ;;  %v6067_v15 = vpack.c.bf16 %v6055_v41, %v6051_v16 }
 0xcbf   : > { %v6046_v4 = vadd.f32 %v6032_v17, %v6005_v9  ;;  %v6008_v33 = vmul.f32 %v5991_v28, %v5967_v48  ;;  %v6058_v24 = vmax.f32 %v6042_v25, 0.0  ;;  %v6069_v12 = vpack.c.bf16 %v6057_v35, %v6053_v60  ;;  %v6079_v28 = vpop.permute.xlu0 %6078 }
 0xcc0   : > { %v6048_v52 = vadd.f32 %v6032_v17, %v6007_v51  ;;  %v6047_v59 = vadd.f32 %v6032_v17, %v6006_v5  ;;  %v6060_v54 = vmax.f32 %v6044_v21, 0.0  ;;  %v6059_v40 = vmax.f32 %v6043_v22, 0.0  ;;  %6085 = vmatprep.subr.bf16.mxu0 %v6067_v15 }
 0xcc1   : > { %v6062_v42 = vmax.f32 %v6046_v4, 0.0  ;;  %v6049_v1 = vadd.f32 %v6032_v17, %v6008_v33  ;;  %v6061_v53 = vmax.f32 %v6045_v31, 0.0  ;;  %6126 = vmatprep.subr.bf16.mxu1 %v6069_v12  ;;  %6086 = vmatpush1.bf16.msra.mxu0 %v6066_v3 }
 0xcc2   : > { %v6064_v26 = vmax.f32 %v6048_v52, 0.0  ;;  %v6063_v43 = vmax.f32 %v6047_v59, 0.0  ;;  %6127 = vmatpush1.bf16.msra.mxu1 %v6068_v13 }
 0xcc3   : > { %v6070_v45 = vpack.c.bf16 %v6062_v42, %v6058_v24  ;;  %v6065_v23 = vmax.f32 %v6049_v1, 0.0 }
 0xcc4   : > { %v6072_v61 = vpack.c.bf16 %v6064_v26, %v6060_v54  ;;  %v6071_v57 = vpack.c.bf16 %v6063_v43, %v6059_v40 }
 0xcc5   : > { %v6073_v38 = vpack.c.bf16 %v6065_v23, %v6061_v53 }
 0xcc6   : > { %6087 = vmatprep.subr.bf16.mxu0 %v6071_v57 }
 0xcc7   : > { %6128 = vmatprep.subr.bf16.mxu1 %v6073_v38  ;;  %6088 = vmatpush1.bf16.msra.mxu0 %v6070_v45 }
 0xcc8   : > { %6129 = vmatpush1.bf16.msra.mxu1 %v6072_v61 }
 0xcca   : > { %6370 = vmatmul.mubr.msk.bf16.vlgmr.msra.gmra.mrb[56].mxu0 %vm6081_vm8, %v6074_v2 }
 0xccb   : > { %6371 = vmatmul.mubr.msk.bf16.vlgmr.msra.gmra.mrb[56].mxu1 %vm6081_vm8, %v6074_v2 }
 0xd9d   : > { %v6119_v47 = vpop.f32.mrb[56].mxu0 }
 0xd9e   : > { %v6120_v19 = vadd.f32 %v6119_v47, %v6079_v28  ;;  %v6160_v37 = vpop.f32.mrb[56].mxu1  ;;  %v6121_v10 = vpop.f32.mrb[57].mxu0 }
 0xd9f   : > { %v6161_v63 = vadd.f32 %v6160_v37, %v6079_v28  ;;  %v6122_v7 = vadd.f32 %v6121_v10, %v6079_v28  ;;  %v6162_v6 = vpop.f32.mrb[57].mxu1  ;;  %v6123_v8 = vpop.f32.mrb[58].mxu0 }
 0xda0   : > { %6583 = vtanh.f32 %v6120_v19  ;;  %v6163_v50 = vadd.f32 %v6162_v6, %v6079_v28  ;;  %v6164_v11 = vpop.f32.mrb[58].mxu1  ;;  %v6124_v29 = vpop.f32.mrb[59].mxu0 }
 0xda1   : > { %6585 = vtanh.f32 %v6161_v63  ;;  %v6165_v46 = vpop.f32.mrb[59].mxu1 }
 0xda2   : > { %6587 = vtanh.f32 %v6122_v7 }
 0xda3   : > { %6589 = vtanh.f32 %v6163_v50 }
 0xdaa   : > { %v6584_v30 = vpop.eup %6583 }
 0xdab   : > { %v6586_v32 = vpop.eup %6585 }
 0xdac   : > { %v6588_v20 = vpop.eup %6587 }
 0xdad   : > { %v6590_v27 = vpop.eup %6589  ;;  %v6175_v16 = vcombine.low %v6584_v30, %v6588_v20 }
 0xdae   : > { %v6176_v3 = vcombine.low %v6586_v32, %v6590_v27 }
 0xdaf   : > { %6179 = vst [vmem:[%s6993_s12] sm:$0x77] %v6175_v16 }
 0xdb0   : > { %6180 = vst [vmem:[%s6993_s12 + $0x8] sm:$0x77] %v6176_v3 }
 0xdb1 PF: > { %s28_s27 = sadd.s32 1, %s6703_s27   ;;  %s9913_s28 = smov %s6877_s18 }
 0xdb2   : > { %p25_p5 = scmp.ge.s32.totalorder %s28_s27, 18   ;;  %s9914_s23 = sld [smem:[#allocation8_spill]] }
 0xdb3   : > { %s9915_s7 = sld [smem:[#allocation9_spill]]  ;;  %s9916_s17 = sld [smem:[#allocation10_spill]] }
 0xdb4   : > { %s9917_s18 = smov %s6671_s19  ;;  %s9918_s19 = smov %s6675_s20 }
 0xdb5   : > { %s9919_s20 = smov %s9913_s28  ;;  %s9920_s21 = smov %s6691_s24 }
 0xdb6   : > { %s9921_s22 = smov %s6695_s25  ;;  %s9924_s26 = smov %s9934_s16 }
 0xdb7   :  { %27 = sbr.rel (!%p25_p5) target bundleno = 16 (0x10), region = 169 }
 0xdb9   : > { %s9922_s24 = smov %s9915_s7  ;;  %s9923_s25 = smov %s9916_s17 }
 0xdbe   :  { %6223 = vsyncpa [#allocation6], 1 }
 0xdbf   :  { %6225 = vsyncpa [#allocation6 + $0x1], 1 }

</bundles_post_ra>
